<compile_context>
chip_gen: v6e
topology: v6e:2x2x1
jax: 0.10.0
libtpu: 0.0.40
codegen_flags: <defaults>
</compile_context>

<pallas_src>
import functools

import jax
import jax.numpy as jnp
from jax.experimental import pallas as pl
from jax.experimental.pallas import tpu as pltpu


def _rcu_kernel(x_ref, w1_ref, b1_ref, w2_ref, b2_ref, o_ref, pad_ref, acc_ref,
                *, H: int, W: int, C: int):
    # x_ref  : (1, H, W, C)        input tile (one batch element), NHWC
    # w*_ref : (3, 3, C, C) bf16   conv weights, HWIO
    # b*_ref : (1, C)       f32    conv biases
    # o_ref  : (1, H, W, C)        output tile
    # pad_ref: (Npad, C)    f32    flattened zero-padded conv input, pitch W+2
    # acc_ref: (H*(W+2), C) f32    width-padded conv accumulator
    Wp = W + 2                       # padded row pitch
    n_acc = H * Wp
    n_pad_total = pad_ref.shape[0]
    f32 = jnp.float32

    # --- zero ONLY the 1-pixel border of the flattened padded scratch -------
    # Interior rows are fully overwritten below; border slots are never
    # touched by the interior writes, so this is all the zeroing needed.
    pad_ref[0:Wp + 1, :] = jnp.zeros((Wp + 1, C), f32)      # top pad row + left pad of image row 0
    for h in range(H - 1):                                   # right pad of row h + left pad of row h+1
        gap = (h + 1) * Wp + W + 1
        pad_ref[gap:gap + 2, :] = jnp.zeros((2, C), f32)
    tail = (H + 1) * Wp - 1                                  # right pad of last row + bottom pad row + overshoot
    pad_ref[tail:n_pad_total, :] = jnp.zeros((n_pad_total - tail, C), f32)

    def write_rows(row_fn):
        # Image row h of the (already relu'd) conv input starts at flat row
        # (h+1)*Wp + 1 of the padded scratch.
        for h in range(H):
            dst = (h + 1) * Wp + 1
            pad_ref[dst:dst + W, :] = row_fn(h)

    def conv3x3(w_ref, b_ref):
        # Bias folded into accumulator init; 9 back-to-back MXU matmuls.
        acc_ref[...] = jnp.broadcast_to(b_ref[...], (n_acc, C))
        for dy in range(3):
            for dx in range(3):
                off = dy * Wp + dx
                lhs = pad_ref[off:off + n_acc, :].astype(jnp.bfloat16)
                acc_ref[...] += jnp.dot(lhs, w_ref[dy, dx],
                                        preferred_element_type=f32)
        # Output pixel (h, w) now sits at accumulator row h*Wp + w
        # (columns w >= W are garbage and are never read).

    # Stage 1: relu(x) -> conv1 + b1.
    write_rows(lambda h: jnp.maximum(x_ref[0, h], 0.0).astype(f32))
    conv3x3(w1_ref, b1_ref)

    # Stage 2: relu(y1) -> conv2 + b2 (y1 read straight out of the accumulator).
    write_rows(lambda h: jnp.maximum(acc_ref[h * Wp:h * Wp + W, :], 0.0))
    conv3x3(w2_ref, b2_ref)

    # Residual add + store.
    for h in range(H):
        y = acc_ref[h * Wp:h * Wp + W, :] + x_ref[0, h].astype(f32)
        o_ref[0, h, :, :] = y.astype(o_ref.dtype)


def residual_conv_unit_custom(x, w1, b1, w2, b2):
    """Fused Pallas forward of ResidualConvUnit_custom (bn=False, ReLU).

    x:  (B, C, H, W)  NCHW, like the PyTorch module.
    w*: (C, C, 3, 3)  OIHW PyTorch conv weights.
    b*: (C,)          conv biases.
    Returns (B, C, H, W).
    """
    B, C, H, W = x.shape
    if C % 128 != 0:
        raise ValueError(
            f"C={C} must be a multiple of 128 (lane-dense channels); pad the "
            "channel dim in the caller.")

    # Lane-dense layout: channels last.  (If the surrounding DPT graph can
    # carry NHWC end-to-end, these two activation transposes should go away.)
    x_nhwc = jnp.transpose(x, (0, 2, 3, 1))                          # (B, H, W, C)
    w1_hwio = jnp.transpose(w1, (2, 3, 1, 0)).astype(jnp.bfloat16)   # (3, 3, Cin, Cout)
    w2_hwio = jnp.transpose(w2, (2, 3, 1, 0)).astype(jnp.bfloat16)
    b1_2d = b1.reshape(1, C).astype(jnp.float32)
    b2_2d = b2.reshape(1, C).astype(jnp.float32)

    Wp = W + 2
    n_acc = H * Wp
    n_pad = (H + 2) * Wp + 2          # +2 rows so the (dy=2,dx=2) tap window stays in-bounds
    n_pad = ((n_pad + 7) // 8) * 8    # sublane-align the scratch rows

    # VMEM working set: 2x-buffered x/out blocks, 2x-buffered bf16 weights,
    # plus the two scratches.  Give ~2x headroom, capped well under any
    # chip's scoped-VMEM ceiling (toy shapes use only a few MiB anyway).
    itemsize = x.dtype.itemsize
    block_bytes = H * W * C * itemsize
    weight_bytes = 2 * 9 * C * C * 2                 # both conv weights, bf16
    scratch_bytes = (n_pad + n_acc) * C * 4
    vmem_bytes = 2 * 2 * block_bytes + 2 * weight_bytes + scratch_bytes + 4 * C * 4
    vmem_limit = int(min(max(2 * vmem_bytes, 8 * 1024 * 1024), 48 * 1024 * 1024))

    cost = pl.CostEstimate(
        flops=int(2 * 2 * 9 * B * H * W * C * C),
        transcendentals=0,
        bytes_accessed=int(2 * B * H * W * C * itemsize + weight_bytes + 2 * C * 4),
    )

    kernel = functools.partial(_rcu_kernel, H=H, W=W, C=C)
    out_nhwc = pl.pallas_call(
        kernel,
        out_shape=jax.ShapeDtypeStruct((B, H, W, C), x.dtype),
        grid=(B,),
        in_specs=[
            pl.BlockSpec((1, H, W, C), lambda b: (b, 0, 0, 0)),
            pl.BlockSpec((3, 3, C, C), lambda b: (0, 0, 0, 0)),
            pl.BlockSpec((1, C), lambda b: (0, 0)),
            pl.BlockSpec((3, 3, C, C), lambda b: (0, 0, 0, 0)),
            pl.BlockSpec((1, C), lambda b: (0, 0)),
        ],
        out_specs=pl.BlockSpec((1, H, W, C), lambda b: (b, 0, 0, 0)),
        scratch_shapes=[
            pltpu.VMEM((n_pad, C), jnp.float32),      # flattened padded conv input
            pltpu.VMEM((n_acc, C), jnp.float32),      # conv accumulator
        ],
        compiler_params=pltpu.CompilerParams(
            dimension_semantics=("parallel",),
            vmem_limit_bytes=vmem_limit),
        cost_estimate=cost,
    )(x_nhwc, w1_hwio, b1_2d, w2_hwio, b2_2d)
    return jnp.transpose(out_nhwc, (0, 3, 1, 2))      # back to NCHW


def residual_conv_unit_ref(x, w1, b1, w2, b2):
    """Pure-JAX reference matching the PyTorch module (bn=False, ReLU)."""
    def conv(a, w, b):
        y = jax.lax.conv_general_dilated(
            a, w, window_strides=(1, 1), padding=((1, 1), (1, 1)),
            dimension_numbers=("NCHW", "OIHW", "NCHW"))
        return y + b[None, :, None, None]

    out = jnp.maximum(x, 0.0)
    out = conv(out, w1, b1)
    out = jnp.maximum(out, 0.0)
    out = conv(out, w2, b2)
    return out + x


if __name__ == "__main__":
    key = jax.random.PRNGKey(0)
    # Small DPT-like feature map: batch=2, features=128 (lane-dense), 16x16.
    B, C, H, W = 2, 128, 16, 16
    k1, k2, k3, k4, k5 = jax.random.split(key, 5)
    fan_in = 3 * 3 * C
    x = jax.random.normal(k1, (B, C, H, W), dtype=jnp.float32)
    w1 = jax.random.normal(k2, (C, C, 3, 3), dtype=jnp.float32) / fan_in ** 0.5
    b1 = jax.random.normal(k3, (C,), dtype=jnp.float32) * 0.1
    w2 = jax.random.normal(k4, (C, C, 3, 3), dtype=jnp.float32) / fan_in ** 0.5
    b2 = jax.random.normal(k5, (C,), dtype=jnp.float32) * 0.1

    out = jax.block_until_ready(residual_conv_unit_custom(x, w1, b1, w2, b2))
    ref = residual_conv_unit_ref(x, w1, b1, w2, b2)

    assert out.shape == (B, C, H, W)
    # Tolerance covers bf16 MXU inputs in the kernel vs the default-precision
    # XLA conv reference (both accumulate in f32).
    max_err = float(jnp.max(jnp.abs(out - ref)))
    assert jnp.allclose(out, ref, atol=5e-2, rtol=5e-2), max_err
    print("KERNEL_OK")
</pallas_src>

<mosaic_0001>
module attributes {stable_mosaic.version = 11 : i64} {
  func.func @_rcu_kernel(%arg0: i32, %arg1: memref<1x16x16x128xf32, #tpu.memory_space<vmem>>, %arg2: memref<3x3x128x128xbf16, #tpu.memory_space<vmem>>, %arg3: memref<1x128xf32, #tpu.memory_space<vmem>>, %arg4: memref<3x3x128x128xbf16, #tpu.memory_space<vmem>>, %arg5: memref<1x128xf32, #tpu.memory_space<vmem>>, %arg6: memref<1x16x16x128xf32, #tpu.memory_space<vmem>>, %arg7: memref<328x128xf32, #tpu.memory_space<vmem>>, %arg8: memref<288x128xf32, #tpu.memory_space<vmem>>) attributes {dimension_semantics = [#tpu.dimension_semantics<parallel>], iteration_bounds = array<i64: 2>, scalar_prefetch = 0 : i64, scratch_operands = 2 : i64, tpu.core_type = #tpu.core_type<tc>, window_params = [{transform_indices = @transform_0, window_bounds = array<i64: 1, 16, 16, 128>}, {pipeline_mode = #tpu.pipeline_mode<synchronous>, transform_indices = @transform_1, window_bounds = array<i64: 3, 3, 128, 128>}, {pipeline_mode = #tpu.pipeline_mode<synchronous>, transform_indices = @transform_2, window_bounds = array<i64: 1, 128>}, {pipeline_mode = #tpu.pipeline_mode<synchronous>, transform_indices = @transform_3, window_bounds = array<i64: 3, 3, 128, 128>}, {pipeline_mode = #tpu.pipeline_mode<synchronous>, transform_indices = @transform_4, window_bounds = array<i64: 1, 128>}, {transform_indices = @transform_5, window_bounds = array<i64: 1, 16, 16, 128>}]} {
    %cst = arith.constant 0.000000e+00 : f32
    %0 = vector.broadcast %cst : f32 to vector<19x128xf32>
    %c0 = arith.constant 0 : index
    %c0_0 = arith.constant 0 : index
    %1 = vector.load %arg7[%c0, %c0_0] : memref<328x128xf32, #tpu.memory_space<vmem>>, vector<19x128xf32>
    tpu.vector_store %arg7[%c0, %c0_0], %0 {strides = array<i32>} : memref<328x128xf32, #tpu.memory_space<vmem>>, vector<19x128xf32>,
    %cst_1 = arith.constant 0.000000e+00 : f32
    %2 = vector.broadcast %cst_1 : f32 to vector<2x128xf32>
    %c35 = arith.constant 35 : index
    %c0_2 = arith.constant 0 : index
    %3 = vector.load %arg7[%c35, %c0_2] : memref<328x128xf32, #tpu.memory_space<vmem>>, vector<2x128xf32>
    tpu.vector_store %arg7[%c35, %c0_2], %2 {strides = array<i32>} : memref<328x128xf32, #tpu.memory_space<vmem>>, vector<2x128xf32>,
    %cst_3 = arith.constant 0.000000e+00 : f32
    %4 = vector.broadcast %cst_3 : f32 to vector<2x128xf32>
    %c53 = arith.constant 53 : index
    %c0_4 = arith.constant 0 : index
    %5 = vector.load %arg7[%c53, %c0_4] : memref<328x128xf32, #tpu.memory_space<vmem>>, vector<2x128xf32>
    tpu.vector_store %arg7[%c53, %c0_4], %4 {strides = array<i32>} : memref<328x128xf32, #tpu.memory_space<vmem>>, vector<2x128xf32>,
    %cst_5 = arith.constant 0.000000e+00 : f32
    %6 = vector.broadcast %cst_5 : f32 to vector<2x128xf32>
    %c71 = arith.constant 71 : index
    %c0_6 = arith.constant 0 : index
    %7 = vector.load %arg7[%c71, %c0_6] : memref<328x128xf32, #tpu.memory_space<vmem>>, vector<2x128xf32>
    tpu.vector_store %arg7[%c71, %c0_6], %6 {strides = array<i32>} : memref<328x128xf32, #tpu.memory_space<vmem>>, vector<2x128xf32>,
    %cst_7 = arith.constant 0.000000e+00 : f32
    %8 = vector.broadcast %cst_7 : f32 to vector<2x128xf32>
    %c89 = arith.constant 89 : index
    %c0_8 = arith.constant 0 : index
    %9 = vector.load %arg7[%c89, %c0_8] : memref<328x128xf32, #tpu.memory_space<vmem>>, vector<2x128xf32>
    tpu.vector_store %arg7[%c89, %c0_8], %8 {strides = array<i32>} : memref<328x128xf32, #tpu.memory_space<vmem>>, vector<2x128xf32>,
    %cst_9 = arith.constant 0.000000e+00 : f32
    %10 = vector.broadcast %cst_9 : f32 to vector<2x128xf32>
    %c107 = arith.constant 107 : index
    %c0_10 = arith.constant 0 : index
    %11 = vector.load %arg7[%c107, %c0_10] : memref<328x128xf32, #tpu.memory_space<vmem>>, vector<2x128xf32>
    tpu.vector_store %arg7[%c107, %c0_10], %10 {strides = array<i32>} : memref<328x128xf32, #tpu.memory_space<vmem>>, vector<2x128xf32>,
    %cst_11 = arith.constant 0.000000e+00 : f32
    %12 = vector.broadcast %cst_11 : f32 to vector<2x128xf32>
    %c125 = arith.constant 125 : index
    %c0_12 = arith.constant 0 : index
    %13 = vector.load %arg7[%c125, %c0_12] : memref<328x128xf32, #tpu.memory_space<vmem>>, vector<2x128xf32>
    tpu.vector_store %arg7[%c125, %c0_12], %12 {strides = array<i32>} : memref<328x128xf32, #tpu.memory_space<vmem>>, vector<2x128xf32>,
    %cst_13 = arith.constant 0.000000e+00 : f32
    %14 = vector.broadcast %cst_13 : f32 to vector<2x128xf32>
    %c143 = arith.constant 143 : index
    %c0_14 = arith.constant 0 : index
    %15 = vector.load %arg7[%c143, %c0_14] : memref<328x128xf32, #tpu.memory_space<vmem>>, vector<2x128xf32>
    tpu.vector_store %arg7[%c143, %c0_14], %14 {strides = array<i32>} : memref<328x128xf32, #tpu.memory_space<vmem>>, vector<2x128xf32>,
    %cst_15 = arith.constant 0.000000e+00 : f32
    %16 = vector.broadcast %cst_15 : f32 to vector<2x128xf32>
    %c161 = arith.constant 161 : index
    %c0_16 = arith.constant 0 : index
    %17 = vector.load %arg7[%c161, %c0_16] : memref<328x128xf32, #tpu.memory_space<vmem>>, vector<2x128xf32>
    tpu.vector_store %arg7[%c161, %c0_16], %16 {strides = array<i32>} : memref<328x128xf32, #tpu.memory_space<vmem>>, vector<2x128xf32>,
    %cst_17 = arith.constant 0.000000e+00 : f32
    %18 = vector.broadcast %cst_17 : f32 to vector<2x128xf32>
    %c179 = arith.constant 179 : index
    %c0_18 = arith.constant 0 : index
    %19 = vector.load %arg7[%c179, %c0_18] : memref<328x128xf32, #tpu.memory_space<vmem>>, vector<2x128xf32>
    tpu.vector_store %arg7[%c179, %c0_18], %18 {strides = array<i32>} : memref<328x128xf32, #tpu.memory_space<vmem>>, vector<2x128xf32>,
    %cst_19 = arith.constant 0.000000e+00 : f32
    %20 = vector.broadcast %cst_19 : f32 to vector<2x128xf32>
    %c197 = arith.constant 197 : index
    %c0_20 = arith.constant 0 : index
    %21 = vector.load %arg7[%c197, %c0_20] : memref<328x128xf32, #tpu.memory_space<vmem>>, vector<2x128xf32>
    tpu.vector_store %arg7[%c197, %c0_20], %20 {strides = array<i32>} : memref<328x128xf32, #tpu.memory_space<vmem>>, vector<2x128xf32>,
    %cst_21 = arith.constant 0.000000e+00 : f32
    %22 = vector.broadcast %cst_21 : f32 to vector<2x128xf32>
    %c215 = arith.constant 215 : index
    %c0_22 = arith.constant 0 : index
    %23 = vector.load %arg7[%c215, %c0_22] : memref<328x128xf32, #tpu.memory_space<vmem>>, vector<2x128xf32>
    tpu.vector_store %arg7[%c215, %c0_22], %22 {strides = array<i32>} : memref<328x128xf32, #tpu.memory_space<vmem>>, vector<2x128xf32>,
    %cst_23 = arith.constant 0.000000e+00 : f32
    %24 = vector.broadcast %cst_23 : f32 to vector<2x128xf32>
    %c233 = arith.constant 233 : index
    %c0_24 = arith.constant 0 : index
    %25 = vector.load %arg7[%c233, %c0_24] : memref<328x128xf32, #tpu.memory_space<vmem>>, vector<2x128xf32>
    tpu.vector_store %arg7[%c233, %c0_24], %24 {strides = array<i32>} : memref<328x128xf32, #tpu.memory_space<vmem>>, vector<2x128xf32>,
    %cst_25 = arith.constant 0.000000e+00 : f32
    %26 = vector.broadcast %cst_25 : f32 to vector<2x128xf32>
    %c251 = arith.constant 251 : index
    %c0_26 = arith.constant 0 : index
    %27 = vector.load %arg7[%c251, %c0_26] : memref<328x128xf32, #tpu.memory_space<vmem>>, vector<2x128xf32>
    tpu.vector_store %arg7[%c251, %c0_26], %26 {strides = array<i32>} : memref<328x128xf32, #tpu.memory_space<vmem>>, vector<2x128xf32>,
    %cst_27 = arith.constant 0.000000e+00 : f32
    %28 = vector.broadcast %cst_27 : f32 to vector<2x128xf32>
    %c269 = arith.constant 269 : index
    %c0_28 = arith.constant 0 : index
    %29 = vector.load %arg7[%c269, %c0_28] : memref<328x128xf32, #tpu.memory_space<vmem>>, vector<2x128xf32>
    tpu.vector_store %arg7[%c269, %c0_28], %28 {strides = array<i32>} : memref<328x128xf32, #tpu.memory_space<vmem>>, vector<2x128xf32>,
    %cst_29 = arith.constant 0.000000e+00 : f32
    %30 = vector.broadcast %cst_29 : f32 to vector<2x128xf32>
    %c287 = arith.constant 287 : index
    %c0_30 = arith.constant 0 : index
    %31 = vector.load %arg7[%c287, %c0_30] : memref<328x128xf32, #tpu.memory_space<vmem>>, vector<2x128xf32>
    tpu.vector_store %arg7[%c287, %c0_30], %30 {strides = array<i32>} : memref<328x128xf32, #tpu.memory_space<vmem>>, vector<2x128xf32>,
    %cst_31 = arith.constant 0.000000e+00 : f32
    %32 = vector.broadcast %cst_31 : f32 to vector<23x128xf32>
    %c305 = arith.constant 305 : index
    %c0_32 = arith.constant 0 : index
    %33 = vector.load %arg7[%c305, %c0_32] : memref<328x128xf32, #tpu.memory_space<vmem>>, vector<23x128xf32>
    tpu.vector_store %arg7[%c305, %c0_32], %32 {strides = array<i32>} : memref<328x128xf32, #tpu.memory_space<vmem>>, vector<23x128xf32>,
    %c0_33 = arith.constant 0 : index
    %c0_34 = arith.constant 0 : index
    %c0_35 = arith.constant 0 : index
    %c0_36 = arith.constant 0 : index
    %34 = vector.load %arg1[%c0_33, %c0_34, %c0_35, %c0_36] : memref<1x16x16x128xf32, #tpu.memory_space<vmem>>, vector<1x1x16x128xf32>
    %35 = vector.shape_cast %34 : vector<1x1x16x128xf32> to vector<16x128xf32>
    %cst_37 = arith.constant 0.000000e+00 : f32
    %36 = vector.broadcast %cst_37 : f32 to vector<16x128xf32>
    %37 = arith.maximumf %35, %36 : vector<16x128xf32>
    %c19 = arith.constant 19 : index
    %c0_38 = arith.constant 0 : index
    %38 = vector.load %arg7[%c19, %c0_38] : memref<328x128xf32, #tpu.memory_space<vmem>>, vector<16x128xf32>
    tpu.vector_store %arg7[%c19, %c0_38], %37 {strides = array<i32>} : memref<328x128xf32, #tpu.memory_space<vmem>>, vector<16x128xf32>,
    %c0_39 = arith.constant 0 : index
    %c1 = arith.constant 1 : index
    %c0_40 = arith.constant 0 : index
    %c0_41 = arith.constant 0 : index
    %39 = vector.load %arg1[%c0_39, %c1, %c0_40, %c0_41] : memref<1x16x16x128xf32, #tpu.memory_space<vmem>>, vector<1x1x16x128xf32>
    %40 = vector.shape_cast %39 : vector<1x1x16x128xf32> to vector<16x128xf32>
    %cst_42 = arith.constant 0.000000e+00 : f32
    %41 = vector.broadcast %cst_42 : f32 to vector<16x128xf32>
    %42 = arith.maximumf %40, %41 : vector<16x128xf32>
    %c37 = arith.constant 37 : index
    %c0_43 = arith.constant 0 : index
    %43 = vector.load %arg7[%c37, %c0_43] : memref<328x128xf32, #tpu.memory_space<vmem>>, vector<16x128xf32>
    tpu.vector_store %arg7[%c37, %c0_43], %42 {strides = array<i32>} : memref<328x128xf32, #tpu.memory_space<vmem>>, vector<16x128xf32>,
    %c0_44 = arith.constant 0 : index
    %c2 = arith.constant 2 : index
    %c0_45 = arith.constant 0 : index
    %c0_46 = arith.constant 0 : index
    %44 = vector.load %arg1[%c0_44, %c2, %c0_45, %c0_46] : memref<1x16x16x128xf32, #tpu.memory_space<vmem>>, vector<1x1x16x128xf32>
    %45 = vector.shape_cast %44 : vector<1x1x16x128xf32> to vector<16x128xf32>
    %cst_47 = arith.constant 0.000000e+00 : f32
    %46 = vector.broadcast %cst_47 : f32 to vector<16x128xf32>
    %47 = arith.maximumf %45, %46 : vector<16x128xf32>
    %c55 = arith.constant 55 : index
    %c0_48 = arith.constant 0 : index
    %48 = vector.load %arg7[%c55, %c0_48] : memref<328x128xf32, #tpu.memory_space<vmem>>, vector<16x128xf32>
    tpu.vector_store %arg7[%c55, %c0_48], %47 {strides = array<i32>} : memref<328x128xf32, #tpu.memory_space<vmem>>, vector<16x128xf32>,
    %c0_49 = arith.constant 0 : index
    %c3 = arith.constant 3 : index
    %c0_50 = arith.constant 0 : index
    %c0_51 = arith.constant 0 : index
    %49 = vector.load %arg1[%c0_49, %c3, %c0_50, %c0_51] : memref<1x16x16x128xf32, #tpu.memory_space<vmem>>, vector<1x1x16x128xf32>
    %50 = vector.shape_cast %49 : vector<1x1x16x128xf32> to vector<16x128xf32>
    %cst_52 = arith.constant 0.000000e+00 : f32
    %51 = vector.broadcast %cst_52 : f32 to vector<16x128xf32>
    %52 = arith.maximumf %50, %51 : vector<16x128xf32>
    %c73 = arith.constant 73 : index
    %c0_53 = arith.constant 0 : index
    %53 = vector.load %arg7[%c73, %c0_53] : memref<328x128xf32, #tpu.memory_space<vmem>>, vector<16x128xf32>
    tpu.vector_store %arg7[%c73, %c0_53], %52 {strides = array<i32>} : memref<328x128xf32, #tpu.memory_space<vmem>>, vector<16x128xf32>,
    %c0_54 = arith.constant 0 : index
    %c4 = arith.constant 4 : index
    %c0_55 = arith.constant 0 : index
    %c0_56 = arith.constant 0 : index
    %54 = vector.load %arg1[%c0_54, %c4, %c0_55, %c0_56] : memref<1x16x16x128xf32, #tpu.memory_space<vmem>>, vector<1x1x16x128xf32>
    %55 = vector.shape_cast %54 : vector<1x1x16x128xf32> to vector<16x128xf32>
    %cst_57 = arith.constant 0.000000e+00 : f32
    %56 = vector.broadcast %cst_57 : f32 to vector<16x128xf32>
    %57 = arith.maximumf %55, %56 : vector<16x128xf32>
    %c91 = arith.constant 91 : index
    %c0_58 = arith.constant 0 : index
    %58 = vector.load %arg7[%c91, %c0_58] : memref<328x128xf32, #tpu.memory_space<vmem>>, vector<16x128xf32>
    tpu.vector_store %arg7[%c91, %c0_58], %57 {strides = array<i32>} : memref<328x128xf32, #tpu.memory_space<vmem>>, vector<16x128xf32>,
    %c0_59 = arith.constant 0 : index
    %c5 = arith.constant 5 : index
    %c0_60 = arith.constant 0 : index
    %c0_61 = arith.constant 0 : index
    %59 = vector.load %arg1[%c0_59, %c5, %c0_60, %c0_61] : memref<1x16x16x128xf32, #tpu.memory_space<vmem>>, vector<1x1x16x128xf32>
    %60 = vector.shape_cast %59 : vector<1x1x16x128xf32> to vector<16x128xf32>
    %cst_62 = arith.constant 0.000000e+00 : f32
    %61 = vector.broadcast %cst_62 : f32 to vector<16x128xf32>
    %62 = arith.maximumf %60, %61 : vector<16x128xf32>
    %c109 = arith.constant 109 : index
    %c0_63 = arith.constant 0 : index
    %63 = vector.load %arg7[%c109, %c0_63] : memref<328x128xf32, #tpu.memory_space<vmem>>, vector<16x128xf32>
    tpu.vector_store %arg7[%c109, %c0_63], %62 {strides = array<i32>} : memref<328x128xf32, #tpu.memory_space<vmem>>, vector<16x128xf32>,
    %c0_64 = arith.constant 0 : index
    %c6 = arith.constant 6 : index
    %c0_65 = arith.constant 0 : index
    %c0_66 = arith.constant 0 : index
    %64 = vector.load %arg1[%c0_64, %c6, %c0_65, %c0_66] : memref<1x16x16x128xf32, #tpu.memory_space<vmem>>, vector<1x1x16x128xf32>
    %65 = vector.shape_cast %64 : vector<1x1x16x128xf32> to vector<16x128xf32>
    %cst_67 = arith.constant 0.000000e+00 : f32
    %66 = vector.broadcast %cst_67 : f32 to vector<16x128xf32>
    %67 = arith.maximumf %65, %66 : vector<16x128xf32>
    %c127 = arith.constant 127 : index
    %c0_68 = arith.constant 0 : index
    %68 = vector.load %arg7[%c127, %c0_68] : memref<328x128xf32, #tpu.memory_space<vmem>>, vector<16x128xf32>
    tpu.vector_store %arg7[%c127, %c0_68], %67 {strides = array<i32>} : memref<328x128xf32, #tpu.memory_space<vmem>>, vector<16x128xf32>,
    %c0_69 = arith.constant 0 : index
    %c7 = arith.constant 7 : index
    %c0_70 = arith.constant 0 : index
    %c0_71 = arith.constant 0 : index
    %69 = vector.load %arg1[%c0_69, %c7, %c0_70, %c0_71] : memref<1x16x16x128xf32, #tpu.memory_space<vmem>>, vector<1x1x16x128xf32>
    %70 = vector.shape_cast %69 : vector<1x1x16x128xf32> to vector<16x128xf32>
    %cst_72 = arith.constant 0.000000e+00 : f32
    %71 = vector.broadcast %cst_72 : f32 to vector<16x128xf32>
    %72 = arith.maximumf %70, %71 : vector<16x128xf32>
    %c145 = arith.constant 145 : index
    %c0_73 = arith.constant 0 : index
    %73 = vector.load %arg7[%c145, %c0_73] : memref<328x128xf32, #tpu.memory_space<vmem>>, vector<16x128xf32>
    tpu.vector_store %arg7[%c145, %c0_73], %72 {strides = array<i32>} : memref<328x128xf32, #tpu.memory_space<vmem>>, vector<16x128xf32>,
    %c0_74 = arith.constant 0 : index
    %c8 = arith.constant 8 : index
    %c0_75 = arith.constant 0 : index
    %c0_76 = arith.constant 0 : index
    %74 = vector.load %arg1[%c0_74, %c8, %c0_75, %c0_76] : memref<1x16x16x128xf32, #tpu.memory_space<vmem>>, vector<1x1x16x128xf32>
    %75 = vector.shape_cast %74 : vector<1x1x16x128xf32> to vector<16x128xf32>
    %cst_77 = arith.constant 0.000000e+00 : f32
    %76 = vector.broadcast %cst_77 : f32 to vector<16x128xf32>
    %77 = arith.maximumf %75, %76 : vector<16x128xf32>
    %c163 = arith.constant 163 : index
    %c0_78 = arith.constant 0 : index
    %78 = vector.load %arg7[%c163, %c0_78] : memref<328x128xf32, #tpu.memory_space<vmem>>, vector<16x128xf32>
    tpu.vector_store %arg7[%c163, %c0_78], %77 {strides = array<i32>} : memref<328x128xf32, #tpu.memory_space<vmem>>, vector<16x128xf32>,
    %c0_79 = arith.constant 0 : index
    %c9 = arith.constant 9 : index
    %c0_80 = arith.constant 0 : index
    %c0_81 = arith.constant 0 : index
    %79 = vector.load %arg1[%c0_79, %c9, %c0_80, %c0_81] : memref<1x16x16x128xf32, #tpu.memory_space<vmem>>, vector<1x1x16x128xf32>
    %80 = vector.shape_cast %79 : vector<1x1x16x128xf32> to vector<16x128xf32>
    %cst_82 = arith.constant 0.000000e+00 : f32
    %81 = vector.broadcast %cst_82 : f32 to vector<16x128xf32>
    %82 = arith.maximumf %80, %81 : vector<16x128xf32>
    %c181 = arith.constant 181 : index
    %c0_83 = arith.constant 0 : index
    %83 = vector.load %arg7[%c181, %c0_83] : memref<328x128xf32, #tpu.memory_space<vmem>>, vector<16x128xf32>
    tpu.vector_store %arg7[%c181, %c0_83], %82 {strides = array<i32>} : memref<328x128xf32, #tpu.memory_space<vmem>>, vector<16x128xf32>,
    %c0_84 = arith.constant 0 : index
    %c10 = arith.constant 10 : index
    %c0_85 = arith.constant 0 : index
    %c0_86 = arith.constant 0 : index
    %84 = vector.load %arg1[%c0_84, %c10, %c0_85, %c0_86] : memref<1x16x16x128xf32, #tpu.memory_space<vmem>>, vector<1x1x16x128xf32>
    %85 = vector.shape_cast %84 : vector<1x1x16x128xf32> to vector<16x128xf32>
    %cst_87 = arith.constant 0.000000e+00 : f32
    %86 = vector.broadcast %cst_87 : f32 to vector<16x128xf32>
    %87 = arith.maximumf %85, %86 : vector<16x128xf32>
    %c199 = arith.constant 199 : index
    %c0_88 = arith.constant 0 : index
    %88 = vector.load %arg7[%c199, %c0_88] : memref<328x128xf32, #tpu.memory_space<vmem>>, vector<16x128xf32>
    tpu.vector_store %arg7[%c199, %c0_88], %87 {strides = array<i32>} : memref<328x128xf32, #tpu.memory_space<vmem>>, vector<16x128xf32>,
    %c0_89 = arith.constant 0 : index
    %c11 = arith.constant 11 : index
    %c0_90 = arith.constant 0 : index
    %c0_91 = arith.constant 0 : index
    %89 = vector.load %arg1[%c0_89, %c11, %c0_90, %c0_91] : memref<1x16x16x128xf32, #tpu.memory_space<vmem>>, vector<1x1x16x128xf32>
    %90 = vector.shape_cast %89 : vector<1x1x16x128xf32> to vector<16x128xf32>
    %cst_92 = arith.constant 0.000000e+00 : f32
    %91 = vector.broadcast %cst_92 : f32 to vector<16x128xf32>
    %92 = arith.maximumf %90, %91 : vector<16x128xf32>
    %c217 = arith.constant 217 : index
    %c0_93 = arith.constant 0 : index
    %93 = vector.load %arg7[%c217, %c0_93] : memref<328x128xf32, #tpu.memory_space<vmem>>, vector<16x128xf32>
    tpu.vector_store %arg7[%c217, %c0_93], %92 {strides = array<i32>} : memref<328x128xf32, #tpu.memory_space<vmem>>, vector<16x128xf32>,
    %c0_94 = arith.constant 0 : index
    %c12 = arith.constant 12 : index
    %c0_95 = arith.constant 0 : index
    %c0_96 = arith.constant 0 : index
    %94 = vector.load %arg1[%c0_94, %c12, %c0_95, %c0_96] : memref<1x16x16x128xf32, #tpu.memory_space<vmem>>, vector<1x1x16x128xf32>
    %95 = vector.shape_cast %94 : vector<1x1x16x128xf32> to vector<16x128xf32>
    %cst_97 = arith.constant 0.000000e+00 : f32
    %96 = vector.broadcast %cst_97 : f32 to vector<16x128xf32>
    %97 = arith.maximumf %95, %96 : vector<16x128xf32>
    %c235 = arith.constant 235 : index
    %c0_98 = arith.constant 0 : index
    %98 = vector.load %arg7[%c235, %c0_98] : memref<328x128xf32, #tpu.memory_space<vmem>>, vector<16x128xf32>
    tpu.vector_store %arg7[%c235, %c0_98], %97 {strides = array<i32>} : memref<328x128xf32, #tpu.memory_space<vmem>>, vector<16x128xf32>,
    %c0_99 = arith.constant 0 : index
    %c13 = arith.constant 13 : index
    %c0_100 = arith.constant 0 : index
    %c0_101 = arith.constant 0 : index
    %99 = vector.load %arg1[%c0_99, %c13, %c0_100, %c0_101] : memref<1x16x16x128xf32, #tpu.memory_space<vmem>>, vector<1x1x16x128xf32>
    %100 = vector.shape_cast %99 : vector<1x1x16x128xf32> to vector<16x128xf32>
    %cst_102 = arith.constant 0.000000e+00 : f32
    %101 = vector.broadcast %cst_102 : f32 to vector<16x128xf32>
    %102 = arith.maximumf %100, %101 : vector<16x128xf32>
    %c253 = arith.constant 253 : index
    %c0_103 = arith.constant 0 : index
    %103 = vector.load %arg7[%c253, %c0_103] : memref<328x128xf32, #tpu.memory_space<vmem>>, vector<16x128xf32>
    tpu.vector_store %arg7[%c253, %c0_103], %102 {strides = array<i32>} : memref<328x128xf32, #tpu.memory_space<vmem>>, vector<16x128xf32>,
    %c0_104 = arith.constant 0 : index
    %c14 = arith.constant 14 : index
    %c0_105 = arith.constant 0 : index
    %c0_106 = arith.constant 0 : index
    %104 = vector.load %arg1[%c0_104, %c14, %c0_105, %c0_106] : memref<1x16x16x128xf32, #tpu.memory_space<vmem>>, vector<1x1x16x128xf32>
    %105 = vector.shape_cast %104 : vector<1x1x16x128xf32> to vector<16x128xf32>
    %cst_107 = arith.constant 0.000000e+00 : f32
    %106 = vector.broadcast %cst_107 : f32 to vector<16x128xf32>
    %107 = arith.maximumf %105, %106 : vector<16x128xf32>
    %c271 = arith.constant 271 : index
    %c0_108 = arith.constant 0 : index
    %108 = vector.load %arg7[%c271, %c0_108] : memref<328x128xf32, #tpu.memory_space<vmem>>, vector<16x128xf32>
    tpu.vector_store %arg7[%c271, %c0_108], %107 {strides = array<i32>} : memref<328x128xf32, #tpu.memory_space<vmem>>, vector<16x128xf32>,
    %c0_109 = arith.constant 0 : index
    %c15 = arith.constant 15 : index
    %c0_110 = arith.constant 0 : index
    %c0_111 = arith.constant 0 : index
    %109 = vector.load %arg1[%c0_109, %c15, %c0_110, %c0_111] : memref<1x16x16x128xf32, #tpu.memory_space<vmem>>, vector<1x1x16x128xf32>
    %110 = vector.shape_cast %109 : vector<1x1x16x128xf32> to vector<16x128xf32>
    %cst_112 = arith.constant 0.000000e+00 : f32
    %111 = vector.broadcast %cst_112 : f32 to vector<16x128xf32>
    %112 = arith.maximumf %110, %111 : vector<16x128xf32>
    %c289 = arith.constant 289 : index
    %c0_113 = arith.constant 0 : index
    %113 = vector.load %arg7[%c289, %c0_113] : memref<328x128xf32, #tpu.memory_space<vmem>>, vector<16x128xf32>
    tpu.vector_store %arg7[%c289, %c0_113], %112 {strides = array<i32>} : memref<328x128xf32, #tpu.memory_space<vmem>>, vector<16x128xf32>,
    %c0_114 = arith.constant 0 : index
    %c0_115 = arith.constant 0 : index
    %114 = vector.load %arg3[%c0_114, %c0_115] : memref<1x128xf32, #tpu.memory_space<vmem>>, vector<1x128xf32>
    %115 = vector.shape_cast %114 : vector<1x128xf32> to vector<1x128xf32>
    %116 = vector.broadcast %115 : vector<1x128xf32> to vector<288x128xf32>
    %c0_116 = arith.constant 0 : index
    %c0_117 = arith.constant 0 : index
    %117 = vector.load %arg8[%c0_116, %c0_117] : memref<288x128xf32, #tpu.memory_space<vmem>>, vector<288x128xf32>
    tpu.vector_store %arg8[%c0_116, %c0_117], %116 {strides = array<i32>} : memref<288x128xf32, #tpu.memory_space<vmem>>, vector<288x128xf32>,
    %c0_118 = arith.constant 0 : index
    %c0_119 = arith.constant 0 : index
    %118 = vector.load %arg7[%c0_118, %c0_119] : memref<328x128xf32, #tpu.memory_space<vmem>>, vector<288x128xf32>
    %119 = arith.truncf %118 : vector<288x128xf32> to vector<288x128xbf16>
    %c0_120 = arith.constant 0 : index
    %c0_121 = arith.constant 0 : index
    %120 = vector.load %arg8[%c0_120, %c0_121] : memref<288x128xf32, #tpu.memory_space<vmem>>, vector<288x128xf32>
    %c0_122 = arith.constant 0 : index
    %c0_123 = arith.constant 0 : index
    %c0_124 = arith.constant 0 : index
    %c0_125 = arith.constant 0 : index
    %121 = vector.load %arg2[%c0_122, %c0_123, %c0_124, %c0_125] : memref<3x3x128x128xbf16, #tpu.memory_space<vmem>>, vector<1x1x128x128xbf16>
    %122 = vector.shape_cast %121 : vector<1x1x128x128xbf16> to vector<128x128xbf16>
    %cst_126 = arith.constant dense<0.000000e+00> : vector<288x128xf32>
    %123 = tpu.matmul %119, %122, %cst_126 {dimension_numbers = #tpu.dot_dimension_numbers<[1], [0], [0], [1], [0, 0, 1, 1], [], []>} : vector<288x128xbf16>, vector<128x128xbf16>, vector<288x128xf32> -> vector<288x128xf32>
    %124 = arith.addf %120, %123 : vector<288x128xf32>
    %c0_127 = arith.constant 0 : index
    %c0_128 = arith.constant 0 : index
    %125 = vector.load %arg8[%c0_127, %c0_128] : memref<288x128xf32, #tpu.memory_space<vmem>>, vector<288x128xf32>
    tpu.vector_store %arg8[%c0_127, %c0_128], %124 {strides = array<i32>} : memref<288x128xf32, #tpu.memory_space<vmem>>, vector<288x128xf32>,
    %c1_129 = arith.constant 1 : index
    %c0_130 = arith.constant 0 : index
    %126 = vector.load %arg7[%c1_129, %c0_130] : memref<328x128xf32, #tpu.memory_space<vmem>>, vector<288x128xf32>
    %127 = arith.truncf %126 : vector<288x128xf32> to vector<288x128xbf16>
    %c0_131 = arith.constant 0 : index
    %c0_132 = arith.constant 0 : index
    %128 = vector.load %arg8[%c0_131, %c0_132] : memref<288x128xf32, #tpu.memory_space<vmem>>, vector<288x128xf32>
    %c0_133 = arith.constant 0 : index
    %c1_134 = arith.constant 1 : index
    %c0_135 = arith.constant 0 : index
    %c0_136 = arith.constant 0 : index
    %129 = vector.load %arg2[%c0_133, %c1_134, %c0_135, %c0_136] : memref<3x3x128x128xbf16, #tpu.memory_space<vmem>>, vector<1x1x128x128xbf16>
    %130 = vector.shape_cast %129 : vector<1x1x128x128xbf16> to vector<128x128xbf16>
    %cst_137 = arith.constant dense<0.000000e+00> : vector<288x128xf32>
    %131 = tpu.matmul %127, %130, %cst_137 {dimension_numbers = #tpu.dot_dimension_numbers<[1], [0], [0], [1], [0, 0, 1, 1], [], []>} : vector<288x128xbf16>, vector<128x128xbf16>, vector<288x128xf32> -> vector<288x128xf32>
    %132 = arith.addf %128, %131 : vector<288x128xf32>
    %c0_138 = arith.constant 0 : index
    %c0_139 = arith.constant 0 : index
    %133 = vector.load %arg8[%c0_138, %c0_139] : memref<288x128xf32, #tpu.memory_space<vmem>>, vector<288x128xf32>
    tpu.vector_store %arg8[%c0_138, %c0_139], %132 {strides = array<i32>} : memref<288x128xf32, #tpu.memory_space<vmem>>, vector<288x128xf32>,
    %c2_140 = arith.constant 2 : index
    %c0_141 = arith.constant 0 : index
    %134 = vector.load %arg7[%c2_140, %c0_141] : memref<328x128xf32, #tpu.memory_space<vmem>>, vector<288x128xf32>
    %135 = arith.truncf %134 : vector<288x128xf32> to vector<288x128xbf16>
    %c0_142 = arith.constant 0 : index
    %c0_143 = arith.constant 0 : index
    %136 = vector.load %arg8[%c0_142, %c0_143] : memref<288x128xf32, #tpu.memory_space<vmem>>, vector<288x128xf32>
    %c0_144 = arith.constant 0 : index
    %c2_145 = arith.constant 2 : index
    %c0_146 = arith.constant 0 : index
    %c0_147 = arith.constant 0 : index
    %137 = vector.load %arg2[%c0_144, %c2_145, %c0_146, %c0_147] : memref<3x3x128x128xbf16, #tpu.memory_space<vmem>>, vector<1x1x128x128xbf16>
    %138 = vector.shape_cast %137 : vector<1x1x128x128xbf16> to vector<128x128xbf16>
    %cst_148 = arith.constant dense<0.000000e+00> : vector<288x128xf32>
    %139 = tpu.matmul %135, %138, %cst_148 {dimension_numbers = #tpu.dot_dimension_numbers<[1], [0], [0], [1], [0, 0, 1, 1], [], []>} : vector<288x128xbf16>, vector<128x128xbf16>, vector<288x128xf32> -> vector<288x128xf32>
    %140 = arith.addf %136, %139 : vector<288x128xf32>
    %c0_149 = arith.constant 0 : index
    %c0_150 = arith.constant 0 : index
    %141 = vector.load %arg8[%c0_149, %c0_150] : memref<288x128xf32, #tpu.memory_space<vmem>>, vector<288x128xf32>
    tpu.vector_store %arg8[%c0_149, %c0_150], %140 {strides = array<i32>} : memref<288x128xf32, #tpu.memory_space<vmem>>, vector<288x128xf32>,
    %c18 = arith.constant 18 : index
    %c0_151 = arith.constant 0 : index
    %142 = vector.load %arg7[%c18, %c0_151] : memref<328x128xf32, #tpu.memory_space<vmem>>, vector<288x128xf32>
    %143 = arith.truncf %142 : vector<288x128xf32> to vector<288x128xbf16>
    %c0_152 = arith.constant 0 : index
    %c0_153 = arith.constant 0 : index
    %144 = vector.load %arg8[%c0_152, %c0_153] : memref<288x128xf32, #tpu.memory_space<vmem>>, vector<288x128xf32>
    %c1_154 = arith.constant 1 : index
    %c0_155 = arith.constant 0 : index
    %c0_156 = arith.constant 0 : index
    %c0_157 = arith.constant 0 : index
    %145 = vector.load %arg2[%c1_154, %c0_155, %c0_156, %c0_157] : memref<3x3x128x128xbf16, #tpu.memory_space<vmem>>, vector<1x1x128x128xbf16>
    %146 = vector.shape_cast %145 : vector<1x1x128x128xbf16> to vector<128x128xbf16>
    %cst_158 = arith.constant dense<0.000000e+00> : vector<288x128xf32>
    %147 = tpu.matmul %143, %146, %cst_158 {dimension_numbers = #tpu.dot_dimension_numbers<[1], [0], [0], [1], [0, 0, 1, 1], [], []>} : vector<288x128xbf16>, vector<128x128xbf16>, vector<288x128xf32> -> vector<288x128xf32>
    %148 = arith.addf %144, %147 : vector<288x128xf32>
    %c0_159 = arith.constant 0 : index
    %c0_160 = arith.constant 0 : index
    %149 = vector.load %arg8[%c0_159, %c0_160] : memref<288x128xf32, #tpu.memory_space<vmem>>, vector<288x128xf32>
    tpu.vector_store %arg8[%c0_159, %c0_160], %148 {strides = array<i32>} : memref<288x128xf32, #tpu.memory_space<vmem>>, vector<288x128xf32>,
    %c19_161 = arith.constant 19 : index
    %c0_162 = arith.constant 0 : index
    %150 = vector.load %arg7[%c19_161, %c0_162] : memref<328x128xf32, #tpu.memory_space<vmem>>, vector<288x128xf32>
    %151 = arith.truncf %150 : vector<288x128xf32> to vector<288x128xbf16>
    %c0_163 = arith.constant 0 : index
    %c0_164 = arith.constant 0 : index
    %152 = vector.load %arg8[%c0_163, %c0_164] : memref<288x128xf32, #tpu.memory_space<vmem>>, vector<288x128xf32>
    %c1_165 = arith.constant 1 : index
    %c1_166 = arith.constant 1 : index
    %c0_167 = arith.constant 0 : index
    %c0_168 = arith.constant 0 : index
    %153 = vector.load %arg2[%c1_165, %c1_166, %c0_167, %c0_168] : memref<3x3x128x128xbf16, #tpu.memory_space<vmem>>, vector<1x1x128x128xbf16>
    %154 = vector.shape_cast %153 : vector<1x1x128x128xbf16> to vector<128x128xbf16>
    %cst_169 = arith.constant dense<0.000000e+00> : vector<288x128xf32>
    %155 = tpu.matmul %151, %154, %cst_169 {dimension_numbers = #tpu.dot_dimension_numbers<[1], [0], [0], [1], [0, 0, 1, 1], [], []>} : vector<288x128xbf16>, vector<128x128xbf16>, vector<288x128xf32> -> vector<288x128xf32>
    %156 = arith.addf %152, %155 : vector<288x128xf32>
    %c0_170 = arith.constant 0 : index
    %c0_171 = arith.constant 0 : index
    %157 = vector.load %arg8[%c0_170, %c0_171] : memref<288x128xf32, #tpu.memory_space<vmem>>, vector<288x128xf32>
    tpu.vector_store %arg8[%c0_170, %c0_171], %156 {strides = array<i32>} : memref<288x128xf32, #tpu.memory_space<vmem>>, vector<288x128xf32>,
    %c20 = arith.constant 20 : index
    %c0_172 = arith.constant 0 : index
    %158 = vector.load %arg7[%c20, %c0_172] : memref<328x128xf32, #tpu.memory_space<vmem>>, vector<288x128xf32>
    %159 = arith.truncf %158 : vector<288x128xf32> to vector<288x128xbf16>
    %c0_173 = arith.constant 0 : index
    %c0_174 = arith.constant 0 : index
    %160 = vector.load %arg8[%c0_173, %c0_174] : memref<288x128xf32, #tpu.memory_space<vmem>>, vector<288x128xf32>
    %c1_175 = arith.constant 1 : index
    %c2_176 = arith.constant 2 : index
    %c0_177 = arith.constant 0 : index
    %c0_178 = arith.constant 0 : index
    %161 = vector.load %arg2[%c1_175, %c2_176, %c0_177, %c0_178] : memref<3x3x128x128xbf16, #tpu.memory_space<vmem>>, vector<1x1x128x128xbf16>
    %162 = vector.shape_cast %161 : vector<1x1x128x128xbf16> to vector<128x128xbf16>
    %cst_179 = arith.constant dense<0.000000e+00> : vector<288x128xf32>
    %163 = tpu.matmul %159, %162, %cst_179 {dimension_numbers = #tpu.dot_dimension_numbers<[1], [0], [0], [1], [0, 0, 1, 1], [], []>} : vector<288x128xbf16>, vector<128x128xbf16>, vector<288x128xf32> -> vector<288x128xf32>
    %164 = arith.addf %160, %163 : vector<288x128xf32>
    %c0_180 = arith.constant 0 : index
    %c0_181 = arith.constant 0 : index
    %165 = vector.load %arg8[%c0_180, %c0_181] : memref<288x128xf32, #tpu.memory_space<vmem>>, vector<288x128xf32>
    tpu.vector_store %arg8[%c0_180, %c0_181], %164 {strides = array<i32>} : memref<288x128xf32, #tpu.memory_space<vmem>>, vector<288x128xf32>,
    %c36 = arith.constant 36 : index
    %c0_182 = arith.constant 0 : index
    %166 = vector.load %arg7[%c36, %c0_182] : memref<328x128xf32, #tpu.memory_space<vmem>>, vector<288x128xf32>
    %167 = arith.truncf %166 : vector<288x128xf32> to vector<288x128xbf16>
    %c0_183 = arith.constant 0 : index
    %c0_184 = arith.constant 0 : index
    %168 = vector.load %arg8[%c0_183, %c0_184] : memref<288x128xf32, #tpu.memory_space<vmem>>, vector<288x128xf32>
    %c2_185 = arith.constant 2 : index
    %c0_186 = arith.constant 0 : index
    %c0_187 = arith.constant 0 : index
    %c0_188 = arith.constant 0 : index
    %169 = vector.load %arg2[%c2_185, %c0_186, %c0_187, %c0_188] : memref<3x3x128x128xbf16, #tpu.memory_space<vmem>>, vector<1x1x128x128xbf16>
    %170 = vector.shape_cast %169 : vector<1x1x128x128xbf16> to vector<128x128xbf16>
    %cst_189 = arith.constant dense<0.000000e+00> : vector<288x128xf32>
    %171 = tpu.matmul %167, %170, %cst_189 {dimension_numbers = #tpu.dot_dimension_numbers<[1], [0], [0], [1], [0, 0, 1, 1], [], []>} : vector<288x128xbf16>, vector<128x128xbf16>, vector<288x128xf32> -> vector<288x128xf32>
    %172 = arith.addf %168, %171 : vector<288x128xf32>
    %c0_190 = arith.constant 0 : index
    %c0_191 = arith.constant 0 : index
    %173 = vector.load %arg8[%c0_190, %c0_191] : memref<288x128xf32, #tpu.memory_space<vmem>>, vector<288x128xf32>
    tpu.vector_store %arg8[%c0_190, %c0_191], %172 {strides = array<i32>} : memref<288x128xf32, #tpu.memory_space<vmem>>, vector<288x128xf32>,
    %c37_192 = arith.constant 37 : index
    %c0_193 = arith.constant 0 : index
    %174 = vector.load %arg7[%c37_192, %c0_193] : memref<328x128xf32, #tpu.memory_space<vmem>>, vector<288x128xf32>
    %175 = arith.truncf %174 : vector<288x128xf32> to vector<288x128xbf16>
    %c0_194 = arith.constant 0 : index
    %c0_195 = arith.constant 0 : index
    %176 = vector.load %arg8[%c0_194, %c0_195] : memref<288x128xf32, #tpu.memory_space<vmem>>, vector<288x128xf32>
    %c2_196 = arith.constant 2 : index
    %c1_197 = arith.constant 1 : index
    %c0_198 = arith.constant 0 : index
    %c0_199 = arith.constant 0 : index
    %177 = vector.load %arg2[%c2_196, %c1_197, %c0_198, %c0_199] : memref<3x3x128x128xbf16, #tpu.memory_space<vmem>>, vector<1x1x128x128xbf16>
    %178 = vector.shape_cast %177 : vector<1x1x128x128xbf16> to vector<128x128xbf16>
    %cst_200 = arith.constant dense<0.000000e+00> : vector<288x128xf32>
    %179 = tpu.matmul %175, %178, %cst_200 {dimension_numbers = #tpu.dot_dimension_numbers<[1], [0], [0], [1], [0, 0, 1, 1], [], []>} : vector<288x128xbf16>, vector<128x128xbf16>, vector<288x128xf32> -> vector<288x128xf32>
    %180 = arith.addf %176, %179 : vector<288x128xf32>
    %c0_201 = arith.constant 0 : index
    %c0_202 = arith.constant 0 : index
    %181 = vector.load %arg8[%c0_201, %c0_202] : memref<288x128xf32, #tpu.memory_space<vmem>>, vector<288x128xf32>
    tpu.vector_store %arg8[%c0_201, %c0_202], %180 {strides = array<i32>} : memref<288x128xf32, #tpu.memory_space<vmem>>, vector<288x128xf32>,
    %c38 = arith.constant 38 : index
    %c0_203 = arith.constant 0 : index
    %182 = vector.load %arg7[%c38, %c0_203] : memref<328x128xf32, #tpu.memory_space<vmem>>, vector<288x128xf32>
    %183 = arith.truncf %182 : vector<288x128xf32> to vector<288x128xbf16>
    %c0_204 = arith.constant 0 : index
    %c0_205 = arith.constant 0 : index
    %184 = vector.load %arg8[%c0_204, %c0_205] : memref<288x128xf32, #tpu.memory_space<vmem>>, vector<288x128xf32>
    %c2_206 = arith.constant 2 : index
    %c2_207 = arith.constant 2 : index
    %c0_208 = arith.constant 0 : index
    %c0_209 = arith.constant 0 : index
    %185 = vector.load %arg2[%c2_206, %c2_207, %c0_208, %c0_209] : memref<3x3x128x128xbf16, #tpu.memory_space<vmem>>, vector<1x1x128x128xbf16>
    %186 = vector.shape_cast %185 : vector<1x1x128x128xbf16> to vector<128x128xbf16>
    %cst_210 = arith.constant dense<0.000000e+00> : vector<288x128xf32>
    %187 = tpu.matmul %183, %186, %cst_210 {dimension_numbers = #tpu.dot_dimension_numbers<[1], [0], [0], [1], [0, 0, 1, 1], [], []>} : vector<288x128xbf16>, vector<128x128xbf16>, vector<288x128xf32> -> vector<288x128xf32>
    %188 = arith.addf %184, %187 : vector<288x128xf32>
    %c0_211 = arith.constant 0 : index
    %c0_212 = arith.constant 0 : index
    %189 = vector.load %arg8[%c0_211, %c0_212] : memref<288x128xf32, #tpu.memory_space<vmem>>, vector<288x128xf32>
    tpu.vector_store %arg8[%c0_211, %c0_212], %188 {strides = array<i32>} : memref<288x128xf32, #tpu.memory_space<vmem>>, vector<288x128xf32>,
    %c0_213 = arith.constant 0 : index
    %c0_214 = arith.constant 0 : index
    %190 = vector.load %arg8[%c0_213, %c0_214] : memref<288x128xf32, #tpu.memory_space<vmem>>, vector<16x128xf32>
    %cst_215 = arith.constant 0.000000e+00 : f32
    %191 = vector.broadcast %cst_215 : f32 to vector<16x128xf32>
    %192 = arith.maximumf %190, %191 : vector<16x128xf32>
    %c19_216 = arith.constant 19 : index
    %c0_217 = arith.constant 0 : index
    %193 = vector.load %arg7[%c19_216, %c0_217] : memref<328x128xf32, #tpu.memory_space<vmem>>, vector<16x128xf32>
    tpu.vector_store %arg7[%c19_216, %c0_217], %192 {strides = array<i32>} : memref<328x128xf32, #tpu.memory_space<vmem>>, vector<16x128xf32>,
    %c18_218 = arith.constant 18 : index
    %c0_219 = arith.constant 0 : index
    %194 = vector.load %arg8[%c18_218, %c0_219] : memref<288x128xf32, #tpu.memory_space<vmem>>, vector<16x128xf32>
    %cst_220 = arith.constant 0.000000e+00 : f32
    %195 = vector.broadcast %cst_220 : f32 to vector<16x128xf32>
    %196 = arith.maximumf %194, %195 : vector<16x128xf32>
    %c37_221 = arith.constant 37 : index
    %c0_222 = arith.constant 0 : index
    %197 = vector.load %arg7[%c37_221, %c0_222] : memref<328x128xf32, #tpu.memory_space<vmem>>, vector<16x128xf32>
    tpu.vector_store %arg7[%c37_221, %c0_222], %196 {strides = array<i32>} : memref<328x128xf32, #tpu.memory_space<vmem>>, vector<16x128xf32>,
    %c36_223 = arith.constant 36 : index
    %c0_224 = arith.constant 0 : index
    %198 = vector.load %arg8[%c36_223, %c0_224] : memref<288x128xf32, #tpu.memory_space<vmem>>, vector<16x128xf32>
    %cst_225 = arith.constant 0.000000e+00 : f32
    %199 = vector.broadcast %cst_225 : f32 to vector<16x128xf32>
    %200 = arith.maximumf %198, %199 : vector<16x128xf32>
    %c55_226 = arith.constant 55 : index
    %c0_227 = arith.constant 0 : index
    %201 = vector.load %arg7[%c55_226, %c0_227] : memref<328x128xf32, #tpu.memory_space<vmem>>, vector<16x128xf32>
    tpu.vector_store %arg7[%c55_226, %c0_227], %200 {strides = array<i32>} : memref<328x128xf32, #tpu.memory_space<vmem>>, vector<16x128xf32>,
    %c54 = arith.constant 54 : index
    %c0_228 = arith.constant 0 : index
    %202 = vector.load %arg8[%c54, %c0_228] : memref<288x128xf32, #tpu.memory_space<vmem>>, vector<16x128xf32>
    %cst_229 = arith.constant 0.000000e+00 : f32
    %203 = vector.broadcast %cst_229 : f32 to vector<16x128xf32>
    %204 = arith.maximumf %202, %203 : vector<16x128xf32>
    %c73_230 = arith.constant 73 : index
    %c0_231 = arith.constant 0 : index
    %205 = vector.load %arg7[%c73_230, %c0_231] : memref<328x128xf32, #tpu.memory_space<vmem>>, vector<16x128xf32>
    tpu.vector_store %arg7[%c73_230, %c0_231], %204 {strides = array<i32>} : memref<328x128xf32, #tpu.memory_space<vmem>>, vector<16x128xf32>,
    %c72 = arith.constant 72 : index
    %c0_232 = arith.constant 0 : index
    %206 = vector.load %arg8[%c72, %c0_232] : memref<288x128xf32, #tpu.memory_space<vmem>>, vector<16x128xf32>
    %cst_233 = arith.constant 0.000000e+00 : f32
    %207 = vector.broadcast %cst_233 : f32 to vector<16x128xf32>
    %208 = arith.maximumf %206, %207 : vector<16x128xf32>
    %c91_234 = arith.constant 91 : index
    %c0_235 = arith.constant 0 : index
    %209 = vector.load %arg7[%c91_234, %c0_235] : memref<328x128xf32, #tpu.memory_space<vmem>>, vector<16x128xf32>
    tpu.vector_store %arg7[%c91_234, %c0_235], %208 {strides = array<i32>} : memref<328x128xf32, #tpu.memory_space<vmem>>, vector<16x128xf32>,
    %c90 = arith.constant 90 : index
    %c0_236 = arith.constant 0 : index
    %210 = vector.load %arg8[%c90, %c0_236] : memref<288x128xf32, #tpu.memory_space<vmem>>, vector<16x128xf32>
    %cst_237 = arith.constant 0.000000e+00 : f32
    %211 = vector.broadcast %cst_237 : f32 to vector<16x128xf32>
    %212 = arith.maximumf %210, %211 : vector<16x128xf32>
    %c109_238 = arith.constant 109 : index
    %c0_239 = arith.constant 0 : index
    %213 = vector.load %arg7[%c109_238, %c0_239] : memref<328x128xf32, #tpu.memory_space<vmem>>, vector<16x128xf32>
    tpu.vector_store %arg7[%c109_238, %c0_239], %212 {strides = array<i32>} : memref<328x128xf32, #tpu.memory_space<vmem>>, vector<16x128xf32>,
    %c108 = arith.constant 108 : index
    %c0_240 = arith.constant 0 : index
    %214 = vector.load %arg8[%c108, %c0_240] : memref<288x128xf32, #tpu.memory_space<vmem>>, vector<16x128xf32>
    %cst_241 = arith.constant 0.000000e+00 : f32
    %215 = vector.broadcast %cst_241 : f32 to vector<16x128xf32>
    %216 = arith.maximumf %214, %215 : vector<16x128xf32>
    %c127_242 = arith.constant 127 : index
    %c0_243 = arith.constant 0 : index
    %217 = vector.load %arg7[%c127_242, %c0_243] : memref<328x128xf32, #tpu.memory_space<vmem>>, vector<16x128xf32>
    tpu.vector_store %arg7[%c127_242, %c0_243], %216 {strides = array<i32>} : memref<328x128xf32, #tpu.memory_space<vmem>>, vector<16x128xf32>,
    %c126 = arith.constant 126 : index
    %c0_244 = arith.constant 0 : index
    %218 = vector.load %arg8[%c126, %c0_244] : memref<288x128xf32, #tpu.memory_space<vmem>>, vector<16x128xf32>
    %cst_245 = arith.constant 0.000000e+00 : f32
    %219 = vector.broadcast %cst_245 : f32 to vector<16x128xf32>
    %220 = arith.maximumf %218, %219 : vector<16x128xf32>
    %c145_246 = arith.constant 145 : index
    %c0_247 = arith.constant 0 : index
    %221 = vector.load %arg7[%c145_246, %c0_247] : memref<328x128xf32, #tpu.memory_space<vmem>>, vector<16x128xf32>
    tpu.vector_store %arg7[%c145_246, %c0_247], %220 {strides = array<i32>} : memref<328x128xf32, #tpu.memory_space<vmem>>, vector<16x128xf32>,
    %c144 = arith.constant 144 : index
    %c0_248 = arith.constant 0 : index
    %222 = vector.load %arg8[%c144, %c0_248] : memref<288x128xf32, #tpu.memory_space<vmem>>, vector<16x128xf32>
    %cst_249 = arith.constant 0.000000e+00 : f32
    %223 = vector.broadcast %cst_249 : f32 to vector<16x128xf32>
    %224 = arith.maximumf %222, %223 : vector<16x128xf32>
    %c163_250 = arith.constant 163 : index
    %c0_251 = arith.constant 0 : index
    %225 = vector.load %arg7[%c163_250, %c0_251] : memref<328x128xf32, #tpu.memory_space<vmem>>, vector<16x128xf32>
    tpu.vector_store %arg7[%c163_250, %c0_251], %224 {strides = array<i32>} : memref<328x128xf32, #tpu.memory_space<vmem>>, vector<16x128xf32>,
    %c162 = arith.constant 162 : index
    %c0_252 = arith.constant 0 : index
    %226 = vector.load %arg8[%c162, %c0_252] : memref<288x128xf32, #tpu.memory_space<vmem>>, vector<16x128xf32>
    %cst_253 = arith.constant 0.000000e+00 : f32
    %227 = vector.broadcast %cst_253 : f32 to vector<16x128xf32>
    %228 = arith.maximumf %226, %227 : vector<16x128xf32>
    %c181_254 = arith.constant 181 : index
    %c0_255 = arith.constant 0 : index
    %229 = vector.load %arg7[%c181_254, %c0_255] : memref<328x128xf32, #tpu.memory_space<vmem>>, vector<16x128xf32>
    tpu.vector_store %arg7[%c181_254, %c0_255], %228 {strides = array<i32>} : memref<328x128xf32, #tpu.memory_space<vmem>>, vector<16x128xf32>,
    %c180 = arith.constant 180 : index
    %c0_256 = arith.constant 0 : index
    %230 = vector.load %arg8[%c180, %c0_256] : memref<288x128xf32, #tpu.memory_space<vmem>>, vector<16x128xf32>
    %cst_257 = arith.constant 0.000000e+00 : f32
    %231 = vector.broadcast %cst_257 : f32 to vector<16x128xf32>
    %232 = arith.maximumf %230, %231 : vector<16x128xf32>
    %c199_258 = arith.constant 199 : index
    %c0_259 = arith.constant 0 : index
    %233 = vector.load %arg7[%c199_258, %c0_259] : memref<328x128xf32, #tpu.memory_space<vmem>>, vector<16x128xf32>
    tpu.vector_store %arg7[%c199_258, %c0_259], %232 {strides = array<i32>} : memref<328x128xf32, #tpu.memory_space<vmem>>, vector<16x128xf32>,
    %c198 = arith.constant 198 : index
    %c0_260 = arith.constant 0 : index
    %234 = vector.load %arg8[%c198, %c0_260] : memref<288x128xf32, #tpu.memory_space<vmem>>, vector<16x128xf32>
    %cst_261 = arith.constant 0.000000e+00 : f32
    %235 = vector.broadcast %cst_261 : f32 to vector<16x128xf32>
    %236 = arith.maximumf %234, %235 : vector<16x128xf32>
    %c217_262 = arith.constant 217 : index
    %c0_263 = arith.constant 0 : index
    %237 = vector.load %arg7[%c217_262, %c0_263] : memref<328x128xf32, #tpu.memory_space<vmem>>, vector<16x128xf32>
    tpu.vector_store %arg7[%c217_262, %c0_263], %236 {strides = array<i32>} : memref<328x128xf32, #tpu.memory_space<vmem>>, vector<16x128xf32>,
    %c216 = arith.constant 216 : index
    %c0_264 = arith.constant 0 : index
    %238 = vector.load %arg8[%c216, %c0_264] : memref<288x128xf32, #tpu.memory_space<vmem>>, vector<16x128xf32>
    %cst_265 = arith.constant 0.000000e+00 : f32
    %239 = vector.broadcast %cst_265 : f32 to vector<16x128xf32>
    %240 = arith.maximumf %238, %239 : vector<16x128xf32>
    %c235_266 = arith.constant 235 : index
    %c0_267 = arith.constant 0 : index
    %241 = vector.load %arg7[%c235_266, %c0_267] : memref<328x128xf32, #tpu.memory_space<vmem>>, vector<16x128xf32>
    tpu.vector_store %arg7[%c235_266, %c0_267], %240 {strides = array<i32>} : memref<328x128xf32, #tpu.memory_space<vmem>>, vector<16x128xf32>,
    %c234 = arith.constant 234 : index
    %c0_268 = arith.constant 0 : index
    %242 = vector.load %arg8[%c234, %c0_268] : memref<288x128xf32, #tpu.memory_space<vmem>>, vector<16x128xf32>
    %cst_269 = arith.constant 0.000000e+00 : f32
    %243 = vector.broadcast %cst_269 : f32 to vector<16x128xf32>
    %244 = arith.maximumf %242, %243 : vector<16x128xf32>
    %c253_270 = arith.constant 253 : index
    %c0_271 = arith.constant 0 : index
    %245 = vector.load %arg7[%c253_270, %c0_271] : memref<328x128xf32, #tpu.memory_space<vmem>>, vector<16x128xf32>
    tpu.vector_store %arg7[%c253_270, %c0_271], %244 {strides = array<i32>} : memref<328x128xf32, #tpu.memory_space<vmem>>, vector<16x128xf32>,
    %c252 = arith.constant 252 : index
    %c0_272 = arith.constant 0 : index
    %246 = vector.load %arg8[%c252, %c0_272] : memref<288x128xf32, #tpu.memory_space<vmem>>, vector<16x128xf32>
    %cst_273 = arith.constant 0.000000e+00 : f32
    %247 = vector.broadcast %cst_273 : f32 to vector<16x128xf32>
    %248 = arith.maximumf %246, %247 : vector<16x128xf32>
    %c271_274 = arith.constant 271 : index
    %c0_275 = arith.constant 0 : index
    %249 = vector.load %arg7[%c271_274, %c0_275] : memref<328x128xf32, #tpu.memory_space<vmem>>, vector<16x128xf32>
    tpu.vector_store %arg7[%c271_274, %c0_275], %248 {strides = array<i32>} : memref<328x128xf32, #tpu.memory_space<vmem>>, vector<16x128xf32>,
    %c270 = arith.constant 270 : index
    %c0_276 = arith.constant 0 : index
    %250 = vector.load %arg8[%c270, %c0_276] : memref<288x128xf32, #tpu.memory_space<vmem>>, vector<16x128xf32>
    %cst_277 = arith.constant 0.000000e+00 : f32
    %251 = vector.broadcast %cst_277 : f32 to vector<16x128xf32>
    %252 = arith.maximumf %250, %251 : vector<16x128xf32>
    %c289_278 = arith.constant 289 : index
    %c0_279 = arith.constant 0 : index
    %253 = vector.load %arg7[%c289_278, %c0_279] : memref<328x128xf32, #tpu.memory_space<vmem>>, vector<16x128xf32>
    tpu.vector_store %arg7[%c289_278, %c0_279], %252 {strides = array<i32>} : memref<328x128xf32, #tpu.memory_space<vmem>>, vector<16x128xf32>,
    %c0_280 = arith.constant 0 : index
    %c0_281 = arith.constant 0 : index
    %254 = vector.load %arg5[%c0_280, %c0_281] : memref<1x128xf32, #tpu.memory_space<vmem>>, vector<1x128xf32>
    %255 = vector.shape_cast %254 : vector<1x128xf32> to vector<1x128xf32>
    %256 = vector.broadcast %255 : vector<1x128xf32> to vector<288x128xf32>
    %c0_282 = arith.constant 0 : index
    %c0_283 = arith.constant 0 : index
    %257 = vector.load %arg8[%c0_282, %c0_283] : memref<288x128xf32, #tpu.memory_space<vmem>>, vector<288x128xf32>
    tpu.vector_store %arg8[%c0_282, %c0_283], %256 {strides = array<i32>} : memref<288x128xf32, #tpu.memory_space<vmem>>, vector<288x128xf32>,
    %c0_284 = arith.constant 0 : index
    %c0_285 = arith.constant 0 : index
    %258 = vector.load %arg7[%c0_284, %c0_285] : memref<328x128xf32, #tpu.memory_space<vmem>>, vector<288x128xf32>
    %259 = arith.truncf %258 : vector<288x128xf32> to vector<288x128xbf16>
    %c0_286 = arith.constant 0 : index
    %c0_287 = arith.constant 0 : index
    %260 = vector.load %arg8[%c0_286, %c0_287] : memref<288x128xf32, #tpu.memory_space<vmem>>, vector<288x128xf32>
    %c0_288 = arith.constant 0 : index
    %c0_289 = arith.constant 0 : index
    %c0_290 = arith.constant 0 : index
    %c0_291 = arith.constant 0 : index
    %261 = vector.load %arg4[%c0_288, %c0_289, %c0_290, %c0_291] : memref<3x3x128x128xbf16, #tpu.memory_space<vmem>>, vector<1x1x128x128xbf16>
    %262 = vector.shape_cast %261 : vector<1x1x128x128xbf16> to vector<128x128xbf16>
    %cst_292 = arith.constant dense<0.000000e+00> : vector<288x128xf32>
    %263 = tpu.matmul %259, %262, %cst_292 {dimension_numbers = #tpu.dot_dimension_numbers<[1], [0], [0], [1], [0, 0, 1, 1], [], []>} : vector<288x128xbf16>, vector<128x128xbf16>, vector<288x128xf32> -> vector<288x128xf32>
    %264 = arith.addf %260, %263 : vector<288x128xf32>
    %c0_293 = arith.constant 0 : index
    %c0_294 = arith.constant 0 : index
    %265 = vector.load %arg8[%c0_293, %c0_294] : memref<288x128xf32, #tpu.memory_space<vmem>>, vector<288x128xf32>
    tpu.vector_store %arg8[%c0_293, %c0_294], %264 {strides = array<i32>} : memref<288x128xf32, #tpu.memory_space<vmem>>, vector<288x128xf32>,
    %c1_295 = arith.constant 1 : index
    %c0_296 = arith.constant 0 : index
    %266 = vector.load %arg7[%c1_295, %c0_296] : memref<328x128xf32, #tpu.memory_space<vmem>>, vector<288x128xf32>
    %267 = arith.truncf %266 : vector<288x128xf32> to vector<288x128xbf16>
    %c0_297 = arith.constant 0 : index
    %c0_298 = arith.constant 0 : index
    %268 = vector.load %arg8[%c0_297, %c0_298] : memref<288x128xf32, #tpu.memory_space<vmem>>, vector<288x128xf32>
    %c0_299 = arith.constant 0 : index
    %c1_300 = arith.constant 1 : index
    %c0_301 = arith.constant 0 : index
    %c0_302 = arith.constant 0 : index
    %269 = vector.load %arg4[%c0_299, %c1_300, %c0_301, %c0_302] : memref<3x3x128x128xbf16, #tpu.memory_space<vmem>>, vector<1x1x128x128xbf16>
    %270 = vector.shape_cast %269 : vector<1x1x128x128xbf16> to vector<128x128xbf16>
    %cst_303 = arith.constant dense<0.000000e+00> : vector<288x128xf32>
    %271 = tpu.matmul %267, %270, %cst_303 {dimension_numbers = #tpu.dot_dimension_numbers<[1], [0], [0], [1], [0, 0, 1, 1], [], []>} : vector<288x128xbf16>, vector<128x128xbf16>, vector<288x128xf32> -> vector<288x128xf32>
    %272 = arith.addf %268, %271 : vector<288x128xf32>
    %c0_304 = arith.constant 0 : index
    %c0_305 = arith.constant 0 : index
    %273 = vector.load %arg8[%c0_304, %c0_305] : memref<288x128xf32, #tpu.memory_space<vmem>>, vector<288x128xf32>
    tpu.vector_store %arg8[%c0_304, %c0_305], %272 {strides = array<i32>} : memref<288x128xf32, #tpu.memory_space<vmem>>, vector<288x128xf32>,
    %c2_306 = arith.constant 2 : index
    %c0_307 = arith.constant 0 : index
    %274 = vector.load %arg7[%c2_306, %c0_307] : memref<328x128xf32, #tpu.memory_space<vmem>>, vector<288x128xf32>
    %275 = arith.truncf %274 : vector<288x128xf32> to vector<288x128xbf16>
    %c0_308 = arith.constant 0 : index
    %c0_309 = arith.constant 0 : index
    %276 = vector.load %arg8[%c0_308, %c0_309] : memref<288x128xf32, #tpu.memory_space<vmem>>, vector<288x128xf32>
    %c0_310 = arith.constant 0 : index
    %c2_311 = arith.constant 2 : index
    %c0_312 = arith.constant 0 : index
    %c0_313 = arith.constant 0 : index
    %277 = vector.load %arg4[%c0_310, %c2_311, %c0_312, %c0_313] : memref<3x3x128x128xbf16, #tpu.memory_space<vmem>>, vector<1x1x128x128xbf16>
    %278 = vector.shape_cast %277 : vector<1x1x128x128xbf16> to vector<128x128xbf16>
    %cst_314 = arith.constant dense<0.000000e+00> : vector<288x128xf32>
    %279 = tpu.matmul %275, %278, %cst_314 {dimension_numbers = #tpu.dot_dimension_numbers<[1], [0], [0], [1], [0, 0, 1, 1], [], []>} : vector<288x128xbf16>, vector<128x128xbf16>, vector<288x128xf32> -> vector<288x128xf32>
    %280 = arith.addf %276, %279 : vector<288x128xf32>
    %c0_315 = arith.constant 0 : index
    %c0_316 = arith.constant 0 : index
    %281 = vector.load %arg8[%c0_315, %c0_316] : memref<288x128xf32, #tpu.memory_space<vmem>>, vector<288x128xf32>
    tpu.vector_store %arg8[%c0_315, %c0_316], %280 {strides = array<i32>} : memref<288x128xf32, #tpu.memory_space<vmem>>, vector<288x128xf32>,
    %c18_317 = arith.constant 18 : index
    %c0_318 = arith.constant 0 : index
    %282 = vector.load %arg7[%c18_317, %c0_318] : memref<328x128xf32, #tpu.memory_space<vmem>>, vector<288x128xf32>
    %283 = arith.truncf %282 : vector<288x128xf32> to vector<288x128xbf16>
    %c0_319 = arith.constant 0 : index
    %c0_320 = arith.constant 0 : index
    %284 = vector.load %arg8[%c0_319, %c0_320] : memref<288x128xf32, #tpu.memory_space<vmem>>, vector<288x128xf32>
    %c1_321 = arith.constant 1 : index
    %c0_322 = arith.constant 0 : index
    %c0_323 = arith.constant 0 : index
    %c0_324 = arith.constant 0 : index
    %285 = vector.load %arg4[%c1_321, %c0_322, %c0_323, %c0_324] : memref<3x3x128x128xbf16, #tpu.memory_space<vmem>>, vector<1x1x128x128xbf16>
    %286 = vector.shape_cast %285 : vector<1x1x128x128xbf16> to vector<128x128xbf16>
    %cst_325 = arith.constant dense<0.000000e+00> : vector<288x128xf32>
    %287 = tpu.matmul %283, %286, %cst_325 {dimension_numbers = #tpu.dot_dimension_numbers<[1], [0], [0], [1], [0, 0, 1, 1], [], []>} : vector<288x128xbf16>, vector<128x128xbf16>, vector<288x128xf32> -> vector<288x128xf32>
    %288 = arith.addf %284, %287 : vector<288x128xf32>
    %c0_326 = arith.constant 0 : index
    %c0_327 = arith.constant 0 : index
    %289 = vector.load %arg8[%c0_326, %c0_327] : memref<288x128xf32, #tpu.memory_space<vmem>>, vector<288x128xf32>
    tpu.vector_store %arg8[%c0_326, %c0_327], %288 {strides = array<i32>} : memref<288x128xf32, #tpu.memory_space<vmem>>, vector<288x128xf32>,
    %c19_328 = arith.constant 19 : index
    %c0_329 = arith.constant 0 : index
    %290 = vector.load %arg7[%c19_328, %c0_329] : memref<328x128xf32, #tpu.memory_space<vmem>>, vector<288x128xf32>
    %291 = arith.truncf %290 : vector<288x128xf32> to vector<288x128xbf16>
    %c0_330 = arith.constant 0 : index
    %c0_331 = arith.constant 0 : index
    %292 = vector.load %arg8[%c0_330, %c0_331] : memref<288x128xf32, #tpu.memory_space<vmem>>, vector<288x128xf32>
    %c1_332 = arith.constant 1 : index
    %c1_333 = arith.constant 1 : index
    %c0_334 = arith.constant 0 : index
    %c0_335 = arith.constant 0 : index
    %293 = vector.load %arg4[%c1_332, %c1_333, %c0_334, %c0_335] : memref<3x3x128x128xbf16, #tpu.memory_space<vmem>>, vector<1x1x128x128xbf16>
    %294 = vector.shape_cast %293 : vector<1x1x128x128xbf16> to vector<128x128xbf16>
    %cst_336 = arith.constant dense<0.000000e+00> : vector<288x128xf32>
    %295 = tpu.matmul %291, %294, %cst_336 {dimension_numbers = #tpu.dot_dimension_numbers<[1], [0], [0], [1], [0, 0, 1, 1], [], []>} : vector<288x128xbf16>, vector<128x128xbf16>, vector<288x128xf32> -> vector<288x128xf32>
    %296 = arith.addf %292, %295 : vector<288x128xf32>
    %c0_337 = arith.constant 0 : index
    %c0_338 = arith.constant 0 : index
    %297 = vector.load %arg8[%c0_337, %c0_338] : memref<288x128xf32, #tpu.memory_space<vmem>>, vector<288x128xf32>
    tpu.vector_store %arg8[%c0_337, %c0_338], %296 {strides = array<i32>} : memref<288x128xf32, #tpu.memory_space<vmem>>, vector<288x128xf32>,
    %c20_339 = arith.constant 20 : index
    %c0_340 = arith.constant 0 : index
    %298 = vector.load %arg7[%c20_339, %c0_340] : memref<328x128xf32, #tpu.memory_space<vmem>>, vector<288x128xf32>
    %299 = arith.truncf %298 : vector<288x128xf32> to vector<288x128xbf16>
    %c0_341 = arith.constant 0 : index
    %c0_342 = arith.constant 0 : index
    %300 = vector.load %arg8[%c0_341, %c0_342] : memref<288x128xf32, #tpu.memory_space<vmem>>, vector<288x128xf32>
    %c1_343 = arith.constant 1 : index
    %c2_344 = arith.constant 2 : index
    %c0_345 = arith.constant 0 : index
    %c0_346 = arith.constant 0 : index
    %301 = vector.load %arg4[%c1_343, %c2_344, %c0_345, %c0_346] : memref<3x3x128x128xbf16, #tpu.memory_space<vmem>>, vector<1x1x128x128xbf16>
    %302 = vector.shape_cast %301 : vector<1x1x128x128xbf16> to vector<128x128xbf16>
    %cst_347 = arith.constant dense<0.000000e+00> : vector<288x128xf32>
    %303 = tpu.matmul %299, %302, %cst_347 {dimension_numbers = #tpu.dot_dimension_numbers<[1], [0], [0], [1], [0, 0, 1, 1], [], []>} : vector<288x128xbf16>, vector<128x128xbf16>, vector<288x128xf32> -> vector<288x128xf32>
    %304 = arith.addf %300, %303 : vector<288x128xf32>
    %c0_348 = arith.constant 0 : index
    %c0_349 = arith.constant 0 : index
    %305 = vector.load %arg8[%c0_348, %c0_349] : memref<288x128xf32, #tpu.memory_space<vmem>>, vector<288x128xf32>
    tpu.vector_store %arg8[%c0_348, %c0_349], %304 {strides = array<i32>} : memref<288x128xf32, #tpu.memory_space<vmem>>, vector<288x128xf32>,
    %c36_350 = arith.constant 36 : index
    %c0_351 = arith.constant 0 : index
    %306 = vector.load %arg7[%c36_350, %c0_351] : memref<328x128xf32, #tpu.memory_space<vmem>>, vector<288x128xf32>
    %307 = arith.truncf %306 : vector<288x128xf32> to vector<288x128xbf16>
    %c0_352 = arith.constant 0 : index
    %c0_353 = arith.constant 0 : index
    %308 = vector.load %arg8[%c0_352, %c0_353] : memref<288x128xf32, #tpu.memory_space<vmem>>, vector<288x128xf32>
    %c2_354 = arith.constant 2 : index
    %c0_355 = arith.constant 0 : index
    %c0_356 = arith.constant 0 : index
    %c0_357 = arith.constant 0 : index
    %309 = vector.load %arg4[%c2_354, %c0_355, %c0_356, %c0_357] : memref<3x3x128x128xbf16, #tpu.memory_space<vmem>>, vector<1x1x128x128xbf16>
    %310 = vector.shape_cast %309 : vector<1x1x128x128xbf16> to vector<128x128xbf16>
    %cst_358 = arith.constant dense<0.000000e+00> : vector<288x128xf32>
    %311 = tpu.matmul %307, %310, %cst_358 {dimension_numbers = #tpu.dot_dimension_numbers<[1], [0], [0], [1], [0, 0, 1, 1], [], []>} : vector<288x128xbf16>, vector<128x128xbf16>, vector<288x128xf32> -> vector<288x128xf32>
    %312 = arith.addf %308, %311 : vector<288x128xf32>
    %c0_359 = arith.constant 0 : index
    %c0_360 = arith.constant 0 : index
    %313 = vector.load %arg8[%c0_359, %c0_360] : memref<288x128xf32, #tpu.memory_space<vmem>>, vector<288x128xf32>
    tpu.vector_store %arg8[%c0_359, %c0_360], %312 {strides = array<i32>} : memref<288x128xf32, #tpu.memory_space<vmem>>, vector<288x128xf32>,
    %c37_361 = arith.constant 37 : index
    %c0_362 = arith.constant 0 : index
    %314 = vector.load %arg7[%c37_361, %c0_362] : memref<328x128xf32, #tpu.memory_space<vmem>>, vector<288x128xf32>
    %315 = arith.truncf %314 : vector<288x128xf32> to vector<288x128xbf16>
    %c0_363 = arith.constant 0 : index
    %c0_364 = arith.constant 0 : index
    %316 = vector.load %arg8[%c0_363, %c0_364] : memref<288x128xf32, #tpu.memory_space<vmem>>, vector<288x128xf32>
    %c2_365 = arith.constant 2 : index
    %c1_366 = arith.constant 1 : index
    %c0_367 = arith.constant 0 : index
    %c0_368 = arith.constant 0 : index
    %317 = vector.load %arg4[%c2_365, %c1_366, %c0_367, %c0_368] : memref<3x3x128x128xbf16, #tpu.memory_space<vmem>>, vector<1x1x128x128xbf16>
    %318 = vector.shape_cast %317 : vector<1x1x128x128xbf16> to vector<128x128xbf16>
    %cst_369 = arith.constant dense<0.000000e+00> : vector<288x128xf32>
    %319 = tpu.matmul %315, %318, %cst_369 {dimension_numbers = #tpu.dot_dimension_numbers<[1], [0], [0], [1], [0, 0, 1, 1], [], []>} : vector<288x128xbf16>, vector<128x128xbf16>, vector<288x128xf32> -> vector<288x128xf32>
    %320 = arith.addf %316, %319 : vector<288x128xf32>
    %c0_370 = arith.constant 0 : index
    %c0_371 = arith.constant 0 : index
    %321 = vector.load %arg8[%c0_370, %c0_371] : memref<288x128xf32, #tpu.memory_space<vmem>>, vector<288x128xf32>
    tpu.vector_store %arg8[%c0_370, %c0_371], %320 {strides = array<i32>} : memref<288x128xf32, #tpu.memory_space<vmem>>, vector<288x128xf32>,
    %c38_372 = arith.constant 38 : index
    %c0_373 = arith.constant 0 : index
    %322 = vector.load %arg7[%c38_372, %c0_373] : memref<328x128xf32, #tpu.memory_space<vmem>>, vector<288x128xf32>
    %323 = arith.truncf %322 : vector<288x128xf32> to vector<288x128xbf16>
    %c0_374 = arith.constant 0 : index
    %c0_375 = arith.constant 0 : index
    %324 = vector.load %arg8[%c0_374, %c0_375] : memref<288x128xf32, #tpu.memory_space<vmem>>, vector<288x128xf32>
    %c2_376 = arith.constant 2 : index
    %c2_377 = arith.constant 2 : index
    %c0_378 = arith.constant 0 : index
    %c0_379 = arith.constant 0 : index
    %325 = vector.load %arg4[%c2_376, %c2_377, %c0_378, %c0_379] : memref<3x3x128x128xbf16, #tpu.memory_space<vmem>>, vector<1x1x128x128xbf16>
    %326 = vector.shape_cast %325 : vector<1x1x128x128xbf16> to vector<128x128xbf16>
    %cst_380 = arith.constant dense<0.000000e+00> : vector<288x128xf32>
    %327 = tpu.matmul %323, %326, %cst_380 {dimension_numbers = #tpu.dot_dimension_numbers<[1], [0], [0], [1], [0, 0, 1, 1], [], []>} : vector<288x128xbf16>, vector<128x128xbf16>, vector<288x128xf32> -> vector<288x128xf32>
    %328 = arith.addf %324, %327 : vector<288x128xf32>
    %c0_381 = arith.constant 0 : index
    %c0_382 = arith.constant 0 : index
    %329 = vector.load %arg8[%c0_381, %c0_382] : memref<288x128xf32, #tpu.memory_space<vmem>>, vector<288x128xf32>
    tpu.vector_store %arg8[%c0_381, %c0_382], %328 {strides = array<i32>} : memref<288x128xf32, #tpu.memory_space<vmem>>, vector<288x128xf32>,
    %c0_383 = arith.constant 0 : index
    %c0_384 = arith.constant 0 : index
    %330 = vector.load %arg8[%c0_383, %c0_384] : memref<288x128xf32, #tpu.memory_space<vmem>>, vector<16x128xf32>
    %c0_385 = arith.constant 0 : index
    %c0_386 = arith.constant 0 : index
    %c0_387 = arith.constant 0 : index
    %c0_388 = arith.constant 0 : index
    %331 = vector.load %arg1[%c0_385, %c0_386, %c0_387, %c0_388] : memref<1x16x16x128xf32, #tpu.memory_space<vmem>>, vector<1x1x16x128xf32>
    %332 = vector.shape_cast %331 : vector<1x1x16x128xf32> to vector<16x128xf32>
    %333 = arith.addf %330, %332 : vector<16x128xf32>
    %c0_389 = arith.constant 0 : index
    %c0_390 = arith.constant 0 : index
    %c0_391 = arith.constant 0 : index
    %c0_392 = arith.constant 0 : index
    %334 = vector.load %arg6[%c0_389, %c0_390, %c0_391, %c0_392] : memref<1x16x16x128xf32, #tpu.memory_space<vmem>>, vector<1x1x16x128xf32>
    %335 = vector.shape_cast %334 : vector<1x1x16x128xf32> to vector<16x128xf32>
    %336 = vector.shape_cast %333 : vector<16x128xf32> to vector<1x1x16x128xf32>
    tpu.vector_store %arg6[%c0_389, %c0_390, %c0_391, %c0_392], %336 {strides = array<i32>} : memref<1x16x16x128xf32, #tpu.memory_space<vmem>>, vector<1x1x16x128xf32>,
    %c18_393 = arith.constant 18 : index
    %c0_394 = arith.constant 0 : index
    %337 = vector.load %arg8[%c18_393, %c0_394] : memref<288x128xf32, #tpu.memory_space<vmem>>, vector<16x128xf32>
    %c0_395 = arith.constant 0 : index
    %c1_396 = arith.constant 1 : index
    %c0_397 = arith.constant 0 : index
    %c0_398 = arith.constant 0 : index
    %338 = vector.load %arg1[%c0_395, %c1_396, %c0_397, %c0_398] : memref<1x16x16x128xf32, #tpu.memory_space<vmem>>, vector<1x1x16x128xf32>
    %339 = vector.shape_cast %338 : vector<1x1x16x128xf32> to vector<16x128xf32>
    %340 = arith.addf %337, %339 : vector<16x128xf32>
    %c0_399 = arith.constant 0 : index
    %c1_400 = arith.constant 1 : index
    %c0_401 = arith.constant 0 : index
    %c0_402 = arith.constant 0 : index
    %341 = vector.load %arg6[%c0_399, %c1_400, %c0_401, %c0_402] : memref<1x16x16x128xf32, #tpu.memory_space<vmem>>, vector<1x1x16x128xf32>
    %342 = vector.shape_cast %341 : vector<1x1x16x128xf32> to vector<16x128xf32>
    %343 = vector.shape_cast %340 : vector<16x128xf32> to vector<1x1x16x128xf32>
    tpu.vector_store %arg6[%c0_399, %c1_400, %c0_401, %c0_402], %343 {strides = array<i32>} : memref<1x16x16x128xf32, #tpu.memory_space<vmem>>, vector<1x1x16x128xf32>,
    %c36_403 = arith.constant 36 : index
    %c0_404 = arith.constant 0 : index
    %344 = vector.load %arg8[%c36_403, %c0_404] : memref<288x128xf32, #tpu.memory_space<vmem>>, vector<16x128xf32>
    %c0_405 = arith.constant 0 : index
    %c2_406 = arith.constant 2 : index
    %c0_407 = arith.constant 0 : index
    %c0_408 = arith.constant 0 : index
    %345 = vector.load %arg1[%c0_405, %c2_406, %c0_407, %c0_408] : memref<1x16x16x128xf32, #tpu.memory_space<vmem>>, vector<1x1x16x128xf32>
    %346 = vector.shape_cast %345 : vector<1x1x16x128xf32> to vector<16x128xf32>
    %347 = arith.addf %344, %346 : vector<16x128xf32>
    %c0_409 = arith.constant 0 : index
    %c2_410 = arith.constant 2 : index
    %c0_411 = arith.constant 0 : index
    %c0_412 = arith.constant 0 : index
    %348 = vector.load %arg6[%c0_409, %c2_410, %c0_411, %c0_412] : memref<1x16x16x128xf32, #tpu.memory_space<vmem>>, vector<1x1x16x128xf32>
    %349 = vector.shape_cast %348 : vector<1x1x16x128xf32> to vector<16x128xf32>
    %350 = vector.shape_cast %347 : vector<16x128xf32> to vector<1x1x16x128xf32>
    tpu.vector_store %arg6[%c0_409, %c2_410, %c0_411, %c0_412], %350 {strides = array<i32>} : memref<1x16x16x128xf32, #tpu.memory_space<vmem>>, vector<1x1x16x128xf32>,
    %c54_413 = arith.constant 54 : index
    %c0_414 = arith.constant 0 : index
    %351 = vector.load %arg8[%c54_413, %c0_414] : memref<288x128xf32, #tpu.memory_space<vmem>>, vector<16x128xf32>
    %c0_415 = arith.constant 0 : index
    %c3_416 = arith.constant 3 : index
    %c0_417 = arith.constant 0 : index
    %c0_418 = arith.constant 0 : index
    %352 = vector.load %arg1[%c0_415, %c3_416, %c0_417, %c0_418] : memref<1x16x16x128xf32, #tpu.memory_space<vmem>>, vector<1x1x16x128xf32>
    %353 = vector.shape_cast %352 : vector<1x1x16x128xf32> to vector<16x128xf32>
    %354 = arith.addf %351, %353 : vector<16x128xf32>
    %c0_419 = arith.constant 0 : index
    %c3_420 = arith.constant 3 : index
    %c0_421 = arith.constant 0 : index
    %c0_422 = arith.constant 0 : index
    %355 = vector.load %arg6[%c0_419, %c3_420, %c0_421, %c0_422] : memref<1x16x16x128xf32, #tpu.memory_space<vmem>>, vector<1x1x16x128xf32>
    %356 = vector.shape_cast %355 : vector<1x1x16x128xf32> to vector<16x128xf32>
    %357 = vector.shape_cast %354 : vector<16x128xf32> to vector<1x1x16x128xf32>
    tpu.vector_store %arg6[%c0_419, %c3_420, %c0_421, %c0_422], %357 {strides = array<i32>} : memref<1x16x16x128xf32, #tpu.memory_space<vmem>>, vector<1x1x16x128xf32>,
    %c72_423 = arith.constant 72 : index
    %c0_424 = arith.constant 0 : index
    %358 = vector.load %arg8[%c72_423, %c0_424] : memref<288x128xf32, #tpu.memory_space<vmem>>, vector<16x128xf32>
    %c0_425 = arith.constant 0 : index
    %c4_426 = arith.constant 4 : index
    %c0_427 = arith.constant 0 : index
    %c0_428 = arith.constant 0 : index
    %359 = vector.load %arg1[%c0_425, %c4_426, %c0_427, %c0_428] : memref<1x16x16x128xf32, #tpu.memory_space<vmem>>, vector<1x1x16x128xf32>
    %360 = vector.shape_cast %359 : vector<1x1x16x128xf32> to vector<16x128xf32>
    %361 = arith.addf %358, %360 : vector<16x128xf32>
    %c0_429 = arith.constant 0 : index
    %c4_430 = arith.constant 4 : index
    %c0_431 = arith.constant 0 : index
    %c0_432 = arith.constant 0 : index
    %362 = vector.load %arg6[%c0_429, %c4_430, %c0_431, %c0_432] : memref<1x16x16x128xf32, #tpu.memory_space<vmem>>, vector<1x1x16x128xf32>
    %363 = vector.shape_cast %362 : vector<1x1x16x128xf32> to vector<16x128xf32>
    %364 = vector.shape_cast %361 : vector<16x128xf32> to vector<1x1x16x128xf32>
    tpu.vector_store %arg6[%c0_429, %c4_430, %c0_431, %c0_432], %364 {strides = array<i32>} : memref<1x16x16x128xf32, #tpu.memory_space<vmem>>, vector<1x1x16x128xf32>,
    %c90_433 = arith.constant 90 : index
    %c0_434 = arith.constant 0 : index
    %365 = vector.load %arg8[%c90_433, %c0_434] : memref<288x128xf32, #tpu.memory_space<vmem>>, vector<16x128xf32>
    %c0_435 = arith.constant 0 : index
    %c5_436 = arith.constant 5 : index
    %c0_437 = arith.constant 0 : index
    %c0_438 = arith.constant 0 : index
    %366 = vector.load %arg1[%c0_435, %c5_436, %c0_437, %c0_438] : memref<1x16x16x128xf32, #tpu.memory_space<vmem>>, vector<1x1x16x128xf32>
    %367 = vector.shape_cast %366 : vector<1x1x16x128xf32> to vector<16x128xf32>
    %368 = arith.addf %365, %367 : vector<16x128xf32>
    %c0_439 = arith.constant 0 : index
    %c5_440 = arith.constant 5 : index
    %c0_441 = arith.constant 0 : index
    %c0_442 = arith.constant 0 : index
    %369 = vector.load %arg6[%c0_439, %c5_440, %c0_441, %c0_442] : memref<1x16x16x128xf32, #tpu.memory_space<vmem>>, vector<1x1x16x128xf32>
    %370 = vector.shape_cast %369 : vector<1x1x16x128xf32> to vector<16x128xf32>
    %371 = vector.shape_cast %368 : vector<16x128xf32> to vector<1x1x16x128xf32>
    tpu.vector_store %arg6[%c0_439, %c5_440, %c0_441, %c0_442], %371 {strides = array<i32>} : memref<1x16x16x128xf32, #tpu.memory_space<vmem>>, vector<1x1x16x128xf32>,
    %c108_443 = arith.constant 108 : index
    %c0_444 = arith.constant 0 : index
    %372 = vector.load %arg8[%c108_443, %c0_444] : memref<288x128xf32, #tpu.memory_space<vmem>>, vector<16x128xf32>
    %c0_445 = arith.constant 0 : index
    %c6_446 = arith.constant 6 : index
    %c0_447 = arith.constant 0 : index
    %c0_448 = arith.constant 0 : index
    %373 = vector.load %arg1[%c0_445, %c6_446, %c0_447, %c0_448] : memref<1x16x16x128xf32, #tpu.memory_space<vmem>>, vector<1x1x16x128xf32>
    %374 = vector.shape_cast %373 : vector<1x1x16x128xf32> to vector<16x128xf32>
    %375 = arith.addf %372, %374 : vector<16x128xf32>
    %c0_449 = arith.constant 0 : index
    %c6_450 = arith.constant 6 : index
    %c0_451 = arith.constant 0 : index
    %c0_452 = arith.constant 0 : index
    %376 = vector.load %arg6[%c0_449, %c6_450, %c0_451, %c0_452] : memref<1x16x16x128xf32, #tpu.memory_space<vmem>>, vector<1x1x16x128xf32>
    %377 = vector.shape_cast %376 : vector<1x1x16x128xf32> to vector<16x128xf32>
    %378 = vector.shape_cast %375 : vector<16x128xf32> to vector<1x1x16x128xf32>
    tpu.vector_store %arg6[%c0_449, %c6_450, %c0_451, %c0_452], %378 {strides = array<i32>} : memref<1x16x16x128xf32, #tpu.memory_space<vmem>>, vector<1x1x16x128xf32>,
    %c126_453 = arith.constant 126 : index
    %c0_454 = arith.constant 0 : index
    %379 = vector.load %arg8[%c126_453, %c0_454] : memref<288x128xf32, #tpu.memory_space<vmem>>, vector<16x128xf32>
    %c0_455 = arith.constant 0 : index
    %c7_456 = arith.constant 7 : index
    %c0_457 = arith.constant 0 : index
    %c0_458 = arith.constant 0 : index
    %380 = vector.load %arg1[%c0_455, %c7_456, %c0_457, %c0_458] : memref<1x16x16x128xf32, #tpu.memory_space<vmem>>, vector<1x1x16x128xf32>
    %381 = vector.shape_cast %380 : vector<1x1x16x128xf32> to vector<16x128xf32>
    %382 = arith.addf %379, %381 : vector<16x128xf32>
    %c0_459 = arith.constant 0 : index
    %c7_460 = arith.constant 7 : index
    %c0_461 = arith.constant 0 : index
    %c0_462 = arith.constant 0 : index
    %383 = vector.load %arg6[%c0_459, %c7_460, %c0_461, %c0_462] : memref<1x16x16x128xf32, #tpu.memory_space<vmem>>, vector<1x1x16x128xf32>
    %384 = vector.shape_cast %383 : vector<1x1x16x128xf32> to vector<16x128xf32>
    %385 = vector.shape_cast %382 : vector<16x128xf32> to vector<1x1x16x128xf32>
    tpu.vector_store %arg6[%c0_459, %c7_460, %c0_461, %c0_462], %385 {strides = array<i32>} : memref<1x16x16x128xf32, #tpu.memory_space<vmem>>, vector<1x1x16x128xf32>,
    %c144_463 = arith.constant 144 : index
    %c0_464 = arith.constant 0 : index
    %386 = vector.load %arg8[%c144_463, %c0_464] : memref<288x128xf32, #tpu.memory_space<vmem>>, vector<16x128xf32>
    %c0_465 = arith.constant 0 : index
    %c8_466 = arith.constant 8 : index
    %c0_467 = arith.constant 0 : index
    %c0_468 = arith.constant 0 : index
    %387 = vector.load %arg1[%c0_465, %c8_466, %c0_467, %c0_468] : memref<1x16x16x128xf32, #tpu.memory_space<vmem>>, vector<1x1x16x128xf32>
    %388 = vector.shape_cast %387 : vector<1x1x16x128xf32> to vector<16x128xf32>
    %389 = arith.addf %386, %388 : vector<16x128xf32>
    %c0_469 = arith.constant 0 : index
    %c8_470 = arith.constant 8 : index
    %c0_471 = arith.constant 0 : index
    %c0_472 = arith.constant 0 : index
    %390 = vector.load %arg6[%c0_469, %c8_470, %c0_471, %c0_472] : memref<1x16x16x128xf32, #tpu.memory_space<vmem>>, vector<1x1x16x128xf32>
    %391 = vector.shape_cast %390 : vector<1x1x16x128xf32> to vector<16x128xf32>
    %392 = vector.shape_cast %389 : vector<16x128xf32> to vector<1x1x16x128xf32>
    tpu.vector_store %arg6[%c0_469, %c8_470, %c0_471, %c0_472], %392 {strides = array<i32>} : memref<1x16x16x128xf32, #tpu.memory_space<vmem>>, vector<1x1x16x128xf32>,
    %c162_473 = arith.constant 162 : index
    %c0_474 = arith.constant 0 : index
    %393 = vector.load %arg8[%c162_473, %c0_474] : memref<288x128xf32, #tpu.memory_space<vmem>>, vector<16x128xf32>
    %c0_475 = arith.constant 0 : index
    %c9_476 = arith.constant 9 : index
    %c0_477 = arith.constant 0 : index
    %c0_478 = arith.constant 0 : index
    %394 = vector.load %arg1[%c0_475, %c9_476, %c0_477, %c0_478] : memref<1x16x16x128xf32, #tpu.memory_space<vmem>>, vector<1x1x16x128xf32>
    %395 = vector.shape_cast %394 : vector<1x1x16x128xf32> to vector<16x128xf32>
    %396 = arith.addf %393, %395 : vector<16x128xf32>
    %c0_479 = arith.constant 0 : index
    %c9_480 = arith.constant 9 : index
    %c0_481 = arith.constant 0 : index
    %c0_482 = arith.constant 0 : index
    %397 = vector.load %arg6[%c0_479, %c9_480, %c0_481, %c0_482] : memref<1x16x16x128xf32, #tpu.memory_space<vmem>>, vector<1x1x16x128xf32>
    %398 = vector.shape_cast %397 : vector<1x1x16x128xf32> to vector<16x128xf32>
    %399 = vector.shape_cast %396 : vector<16x128xf32> to vector<1x1x16x128xf32>
    tpu.vector_store %arg6[%c0_479, %c9_480, %c0_481, %c0_482], %399 {strides = array<i32>} : memref<1x16x16x128xf32, #tpu.memory_space<vmem>>, vector<1x1x16x128xf32>,
    %c180_483 = arith.constant 180 : index
    %c0_484 = arith.constant 0 : index
    %400 = vector.load %arg8[%c180_483, %c0_484] : memref<288x128xf32, #tpu.memory_space<vmem>>, vector<16x128xf32>
    %c0_485 = arith.constant 0 : index
    %c10_486 = arith.constant 10 : index
    %c0_487 = arith.constant 0 : index
    %c0_488 = arith.constant 0 : index
    %401 = vector.load %arg1[%c0_485, %c10_486, %c0_487, %c0_488] : memref<1x16x16x128xf32, #tpu.memory_space<vmem>>, vector<1x1x16x128xf32>
    %402 = vector.shape_cast %401 : vector<1x1x16x128xf32> to vector<16x128xf32>
    %403 = arith.addf %400, %402 : vector<16x128xf32>
    %c0_489 = arith.constant 0 : index
    %c10_490 = arith.constant 10 : index
    %c0_491 = arith.constant 0 : index
    %c0_492 = arith.constant 0 : index
    %404 = vector.load %arg6[%c0_489, %c10_490, %c0_491, %c0_492] : memref<1x16x16x128xf32, #tpu.memory_space<vmem>>, vector<1x1x16x128xf32>
    %405 = vector.shape_cast %404 : vector<1x1x16x128xf32> to vector<16x128xf32>
    %406 = vector.shape_cast %403 : vector<16x128xf32> to vector<1x1x16x128xf32>
    tpu.vector_store %arg6[%c0_489, %c10_490, %c0_491, %c0_492], %406 {strides = array<i32>} : memref<1x16x16x128xf32, #tpu.memory_space<vmem>>, vector<1x1x16x128xf32>,
    %c198_493 = arith.constant 198 : index
    %c0_494 = arith.constant 0 : index
    %407 = vector.load %arg8[%c198_493, %c0_494] : memref<288x128xf32, #tpu.memory_space<vmem>>, vector<16x128xf32>
    %c0_495 = arith.constant 0 : index
    %c11_496 = arith.constant 11 : index
    %c0_497 = arith.constant 0 : index
    %c0_498 = arith.constant 0 : index
    %408 = vector.load %arg1[%c0_495, %c11_496, %c0_497, %c0_498] : memref<1x16x16x128xf32, #tpu.memory_space<vmem>>, vector<1x1x16x128xf32>
    %409 = vector.shape_cast %408 : vector<1x1x16x128xf32> to vector<16x128xf32>
    %410 = arith.addf %407, %409 : vector<16x128xf32>
    %c0_499 = arith.constant 0 : index
    %c11_500 = arith.constant 11 : index
    %c0_501 = arith.constant 0 : index
    %c0_502 = arith.constant 0 : index
    %411 = vector.load %arg6[%c0_499, %c11_500, %c0_501, %c0_502] : memref<1x16x16x128xf32, #tpu.memory_space<vmem>>, vector<1x1x16x128xf32>
    %412 = vector.shape_cast %411 : vector<1x1x16x128xf32> to vector<16x128xf32>
    %413 = vector.shape_cast %410 : vector<16x128xf32> to vector<1x1x16x128xf32>
    tpu.vector_store %arg6[%c0_499, %c11_500, %c0_501, %c0_502], %413 {strides = array<i32>} : memref<1x16x16x128xf32, #tpu.memory_space<vmem>>, vector<1x1x16x128xf32>,
    %c216_503 = arith.constant 216 : index
    %c0_504 = arith.constant 0 : index
    %414 = vector.load %arg8[%c216_503, %c0_504] : memref<288x128xf32, #tpu.memory_space<vmem>>, vector<16x128xf32>
    %c0_505 = arith.constant 0 : index
    %c12_506 = arith.constant 12 : index
    %c0_507 = arith.constant 0 : index
    %c0_508 = arith.constant 0 : index
    %415 = vector.load %arg1[%c0_505, %c12_506, %c0_507, %c0_508] : memref<1x16x16x128xf32, #tpu.memory_space<vmem>>, vector<1x1x16x128xf32>
    %416 = vector.shape_cast %415 : vector<1x1x16x128xf32> to vector<16x128xf32>
    %417 = arith.addf %414, %416 : vector<16x128xf32>
    %c0_509 = arith.constant 0 : index
    %c12_510 = arith.constant 12 : index
    %c0_511 = arith.constant 0 : index
    %c0_512 = arith.constant 0 : index
    %418 = vector.load %arg6[%c0_509, %c12_510, %c0_511, %c0_512] : memref<1x16x16x128xf32, #tpu.memory_space<vmem>>, vector<1x1x16x128xf32>
    %419 = vector.shape_cast %418 : vector<1x1x16x128xf32> to vector<16x128xf32>
    %420 = vector.shape_cast %417 : vector<16x128xf32> to vector<1x1x16x128xf32>
    tpu.vector_store %arg6[%c0_509, %c12_510, %c0_511, %c0_512], %420 {strides = array<i32>} : memref<1x16x16x128xf32, #tpu.memory_space<vmem>>, vector<1x1x16x128xf32>,
    %c234_513 = arith.constant 234 : index
    %c0_514 = arith.constant 0 : index
    %421 = vector.load %arg8[%c234_513, %c0_514] : memref<288x128xf32, #tpu.memory_space<vmem>>, vector<16x128xf32>
    %c0_515 = arith.constant 0 : index
    %c13_516 = arith.constant 13 : index
    %c0_517 = arith.constant 0 : index
    %c0_518 = arith.constant 0 : index
    %422 = vector.load %arg1[%c0_515, %c13_516, %c0_517, %c0_518] : memref<1x16x16x128xf32, #tpu.memory_space<vmem>>, vector<1x1x16x128xf32>
    %423 = vector.shape_cast %422 : vector<1x1x16x128xf32> to vector<16x128xf32>
    %424 = arith.addf %421, %423 : vector<16x128xf32>
    %c0_519 = arith.constant 0 : index
    %c13_520 = arith.constant 13 : index
    %c0_521 = arith.constant 0 : index
    %c0_522 = arith.constant 0 : index
    %425 = vector.load %arg6[%c0_519, %c13_520, %c0_521, %c0_522] : memref<1x16x16x128xf32, #tpu.memory_space<vmem>>, vector<1x1x16x128xf32>
    %426 = vector.shape_cast %425 : vector<1x1x16x128xf32> to vector<16x128xf32>
    %427 = vector.shape_cast %424 : vector<16x128xf32> to vector<1x1x16x128xf32>
    tpu.vector_store %arg6[%c0_519, %c13_520, %c0_521, %c0_522], %427 {strides = array<i32>} : memref<1x16x16x128xf32, #tpu.memory_space<vmem>>, vector<1x1x16x128xf32>,
    %c252_523 = arith.constant 252 : index
    %c0_524 = arith.constant 0 : index
    %428 = vector.load %arg8[%c252_523, %c0_524] : memref<288x128xf32, #tpu.memory_space<vmem>>, vector<16x128xf32>
    %c0_525 = arith.constant 0 : index
    %c14_526 = arith.constant 14 : index
    %c0_527 = arith.constant 0 : index
    %c0_528 = arith.constant 0 : index
    %429 = vector.load %arg1[%c0_525, %c14_526, %c0_527, %c0_528] : memref<1x16x16x128xf32, #tpu.memory_space<vmem>>, vector<1x1x16x128xf32>
    %430 = vector.shape_cast %429 : vector<1x1x16x128xf32> to vector<16x128xf32>
    %431 = arith.addf %428, %430 : vector<16x128xf32>
    %c0_529 = arith.constant 0 : index
    %c14_530 = arith.constant 14 : index
    %c0_531 = arith.constant 0 : index
    %c0_532 = arith.constant 0 : index
    %432 = vector.load %arg6[%c0_529, %c14_530, %c0_531, %c0_532] : memref<1x16x16x128xf32, #tpu.memory_space<vmem>>, vector<1x1x16x128xf32>
    %433 = vector.shape_cast %432 : vector<1x1x16x128xf32> to vector<16x128xf32>
    %434 = vector.shape_cast %431 : vector<16x128xf32> to vector<1x1x16x128xf32>
    tpu.vector_store %arg6[%c0_529, %c14_530, %c0_531, %c0_532], %434 {strides = array<i32>} : memref<1x16x16x128xf32, #tpu.memory_space<vmem>>, vector<1x1x16x128xf32>,
    %c270_533 = arith.constant 270 : index
    %c0_534 = arith.constant 0 : index
    %435 = vector.load %arg8[%c270_533, %c0_534] : memref<288x128xf32, #tpu.memory_space<vmem>>, vector<16x128xf32>
    %c0_535 = arith.constant 0 : index
    %c15_536 = arith.constant 15 : index
    %c0_537 = arith.constant 0 : index
    %c0_538 = arith.constant 0 : index
    %436 = vector.load %arg1[%c0_535, %c15_536, %c0_537, %c0_538] : memref<1x16x16x128xf32, #tpu.memory_space<vmem>>, vector<1x1x16x128xf32>
    %437 = vector.shape_cast %436 : vector<1x1x16x128xf32> to vector<16x128xf32>
    %438 = arith.addf %435, %437 : vector<16x128xf32>
    %c0_539 = arith.constant 0 : index
    %c15_540 = arith.constant 15 : index
    %c0_541 = arith.constant 0 : index
    %c0_542 = arith.constant 0 : index
    %439 = vector.load %arg6[%c0_539, %c15_540, %c0_541, %c0_542] : memref<1x16x16x128xf32, #tpu.memory_space<vmem>>, vector<1x1x16x128xf32>
    %440 = vector.shape_cast %439 : vector<1x1x16x128xf32> to vector<16x128xf32>
    %441 = vector.shape_cast %438 : vector<16x128xf32> to vector<1x1x16x128xf32>
    tpu.vector_store %arg6[%c0_539, %c15_540, %c0_541, %c0_542], %441 {strides = array<i32>} : memref<1x16x16x128xf32, #tpu.memory_space<vmem>>, vector<1x1x16x128xf32>,
    return
  }
  func.func @transform_0(%arg0: i32) -> (i32, i32, i32, i32) {
    %c0_i32 = arith.constant 0 : i32
    %c0_i32_0 = arith.constant 0 : i32
    %c0_i32_1 = arith.constant 0 : i32
    %c0_i32_2 = arith.constant 0 : i32
    return %arg0, %c0_i32, %c0_i32_0, %c0_i32_1 : i32, i32, i32, i32
  }
  func.func @transform_1(%arg0: i32) -> (i32, i32, i32, i32) {
    %c0_i32 = arith.constant 0 : i32
    %c0_i32_0 = arith.constant 0 : i32
    %c0_i32_1 = arith.constant 0 : i32
    %c0_i32_2 = arith.constant 0 : i32
    %c0_i32_3 = arith.constant 0 : i32
    return %c0_i32, %c0_i32_0, %c0_i32_1, %c0_i32_2 : i32, i32, i32, i32
  }
  func.func @transform_2(%arg0: i32) -> (i32, i32) {
    %c0_i32 = arith.constant 0 : i32
    %c0_i32_0 = arith.constant 0 : i32
    %c0_i32_1 = arith.constant 0 : i32
    return %c0_i32, %c0_i32_0 : i32, i32
  }
  func.func @transform_3(%arg0: i32) -> (i32, i32, i32, i32) {
    %c0_i32 = arith.constant 0 : i32
    %c0_i32_0 = arith.constant 0 : i32
    %c0_i32_1 = arith.constant 0 : i32
    %c0_i32_2 = arith.constant 0 : i32
    %c0_i32_3 = arith.constant 0 : i32
    return %c0_i32, %c0_i32_0, %c0_i32_1, %c0_i32_2 : i32, i32, i32, i32
  }
  func.func @transform_4(%arg0: i32) -> (i32, i32) {
    %c0_i32 = arith.constant 0 : i32
    %c0_i32_0 = arith.constant 0 : i32
    %c0_i32_1 = arith.constant 0 : i32
    return %c0_i32, %c0_i32_0 : i32, i32
  }
  func.func @transform_5(%arg0: i32) -> (i32, i32, i32, i32) {
    %c0_i32 = arith.constant 0 : i32
    %c0_i32_0 = arith.constant 0 : i32
    %c0_i32_1 = arith.constant 0 : i32
    %c0_i32_2 = arith.constant 0 : i32
    return %arg0, %c0_i32, %c0_i32_0, %c0_i32_1 : i32, i32, i32, i32
  }
}

</mosaic_0001>

<bundles_post_ra>
// kernel: tpu_custom_call.1
= control target key start
LH: loop header
LB: loop body
LE: loop exit
PB: predicated region body
PF: predicated region fallthrough
CT: control target
= control target key end

     0   :  { %10 = vsyncpa [#allocation5], 0  ;;  %s11931_s0 = inlined_call_operand.hbm [shape: f32[2,16,16,128], index: 0, kind: input, shape index: {}]   ;;  %s11932_s1 = inlined_call_operand.hbm [shape: bf16[3,3,128,128], index: 1, kind: input, shape index: {}]   ;;  %s11933_s2 = inlined_call_operand.vmem [shape: f32[1,128], index: 2, kind: input, shape index: {}]   ;;  %s11934_s3 = inlined_call_operand.hbm [shape: bf16[3,3,128,128], index: 3, kind: input, shape index: {}]   ;;  %s11935_s4 = inlined_call_operand.vmem [shape: f32[1,128], index: 4, kind: input, shape index: {}]   ;;  %s11936_s5 = inlined_call_operand.hbm [shape: f32[2,16,16,128], index: 5, kind: output, shape index: {}]  }
   0x1   :  { %12 = vsyncpa [#allocation5 + $0x1], 0 }
   0x2   :  { %13 = vsyncpa [#allocation8], 0 }
   0x3   :  { %14 = vsyncpa [#allocation6], 0 }
   0x4   :  { %16 = vsyncpa [#allocation6 + $0x1], 0  ;;  %s10181_s18 = smov 0   ;;  %s10183_s19 = smov 0  }
   0x5   :  { %s10185_s20 = smov 0   ;;  %s10187_s21 = smov 0  }
   0x6 LB: > { %s10202_s22 = sadd.s32 4294967295, %s10137_s21   ;;  %s8106_s23 = sadd.s32 4294967294, %s10137_s21   ;;  %s10137_s21 = sphi %s10187_s21, %s12046_s21   ;;  %s10133_s20 = sphi %s10185_s20, %s12045_s20   ;;  %s10129_s19 = sphi %s10183_s19, %s12044_s19   ;;  %s10125_s18 = sphi %s10181_s18, %s12043_s18  }
   0x7   : > { %p42_p0 = scmp.ne.s32.totalorder %s10129_s19, %s10125_s18  ;;  %p11937_p1 = scmp.eq.s32.totalorder %s10202_s22, 0 }
   0x8   : > { %p156_p3 = scmp.eq.s32.totalorder %s8106_s23, 1  ;;  %p8107_p5 = scmp.ge.s32.totalorder %s10137_s21, 1 }
   0x9   : > { %p10211_p4 = por %p11937_p1, %p42_p0  ;;  %p163_p7 = scmp.lt.s32.totalorder %s10137_s21, 3 }
   0xa   : > { %p10216_p6 = por %p156_p3, %p42_p0  ;;  %s10139_s27 = smov [#allocation7]  }
   0xb   : > { %s11943_s24 = scalar_select %p10211_p4, 1, 0 }
   0xc   : > { %s11944_s25 = scalar_select %p10216_p6, 1, 0 }
   0xd   : > { %p10221_p8 = pnand %p8107_p5, %p163_p7  ;;  %s175_s28 = sshll.u32 %s10139_s27, 4  ;;  %s176_s28 = int_to_ptr.vmem [resolvable:$true] %s175_s28 }
   0xe   : > { %s10140_s30 = smov [#allocation9]   ;;  %s10000_s7 = scalar_lea.vmem %s176_s28, 9216 }
   0xf   : > { %s11945_s26 = scalar_select %p10221_p8, 1, 0 }
  0x10   : > { %p9778_p9 = pneg %p10221_p8  ;;  %s191_s6 = sshll.u32 %s10140_s30, 4  ;;  %s192_s6 = int_to_ptr.vmem [resolvable:$true] %s191_s6 }
  0x11   : > { %p10001_p13 = scmp.ne.s32.totalorder %s176_s28, %s10000_s7  ;;  %p10008_p5 = scmp.lt.s32.totalorder %s176_s28, %s176_s28 }
  0x12   : > { %p10230_p11 = pnand %p9778_p9, %p11937_p1  ;;  %p10009_p7 = scmp.lt.s32.totalorder %s10000_s7, %s10000_s7 }
  0x14   : > { %p9991_p12 = pneg %p10230_p11  ;;  %p10010_p10 = por %p10009_p7, %p10008_p5 }
  0x16   : > { %p10003_p0 = pnand %p10001_p13, %p9991_p12 }
  0x18   : > { %p10004_p3 = pneg %p10003_p0 }
  0x1a   : > { %p10011_p9 = pnand %p10010_p10, %p10004_p3 }
  0x1c   : > { %10014 = shalt.err (!%p10011_p9)
}
  0x1d   : > { %s10141_s8 = smov 64   ;;  %s10142_s9 = smov 4  }
  0x1e   : > { %9781 = dma.hbm_to_vmem [thread:$0]  (!%p10230_p11), %s11932_s1, 9216, %s176_s28, [#allocation8], %s10141_s8, %s10141_s8, %s10142_s9  }
  0x1f   : > { %s10026_s12 = scalar_lea.vmem %s192_s6, 9216  ;;  %p10034_p2 = scmp.lt.s32.totalorder %s192_s6, %s192_s6 }
  0x20   : > { %p10027_p1 = scmp.ne.s32.totalorder %s192_s6, %s10026_s12  ;;  %p10035_p6 = scmp.lt.s32.totalorder %s10026_s12, %s10026_s12 }
  0x22   : > { %p10029_p13 = pnand %p10027_p1, %p9991_p12  ;;  %p10036_p5 = por %p10035_p6, %p10034_p2 }
  0x24   : > { %p10030_p0 = pneg %p10029_p13 }
  0x26   : > { %p10037_p10 = pnand %p10036_p5, %p10030_p0 }
  0x28   : > { %10040 = shalt.err (!%p10037_p10)
}
  0x29   : > { %9784 = dma.hbm_to_vmem [thread:$0]  (!%p10230_p11), %s11934_s3, 9216, %s192_s6, [#allocation8], %s10141_s8, %s10141_s8, %s10142_s9  }
  0x2a   : > { %s10253_s15 = sadd.s32 1, %s10137_s21   ;;  %s29_s16 = sadd.s32 1, %s10133_s20 }
  0x2b   : > { %s26_s17 = ssub.s32 %s10137_s21, %s10253_s15  ;;  %p36_p1 = scmp.ne.s32.totalorder %s10133_s20, %s10129_s19 }
  0x2c   : > { %p27_p2 = scmp.eq.s32.totalorder %s26_s17, 0  ;;  %p37_p6 = scmp.eq.s32.totalorder %s10137_s21, 0 }
  0x2d   : > { %p11947_p12 = scmp.eq.s32.totalorder %s10202_s22, 1  ;;  %p9795_p7 = scmp.lt.s32.totalorder %s10137_s21, 2 }
  0x2e   : > { %s10269_s27 = scalar_select %p27_p2, %s10133_s20, %s29_s16  }
  0x2f   : > { %p10263_p3 = por %p11947_p12, %p36_p1  ;;  %p38_p9 = por %p37_p6, %p36_p1 }
  0x30   : > { %s208_s28 = sand.u32 1, %s10133_s20   ;;  %s8360_s30 = sshll.u32 %s10137_s21, 12 }
  0x31   : > { %s11948_s23 = scalar_select %p10263_p3, 1, 0 }
  0x32   : > { %s8111_s29 = sshll.u32 %s208_s28, 8  ;;  %s10276_s8 = scalar_lea.hbm %s11931_s0, %s8360_s30 }
  0x33   : > { %s212_s9 = scalar_lea.vmem [#allocation4], %s8111_s29  ;;  %p10280_p11 = pnand %p9795_p7, %p38_p9 }
  0x34   : > { %s219_s10 = sshll.u32 %s212_s9, 4  ;;  %s10284_s12 = scalar_lea.sflag [#allocation5], %s208_s28  ;;  %s10278_s10 = int_to_ptr.vmem [resolvable:$true] %s219_s10 }
  0x35   : > { %s10041_s13 = scalar_lea.hbm %s10276_s8, 4096  ;;  %p10043_p0 = pneg %p10280_p11 }
  0x36   : > { %p10042_p13 = scmp.ne.s32.totalorder %s10276_s8, %s10041_s13  ;;  %s10046_s17 = scalar_lea.hbm %s11931_s0, 8192 }
  0x37   : > { %p10047_p1 = scmp.lt.s32.totalorder %s10276_s8, %s11931_s0  ;;  %p10048_p2 = scmp.lt.s32.totalorder %s10046_s17, %s10041_s13 }
  0x38   : > { %p10044_p5 = pnand %p10043_p0, %p10042_p13 }
  0x39   : > { %p10049_p6 = por %p10048_p2, %p10047_p1 }
  0x3a   : > { %p10045_p10 = pneg %p10044_p5 }
  0x3c   : > { %p10050_p12 = pnand %p10049_p6, %p10045_p10 }
  0x3e   : > { %10053 = shalt.err (!%p10050_p12)
}
  0x3f   : > { %s10054_s28 = scalar_lea.vmem %s10278_s10, 4096  ;;  %s10143_s6 = smov [#allocation4]  }
  0x40   : > { %p10055_p7 = scmp.ne.s32.totalorder %s10278_s10, %s10054_s28  ;;  %s10059_s7 = sshll.u32 %s10143_s6, 4  ;;  %s10060_s7 = int_to_ptr.vmem [resolvable:$false] %s10059_s7 }
  0x41   : > { %s10061_s9 = scalar_lea.vmem %s10060_s7, 8192  ;;  %p10062_p5 = scmp.lt.s32.totalorder %s10278_s10, %s10060_s7 }
  0x42   : > { %p10057_p9 = pnand %p10055_p7, %p10043_p0  ;;  %p10063_p3 = scmp.lt.s32.totalorder %s10061_s9, %s10054_s28 }
  0x44   : > { %p10058_p13 = pneg %p10057_p9  ;;  %p10064_p4 = por %p10063_p3, %p10062_p5 }
  0x46   : > { %p10065_p8 = pnand %p10064_p4, %p10058_p13 }
  0x48   : > { %10068 = shalt.err (!%p10065_p8)
}
  0x49   : > { %s10144_s13 = smov 128   ;;  %s10145_s14 = smov 8  }
  0x4a   : > { %9788 = dma.hbm_to_vmem [thread:$0]  (!%p10280_p11), %s10276_s8, 4096, %s10278_s10, %s10284_s12, %s10144_s13, %s10144_s13, %s10145_s14  }
  0x4b   : > { %p11950_p0 = scmp.ne.s32.totalorder %s11945_s26, 0 }
  0x4d   : > { %231 = sbr.rel (%p11950_p0) target bundleno = 1210 (0x4ba), region = 40 }
  0x52   : > { %s10308_s16 = sand.u32 1, %s10129_s19   ;;  %p11951_p4 = scmp.ne.s32.totalorder %s11943_s24, 0 }
  0x53   : > { %s8115_s17 = sshll.u32 %s10308_s16, 8  ;;  %s234_s29 = scalar_lea.sflag [#allocation5], %s10308_s16 }
  0x54   : > { %s10314_s30 = scalar_lea.vmem [#allocation4], %s8115_s17 }
  0x55   : > { %10112 = dma.done.wait (%p11951_p4), %s234_s29, 4096  }
  0x56   : > { %10114 = vsyncadd (%p11951_p4), %s234_s29, 4294963200  ;;  %p11952_p8 = scmp.eq.s32.totalorder %s10202_s22, 0 }
  0x58   : > { %10116 = dma.done.wait (%p11952_p8), [#allocation8], 18432   ;;  %p11953_p3 = pmov %p11952_p8 }
  0x59   : > { %v10146_v0 = vmov 0.0   ;;  %v10147_v1 = vmov 0.0|0.0   ;;  %v9840_v2 = vld [vmem:[#allocation7 + $0x38] sm:$0xff]   ;;  %v9841_v3 = vld [vmem:[#allocation7 + $0x30] sm:$0xff]   ;;  %v9842_v5 = vld [vmem:[#allocation7 + $0x28] sm:$0xff]   ;;  %s11747_s28 = scalar_lea.vmem [#allocation10], %s8115_s17 }
  0x5a   : > { %10118 = vsyncadd (%p11953_p3), [#allocation8], 4294948864  ;;  %273 = vst [vmem:[#allocation2] sm:$0xff] %v10146_v0  ;;  %8846 = vmatprep.mubr.bf16.mxu0 %v10147_v1  ;;  %8830 = vmatprep.subr.bf16.mxu0 %v9840_v2  ;;  %v9843_v4 = vld [vmem:[#allocation7 + $0x78] sm:$0xff]   ;;  %v9845_v6 = vld [vmem:[#allocation7 + $0x70] sm:$0xff]   ;;  %s8361_s6 = sshll.u32 %s10202_s22, 12 }
  0x5b   : > { %274 = vst [vmem:[#allocation2 + $0x8] sm:$0xff] %v10146_v0  ;;  %275 = vst [vmem:[#allocation2 + $0x10] sm:$0x7] %v10146_v0  ;;  %8831 = vmatpush3.bf16.msra.mxu0 %v9840_v2  ;;  %8882 = vmatprep.subr.bf16.mxu1 %v9843_v4  ;;  %v9847_v7 = vld [vmem:[#allocation7 + $0x68] sm:$0xff]   ;;  %v9844_v8 = vld [vmem:[#allocation7 + $0x20] sm:$0xff]   ;;  %s8014_s7 = sshll.u32 %s11747_s28, 4  ;;  %s11883_s14 = scalar_lea.hbm %s11936_s5, %s8361_s6  ;;  %s11885_s7 = int_to_ptr.vmem [resolvable:$true] %s8014_s7 }
  0x5c   : > { %276 = vst [vmem:[#allocation2 + $0x23] sm:$0x3] %v10146_v0  ;;  %277 = vst [vmem:[#allocation2 + $0x35] sm:$0x3] %v10146_v0  ;;  %8832 = vmatprep.subr.bf16.mxu0 %v9841_v3  ;;  %8883 = vmatpush3.bf16.msra.mxu1 %v9843_v4  ;;  %v9849_v9 = vld [vmem:[#allocation7 + $0x60] sm:$0xff]   ;;  %v9846_v10 = vld [vmem:[#allocation7 + $0x18] sm:$0xff]  }
  0x5d   : > { %278 = vst [vmem:[#allocation2 + $0x47] sm:$0x3] %v10146_v0  ;;  %279 = vst [vmem:[#allocation2 + $0x59] sm:$0x3] %v10146_v0  ;;  %8884 = vmatprep.subr.bf16.mxu1 %v9845_v6  ;;  %v294_v11 = vld [vmem:[%s10314_s30] sm:$0xff]  ;;  %v295_v12 = vld [vmem:[%s10314_s30 + $0x8] sm:$0xff] }
  0x5e   : > { %280 = vst [vmem:[#allocation2 + $0x6b] sm:$0x3] %v10146_v0  ;;  %281 = vst [vmem:[#allocation2 + $0x7d] sm:$0x3] %v10146_v0  ;;  %v9848_v13 = vld [vmem:[#allocation7 + $0x10] sm:$0xff]   ;;  %v9851_v14 = vld [vmem:[#allocation7 + $0x58] sm:$0xff]  }
  0x5f   : > { %282 = vst [vmem:[#allocation2 + $0x8f] sm:$0x3] %v10146_v0  ;;  %283 = vst [vmem:[#allocation2 + $0xa1] sm:$0x3] %v10146_v0  ;;  %8833 = vmatpush3.bf16.msra.mxu0 %v9841_v3  ;;  %v296_v15 = vmax.f32 %v294_v11, 0.0  ;;  %v297_v16 = vmax.f32 %v295_v12, 0.0 }
  0x60   : > { %284 = vst [vmem:[#allocation2 + $0xb3] sm:$0x3] %v10146_v0  ;;  %285 = vst [vmem:[#allocation2 + $0xc5] sm:$0x3] %v10146_v0  ;;  %8834 = vmatprep.subr.bf16.mxu0 %v9842_v5  ;;  %8885 = vmatpush3.bf16.msra.mxu1 %v9845_v6  ;;  %v8119_v17 = vld [vmem:[%s10314_s30 + $0x10] sm:$0xff]  ;;  %v9850_v18 = vld [vmem:[#allocation7 + $0x8] sm:$0xff]  }
  0x61   : > { %286 = vst [vmem:[#allocation2 + $0xd7] sm:$0x3] %v10146_v0  ;;  %287 = vst [vmem:[#allocation2 + $0xe9] sm:$0x3] %v10146_v0  ;;  %8886 = vmatprep.subr.bf16.mxu1 %v9847_v7  ;;  %v8120_v19 = vld [vmem:[%s10314_s30 + $0x18] sm:$0xff]  ;;  %v303_v20 = vmax.f32 %v8119_v17, 0.0 }
  0x62   : > { %288 = vst [vmem:[#allocation2 + $0xfb] sm:$0x3] %v10146_v0  ;;  %289 = vst [vmem:[#allocation2 + $0x10d] sm:$0x3] %v10146_v0  ;;  %v8121_v21 = vld [vmem:[%s10314_s30 + $0x20] sm:$0xff]  ;;  %v8122_v22 = vld [vmem:[%s10314_s30 + $0x28] sm:$0xff] }
  0x63   : > { %290 = vst [vmem:[#allocation2 + $0x11f] sm:$0x3] %v10146_v0  ;;  %291 = vst [vmem:[#allocation2 + $0x131] sm:$0xff] %v10146_v0  ;;  %8835 = vmatpush3.bf16.msra.mxu0 %v9842_v5  ;;  %v9853_v23 = vld [vmem:[#allocation7 + $0x50] sm:$0xff]   ;;  %v304_v24 = vmax.f32 %v8120_v19, 0.0  ;;  %v310_v25 = vmax.f32 %v8121_v21, 0.0 }
  0x64   : > { %292 = vst [vmem:[#allocation2 + $0x139] sm:$0xff] %v10146_v0  ;;  %293 = vst [vmem:[#allocation2 + $0x141] sm:$0x7f] %v10146_v0  ;;  %8836 = vmatprep.subr.bf16.mxu0 %v9844_v8  ;;  %8887 = vmatpush3.bf16.msra.mxu1 %v9847_v7  ;;  %v311_v26 = vmax.f32 %v8122_v22, 0.0  ;;  %v851_v27 = vld [vmem:[#allocation2 + $0x1] sm:$0xff]  ;;  %v852_v28 = vld [vmem:[#allocation2 + $0x9] sm:$0xff] }
  0x65   : > { %8888 = vmatprep.subr.bf16.mxu1 %v9849_v9  ;;  %298 = vst [vmem:[#allocation2 + $0x13] sm:$0xff] %v296_v15  ;;  %299 = vst [vmem:[#allocation2 + $0x1b] sm:$0xff] %v297_v16  ;;  %v887_v29 = vpack.c.bf16 %v852_v28, %v851_v27  ;;  %v10331_v30 = vld [vmem:[%s10314_s30 + $0x30] sm:$0xff]  ;;  %v10335_v32 = vld [vmem:[%s10314_s30 + $0x38] sm:$0xff]  ;;  %s8001_s22 = scalar_lea.sflag [#allocation6], %s10308_s16  ;;  %s10069_s17 = scalar_lea.vmem %s11885_s7, 4096 }
  0x66   : > { %305 = vst [vmem:[#allocation2 + $0x25] sm:$0xff] %v303_v20  ;;  %306 = vst [vmem:[#allocation2 + $0x2d] sm:$0xff] %v304_v24  ;;  %v317_v31 = vmax.f32 %v10331_v30, 0.0  ;;  %v8125_v33 = vld [vmem:[%s10314_s30 + $0x40] sm:$0xff]  ;;  %v9855_v34 = vld [vmem:[#allocation7 + $0x48] sm:$0xff]   ;;  %v318_v35 = vmax.f32 %v10335_v32, 0.0  ;;  %p10070_p11 = scmp.ne.s32.totalorder %s11885_s7, %s10069_s17 }
  0x67   : > { %8837 = vmatpush3.bf16.msra.mxu0 %v9844_v8  ;;  %312 = vst [vmem:[#allocation2 + $0x37] sm:$0xff] %v310_v25  ;;  %313 = vst [vmem:[#allocation2 + $0x3f] sm:$0xff] %v311_v26  ;;  %8898 = vmatprep.mubr.bf16.mxu1 %v887_v29  ;;  %v324_v36 = vmax.f32 %v8125_v33, 0.0  ;;  %v8126_v37 = vld [vmem:[%s10314_s30 + $0x48] sm:$0xff]  ;;  %v8127_v39 = vld [vmem:[%s10314_s30 + $0x50] sm:$0xff]  ;;  %p12040_p10 = scmp.ne.s32.totalorder %s11948_s23, 0 }
  0x68   : > { %8838 = vmatprep.subr.bf16.mxu0 %v9846_v10  ;;  %8889 = vmatpush3.bf16.msra.mxu1 %v9849_v9  ;;  %319 = vst [vmem:[#allocation2 + $0x49] sm:$0xff] %v317_v31  ;;  %v325_v38 = vmax.f32 %v8126_v37, 0.0  ;;  %v8128_v40 = vld [vmem:[%s10314_s30 + $0x58] sm:$0xff]  ;;  %v8129_v41 = vld [vmem:[%s10314_s30 + $0x60] sm:$0xff]  ;;  %320 = vst [vmem:[#allocation2 + $0x51] sm:$0xff] %v318_v35  ;;  %v331_v43 = vmax.f32 %v8127_v39, 0.0 }
  0x69   : > { %8890 = vmatprep.subr.bf16.mxu1 %v9851_v14  ;;  %v9852_v42 = vld [vmem:[#allocation7] sm:$0xff]   ;;  %326 = vst [vmem:[#allocation2 + $0x5b] sm:$0xff] %v324_v36  ;;  %v332_v44 = vmax.f32 %v8128_v40, 0.0  ;;  %v338_v45 = vmax.f32 %v8129_v41, 0.0  ;;  %v8130_v47 = vld [vmem:[%s10314_s30 + $0x68] sm:$0xff]  ;;  %v10349_v48 = vld [vmem:[%s10314_s30 + $0x70] sm:$0xff]  ;;  %p10071_p1 = pnand %p10070_p11, %p12040_p10 }
  0x6a   : > { %327 = vst [vmem:[#allocation2 + $0x63] sm:$0xff] %v325_v38  ;;  %v9856_v46 = vld [vmem:[#allocation7 + $0x40] sm:$0xff]   ;;  %333 = vst [vmem:[#allocation2 + $0x6d] sm:$0xff] %v331_v43  ;;  %v339_v51 = vmax.f32 %v8130_v47, 0.0  ;;  %v10352_v52 = vld [vmem:[%s10314_s30 + $0x78] sm:$0xff]  ;;  %v345_v53 = vmax.f32 %v10349_v48, 0.0 }
  0x6b   : > { %8839 = vmatpush3.bf16.msra.mxu0 %v9846_v10  ;;  %334 = vst [vmem:[#allocation2 + $0x75] sm:$0xff] %v332_v44  ;;  %340 = vst [vmem:[#allocation2 + $0x7f] sm:$0xff] %v338_v45  ;;  %v9854_v54 = vld [vmem:[#allocation7 + $0xb8] sm:$0xff]   ;;  %v346_v57 = vmax.f32 %v10352_v52, 0.0  ;;  %v9857_v0 = vld [vmem:[#allocation7 + $0xb0] sm:$0xff]   ;;  %p10072_p2 = pneg %p10071_p1  ;;  %s10148_s29 = smov [#allocation10]  }
  0x6c   : > { %8840 = vmatprep.subr.bf16.mxu0 %v9848_v13  ;;  %8891 = vmatpush3.bf16.msra.mxu1 %v9851_v14  ;;  %v450_v49 = vld [vmem:[#allocation2 + $0x10] sm:$0xff]  ;;  %v451_v50 = vld [vmem:[#allocation2 + $0x18] sm:$0xff]  ;;  %341 = vst [vmem:[#allocation2 + $0x87] sm:$0xff] %v339_v51  ;;  %347 = vst [vmem:[#allocation2 + $0x91] sm:$0xff] %v345_v53 }
  0x6d   : > { %8892 = vmatprep.subr.bf16.mxu1 %v9853_v23  ;;  %v452_v55 = vld [vmem:[#allocation2 + $0x20] sm:$0xff]  ;;  %v453_v56 = vld [vmem:[#allocation2 + $0x28] sm:$0xff]  ;;  %v485_v58 = vpack.c.bf16 %v451_v50, %v450_v49  ;;  %v853_v59 = vld [vmem:[#allocation2 + $0x11] sm:$0xff]  ;;  %348 = vst [vmem:[#allocation2 + $0x99] sm:$0xff] %v346_v57 }
  0x6e   : > { %v854_v60 = vld [vmem:[#allocation2 + $0x19] sm:$0xff]  ;;  %v486_v61 = vpack.c.bf16 %v453_v56, %v452_v55  ;;  %v855_v62 = vld [vmem:[#allocation2 + $0x21] sm:$0xff]  ;;  %v856_v63 = vld [vmem:[#allocation2 + $0x29] sm:$0xff] }
  0x6f   : > { %8841 = vmatpush3.bf16.msra.mxu0 %v9848_v13  ;;  %v888_v1 = vpack.c.bf16 %v854_v60, %v853_v59  ;;  %v454_v2 = vld [vmem:[#allocation2 + $0x30] sm:$0xff]  ;;  %v889_v3 = vpack.c.bf16 %v856_v63, %v855_v62  ;;  %v455_v4 = vld [vmem:[#allocation2 + $0x38] sm:$0xff]  ;;  %v10361_v5 = vld [vmem:[%s10314_s30 + $0x80] sm:$0xff] }
  0x70   : > { %8842 = vmatprep.subr.bf16.mxu0 %v9850_v18  ;;  %8893 = vmatpush3.bf16.msra.mxu1 %v9853_v23  ;;  %v456_v6 = vld [vmem:[#allocation2 + $0x40] sm:$0xff]  ;;  %v457_v7 = vld [vmem:[#allocation2 + $0x48] sm:$0xff]  ;;  %v9858_v8 = vld [vmem:[#allocation7 + $0xa8] sm:$0xff]   ;;  %v352_v9 = vmax.f32 %v10361_v5, 0.0  ;;  %v487_v12 = vpack.c.bf16 %v455_v4, %v454_v2 }
  0x71   : > { %8894 = vmatprep.subr.bf16.mxu1 %v9855_v34  ;;  %v10365_v10 = vld [vmem:[%s10314_s30 + $0x88] sm:$0xff]  ;;  %v8135_v11 = vld [vmem:[%s10314_s30 + $0x90] sm:$0xff]  ;;  %v9859_v15 = vld [vmem:[#allocation7 + $0xa0] sm:$0xff]   ;;  %v488_v19 = vpack.c.bf16 %v457_v7, %v456_v6 }
  0x72   : > { %v857_v13 = vld [vmem:[#allocation2 + $0x31] sm:$0xff]  ;;  %v858_v14 = vld [vmem:[#allocation2 + $0x39] sm:$0xff]  ;;  %v353_v16 = vmax.f32 %v10365_v10, 0.0  ;;  %354 = vst [vmem:[#allocation2 + $0xa3] sm:$0xff] %v352_v9  ;;  %v859_v20 = vld [vmem:[#allocation2 + $0x41] sm:$0xff] }
  0x73   : > { %8843 = vmatpush3.bf16.msra.mxu0 %v9850_v18  ;;  %v8136_v17 = vld [vmem:[%s10314_s30 + $0x98] sm:$0xff]  ;;  %v359_v18 = vmax.f32 %v8135_v11, 0.0  ;;  %v8137_v22 = vld [vmem:[%s10314_s30 + $0xa0] sm:$0xff]  ;;  %v8138_v23 = vld [vmem:[%s10314_s30 + $0xa8] sm:$0xff]  ;;  %v890_v27 = vpack.c.bf16 %v858_v14, %v857_v13  ;;  %v891_v38 = vpack.c.bf16 %v317_v31, %v859_v20 }
  0x74   : > { %8844 = vmatprep.subr.bf16.mxu0 %v9852_v42  ;;  %8895 = vmatpush3.bf16.msra.mxu1 %v9855_v34  ;;  %v360_v21 = vmax.f32 %v8136_v17, 0.0  ;;  %355 = vst [vmem:[#allocation2 + $0xab] sm:$0xff] %v353_v16  ;;  %v10377_v24 = vld [vmem:[%s10314_s30 + $0xb0] sm:$0xff]  ;;  %v458_v25 = vld [vmem:[#allocation2 + $0x50] sm:$0xff]  ;;  %v366_v28 = vmax.f32 %v8137_v22, 0.0  ;;  %v367_v29 = vmax.f32 %v8138_v23, 0.0 }
  0x75   : > { %8896 = vmatprep.subr.bf16.mxu1 %v9856_v46  ;;  %361 = vst [vmem:[#allocation2 + $0xb5] sm:$0xff] %v359_v18  ;;  %v459_v26 = vld [vmem:[#allocation2 + $0x58] sm:$0xff]  ;;  %v373_v33 = vmax.f32 %v10377_v24, 0.0  ;;  %v9862_v34 = vld [vmem:[#allocation7 + $0xf8] sm:$0xff]   ;;  %v461_v37 = vld [vmem:[#allocation2 + $0x68] sm:$0xff] }
  0x76   : > { %362 = vst [vmem:[#allocation2 + $0xbd] sm:$0xff] %v360_v21  ;;  %v460_v36 = vld [vmem:[#allocation2 + $0x60] sm:$0xff]  ;;  %368 = vst [vmem:[#allocation2 + $0xc7] sm:$0xff] %v366_v28  ;;  %v9864_v40 = vld [vmem:[#allocation7 + $0xf0] sm:$0xff]   ;;  %v489_v45 = vpack.c.bf16 %v459_v26, %v458_v25 }
  0x77   : > { %8845 = vmatpush3.bf16.msra.mxu0 %v9852_v42  ;;  %v9860_v39 = vld [vmem:[#allocation7 + $0x98] sm:$0xff]   ;;  %369 = vst [vmem:[#allocation2 + $0xcf] sm:$0xff] %v367_v29  ;;  %375 = vst [vmem:[#allocation2 + $0xd9] sm:$0xff] %v373_v33  ;;  %v8141_v42 = vld [vmem:[%s10314_s30 + $0xc0] sm:$0xff]  ;;  %v490_v49 = vpack.c.bf16 %v461_v37, %v460_v36  ;;  %v896_v37 = vpack.c.bf16 %v346_v57, %v345_v53 }
  0x78   : > { %8934 = vmatprep.subr.bf16.mxu0 %v9854_v54  ;;  %8897 = vmatpush3.bf16.msra.mxu1 %v9856_v46  ;;  %v10385_v41 = vld [vmem:[%s10314_s30 + $0xb8] sm:$0xff]  ;;  %v380_v31 = vmax.f32 %v8141_v42, 0.0  ;;  %v8142_v44 = vld [vmem:[%s10314_s30 + $0xc8] sm:$0xff]  ;;  %v8143_v47 = vld [vmem:[%s10314_s30 + $0xd0] sm:$0xff] }
  0x79   : > { %8986 = vmatprep.subr.bf16.mxu1 %v9862_v34  ;;  %v862_v43 = vld [vmem:[#allocation2 + $0x59] sm:$0xff]  ;;  %v374_v30 = vmax.f32 %v10385_v41, 0.0  ;;  %v381_v46 = vmax.f32 %v8142_v44, 0.0  ;;  %v863_v50 = vld [vmem:[#allocation2 + $0x61] sm:$0xff]  ;;  %v864_v51 = vld [vmem:[#allocation2 + $0x69] sm:$0xff] }
  0x7a   : > { %8847 = vmatmul.mubr.bf16.vlgmr.msra.gmra.mxu0 %v485_v58  ;;  %382 = vst [vmem:[#allocation2 + $0xeb] sm:$0xff] %v380_v31  ;;  %v9861_v55 = vld [vmem:[#allocation7 + $0x90] sm:$0xff]   ;;  %v892_v56 = vpack.c.bf16 %v862_v43, %v318_v35  ;;  %v9865_v58 = vld [vmem:[#allocation7 + $0xe8] sm:$0xff]   ;;  %v893_v60 = vpack.c.bf16 %v864_v51, %v863_v50  ;;  %v464_v62 = vld [vmem:[#allocation2 + $0x80] sm:$0xff]  ;;  %v10409_v51 = vpack.c.bf16 %v353_v16, %v352_v9 }
  0x7b   : > { %8935 = vmatpush3.bf16.msra.mxu0 %v9854_v54  ;;  %8850 = vmatprep.mubr.bf16.mxu0 %v486_v61  ;;  %376 = vst [vmem:[#allocation2 + $0xe1] sm:$0xff] %v374_v30  ;;  %v387_v54 = vmax.f32 %v8143_v47, 0.0  ;;  %383 = vst [vmem:[#allocation2 + $0xf3] sm:$0xff] %v381_v46  ;;  %v462_v59 = vld [vmem:[#allocation2 + $0x70] sm:$0xff]  ;;  %v463_v61 = vld [vmem:[#allocation2 + $0x78] sm:$0xff] }
  0x7c   : > { %8936 = vmatprep.subr.bf16.mxu0 %v9857_v0  ;;  %8899 = vmatmul.mubr.bf16.vlgmr.msra.gmra.mxu1 %v888_v1  ;;  %v465_v63 = vld [vmem:[#allocation2 + $0x88] sm:$0xff]  ;;  %v8144_v2 = vld [vmem:[%s10314_s30 + $0xd8] sm:$0xff]  ;;  %v865_v4 = vld [vmem:[#allocation2 + $0x71] sm:$0xff] }
  0x7d   : > { %8902 = vmatprep.mubr.bf16.mxu1 %v889_v3  ;;  %8987 = vmatpush3.bf16.msra.mxu1 %v9862_v34  ;;  %389 = vst [vmem:[#allocation2 + $0xfd] sm:$0xff] %v387_v54  ;;  %v9866_v1 = vld [vmem:[#allocation7 + $0xe0] sm:$0xff]   ;;  %v388_v32 = vmax.f32 %v8144_v2, 0.0  ;;  %v491_v3 = vpack.c.bf16 %v463_v61, %v462_v59  ;;  %v866_v6 = vld [vmem:[#allocation2 + $0x79] sm:$0xff]  ;;  %v8146_v13 = vld [vmem:[%s10314_s30 + $0xe8] sm:$0xff] }
  0x7e   : > { %8988 = vmatprep.subr.bf16.mxu1 %v9864_v40  ;;  %v8145_v35 = vld [vmem:[%s10314_s30 + $0xe0] sm:$0xff]  ;;  %v894_v17 = vpack.c.bf16 %v866_v6, %v865_v4  ;;  %v9868_v18 = vld [vmem:[#allocation7 + $0xd8] sm:$0xff]   ;;  %v467_v21 = vld [vmem:[#allocation2 + $0x98] sm:$0xff] }
  0x7f   : > { %8937 = vmatpush3.bf16.msra.mxu0 %v9857_v0  ;;  %v9863_v0 = vld [vmem:[#allocation7 + $0x88] sm:$0xff]   ;;  %v394_v7 = vmax.f32 %v8145_v35, 0.0  ;;  %v867_v11 = vld [vmem:[#allocation2 + $0x81] sm:$0xff]  ;;  %390 = vst [vmem:[#allocation2 + $0x105] sm:$0xff] %v388_v32  ;;  %v9869_v23 = vld [vmem:[#allocation7 + $0xd0] sm:$0xff]  }
  0x80   : > { %8938 = vmatprep.subr.bf16.mxu0 %v9858_v8  ;;  %v9867_v14 = vld [vmem:[#allocation7 + $0x80] sm:$0xff]   ;;  %v468_v22 = vld [vmem:[#allocation2 + $0xa0] sm:$0xff]  ;;  %v9871_v36 = vld [vmem:[#allocation7 + $0xc8] sm:$0xff]  }
  0x81   : > { %8989 = vmatpush3.bf16.msra.mxu1 %v9864_v40  ;;  %396 = vst [vmem:[#allocation2 + $0x10f] sm:$0xff] %v394_v7  ;;  %v469_v25 = vld [vmem:[#allocation2 + $0xa8] sm:$0xff]  ;;  %v10398_v26 = vld [vmem:[#allocation7 + $0x138] sm:$0xff]   ;;  %v475_v50 = vld [vmem:[#allocation2 + $0xd8] sm:$0xff] }
  0x82   : > { %8851 = vmatmul.mubr.bf16.gmra.mxu0 %v487_v12  ;;  %8990 = vmatprep.subr.bf16.mxu1 %v9865_v58  ;;  %v868_v12 = vld [vmem:[#allocation2 + $0x89] sm:$0xff]  ;;  %v871_v28 = vld [vmem:[#allocation2 + $0xa1] sm:$0xff]  ;;  %v494_v29 = vpack.c.bf16 %v469_v25, %v468_v22  ;;  %v874_v46 = vld [vmem:[#allocation2 + $0xb9] sm:$0xff] }
  0x83   : > { %8854 = vmatprep.mubr.bf16.mxu0 %v488_v19  ;;  %8939 = vmatpush3.bf16.msra.mxu0 %v9858_v8  ;;  %v492_v8 = vpack.c.bf16 %v465_v63, %v464_v62  ;;  %v466_v19 = vld [vmem:[#allocation2 + $0x90] sm:$0xff]  ;;  %v895_v20 = vpack.c.bf16 %v868_v12, %v867_v11  ;;  %v9872_v42 = vld [vmem:[#allocation7 + $0xc0] sm:$0xff]   ;;  %v472_v43 = vld [vmem:[#allocation2 + $0xc0] sm:$0xff] }
  0x84   : > { %8940 = vmatprep.subr.bf16.mxu0 %v9859_v15  ;;  %8903 = vmatmul.mubr.bf16.gmra.mxu1 %v890_v27  ;;  %v493_v27 = vpack.c.bf16 %v467_v21, %v466_v19  ;;  %v872_v34 = vld [vmem:[#allocation2 + $0xa9] sm:$0xff]  ;;  %v875_v47 = vld [vmem:[#allocation2 + $0xc1] sm:$0xff]  ;;  %v479_v63 = vld [vmem:[#allocation2 + $0xf8] sm:$0xff] }
  0x85   : > { %8906 = vmatprep.mubr.bf16.mxu1 %v891_v38  ;;  %8991 = vmatpush3.bf16.msra.mxu1 %v9865_v58  ;;  %v470_v38 = vld [vmem:[#allocation2 + $0xb0] sm:$0xff]  ;;  %v897_v40 = vpack.c.bf16 %v872_v34, %v871_v28  ;;  %v473_v31 = vld [vmem:[#allocation2 + $0xc8] sm:$0xff]  ;;  %v476_v54 = vld [vmem:[#allocation2 + $0xe0] sm:$0xff] }
  0x86   : > { %8992 = vmatprep.subr.bf16.mxu1 %v9866_v1  ;;  %v496_v48 = vpack.c.bf16 %v473_v31, %v472_v43  ;;  %v876_v52 = vld [vmem:[#allocation2 + $0xc9] sm:$0xff]  ;;  %v877_v58 = vld [vmem:[#allocation2 + $0xd1] sm:$0xff]  ;;  %v9878_v61 = vld [vmem:[#allocation7 + $0x178] sm:$0xff]  }
  0x87   : > { %8941 = vmatpush3.bf16.msra.mxu0 %v9859_v15  ;;  %v395_v15 = vmax.f32 %v8146_v13, 0.0  ;;  %v899_v57 = vpack.c.bf16 %v876_v52, %v875_v47  ;;  %v880_v59 = vld [vmem:[#allocation2 + $0xe9] sm:$0xff]  ;;  %v900_v62 = vpack.c.bf16 %v373_v33, %v877_v58  ;;  %v480_v10 = vld [vmem:[#allocation2 + $0x100] sm:$0xff]  ;;  %v8147_v35 = vld [vmem:[%s10314_s30 + $0xf0] sm:$0xff] }
  0x88   : > { %8942 = vmatprep.subr.bf16.mxu0 %v9860_v39  ;;  %v478_v5 = vld [vmem:[#allocation2 + $0xf0] sm:$0xff]  ;;  %v901_v9 = vpack.c.bf16 %v880_v59, %v374_v30  ;;  %v481_v16 = vld [vmem:[#allocation2 + $0x108] sm:$0xff]  ;;  %v8148_v11 = vld [vmem:[%s10314_s30 + $0xf8] sm:$0xff] }
  0x89   : > { %8993 = vmatpush3.bf16.msra.mxu1 %v9866_v1  ;;  %397 = vst [vmem:[#allocation2 + $0x117] sm:$0xff] %v395_v15  ;;  %v882_v1 = vld [vmem:[#allocation2 + $0xf9] sm:$0xff]  ;;  %v499_v2 = vpack.c.bf16 %v479_v63, %v478_v5  ;;  %v883_v32 = vld [vmem:[#allocation2 + $0x101] sm:$0xff]  ;;  %v500_v24 = vpack.c.bf16 %v481_v16, %v480_v10  ;;  %v884_v33 = vld [vmem:[#allocation2 + $0x109] sm:$0xff]  ;;  %v402_v12 = vmax.f32 %v8148_v11, 0.0 }
  0x8a   : > { %8855 = vmatmul.mubr.bf16.gmra.mxu0 %v489_v45  ;;  %8994 = vmatprep.subr.bf16.mxu1 %v9868_v18  ;;  %v873_v45 = vld [vmem:[#allocation2 + $0xb1] sm:$0xff]  ;;  %v1255_v7 = vld [vmem:[#allocation2 + $0x2] sm:$0xff]  ;;  %v903_v30 = vpack.c.bf16 %v884_v33, %v883_v32  ;;  %v1258_v19 = vld [vmem:[#allocation2 + $0x1a] sm:$0xff] }
  0x8b   : > { %8858 = vmatprep.mubr.bf16.mxu0 %v490_v49  ;;  %8943 = vmatpush3.bf16.msra.mxu0 %v9860_v39  ;;  %v471_v39 = vld [vmem:[#allocation2 + $0xb8] sm:$0xff]  ;;  %v898_v53 = vpack.c.bf16 %v874_v46, %v873_v45  ;;  %v474_v49 = vld [vmem:[#allocation2 + $0xd0] sm:$0xff]  ;;  %404 = vst [vmem:[#allocation2 + $0x129] sm:$0xff] %v402_v12  ;;  %v1259_v22 = vld [vmem:[#allocation2 + $0x22] sm:$0xff] }
  0x8c   : > { %8944 = vmatprep.subr.bf16.mxu0 %v9861_v55  ;;  %8907 = vmatmul.mubr.bf16.gmra.mxu1 %v892_v56  ;;  %v495_v44 = vpack.c.bf16 %v471_v39, %v470_v38  ;;  %v497_v56 = vpack.c.bf16 %v475_v50, %v474_v49  ;;  %v1256_v41 = vld [vmem:[#allocation2 + $0xa] sm:$0xff]  ;;  %v1261_v25 = vld [vmem:[#allocation2 + $0x32] sm:$0xff]  ;;  %v1263_v38 = vld [vmem:[#allocation2 + $0x42] sm:$0xff] }
  0x8d   : > { %8910 = vmatprep.mubr.bf16.mxu1 %v893_v60  ;;  %8995 = vmatpush3.bf16.msra.mxu1 %v9868_v18  ;;  %v1257_v18 = vld [vmem:[#allocation2 + $0x12] sm:$0xff]  ;;  %v1264_v39 = vld [vmem:[#allocation2 + $0x4a] sm:$0xff]  ;;  %v9876_v46 = vld [vmem:[#allocation7 + $0x118] sm:$0xff]  }
  0x8e   : > { %8996 = vmatprep.subr.bf16.mxu1 %v9869_v23  ;;  %v1292_v21 = vpack.c.bf16 %v1258_v19, %v1257_v18  ;;  %v9873_v28 = vld [vmem:[#allocation7 + $0x130] sm:$0xff]   ;;  %v9875_v43 = vld [vmem:[#allocation7 + $0x120] sm:$0xff]   ;;  %v9881_v31 = vld [vmem:[#allocation7 + $0x168] sm:$0xff]  }
  0x8f   : > { %8945 = vmatpush3.bf16.msra.mxu0 %v9861_v55  ;;  %v477_v55 = vld [vmem:[#allocation2 + $0xe8] sm:$0xff]  ;;  %v1269_v52 = vld [vmem:[#allocation2 + $0x72] sm:$0xff]  ;;  %v9884_v49 = vld [vmem:[#allocation7 + $0x158] sm:$0xff]  }
  0x90   : > { %8946 = vmatprep.subr.bf16.mxu0 %v9863_v0  ;;  %v498_v60 = vpack.c.bf16 %v477_v55, %v476_v54  ;;  %v482_v6 = vld [vmem:[#allocation2 + $0x110] sm:$0xff]  ;;  %v886_v15 = vld [vmem:[#allocation2 + $0x119] sm:$0xff]  ;;  %v1271_v58 = vld [vmem:[#allocation2 + $0x82] sm:$0xff] }
  0x91   : > { %8997 = vmatpush3.bf16.msra.mxu1 %v9869_v23  ;;  %v1260_v23 = vld [vmem:[#allocation2 + $0x2a] sm:$0xff]  ;;  %v9885_v55 = vld [vmem:[#allocation7 + $0x150] sm:$0xff]   ;;  %v10418_v16 = vld [vmem:[#allocation7 + $0x1b8] sm:$0xff]  }
  0x92   : > { %8859 = vmatmul.mubr.bf16.gmra.mxu0 %v491_v3  ;;  %8998 = vmatprep.subr.bf16.mxu1 %v9871_v36  ;;  %v401_v3 = vmax.f32 %v8147_v35, 0.0  ;;  %v1268_v47 = vld [vmem:[#allocation2 + $0x6a] sm:$0xff]  ;;  %v1278_v32 = vld [vmem:[#allocation2 + $0xba] sm:$0xff]  ;;  %v1285_v12 = vld [vmem:[#allocation2 + $0xf2] sm:$0xff] }
  0x93   : > { %8862 = vmatprep.mubr.bf16.mxu0 %v492_v8  ;;  %8947 = vmatpush3.bf16.msra.mxu0 %v9863_v0  ;;  %v881_v0 = vld [vmem:[#allocation2 + $0xf1] sm:$0xff]  ;;  %v9888_v10 = vld [vmem:[#allocation7 + $0x140] sm:$0xff]  }
  0x94   : > { %8948 = vmatprep.subr.bf16.mxu0 %v9867_v14  ;;  %8911 = vmatmul.mubr.bf16.gmra.mxu1 %v894_v17  ;;  %v902_v4 = vpack.c.bf16 %v882_v1, %v881_v0  ;;  %403 = vst [vmem:[#allocation2 + $0x121] sm:$0xff] %v401_v3  ;;  %v483_v8 = vld [vmem:[#allocation2 + $0x118] sm:$0xff]  ;;  %v1291_v17 = vpack.c.bf16 %v1256_v41, %v1255_v7  ;;  %v1272_v59 = vld [vmem:[#allocation2 + $0x8a] sm:$0xff]  ;;  %v1275_v0 = vld [vmem:[#allocation2 + $0xa2] sm:$0xff] }
  0x95   : > { %8914 = vmatprep.mubr.bf16.mxu1 %v895_v20  ;;  %8999 = vmatpush3.bf16.msra.mxu1 %v9871_v36  ;;  %v501_v13 = vpack.c.bf16 %v483_v8, %v482_v6  ;;  %v9880_v36 = vld [vmem:[#allocation7 + $0x170] sm:$0xff]   ;;  %v9887_v5 = vld [vmem:[#allocation7 + $0x148] sm:$0xff]   ;;  %v1299_v63 = vpack.c.bf16 %v1272_v59, %v1271_v58  ;;  %v1279_v3 = vld [vmem:[#allocation2 + $0xc2] sm:$0xff] }
  0x96   : > { %9000 = vmatprep.subr.bf16.mxu1 %v9872_v42  ;;  %v1276_v1 = vld [vmem:[#allocation2 + $0xaa] sm:$0xff]  ;;  %v1281_v6 = vld [vmem:[#allocation2 + $0xd2] sm:$0xff]  ;;  %v1282_v7 = vld [vmem:[#allocation2 + $0xda] sm:$0xff] }
  0x97   : > { %8949 = vmatpush3.bf16.msra.mxu0 %v9867_v14  ;;  %v885_v14 = vld [vmem:[#allocation2 + $0x111] sm:$0xff]  ;;  %v1301_v33 = vpack.c.bf16 %v1276_v1, %v1275_v0  ;;  %v1283_v8 = vld [vmem:[#allocation2 + $0xe2] sm:$0xff] }
  0x98   : > { %9038 = vmatprep.subr.bf16.mxu0 %v10398_v26  ;;  %v904_v20 = vpack.c.bf16 %v886_v15, %v885_v14  ;;  %v1284_v11 = vld [vmem:[#allocation2 + $0xea] sm:$0xff]  ;;  %v1289_v19 = vld [vmem:[#allocation2 + $0x112] sm:$0xff]  ;;  %v2076_v1 = vld [vmem:[#allocation2 + $0x7b] sm:$0xff] }
  0x99   : > { %9001 = vmatpush3.bf16.msra.mxu1 %v9872_v42  ;;  %v1266_v42 = vld [vmem:[#allocation2 + $0x5a] sm:$0xff]  ;;  %v1305_v14 = vpack.c.bf16 %v1284_v11, %v1283_v8  ;;  %v1288_v18 = vld [vmem:[#allocation2 + $0x10a] sm:$0xff] }
  0x9a   : > { %8863 = vmatmul.mubr.bf16.gmra.mxu0 %v493_v27  ;;  %9090 = vmatprep.subr.bf16.mxu1 %v9878_v61  ;;  %v1262_v27 = vld [vmem:[#allocation2 + $0x3a] sm:$0xff]  ;;  %v2473_v58 = vld [vmem:[#allocation2 + $0x44] sm:$0xff]  ;;  %v2474_v59 = vld [vmem:[#allocation2 + $0x4c] sm:$0xff] }
  0x9b   : > { %8866 = vmatprep.mubr.bf16.mxu0 %v494_v29  ;;  %v1293_v29 = vpack.c.bf16 %v1260_v23, %v1259_v22  ;;  %v1294_v34 = vpack.c.bf16 %v1262_v27, %v1261_v25  ;;  %v2063_v23 = vld [vmem:[#allocation2 + $0x13] sm:$0xff]  ;;  %v2064_v25 = vld [vmem:[#allocation2 + $0x1b] sm:$0xff]  ;;  %v2077_v11 = vld [vmem:[#allocation2 + $0x83] sm:$0xff] }
  0x9c   : > { %8915 = vmatmul.mubr.bf16.gmra.mxu1 %v896_v37  ;;  %v9874_v37 = vld [vmem:[#allocation7 + $0x128] sm:$0xff]   ;;  %v1693_v27 = vld [vmem:[#allocation2 + $0x122] sm:$0xff] }
  0x9d   : > { %8918 = vmatprep.mubr.bf16.mxu1 %v897_v40  ;;  %v1265_v40 = vld [vmem:[#allocation2 + $0x52] sm:$0xff]  ;;  %v9900_v8 = vld [vmem:[#allocation7 + $0x1d8] sm:$0xff]  }
  0x9e   : > { %v1296_v45 = vpack.c.bf16 %v1266_v42, %v1265_v40  ;;  %v2067_v40 = vld [vmem:[#allocation2 + $0x33] sm:$0xff]  ;;  %v2068_v42 = vld [vmem:[#allocation2 + $0x3b] sm:$0xff] }
  0x9f   : > { %v2075_v0 = vld [vmem:[#allocation2 + $0x73] sm:$0xff] }
  0xa2   : > { %8867 = vmatmul.mubr.bf16.gmra.mxu0 %v495_v44  ;;  %v1295_v44 = vpack.c.bf16 %v1264_v39, %v1263_v38  ;;  %v2066_v38 = vld [vmem:[#allocation2 + $0x2b] sm:$0xff] }
  0xa3   : > { %8870 = vmatprep.mubr.bf16.mxu0 %v496_v48  ;;  %v1267_v48 = vld [vmem:[#allocation2 + $0x62] sm:$0xff] }
  0xa4   : > { %8919 = vmatmul.mubr.bf16.gmra.mxu1 %v898_v53  ;;  %v1270_v53 = vld [vmem:[#allocation2 + $0x7a] sm:$0xff]  ;;  %v1297_v50 = vpack.c.bf16 %v1268_v47, %v1267_v48  ;;  %v2101_v47 = vpack.c.bf16 %v2068_v42, %v2067_v40  ;;  %v2485_v42 = vld [vmem:[#allocation2 + $0xa4] sm:$0xff] }
  0xa5   : > { %8922 = vmatprep.mubr.bf16.mxu1 %v899_v57  ;;  %v9877_v57 = vld [vmem:[#allocation7 + $0x110] sm:$0xff]   ;;  %v1298_v54 = vpack.c.bf16 %v1270_v53, %v1269_v52  ;;  %v2069_v52 = vld [vmem:[#allocation2 + $0x43] sm:$0xff]  ;;  %v2070_v53 = vld [vmem:[#allocation2 + $0x4b] sm:$0xff] }
  0xa6   : > { %v9889_v48 = vld [vmem:[#allocation7 + $0x1b0] sm:$0xff]   ;;  %v10448_v40 = vld [vmem:[#allocation7 + $0x238] sm:$0xff]  }
  0xaa   : > { %8871 = vmatmul.mubr.bf16.gmra.mxu0 %v497_v56  ;;  %v9879_v56 = vld [vmem:[#allocation7 + $0x108] sm:$0xff]  }
  0xab   : > { %8874 = vmatprep.mubr.bf16.mxu0 %v498_v60  ;;  %v1273_v60 = vld [vmem:[#allocation2 + $0x92] sm:$0xff] }
  0xac   : > { %8923 = vmatmul.mubr.bf16.gmra.mxu1 %v900_v62  ;;  %v9883_v62 = vld [vmem:[#allocation7 + $0x100] sm:$0xff]  }
  0xad   : > { %8926 = vmatprep.mubr.bf16.mxu1 %v901_v9 }
  0xb2   : > { %8875 = vmatmul.mubr.bf16.gmra.mxu0 %v499_v2  ;;  %v1277_v2 = vld [vmem:[#allocation2 + $0xb2] sm:$0xff] }
  0xb3   : > { %8878 = vmatprep.mubr.bf16.mxu0 %v500_v24  ;;  %v10420_v24 = vld [vmem:[#allocation7 + $0x1f8] sm:$0xff]   ;;  %v1302_v35 = vpack.c.bf16 %v1278_v32, %v1277_v2 }
  0xb4   : > { %8927 = vmatmul.mubr.bf16.gmra.mxu1 %v902_v4  ;;  %v1280_v4 = vld [vmem:[#allocation2 + $0xca] sm:$0xff]  ;;  %v9892_v32 = vld [vmem:[#allocation7 + $0x198] sm:$0xff]  }
  0xb5   : > { %8930 = vmatprep.mubr.bf16.mxu1 %v903_v30  ;;  %v1303_v41 = vpack.c.bf16 %v1280_v4, %v1279_v3  ;;  %v1304_v30 = vpack.c.bf16 %v1282_v7, %v1281_v6  ;;  %v9984_v3 = vld [vmem:[#allocation2 + $0x63] sm:$0xff]  ;;  %v2105_v6 = vpack.c.bf16 %v2076_v1, %v2075_v0  ;;  %v2479_v7 = vld [vmem:[#allocation2 + $0x74] sm:$0xff]  ;;  %v2494_v0 = vld [vmem:[#allocation2 + $0xec] sm:$0xff] }
  0xba   : > { %8879 = vmatmul.mubr.bf16.gmra.mxu0 %v501_v13  ;;  %v1286_v13 = vld [vmem:[#allocation2 + $0xfa] sm:$0xff] }
  0xbb   : > { %8950 = vmatprep.mubr.bf16.mxu0 %v1291_v17  ;;  %v1306_v15 = vpack.c.bf16 %v1286_v13, %v1285_v12  ;;  %v1287_v17 = vld [vmem:[#allocation2 + $0x102] sm:$0xff]  ;;  %v2078_v12 = vld [vmem:[#allocation2 + $0x8b] sm:$0xff] }
  0xbc   : > { %8931 = vmatmul.mubr.bf16.gmra.mxu1 %v904_v20  ;;  %v1290_v20 = vld [vmem:[#allocation2 + $0x11a] sm:$0xff] }
  0xbd   : > { %9002 = vmatprep.mubr.bf16.mxu1 %v1292_v21  ;;  %v1308_v22 = vpack.c.bf16 %v1290_v20, %v1289_v19  ;;  %v9895_v19 = vld [vmem:[#allocation7 + $0x188] sm:$0xff]   ;;  %v2481_v20 = vld [vmem:[#allocation2 + $0x84] sm:$0xff] }
  0xc2   : > { %8951 = vmatmul.mubr.bf16.vlgmr.msra.gmra.mxu0 %v1292_v21  ;;  %v1307_v21 = vpack.c.bf16 %v1288_v18, %v1287_v17  ;;  %v2080_v17 = vld [vmem:[#allocation2 + $0x9b] sm:$0xff] }
  0xc3   : > { %9039 = vmatpush3.bf16.msra.mxu0 %v10398_v26  ;;  %8954 = vmatprep.mubr.bf16.mxu0 %v1293_v29  ;;  %v9882_v26 = vld [vmem:[#allocation7 + $0x160] sm:$0xff]  }
  0xc4   : > { %9040 = vmatprep.subr.bf16.mxu0 %v9873_v28  ;;  %9003 = vmatmul.mubr.bf16.vlgmr.msra.gmra.mxu1 %v1293_v29  ;;  %v2467_v29 = vld [vmem:[#allocation2 + $0x14] sm:$0xff] }
  0xc5   : > { %9006 = vmatprep.mubr.bf16.mxu1 %v1294_v34  ;;  %9091 = vmatpush3.bf16.msra.mxu1 %v9878_v61  ;;  %v1274_v61 = vld [vmem:[#allocation2 + $0x9a] sm:$0xff] }
  0xc6   : > { %9092 = vmatprep.subr.bf16.mxu1 %v9880_v36  ;;  %v1300_v9 = vpack.c.bf16 %v1274_v61, %v1273_v60  ;;  %v2475_v60 = vld [vmem:[#allocation2 + $0x54] sm:$0xff]  ;;  %v2476_v61 = vld [vmem:[#allocation2 + $0x5c] sm:$0xff] }
  0xc7   : > { %9041 = vmatpush3.bf16.msra.mxu0 %v9873_v28  ;;  %v1694_v28 = vld [vmem:[#allocation2 + $0x12a] sm:$0xff]  ;;  %v10434_v2 = vpack.c.bf16 %v2476_v61, %v2475_v60 }
  0xc8   : > { %9042 = vmatprep.subr.bf16.mxu0 %v9874_v37  ;;  %v1712_v39 = vpack.c.bf16 %v1694_v28, %v1693_v27  ;;  %v2484_v27 = vld [vmem:[#allocation2 + $0x9c] sm:$0xff]  ;;  %v9899_v28 = vld [vmem:[#allocation7 + $0x180] sm:$0xff]  }
  0xc9   : > { %9093 = vmatpush3.bf16.msra.mxu1 %v9880_v36  ;;  %v2468_v36 = vld [vmem:[#allocation2 + $0x1c] sm:$0xff] }
  0xca   : > { %8955 = vmatmul.mubr.bf16.gmra.mxu0 %v1294_v34  ;;  %9094 = vmatprep.subr.bf16.mxu1 %v9881_v31  ;;  %v2099_v34 = vpack.c.bf16 %v2064_v25, %v2063_v23  ;;  %v2483_v25 = vld [vmem:[#allocation2 + $0x94] sm:$0xff]  ;;  %v2089_v61 = vld [vmem:[#allocation2 + $0xe3] sm:$0xff] }
  0xcb   : > { %8958 = vmatprep.mubr.bf16.mxu0 %v1295_v44  ;;  %9043 = vmatpush3.bf16.msra.mxu0 %v9874_v37  ;;  %v2065_v37 = vld [vmem:[#allocation2 + $0x23] sm:$0xff] }
  0xcc   : > { %9044 = vmatprep.subr.bf16.mxu0 %v9875_v43  ;;  %9007 = vmatmul.mubr.bf16.gmra.mxu1 %v1295_v44  ;;  %v2470_v44 = vld [vmem:[#allocation2 + $0x2c] sm:$0xff] }
  0xcd   : > { %9010 = vmatprep.mubr.bf16.mxu1 %v1296_v45  ;;  %9095 = vmatpush3.bf16.msra.mxu1 %v9881_v31  ;;  %v2469_v31 = vld [vmem:[#allocation2 + $0x24] sm:$0xff] }
  0xce   : > { %9096 = vmatprep.subr.bf16.mxu1 %v9882_v26 }
  0xcf   : > { %9045 = vmatpush3.bf16.msra.mxu0 %v9875_v43  ;;  %v2503_v43 = vpack.c.bf16 %v2468_v36, %v2467_v29  ;;  %v9903_v29 = vld [vmem:[#allocation7 + $0x1c8] sm:$0xff]   ;;  %v10446_v36 = vpack.c.bf16 %v2484_v27, %v2483_v25 }
  0xd0   : > { %9046 = vmatprep.subr.bf16.mxu0 %v9876_v46  ;;  %v2499_v27 = vld [vmem:[#allocation2 + $0x114] sm:$0xff] }
  0xd1   : > { %9097 = vmatpush3.bf16.msra.mxu1 %v9882_v26  ;;  %v2472_v26 = vld [vmem:[#allocation2 + $0x3c] sm:$0xff] }
  0xd2   : > { %8959 = vmatmul.mubr.bf16.gmra.mxu0 %v1296_v45  ;;  %9098 = vmatprep.subr.bf16.mxu1 %v9884_v49  ;;  %v2471_v45 = vld [vmem:[#allocation2 + $0x34] sm:$0xff] }
  0xd3   : > { %8962 = vmatprep.mubr.bf16.mxu0 %v1297_v50  ;;  %9047 = vmatpush3.bf16.msra.mxu0 %v9876_v46  ;;  %v2100_v46 = vpack.c.bf16 %v2066_v38, %v2065_v37  ;;  %v9904_v37 = vld [vmem:[#allocation7 + $0x1c0] sm:$0xff]   ;;  %v2083_v38 = vld [vmem:[#allocation2 + $0xb3] sm:$0xff] }
  0xd4   : > { %9048 = vmatprep.subr.bf16.mxu0 %v9877_v57  ;;  %9011 = vmatmul.mubr.bf16.gmra.mxu1 %v1297_v50  ;;  %v2072_v50 = vld [vmem:[#allocation2 + $0x5b] sm:$0xff] }
  0xd5   : > { %9014 = vmatprep.mubr.bf16.mxu1 %v1298_v54  ;;  %9099 = vmatpush3.bf16.msra.mxu1 %v9884_v49  ;;  %v2071_v49 = vld [vmem:[#allocation2 + $0x53] sm:$0xff] }
  0xd6   : > { %9100 = vmatprep.subr.bf16.mxu1 %v9885_v55 }
  0xd7   : > { %9049 = vmatpush3.bf16.msra.mxu0 %v9877_v57  ;;  %v10424_v57 = vpack.c.bf16 %v2470_v44, %v2469_v31  ;;  %v2487_v44 = vld [vmem:[#allocation2 + $0xb4] sm:$0xff] }
  0xd8   : > { %9050 = vmatprep.subr.bf16.mxu0 %v9879_v56 }
  0xd9   : > { %9101 = vmatpush3.bf16.msra.mxu1 %v9885_v55  ;;  %v9890_v55 = vld [vmem:[#allocation7 + $0x1a8] sm:$0xff]  }
  0xda   : > { %8963 = vmatmul.mubr.bf16.gmra.mxu0 %v1298_v54  ;;  %9102 = vmatprep.subr.bf16.mxu1 %v9887_v5  ;;  %v10426_v54 = vpack.c.bf16 %v2472_v26, %v2471_v45  ;;  %v2488_v45 = vld [vmem:[#allocation2 + $0xbc] sm:$0xff] }
  0xdb   : > { %8966 = vmatprep.mubr.bf16.mxu0 %v1299_v63  ;;  %9051 = vmatpush3.bf16.msra.mxu0 %v9879_v56  ;;  %v9896_v56 = vld [vmem:[#allocation7 + $0x1f0] sm:$0xff]  }
  0xdc   : > { %9052 = vmatprep.subr.bf16.mxu0 %v9883_v62  ;;  %9015 = vmatmul.mubr.bf16.gmra.mxu1 %v1299_v63  ;;  %v9891_v63 = vld [vmem:[#allocation7 + $0x1a0] sm:$0xff]  }
  0xdd   : > { %9018 = vmatprep.mubr.bf16.mxu1 %v1300_v9  ;;  %9103 = vmatpush3.bf16.msra.mxu1 %v9887_v5  ;;  %v2103_v5 = vpack.c.bf16 %v2072_v50, %v2071_v49  ;;  %v2489_v50 = vld [vmem:[#allocation2 + $0xc4] sm:$0xff] }
  0xde   : > { %9104 = vmatprep.subr.bf16.mxu1 %v9888_v10 }
  0xdf   : > { %9053 = vmatpush3.bf16.msra.mxu0 %v9883_v62  ;;  %v2102_v62 = vpack.c.bf16 %v2070_v53, %v2069_v52  ;;  %v2087_v52 = vld [vmem:[#allocation2 + $0xd3] sm:$0xff]  ;;  %v2088_v53 = vld [vmem:[#allocation2 + $0xdb] sm:$0xff] }
  0xe0   : > { %9142 = vmatprep.subr.bf16.mxu0 %v10418_v16 }
  0xe1   : > { %9105 = vmatpush3.bf16.msra.mxu1 %v9888_v10  ;;  %v2074_v10 = vld [vmem:[#allocation2 + $0x6b] sm:$0xff] }
  0xe2   : > { %8967 = vmatmul.mubr.bf16.gmra.mxu0 %v1300_v9  ;;  %9194 = vmatprep.subr.bf16.mxu1 %v10420_v24  ;;  %v9897_v9 = vld [vmem:[#allocation7 + $0x1e8] sm:$0xff]   ;;  %v2104_v4 = vpack.c.bf16 %v2074_v10, %v9984_v3  ;;  %v2493_v10 = vld [vmem:[#allocation2 + $0xe4] sm:$0xff] }
  0xe3   : > { %8970 = vmatprep.mubr.bf16.mxu0 %v1301_v33 }
  0xe4   : > { %9019 = vmatmul.mubr.bf16.gmra.mxu1 %v1301_v33  ;;  %v9898_v33 = vld [vmem:[#allocation7 + $0x1e0] sm:$0xff]  }
  0xe5   : > { %9022 = vmatprep.mubr.bf16.mxu1 %v1302_v35 }
  0xea   : > { %8971 = vmatmul.mubr.bf16.gmra.mxu0 %v1302_v35  ;;  %v2478_v35 = vld [vmem:[#allocation2 + $0x6c] sm:$0xff] }
  0xeb   : > { %8974 = vmatprep.mubr.bf16.mxu0 %v1303_v41 }
  0xec   : > { %9023 = vmatmul.mubr.bf16.gmra.mxu1 %v1303_v41  ;;  %v2480_v41 = vld [vmem:[#allocation2 + $0x7c] sm:$0xff] }
  0xed   : > { %9026 = vmatprep.mubr.bf16.mxu1 %v1304_v30  ;;  %v10440_v18 = vpack.c.bf16 %v2480_v41, %v2479_v7  ;;  %v2093_v7 = vld [vmem:[#allocation2 + $0x103] sm:$0xff]  ;;  %v2094_v41 = vld [vmem:[#allocation2 + $0x10b] sm:$0xff] }
  0xf2   : > { %8975 = vmatmul.mubr.bf16.gmra.mxu0 %v1304_v30  ;;  %v9893_v30 = vld [vmem:[#allocation7 + $0x190] sm:$0xff]  }
  0xf3   : > { %8978 = vmatprep.mubr.bf16.mxu0 %v1305_v14 }
  0xf4   : > { %9027 = vmatmul.mubr.bf16.gmra.mxu1 %v1305_v14  ;;  %v9901_v14 = vld [vmem:[#allocation7 + $0x1d0] sm:$0xff]  }
  0xf5   : > { %9030 = vmatprep.mubr.bf16.mxu1 %v1306_v15 }
  0xfa   : > { %8979 = vmatmul.mubr.bf16.gmra.mxu0 %v1306_v15  ;;  %v2079_v15 = vld [vmem:[#allocation2 + $0x93] sm:$0xff] }
  0xfb   : > { %8982 = vmatprep.mubr.bf16.mxu0 %v1307_v21  ;;  %v2107_v23 = vpack.c.bf16 %v2080_v17, %v2079_v15  ;;  %v2114_v17 = vpack.c.bf16 %v2094_v41, %v2093_v7 }
  0xfc   : > { %9031 = vmatmul.mubr.bf16.gmra.mxu1 %v1307_v21  ;;  %v2482_v21 = vld [vmem:[#allocation2 + $0x8c] sm:$0xff] }
  0xfd   : > { %9034 = vmatprep.mubr.bf16.mxu1 %v1308_v22 }
 0x102   : > { %8983 = vmatmul.mubr.bf16.gmra.mxu0 %v1308_v22  ;;  %v2106_v22 = vpack.c.bf16 %v2078_v12, %v2077_v11  ;;  %v2096_v11 = vld [vmem:[#allocation2 + $0x11b] sm:$0xff] }
 0x103   : > { %9054 = vmatprep.mubr.bf16.mxu0 %v2099_v34  ;;  %v10444_v34 = vpack.c.bf16 %v2482_v21, %v2481_v20  ;;  %v2497_v20 = vld [vmem:[#allocation2 + $0x104] sm:$0xff]  ;;  %v2498_v21 = vld [vmem:[#allocation2 + $0x10c] sm:$0xff] }
 0x104   : > { %9035 = vmatmul.mubr.bf16.gmra.mxu1 %v1712_v39  ;;  %v2084_v39 = vld [vmem:[#allocation2 + $0xbb] sm:$0xff] }
 0x105   : > { %9106 = vmatprep.mubr.bf16.mxu1 %v2503_v43  ;;  %v2486_v43 = vld [vmem:[#allocation2 + $0xac] sm:$0xff]  ;;  %v2109_v31 = vpack.c.bf16 %v2084_v39, %v2083_v38 }
 0x106   : > { %v10453_v26 = vpack.c.bf16 %v2486_v43, %v2485_v42  ;;  %v10485_v42 = vpack.c.bf16 %v2498_v21, %v2497_v20  ;;  %v3277_v21 = vld [vmem:[#allocation2 + $0x35] sm:$0xff] }
 0x10a   : > { %9055 = vmatmul.mubr.bf16.vlgmr.msra.gmra.mxu0 %v2100_v46  ;;  %v10456_v46 = vpack.c.bf16 %v2488_v45, %v2487_v44 }
 0x10b   : > { %9143 = vmatpush3.bf16.msra.mxu0 %v10418_v16  ;;  %9058 = vmatprep.mubr.bf16.mxu0 %v2101_v47  ;;  %v10432_v16 = vpack.c.bf16 %v2474_v59, %v2473_v58  ;;  %v2086_v47 = vld [vmem:[#allocation2 + $0xcb] sm:$0xff]  ;;  %v2491_v58 = vld [vmem:[#allocation2 + $0xd4] sm:$0xff]  ;;  %v2492_v59 = vld [vmem:[#allocation2 + $0xdc] sm:$0xff] }
 0x10c   : > { %9144 = vmatprep.subr.bf16.mxu0 %v9889_v48  ;;  %9107 = vmatmul.mubr.bf16.vlgmr.msra.gmra.mxu1 %v10424_v57 }
 0x10d   : > { %9110 = vmatprep.mubr.bf16.mxu1 %v10426_v54  ;;  %9195 = vmatpush3.bf16.msra.mxu1 %v10420_v24  ;;  %v2477_v24 = vld [vmem:[#allocation2 + $0x64] sm:$0xff] }
 0x10e   : > { %9196 = vmatprep.subr.bf16.mxu1 %v9896_v56  ;;  %v10438_v13 = vpack.c.bf16 %v2478_v35, %v2477_v24  ;;  %v10469_v24 = vld [vmem:[%s11933_s2] ss:$0 sm:$0xff]  ;;  %v10471_v35 = vpack.c.bf16 %v2494_v0, %v2493_v10  ;;  %v3276_v10 = vld [vmem:[#allocation2 + $0x2d] sm:$0xff] }
 0x10f   : > { %9145 = vmatpush3.bf16.msra.mxu0 %v9889_v48  ;;  %v2085_v48 = vld [vmem:[#allocation2 + $0xc3] sm:$0xff] }
 0x110   : > { %9146 = vmatprep.subr.bf16.mxu0 %v9890_v55  ;;  %v2110_v49 = vpack.c.bf16 %v2086_v47, %v2085_v48  ;;  %v2097_v47 = vld [vmem:[#allocation2 + $0x123] sm:$0xff] }
 0x111   : > { %9197 = vmatpush3.bf16.msra.mxu1 %v9896_v56  ;;  %v2111_v56 = vpack.c.bf16 %v2088_v53, %v2087_v52  ;;  %v2098_v52 = vld [vmem:[#allocation2 + $0x12b] sm:$0xff] }
 0x112   : > { %9059 = vmatmul.mubr.bf16.gmra.mxu0 %v2102_v62  ;;  %9198 = vmatprep.subr.bf16.mxu1 %v9897_v9  ;;  %v2091_v62 = vld [vmem:[#allocation2 + $0xf3] sm:$0xff] }
 0x113   : > { %9062 = vmatprep.mubr.bf16.mxu0 %v2103_v5  ;;  %9147 = vmatpush3.bf16.msra.mxu0 %v9890_v55  ;;  %v2490_v55 = vld [vmem:[#allocation2 + $0xcc] sm:$0xff]  ;;  %v2092_v5 = vld [vmem:[#allocation2 + $0xfb] sm:$0xff] }
 0x114   : > { %9148 = vmatprep.subr.bf16.mxu0 %v9891_v63  ;;  %9111 = vmatmul.mubr.bf16.gmra.mxu1 %v10432_v16  ;;  %v10460_v60 = vpack.c.bf16 %v2490_v55, %v2489_v50  ;;  %v2113_v1 = vpack.c.bf16 %v2092_v5, %v2091_v62  ;;  %v2502_v62 = vld [vmem:[#allocation2 + $0x12c] sm:$0xff] }
 0x115   : > { %9114 = vmatprep.mubr.bf16.mxu1 %v10434_v2  ;;  %9199 = vmatpush3.bf16.msra.mxu1 %v9897_v9 }
 0x116   : > { %9200 = vmatprep.subr.bf16.mxu1 %v9898_v33 }
 0x117   : > { %9149 = vmatpush3.bf16.msra.mxu0 %v9891_v63  ;;  %v9985_v63 = vld [vmem:[#allocation2 + $0xeb] sm:$0xff] }
 0x118   : > { %9150 = vmatprep.subr.bf16.mxu0 %v9892_v32  ;;  %v2112_v9 = vpack.c.bf16 %v9985_v63, %v2089_v61  ;;  %v2501_v61 = vld [vmem:[#allocation2 + $0x124] sm:$0xff] }
 0x119   : > { %9201 = vmatpush3.bf16.msra.mxu1 %v9898_v33  ;;  %v2496_v33 = vld [vmem:[#allocation2 + $0xfc] sm:$0xff] }
 0x11a   : > { %9063 = vmatmul.mubr.bf16.gmra.mxu0 %v2104_v4  ;;  %9202 = vmatprep.subr.bf16.mxu1 %v9900_v8 }
 0x11b   : > { %9066 = vmatprep.mubr.bf16.mxu0 %v2105_v6  ;;  %9151 = vmatpush3.bf16.msra.mxu0 %v9892_v32  ;;  %v2495_v32 = vld [vmem:[#allocation2 + $0xf4] sm:$0xff] }
 0x11c   : > { %9152 = vmatprep.subr.bf16.mxu0 %v9893_v30  ;;  %9115 = vmatmul.mubr.bf16.gmra.mxu1 %v10438_v13  ;;  %v10473_v4 = vpack.c.bf16 %v2496_v33, %v2495_v32 }
 0x11d   : > { %9118 = vmatprep.mubr.bf16.mxu1 %v10440_v18  ;;  %9203 = vmatpush3.bf16.msra.mxu1 %v9900_v8  ;;  %v2095_v8 = vld [vmem:[#allocation2 + $0x113] sm:$0xff] }
 0x11e   : > { %9204 = vmatprep.subr.bf16.mxu1 %v9901_v14  ;;  %v2115_v25 = vpack.c.bf16 %v2096_v11, %v2095_v8 }
 0x11f   : > { %9153 = vmatpush3.bf16.msra.mxu0 %v9893_v30 }
 0x120   : > { %9154 = vmatprep.subr.bf16.mxu0 %v9895_v19 }
 0x121   : > { %9205 = vmatpush3.bf16.msra.mxu1 %v9901_v14 }
 0x122   : > { %9067 = vmatmul.mubr.bf16.gmra.mxu0 %v2106_v22  ;;  %9206 = vmatprep.subr.bf16.mxu1 %v9903_v29 }
 0x123   : > { %9070 = vmatprep.mubr.bf16.mxu0 %v2107_v23  ;;  %9155 = vmatpush3.bf16.msra.mxu0 %v9895_v19 }
 0x124   : > { %9156 = vmatprep.subr.bf16.mxu0 %v9899_v28  ;;  %9119 = vmatmul.mubr.bf16.gmra.mxu1 %v10444_v34 }
 0x125   : > { %9122 = vmatprep.mubr.bf16.mxu1 %v10446_v36  ;;  %9207 = vmatpush3.bf16.msra.mxu1 %v9903_v29 }
 0x126   : > { %9208 = vmatprep.subr.bf16.mxu1 %v9904_v37 }
 0x127   : > { %9157 = vmatpush3.bf16.msra.mxu0 %v9899_v28  ;;  %v2500_v28 = vld [vmem:[#allocation2 + $0x11c] sm:$0xff] }
 0x128   : > { %9246 = vmatprep.subr.bf16.mxu0 %v10448_v40  ;;  %v10489_v44 = vpack.c.bf16 %v2500_v28, %v2499_v27  ;;  %v3279_v27 = vld [vmem:[#allocation2 + $0x45] sm:$0xff] }
 0x129   : > { %9209 = vmatpush3.bf16.msra.mxu1 %v9904_v37 }
 0x12a   : > { %9071 = vmatmul.mubr.bf16.gmra.mxu0 %v10409_v51  ;;  %v10462_v51 = vpack.c.bf16 %v2492_v59, %v2491_v58  ;;  %v2116_v58 = vpack.c.bf16 %v2098_v52, %v2097_v47 }
 0x12b   : > { %9074 = vmatprep.mubr.bf16.mxu0 %v2109_v31 }
 0x12c   : > { %9123 = vmatmul.mubr.bf16.gmra.mxu1 %v10453_v26 }
 0x12d   : > { %9126 = vmatprep.mubr.bf16.mxu1 %v10456_v46 }
 0x132   : > { %9075 = vmatmul.mubr.bf16.gmra.mxu0 %v2110_v49 }
 0x133   : > { %9078 = vmatprep.mubr.bf16.mxu0 %v2111_v56 }
 0x134   : > { %9127 = vmatmul.mubr.bf16.gmra.mxu1 %v10460_v60 }
 0x135   : > { %9130 = vmatprep.mubr.bf16.mxu1 %v10462_v51 }
 0x13a   : > { %v8848_v3 = vpop.f32.mrf.mxu0  ;;  %9079 = vmatmul.mubr.bf16.gmra.mxu0 %v2112_v9  ;;  %v3275_v9 = vld [vmem:[#allocation2 + $0x25] sm:$0xff] }
 0x13b   : > { %v781_v6 = vadd.f32 %v8848_v3, %v10469_v24  ;;  %9082 = vmatprep.mubr.bf16.mxu0 %v2113_v1  ;;  %v10503_v3 = vpack.c.bf16 %v2502_v62, %v2501_v61  ;;  %v3311_v41 = vpack.c.bf16 %v3276_v10, %v3275_v9  ;;  %v3282_v9 = vld [vmem:[#allocation2 + $0x5d] sm:$0xff]  ;;  %v3283_v10 = vld [vmem:[#allocation2 + $0x65] sm:$0xff] }
 0x13c   : > { %v636_v30 = vpop.f32.mrf.mxu0  ;;  %v8900_v14 = vpop.f32.mrf.mxu1  ;;  %9131 = vmatmul.mubr.bf16.gmra.mxu1 %v10471_v35 }
 0x13d   : > { %v779_v12 = vadd.f32 %v10469_v24, %v636_v30  ;;  %v10478_v19 = vadd.f32 %v8900_v14, %v781_v6  ;;  %9134 = vmatprep.mubr.bf16.mxu1 %v10473_v4 }
 0x13e   : > { %v8849_v15 = vpop.f32.mrf.mxu0  ;;  %v1040_v23 = vpop.f32.mrf.mxu1 }
 0x13f   : > { %v782_v22 = vadd.f32 %v8849_v15, %v10469_v24  ;;  %v10482_v37 = vadd.f32 %v1040_v23, %v779_v12 }
 0x140   : > { %v639_v29 = vpop.f32.mrf.mxu0  ;;  %v8901_v39 = vpop.f32.mrf.mxu1 }
 0x141   : > { %v780_v38 = vadd.f32 %v10469_v24, %v639_v29  ;;  %v10487_v31 = vadd.f32 %v8901_v39, %v782_v22  ;;  %v3278_v22 = vld [vmem:[#allocation2 + $0x3d] sm:$0xff] }
 0x142   : > { %v8852_v43 = vpop.f32.mrf.mxu0  ;;  %9083 = vmatmul.mubr.bf16.gmra.mxu0 %v2114_v17  ;;  %v1043_v48 = vpop.f32.mrf.mxu1 }
 0x143   : > { %v785_v45 = vadd.f32 %v8852_v43, %v10469_v24  ;;  %9086 = vmatprep.mubr.bf16.mxu0 %v2115_v25  ;;  %v10492_v49 = vadd.f32 %v1043_v48, %v780_v38  ;;  %v9905_v38 = vld [vmem:[#allocation7 + $0x230] sm:$0xff]  }
 0x144   : > { %v652_v53 = vpop.f32.mrf.mxu0  ;;  %v8904_v55 = vpop.f32.mrf.mxu1  ;;  %9135 = vmatmul.mubr.bf16.gmra.mxu1 %v10485_v42 }
 0x145   : > { %v783_v50 = vadd.f32 %v10469_v24, %v652_v53  ;;  %v10496_v59 = vadd.f32 %v8904_v55, %v785_v45  ;;  %9138 = vmatprep.mubr.bf16.mxu1 %v10489_v44  ;;  %v3312_v45 = vpack.c.bf16 %v3278_v22, %v3277_v21 }
 0x146   : > { %v8853_v56 = vpop.f32.mrf.mxu0  ;;  %v1056_v63 = vpop.f32.mrf.mxu1 }
 0x147   : > { %v786_v5 = vadd.f32 %v8853_v56, %v10469_v24  ;;  %v10500_v1 = vadd.f32 %v1056_v63, %v783_v50  ;;  %v3281_v63 = vld [vmem:[#allocation2 + $0x55] sm:$0xff] }
 0x148   : > { %v655_v0 = vpop.f32.mrf.mxu0  ;;  %v8905_v33 = vpop.f32.mrf.mxu1 }
 0x149   : > { %v784_v32 = vadd.f32 %v10469_v24, %v655_v0  ;;  %v10505_v7 = vadd.f32 %v8905_v33, %v786_v5  ;;  %v3284_v0 = vld [vmem:[#allocation2 + $0x6d] sm:$0xff] }
 0x14a   : > { %v8856_v6 = vpop.f32.mrf.mxu0  ;;  %9087 = vmatmul.mubr.bf16.gmra.mxu0 %v2116_v58  ;;  %v1059_v8 = vpop.f32.mrf.mxu1  ;;  %v9906_v58 = vld [vmem:[#allocation7 + $0x228] sm:$0xff]  }
 0x14b   : > { %v789_v30 = vadd.f32 %v8856_v6, %v10469_v24  ;;  %9158 = vmatprep.mubr.bf16.mxu0 %v10424_v57  ;;  %v10509_v12 = vadd.f32 %v1059_v8, %v784_v32  ;;  %v3280_v57 = vld [vmem:[#allocation2 + $0x4d] sm:$0xff]  ;;  %v3314_v8 = vpack.c.bf16 %v3282_v9, %v3281_v63 }
 0x14c   : > { %v668_v11 = vpop.f32.mrf.mxu0  ;;  %v8908_v15 = vpop.f32.mrf.mxu1  ;;  %9139 = vmatmul.mubr.bf16.gmra.mxu1 %v10503_v3  ;;  %v3313_v52 = vpack.c.bf16 %v3280_v57, %v3279_v27  ;;  %v9907_v6 = vld [vmem:[#allocation7 + $0x220] sm:$0xff]  }
 0x14d   : > { %v787_v14 = vadd.f32 %v10469_v24, %v668_v11  ;;  %v10513_v20 = vadd.f32 %v8908_v15, %v789_v30  ;;  %9210 = vmatprep.mubr.bf16.mxu1 %v3311_v41  ;;  %v3315_v15 = vpack.c.bf16 %v3284_v0, %v3283_v10  ;;  %v9910_v0 = vld [vmem:[#allocation7 + $0x208] sm:$0xff]  }
 0x14e   : > { %v8857_v17 = vpop.f32.mrf.mxu0  ;;  %v1072_v25 = vpop.f32.mrf.mxu1 }
 0x14f   : > { %v790_v23 = vadd.f32 %v8857_v17, %v10469_v24  ;;  %v10516_v29 = vadd.f32 %v1072_v25, %v787_v14  ;;  %v9908_v25 = vld [vmem:[#allocation7 + $0x218] sm:$0xff]  }
 0x150   : > { %v671_v28 = vpop.f32.mrf.mxu0  ;;  %v8909_v43 = vpop.f32.mrf.mxu1 }
 0x151   : > { %v788_v39 = vadd.f32 %v10469_v24, %v671_v28  ;;  %v10520_v47 = vadd.f32 %v8909_v43, %v790_v23 }
 0x152   : > { %v8860_v48 = vpop.f32.mrf.mxu0  ;;  %9159 = vmatmul.mubr.bf16.vlgmr.msra.gmra.mxu0 %v10426_v54  ;;  %v1075_v50 = vpop.f32.mrf.mxu1 }
 0x153   : > { %v793_v53 = vadd.f32 %v8860_v48, %v10469_v24  ;;  %9247 = vmatpush3.bf16.msra.mxu0 %v10448_v40  ;;  %9162 = vmatprep.mubr.bf16.mxu0 %v10432_v16  ;;  %v10525_v56 = vadd.f32 %v1075_v50, %v788_v39  ;;  %v3286_v39 = vld [vmem:[#allocation2 + $0x7d] sm:$0xff]  ;;  %v3288_v48 = vld [vmem:[#allocation2 + $0x8d] sm:$0xff] }
 0x154   : > { %v684_v55 = vpop.f32.mrf.mxu0  ;;  %9248 = vmatprep.subr.bf16.mxu0 %v9905_v38  ;;  %v8912_v62 = vpop.f32.mrf.mxu1  ;;  %9211 = vmatmul.mubr.bf16.vlgmr.msra.gmra.mxu1 %v3312_v45  ;;  %v3287_v45 = vld [vmem:[#allocation2 + $0x85] sm:$0xff]  ;;  %v9909_v50 = vld [vmem:[#allocation7 + $0x210] sm:$0xff]  }
 0x155   : > { %v791_v61 = vadd.f32 %v10469_v24, %v684_v55  ;;  %v10528_v5 = vadd.f32 %v8912_v62, %v793_v53  ;;  %9214 = vmatprep.mubr.bf16.mxu1 %v3313_v52  ;;  %v3317_v63 = vpack.c.bf16 %v3288_v48, %v3287_v45 }
 0x156   : > { %v8861_v54 = vpop.f32.mrf.mxu0  ;;  %v1088_v16 = vpop.f32.mrf.mxu1 }
 0x157   : > { %v794_v40 = vadd.f32 %v8861_v54, %v10469_v24  ;;  %9249 = vmatpush3.bf16.msra.mxu0 %v9905_v38  ;;  %v10531_v33 = vadd.f32 %v1088_v16, %v791_v61  ;;  %v3285_v38 = vld [vmem:[#allocation2 + $0x75] sm:$0xff] }
 0x158   : > { %v687_v32 = vpop.f32.mrf.mxu0  ;;  %9250 = vmatprep.subr.bf16.mxu0 %v9906_v58  ;;  %v8913_v30 = vpop.f32.mrf.mxu1  ;;  %v3316_v61 = vpack.c.bf16 %v3286_v39, %v3285_v38 }
 0x159   : > { %v792_v41 = vadd.f32 %v10469_v24, %v687_v32  ;;  %v10535_v14 = vadd.f32 %v8913_v30, %v794_v40  ;;  %v3289_v30 = vld [vmem:[#allocation2 + $0x95] sm:$0xff] }
 0x15a   : > { %v8864_v11 = vpop.f32.mrf.mxu0  ;;  %9163 = vmatmul.mubr.bf16.gmra.mxu0 %v10434_v2  ;;  %v1091_v21 = vpop.f32.mrf.mxu1 }
 0x15b   : > { %v797_v17 = vadd.f32 %v8864_v11, %v10469_v24  ;;  %9166 = vmatprep.mubr.bf16.mxu0 %v10438_v13  ;;  %9251 = vmatpush3.bf16.msra.mxu0 %v9906_v58  ;;  %v10539_v23 = vadd.f32 %v1091_v21, %v792_v41 }
 0x15c   : > { %v700_v22 = vpop.f32.mrf.mxu0  ;;  %9252 = vmatprep.subr.bf16.mxu0 %v9907_v6  ;;  %v8916_v57 = vpop.f32.mrf.mxu1  ;;  %9215 = vmatmul.mubr.bf16.gmra.mxu1 %v3314_v8  ;;  %v3290_v8 = vld [vmem:[#allocation2 + $0x9d] sm:$0xff] }
 0x15d   : > { %v795_v27 = vadd.f32 %v10469_v24, %v700_v22  ;;  %v10542_v2 = vadd.f32 %v8916_v57, %v797_v17  ;;  %9218 = vmatprep.mubr.bf16.mxu1 %v3315_v15  ;;  %v3291_v15 = vld [vmem:[#allocation2 + $0xa5] sm:$0xff]  ;;  %v3292_v17 = vld [vmem:[#allocation2 + $0xad] sm:$0xff] }
 0x15e   : > { %v8865_v28 = vpop.f32.mrf.mxu0  ;;  %v1104_v13 = vpop.f32.mrf.mxu1 }
 0x15f   : > { %v798_v43 = vadd.f32 %v8865_v28, %v10469_v24  ;;  %9253 = vmatpush3.bf16.msra.mxu0 %v9907_v6  ;;  %v10545_v53 = vadd.f32 %v1104_v13, %v795_v27  ;;  %v3318_v28 = vpack.c.bf16 %v3290_v8, %v3289_v30 }
 0x160   : > { %v703_v52 = vpop.f32.mrf.mxu0  ;;  %9254 = vmatprep.subr.bf16.mxu0 %v9908_v25  ;;  %v8917_v58 = vpop.f32.mrf.mxu1 }
 0x161   : > { %v796_v55 = vadd.f32 %v10469_v24, %v703_v52  ;;  %v10549_v54 = vadd.f32 %v8917_v58, %v798_v43  ;;  %v3319_v43 = vpack.c.bf16 %v3292_v17, %v3291_v15 }
 0x162   : > { %v8868_v62 = vpop.f32.mrf.mxu0  ;;  %9167 = vmatmul.mubr.bf16.gmra.mxu0 %v10440_v18  ;;  %v1107_v40 = vpop.f32.mrf.mxu1 }
 0x163   : > { %v801_v9 = vadd.f32 %v8868_v62, %v10469_v24  ;;  %9170 = vmatprep.mubr.bf16.mxu0 %v10444_v34  ;;  %9255 = vmatpush3.bf16.msra.mxu0 %v9908_v25  ;;  %v10553_v10 = vadd.f32 %v1107_v40, %v796_v55  ;;  %v9911_v25 = vld [vmem:[#allocation7 + $0x200] sm:$0xff]   ;;  %v3294_v62 = vld [vmem:[#allocation2 + $0xbd] sm:$0xff] }
 0x164   : > { %v716_v16 = vpop.f32.mrf.mxu0  ;;  %9256 = vmatprep.subr.bf16.mxu0 %v9909_v50  ;;  %v8920_v6 = vpop.f32.mrf.mxu1  ;;  %9219 = vmatmul.mubr.bf16.gmra.mxu1 %v3316_v61  ;;  %v3296_v40 = vld [vmem:[#allocation2 + $0xcd] sm:$0xff] }
 0x165   : > { %v799_v32 = vadd.f32 %v10469_v24, %v716_v16  ;;  %v10556_v18 = vadd.f32 %v8920_v6, %v801_v9  ;;  %9222 = vmatprep.mubr.bf16.mxu1 %v3317_v63 }
 0x166   : > { %v8869_v41 = vpop.f32.mrf.mxu0  ;;  %v1120_v34 = vpop.f32.mrf.mxu1 }
 0x167   : > { %v802_v11 = vadd.f32 %v8869_v41, %v10469_v24  ;;  %9257 = vmatpush3.bf16.msra.mxu0 %v9909_v50  ;;  %v10559_v22 = vadd.f32 %v1120_v34, %v799_v32 }
 0x168   : > { %v719_v21 = vpop.f32.mrf.mxu0  ;;  %9258 = vmatprep.subr.bf16.mxu0 %v9910_v0  ;;  %v8921_v57 = vpop.f32.mrf.mxu1 }
 0x169   : > { %v800_v27 = vadd.f32 %v10469_v24, %v719_v21  ;;  %v10563_v39 = vadd.f32 %v8921_v57, %v802_v11 }
 0x16a   : > { %v8872_v38 = vpop.f32.mrf.mxu0  ;;  %9171 = vmatmul.mubr.bf16.gmra.mxu0 %v10446_v36  ;;  %v1123_v45 = vpop.f32.mrf.mxu1  ;;  %v3293_v36 = vld [vmem:[#allocation2 + $0xb5] sm:$0xff] }
 0x16b   : > { %v805_v13 = vadd.f32 %v8872_v38, %v10469_v24  ;;  %9174 = vmatprep.mubr.bf16.mxu0 %v10453_v26  ;;  %9259 = vmatpush3.bf16.msra.mxu0 %v9910_v0  ;;  %v10567_v52 = vadd.f32 %v1123_v45, %v800_v27  ;;  %v3295_v26 = vld [vmem:[#allocation2 + $0xc5] sm:$0xff]  ;;  %v3320_v41 = vpack.c.bf16 %v3294_v62, %v3293_v36  ;;  %v3298_v38 = vld [vmem:[#allocation2 + $0xdd] sm:$0xff] }
 0x16c   : > { %v732_v48 = vpop.f32.mrf.mxu0  ;;  %9260 = vmatprep.subr.bf16.mxu0 %v9911_v25  ;;  %v8924_v55 = vpop.f32.mrf.mxu1  ;;  %9223 = vmatmul.mubr.bf16.gmra.mxu1 %v3318_v28  ;;  %v3321_v11 = vpack.c.bf16 %v3296_v40, %v3295_v26  ;;  %v3299_v45 = vld [vmem:[#allocation2 + $0xe5] sm:$0xff] }
 0x16d   : > { %v803_v50 = vadd.f32 %v10469_v24, %v732_v48  ;;  %v10570_v61 = vadd.f32 %v8924_v55, %v805_v13  ;;  %9226 = vmatprep.mubr.bf16.mxu1 %v3319_v43  ;;  %v3300_v48 = vld [vmem:[#allocation2 + $0xed] sm:$0xff] }
 0x16e   : > { %v8873_v58 = vpop.f32.mrf.mxu0  ;;  %v1136_v9 = vpop.f32.mrf.mxu1 }
 0x16f   : > { %v806_v63 = vadd.f32 %v8873_v58, %v10469_v24  ;;  %9261 = vmatpush3.bf16.msra.mxu0 %v9911_v25  ;;  %v10573_v0 = vadd.f32 %v1136_v9, %v803_v50  ;;  %v3323_v9 = vpack.c.bf16 %v3300_v48, %v3299_v45 }
 0x170   : > { %v735_v16 = vpop.f32.mrf.mxu0  ;;  %v8925_v6 = vpop.f32.mrf.mxu1 }
 0x171   : > { %v804_v32 = vadd.f32 %v10469_v24, %v735_v16  ;;  %v10577_v8 = vadd.f32 %v8925_v6, %v806_v63 }
 0x172   : > { %v8876_v30 = vpop.f32.mrf.mxu0  ;;  %9175 = vmatmul.mubr.bf16.gmra.mxu0 %v10456_v46  ;;  %v1139_v15 = vpop.f32.mrf.mxu1  ;;  %v3297_v46 = vld [vmem:[#allocation2 + $0xd5] sm:$0xff] }
 0x173   : > { %v809_v34 = vadd.f32 %v8876_v30, %v10469_v24  ;;  %9178 = vmatprep.mubr.bf16.mxu0 %v10460_v60  ;;  %v10581_v21 = vadd.f32 %v1139_v15, %v804_v32  ;;  %v3322_v36 = vpack.c.bf16 %v3298_v38, %v3297_v46 }
 0x174   : > { %v748_v17 = vpop.f32.mrf.mxu0  ;;  %v8928_v27 = vpop.f32.mrf.mxu1  ;;  %9227 = vmatmul.mubr.bf16.gmra.mxu1 %v3320_v41 }
 0x175   : > { %v807_v25 = vadd.f32 %v10469_v24, %v748_v17  ;;  %v10584_v28 = vadd.f32 %v8928_v27, %v809_v34  ;;  %9230 = vmatprep.mubr.bf16.mxu1 %v3321_v11  ;;  %v3302_v34 = vld [vmem:[#allocation2 + $0xfd] sm:$0xff]  ;;  %v3304_v27 = vld [vmem:[#allocation2 + $0x10d] sm:$0xff] }
 0x176   : > { %v8877_v57 = vpop.f32.mrf.mxu0  ;;  %v1152_v13 = vpop.f32.mrf.mxu1 }
 0x177   : > { %v810_v43 = vadd.f32 %v8877_v57, %v10469_v24  ;;  %v10587_v50 = vadd.f32 %v1152_v13, %v807_v25  ;;  %v3303_v25 = vld [vmem:[#allocation2 + $0x105] sm:$0xff] }
 0x178   : > { %v751_v60 = vpop.f32.mrf.mxu0  ;;  %v8929_v58 = vpop.f32.mrf.mxu1  ;;  %v3325_v45 = vpack.c.bf16 %v3304_v27, %v3303_v25  ;;  %v2905_v25 = vld [vmem:[#allocation2 + $0x134] sm:$0xff]  ;;  %v2906_v27 = vld [vmem:[#allocation2 + $0x13c] sm:$0xff] }
 0x179   : > { %v808_v55 = vadd.f32 %v10469_v24, %v751_v60  ;;  %v10591_v63 = vadd.f32 %v8929_v58, %v810_v43 }
 0x17a   : > { %v8880_v62 = vpop.f32.mrf.mxu0  ;;  %9179 = vmatmul.mubr.bf16.gmra.mxu0 %v10462_v51  ;;  %v1155_v40 = vpop.f32.mrf.mxu1  ;;  %v3301_v51 = vld [vmem:[#allocation2 + $0xf5] sm:$0xff] }
 0x17b   : > { %v813_v26 = vadd.f32 %v8880_v62, %v10469_v24  ;;  %9182 = vmatprep.mubr.bf16.mxu0 %v10471_v35  ;;  %v10595_v32 = vadd.f32 %v1155_v40, %v808_v55  ;;  %v3324_v38 = vpack.c.bf16 %v3302_v34, %v3301_v51 }
 0x17c   : > { %v764_v16 = vpop.f32.mrf.mxu0  ;;  %v8932_v41 = vpop.f32.mrf.mxu1  ;;  %9231 = vmatmul.mubr.bf16.gmra.mxu1 %v3322_v36 }
 0x17d   : > { %v811_v6 = vadd.f32 %v10469_v24, %v764_v16  ;;  %v10598_v11 = vadd.f32 %v8932_v41, %v813_v26  ;;  %9234 = vmatprep.mubr.bf16.mxu1 %v3323_v9  ;;  %v3305_v9 = vld [vmem:[#allocation2 + $0x115] sm:$0xff]  ;;  %v3307_v16 = vld [vmem:[#allocation2 + $0x125] sm:$0xff] }
 0x17e   : > { %v8881_v30 = vpop.f32.mrf.mxu0  ;;  %v1168_v17 = vpop.f32.mrf.mxu1 }
 0x17f   : > { %v814_v15 = vadd.f32 %v8881_v30, %v10469_v24  ;;  %v10603_v57 = vadd.f32 %v1168_v17, %v811_v6 }
 0x180   : > { %v10601_v35 = vpop.f32.mrf.mxu0  ;;  %v8933_v46 = vpop.f32.mrf.mxu1 }
 0x181   : > { %11954 = vst [vmem:[#allocation14_spill] sm:$0xff] %v10601_v35  ;;  %v10606_v13 = vadd.f32 %v8933_v46, %v814_v15 }
 0x182   : > { %v8952_v43 = vpop.f32.mrf.mxu0  ;;  %9183 = vmatmul.mubr.bf16.gmra.mxu0 %v10473_v4  ;;  %v10610_v24 = vpop.f32.mrf.mxu1  ;;  %v3306_v4 = vld [vmem:[#allocation2 + $0x11d] sm:$0xff] }
 0x183   : > { %v1589_v48 = vadd.f32 %v8952_v43, %v10478_v19  ;;  %9186 = vmatprep.mubr.bf16.mxu0 %v10485_v42  ;;  %11955 = vst [vmem:[#allocation15_spill] sm:$0xff] %v10610_v24  ;;  %v3308_v19 = vld [vmem:[#allocation2 + $0x12d] sm:$0xff]  ;;  %v3326_v30 = vpack.c.bf16 %v3306_v4, %v3305_v9 }
 0x184   : > { %v1444_v60 = vpop.f32.mrf.mxu0  ;;  %v9004_v58 = vpop.f32.mrf.mxu1  ;;  %9235 = vmatmul.mubr.bf16.gmra.mxu1 %v3324_v38  ;;  %v3327_v15 = vpack.c.bf16 %v3308_v19, %v3307_v16  ;;  %v3679_v38 = vld [vmem:[#allocation2 + $0x26] sm:$0xff] }
 0x185   : > { %v1587_v55 = vadd.f32 %v1444_v60, %v10482_v37  ;;  %v10613_v62 = vadd.f32 %v9004_v58, %v1589_v48  ;;  %9238 = vmatprep.mubr.bf16.mxu1 %v3325_v45 }
 0x186   : > { %v8953_v36 = vpop.f32.mrf.mxu0  ;;  %v1848_v40 = vpop.f32.mrf.mxu1 }
 0x187   : > { %v1590_v26 = vadd.f32 %v8953_v36, %v10487_v31  ;;  %v10616_v42 = vadd.f32 %v1848_v40, %v1587_v55  ;;  %v3309_v55 = vld [vmem:[#allocation2 + $0x135] sm:$0xff] }
 0x188   : > { %v1447_v6 = vpop.f32.mrf.mxu0  ;;  %v9005_v37 = vpop.f32.mrf.mxu1 }
 0x189   : > { %v10619_v41 = vadd.f32 %v1447_v6, %v10492_v49  ;;  %v10622_v34 = vadd.f32 %v9005_v37, %v1590_v26  ;;  %v3680_v49 = vld [vmem:[#allocation2 + $0x2e] sm:$0xff] }
 0x18a   : > { %v8956_v51 = vpop.f32.mrf.mxu0  ;;  %9187 = vmatmul.mubr.bf16.gmra.mxu0 %v10489_v44  ;;  %v10626_v31 = vpop.f32.mrf.mxu1  ;;  %v2924_v44 = vpack.c.bf16 %v2906_v27, %v2905_v25  ;;  %v3715_v36 = vpack.c.bf16 %v3680_v49, %v3679_v38 }
 0x18b   : > { %v1593_v17 = vadd.f32 %v8956_v51, %v10496_v59  ;;  %9190 = vmatprep.mubr.bf16.mxu0 %v10503_v3  ;;  %v3310_v59 = vld [vmem:[#allocation2 + $0x13d] sm:$0xff] }
 0x18c   : > { %v1460_v46 = vpop.f32.mrf.mxu0  ;;  %v9008_v45 = vpop.f32.mrf.mxu1  ;;  %9239 = vmatmul.mubr.bf16.gmra.mxu1 %v3326_v30  ;;  %v3328_v40 = vpack.c.bf16 %v3310_v59, %v3309_v55  ;;  %v3682_v30 = vld [vmem:[#allocation2 + $0x3e] sm:$0xff] }
 0x18d   : > { %v1591_v43 = vadd.f32 %v1460_v46, %v10500_v1  ;;  %v10629_v60 = vadd.f32 %v9008_v45, %v1593_v17  ;;  %9242 = vmatprep.mubr.bf16.mxu1 %v3327_v15  ;;  %v3683_v15 = vld [vmem:[#allocation2 + $0x46] sm:$0xff]  ;;  %v3684_v17 = vld [vmem:[#allocation2 + $0x4e] sm:$0xff] }
 0x18e   : > { %v8957_v48 = vpop.f32.mrf.mxu0  ;;  %v1864_v58 = vpop.f32.mrf.mxu1 }
 0x18f   : > { %v1594_v3 = vadd.f32 %v8957_v48, %v10505_v7  ;;  %v10632_v4 = vadd.f32 %v1864_v58, %v1591_v43  ;;  %v3681_v7 = vld [vmem:[#allocation2 + $0x36] sm:$0xff] }
 0x190   : > { %v1463_v9 = vpop.f32.mrf.mxu0  ;;  %v9009_v1 = vpop.f32.mrf.mxu1  ;;  %v3716_v46 = vpack.c.bf16 %v3682_v30, %v3681_v7 }
 0x191   : > { %v10635_v26 = vadd.f32 %v1463_v9, %v10509_v12  ;;  %v10637_v19 = vadd.f32 %v9009_v1, %v1594_v3  ;;  %v3687_v1 = vld [vmem:[#allocation2 + $0x66] sm:$0xff] }
 0x192   : > { %v8960_v16 = vpop.f32.mrf.mxu0  ;;  %9191 = vmatmul.mubr.bf16.gmra.mxu0 %v2924_v44  ;;  %v10640_v37 = vpop.f32.mrf.mxu1 }
 0x193   : > { %v1597_v6 = vadd.f32 %v8960_v16, %v10513_v20  ;;  %9262 = vmatprep.mubr.bf16.mxu0 %v3715_v36  ;;  %v3717_v20 = vpack.c.bf16 %v3684_v17, %v3683_v15  ;;  %v3685_v36 = vld [vmem:[#allocation2 + $0x56] sm:$0xff] }
 0x194   : > { %v1476_v51 = vpop.f32.mrf.mxu0  ;;  %v9012_v12 = vpop.f32.mrf.mxu1  ;;  %9243 = vmatmul.mubr.bf16.gmra.mxu1 %v3328_v40  ;;  %v3688_v40 = vld [vmem:[#allocation2 + $0x6e] sm:$0xff] }
 0x195   : > { %v1595_v25 = vadd.f32 %v1476_v51, %v10516_v29  ;;  %v10643_v38 = vadd.f32 %v9012_v12, %v1597_v6  ;;  %v3719_v17 = vpack.c.bf16 %v3688_v40, %v3687_v1 }
 0x196   : > { %v8961_v27 = vpop.f32.mrf.mxu0  ;;  %v1880_v43 = vpop.f32.mrf.mxu1 }
 0x197   : > { %v1598_v49 = vadd.f32 %v8961_v27, %v10520_v47  ;;  %v10646_v48 = vadd.f32 %v1880_v43, %v1595_v25  ;;  %v3686_v47 = vld [vmem:[#allocation2 + $0x5e] sm:$0xff] }
 0x198   : > { %v1479_v45 = vpop.f32.mrf.mxu0  ;;  %v9013_v55 = vpop.f32.mrf.mxu1  ;;  %v3718_v7 = vpack.c.bf16 %v3686_v47, %v3685_v36 }
 0x199   : > { %v10649_v44 = vadd.f32 %v1479_v45, %v10525_v56  ;;  %v10651_v29 = vadd.f32 %v9013_v55, %v1598_v49  ;;  %v3691_v55 = vld [vmem:[#allocation2 + $0x86] sm:$0xff] }
 0x19a   : > { %v8964_v59 = vpop.f32.mrf.mxu0  ;;  %9263 = vmatmul.mubr.bf16.vlgmr.msra.gmra.mxu0 %v3716_v46  ;;  %v10654_v58 = vpop.f32.mrf.mxu1 }
 0x19b   : > { %v1601_v3 = vadd.f32 %v8964_v59, %v10528_v5  ;;  %9266 = vmatprep.mubr.bf16.mxu0 %v3717_v20  ;;  %v3689_v20 = vld [vmem:[#allocation2 + $0x76] sm:$0xff]  ;;  %v3692_v59 = vld [vmem:[#allocation2 + $0x8e] sm:$0xff] }
 0x19c   : > { %v1492_v9 = vpop.f32.mrf.mxu0  ;;  %v9016_v6 = vpop.f32.mrf.mxu1 }
 0x19d   : > { %v1599_v16 = vadd.f32 %v1492_v9, %v10531_v33  ;;  %v10657_v30 = vadd.f32 %v9016_v6, %v1601_v3 }
 0x19e   : > { %v8965_v56 = vpop.f32.mrf.mxu0  ;;  %v1896_v15 = vpop.f32.mrf.mxu1 }
 0x19f   : > { %v1602_v51 = vadd.f32 %v8965_v56, %v10535_v14  ;;  %v10660_v25 = vadd.f32 %v1896_v15, %v1599_v16  ;;  %v3690_v14 = vld [vmem:[#allocation2 + $0x7e] sm:$0xff]  ;;  %v3721_v16 = vpack.c.bf16 %v3692_v59, %v3691_v55 }
 0x1a0   : > { %v1495_v5 = vpop.f32.mrf.mxu0  ;;  %v9017_v27 = vpop.f32.mrf.mxu1  ;;  %v3720_v47 = vpack.c.bf16 %v3690_v14, %v3689_v20 }
 0x1a1   : > { %v10663_v12 = vadd.f32 %v1495_v5, %v10539_v23  ;;  %v10665_v49 = vadd.f32 %v9017_v27, %v1602_v51  ;;  %v3693_v5 = vld [vmem:[#allocation2 + $0x96] sm:$0xff] }
 0x1a2   : > { %v8968_v46 = vpop.f32.mrf.mxu0  ;;  %9267 = vmatmul.mubr.bf16.gmra.mxu0 %v3718_v7  ;;  %v10668_v43 = vpop.f32.mrf.mxu1 }
 0x1a3   : > { %v1605_v33 = vadd.f32 %v8968_v46, %v10542_v2  ;;  %9270 = vmatprep.mubr.bf16.mxu0 %v3719_v17  ;;  %v3695_v46 = vld [vmem:[#allocation2 + $0xa6] sm:$0xff] }
 0x1a4   : > { %v1508_v45 = vpop.f32.mrf.mxu0  ;;  %v9020_v36 = vpop.f32.mrf.mxu1 }
 0x1a5   : > { %v1603_v3 = vadd.f32 %v1508_v45, %v10545_v53  ;;  %v10671_v9 = vadd.f32 %v9020_v36, %v1605_v33  ;;  %v3696_v33 = vld [vmem:[#allocation2 + $0xae] sm:$0xff] }
 0x1a6   : > { %v8969_v23 = vpop.f32.mrf.mxu0  ;;  %v1912_v40 = vpop.f32.mrf.mxu1  ;;  %v3723_v36 = vpack.c.bf16 %v3696_v33, %v3695_v46 }
 0x1a7   : > { %v1606_v1 = vadd.f32 %v8969_v23, %v10549_v54  ;;  %v10674_v6 = vadd.f32 %v1912_v40, %v1603_v3  ;;  %v3694_v54 = vld [vmem:[#allocation2 + $0x9e] sm:$0xff] }
 0x1a8   : > { %v1511_v2 = vpop.f32.mrf.mxu0  ;;  %v9021_v7 = vpop.f32.mrf.mxu1  ;;  %v3722_v45 = vpack.c.bf16 %v3694_v54, %v3693_v5  ;;  %v3699_v5 = vld [vmem:[#allocation2 + $0xc6] sm:$0xff]  ;;  %v3700_v54 = vld [vmem:[#allocation2 + $0xce] sm:$0xff] }
 0x1a9   : > { %v10677_v56 = vadd.f32 %v1511_v2, %v10553_v10  ;;  %v10679_v15 = vadd.f32 %v9021_v7, %v1606_v1  ;;  %v3697_v7 = vld [vmem:[#allocation2 + $0xb6] sm:$0xff] }
 0x1aa   : > { %v8972_v51 = vpop.f32.mrf.mxu0  ;;  %9271 = vmatmul.mubr.bf16.gmra.mxu0 %v3720_v47  ;;  %v10682_v17 = vpop.f32.mrf.mxu1 }
 0x1ab   : > { %11956 = vst [vmem:[#allocation16_spill] sm:$0xff] %v10677_v56  ;;  %v1609_v53 = vadd.f32 %v8972_v51, %v10556_v18  ;;  %9274 = vmatprep.mubr.bf16.mxu0 %v3721_v16  ;;  %11957 = vst [vmem:[#allocation17_spill] sm:$0xff] %v10682_v17  ;;  %v9912_v18 = vld [vmem:[#allocation9 + $0x38] sm:$0xff]  }
 0x1ac   : > { %v1524_v27 = vpop.f32.mrf.mxu0  ;;  %v9024_v14 = vpop.f32.mrf.mxu1  ;;  %9298 = vmatprep.subr.bf16.mxu1 %v9912_v18  ;;  %v3698_v51 = vld [vmem:[#allocation2 + $0xbe] sm:$0xff] }
 0x1ad   : > { %v1607_v20 = vadd.f32 %v1524_v27, %v10559_v22  ;;  %v10685_v55 = vadd.f32 %v9024_v14, %v1609_v53  ;;  %9299 = vmatpush3.bf16.msra.mxu1 %v9912_v18  ;;  %v3724_v33 = vpack.c.bf16 %v3698_v51, %v3697_v7  ;;  %v9913_v18 = vld [vmem:[#allocation9 + $0x30] sm:$0xff]   ;;  %v3703_v51 = vld [vmem:[#allocation2 + $0xe6] sm:$0xff] }
 0x1ae   : > { %v8973_v10 = vpop.f32.mrf.mxu0  ;;  %v1928_v3 = vpop.f32.mrf.mxu1  ;;  %9300 = vmatprep.subr.bf16.mxu1 %v9913_v18 }
 0x1af   : > { %v1610_v59 = vadd.f32 %v8973_v10, %v10563_v39  ;;  %v10688_v47 = vadd.f32 %v1928_v3, %v1607_v20 }
 0x1b0   : > { %v1527_v23 = vpop.f32.mrf.mxu0  ;;  %v9025_v40 = vpop.f32.mrf.mxu1 }
 0x1b1   : > { %v10691_v1 = vadd.f32 %v1527_v23, %v10567_v52  ;;  %v10693_v22 = vadd.f32 %v9025_v40, %v1610_v59  ;;  %9301 = vmatpush3.bf16.msra.mxu1 %v9913_v18 }
 0x1b2   : > { %v8976_v16 = vpop.f32.mrf.mxu0  ;;  %9275 = vmatmul.mubr.bf16.gmra.mxu0 %v3722_v45  ;;  %v10696_v39 = vpop.f32.mrf.mxu1  ;;  %v3725_v45 = vpack.c.bf16 %v3700_v54, %v3699_v5 }
 0x1b3   : > { %11958 = vst [vmem:[#allocation18_spill] sm:$0xff] %v10691_v1  ;;  %v1613_v2 = vadd.f32 %v8976_v16, %v10570_v61  ;;  %9278 = vmatprep.mubr.bf16.mxu0 %v3723_v36  ;;  %11959 = vst [vmem:[#allocation19_spill] sm:$0xff] %v10696_v39 }
 0x1b4   : > { %v1540_v53 = vpop.f32.mrf.mxu0  ;;  %v9028_v27 = vpop.f32.mrf.mxu1 }
 0x1b5   : > { %v1611_v52 = vadd.f32 %v1540_v53, %v10573_v0  ;;  %v10699_v20 = vadd.f32 %v9028_v27, %v1613_v2  ;;  %v3702_v2 = vld [vmem:[#allocation2 + $0xde] sm:$0xff]  ;;  %v3704_v53 = vld [vmem:[#allocation2 + $0xee] sm:$0xff] }
 0x1b6   : > { %v8977_v46 = vpop.f32.mrf.mxu0  ;;  %v1944_v10 = vpop.f32.mrf.mxu1 }
 0x1b7   : > { %v1614_v14 = vadd.f32 %v8977_v46, %v10577_v8  ;;  %v10702_v59 = vadd.f32 %v1944_v10, %v1611_v52  ;;  %v3701_v8 = vld [vmem:[#allocation2 + $0xd6] sm:$0xff] }
 0x1b8   : > { %v1543_v61 = vpop.f32.mrf.mxu0  ;;  %v9029_v36 = vpop.f32.mrf.mxu1  ;;  %v3726_v52 = vpack.c.bf16 %v3702_v2, %v3701_v8  ;;  %v3706_v8 = vld [vmem:[#allocation2 + $0xfe] sm:$0xff] }
 0x1b9   : > { %v10705_v3 = vadd.f32 %v1543_v61, %v10581_v21  ;;  %v10707_v0 = vadd.f32 %v9029_v36, %v1614_v14  ;;  %v9914_v36 = vld [vmem:[#allocation9 + $0x28] sm:$0xff]  }
 0x1ba   : > { %v8980_v23 = vpop.f32.mrf.mxu0  ;;  %9279 = vmatmul.mubr.bf16.gmra.mxu0 %v3724_v33  ;;  %v10710_v16 = vpop.f32.mrf.mxu1  ;;  %v3727_v33 = vpack.c.bf16 %v3704_v53, %v3703_v51  ;;  %9302 = vmatprep.subr.bf16.mxu1 %v9914_v36  ;;  %v3708_v51 = vld [vmem:[#allocation2 + $0x10e] sm:$0xff] }
 0x1bb   : > { %11960 = vst [vmem:[#allocation20_spill] sm:$0xff] %v10705_v3  ;;  %v1617_v40 = vadd.f32 %v8980_v23, %v10584_v28  ;;  %9282 = vmatprep.mubr.bf16.mxu0 %v3725_v45  ;;  %11961 = vst [vmem:[#allocation21_spill] sm:$0xff] %v10710_v16  ;;  %9303 = vmatpush3.bf16.msra.mxu1 %v9914_v36 }
 0x1bc   : > { %v1556_v7 = vpop.f32.mrf.mxu0  ;;  %v9032_v5 = vpop.f32.mrf.mxu1 }
 0x1bd   : > { %v1615_v21 = vadd.f32 %v1556_v7, %v10587_v50  ;;  %v10713_v27 = vadd.f32 %v9032_v5, %v1617_v40  ;;  %v3707_v7 = vld [vmem:[#allocation2 + $0x106] sm:$0xff] }
 0x1be   : > { %v8981_v54 = vpop.f32.mrf.mxu0  ;;  %v1960_v28 = vpop.f32.mrf.mxu1 }
 0x1bf   : > { %v1618_v46 = vadd.f32 %v8981_v54, %v10591_v63  ;;  %v10716_v10 = vadd.f32 %v1960_v28, %v1615_v21  ;;  %v3705_v63 = vld [vmem:[#allocation2 + $0xf6] sm:$0xff] }
 0x1c0   : > { %v1559_v14 = vpop.f32.mrf.mxu0  ;;  %v9033_v61 = vpop.f32.mrf.mxu1  ;;  %v3728_v5 = vpack.c.bf16 %v3706_v8, %v3705_v63  ;;  %v3710_v63 = vld [vmem:[#allocation2 + $0x11e] sm:$0xff]  ;;  %v9915_v8 = vld [vmem:[#allocation9 + $0x20] sm:$0xff]  }
 0x1c1   : > { %v10719_v45 = vadd.f32 %v1559_v14, %v10595_v32  ;;  %v10721_v50 = vadd.f32 %v9033_v61, %v1618_v46  ;;  %v3729_v46 = vpack.c.bf16 %v3708_v51, %v3707_v7  ;;  %v3712_v7 = vld [vmem:[#allocation2 + $0x12e] sm:$0xff]  ;;  %9304 = vmatprep.subr.bf16.mxu1 %v9915_v8 }
 0x1c2   : > { %v8984_v18 = vpop.f32.mrf.mxu0  ;;  %9283 = vmatmul.mubr.bf16.gmra.mxu0 %v3726_v52  ;;  %v10724_v40 = vpop.f32.mrf.mxu1  ;;  %9305 = vmatpush3.bf16.msra.mxu1 %v9915_v8  ;;  %v3714_v8 = vld [vmem:[#allocation2 + $0x13e] sm:$0xff] }
 0x1c3   : > { %11962 = vst [vmem:[#allocation22_spill] sm:$0xff] %v10719_v45  ;;  %v1621_v23 = vadd.f32 %v8984_v18, %v10598_v11  ;;  %9286 = vmatprep.mubr.bf16.mxu0 %v3727_v33  ;;  %11963 = vst [vmem:[#allocation23_spill] sm:$0xff] %v10724_v40 }
 0x1c4   : > { %v1572_v2 = vpop.f32.mrf.mxu0  ;;  %v9036_v53 = vpop.f32.mrf.mxu1 }
 0x1c5   : > { %v1619_v32 = vadd.f32 %v1572_v2, %v10603_v57  ;;  %v10727_v54 = vadd.f32 %v9036_v53, %v1621_v23  ;;  %v3709_v23 = vld [vmem:[#allocation2 + $0x116] sm:$0xff]  ;;  %v3711_v2 = vld [vmem:[#allocation2 + $0x126] sm:$0xff] }
 0x1c6   : > { %v8985_v21 = vpop.f32.mrf.mxu0  ;;  %v1976_v11 = vpop.f32.mrf.mxu1 }
 0x1c7   : > { %v1622_v52 = vadd.f32 %v8985_v21, %v10606_v13  ;;  %v10732_v33 = vadd.f32 %v1976_v11, %v1619_v32  ;;  %v3730_v21 = vpack.c.bf16 %v3710_v63, %v3709_v23  ;;  %v9918_v23 = vld [vmem:[#allocation9 + $0x70] sm:$0xff]  }
 0x1c8   : > { %v10730_v28 = vpop.f32.mrf.mxu0  ;;  %v9037_v14 = vpop.f32.mrf.mxu1 }
 0x1c9   : > { %11964 = vst [vmem:[#allocation24_spill] sm:$0xff] %v10730_v28  ;;  %v10734_v18 = vadd.f32 %v9037_v14, %v1622_v52  ;;  %v9917_v52 = vld [vmem:[#allocation9 + $0x78] sm:$0xff]  }
 0x1ca   : > { %v9056_v61 = vpop.f32.mrf.mxu0  ;;  %9287 = vmatmul.mubr.bf16.gmra.mxu0 %v3728_v5  ;;  %v10737_v36 = vpop.f32.mrf.mxu1  ;;  %9350 = vmatprep.subr.bf16.mxu0 %v9917_v52 }
 0x1cb   : > { %v2397_v57 = vadd.f32 %v9056_v61, %v10613_v62  ;;  %9290 = vmatprep.mubr.bf16.mxu0 %v3729_v46  ;;  %11965 = vst [vmem:[#allocation25_spill] sm:$0xff] %v10737_v36  ;;  %v3731_v46 = vpack.c.bf16 %v3712_v7, %v3711_v2  ;;  %9351 = vmatpush3.bf16.msra.mxu0 %v9917_v52  ;;  %v9916_v2 = vld [vmem:[#allocation9 + $0x18] sm:$0xff]   ;;  %v9920_v52 = vld [vmem:[#allocation9 + $0x68] sm:$0xff]  }
 0x1cc   : > { %v2252_v13 = vpop.f32.mrf.mxu0  ;;  %v9108_v32 = vpop.f32.mrf.mxu1  ;;  %9352 = vmatprep.subr.bf16.mxu0 %v9918_v23  ;;  %9306 = vmatprep.subr.bf16.mxu1 %v9916_v2 }
 0x1cd   : > { %v2395_v51 = vadd.f32 %v2252_v13, %v10616_v42  ;;  %v10740_v5 = vadd.f32 %v9108_v32, %v2397_v57  ;;  %9307 = vmatpush3.bf16.msra.mxu1 %v9916_v2 }
 0x1ce   : > { %v9057_v53 = vpop.f32.mrf.mxu0  ;;  %v2656_v11 = vpop.f32.mrf.mxu1 }
 0x1cf   : > { %v2398_v62 = vadd.f32 %v9057_v53, %v10622_v34  ;;  %v10745_v61 = vadd.f32 %v2656_v11, %v2395_v51  ;;  %v3713_v34 = vld [vmem:[#allocation2 + $0x136] sm:$0xff]  ;;  %9353 = vmatpush3.bf16.msra.mxu0 %v9918_v23  ;;  %v9921_v23 = vld [vmem:[#allocation9 + $0x60] sm:$0xff]  }
 0x1d0   : > { %v10743_v14 = vpop.f32.mrf.mxu0  ;;  %v9109_v36 = vpop.f32.mrf.mxu1  ;;  %9354 = vmatprep.subr.bf16.mxu0 %v9920_v52 }
 0x1d1   : > { %v10747_v13 = vadd.f32 %v9109_v36, %v2398_v62 }
 0x1d2   : > { %v9060_v42 = vpop.f32.mrf.mxu0  ;;  %9291 = vmatmul.mubr.bf16.gmra.mxu0 %v3730_v21  ;;  %v10750_v63 = vpop.f32.mrf.mxu1  ;;  %v3732_v21 = vpack.c.bf16 %v3714_v8, %v3713_v34 }
 0x1d3   : > { %v2401_v57 = vadd.f32 %v9060_v42, %v10629_v60  ;;  %9294 = vmatprep.mubr.bf16.mxu0 %v3731_v46  ;;  %9355 = vmatpush3.bf16.msra.mxu0 %v9920_v52 }
 0x1d4   : > { %v2268_v7 = vpop.f32.mrf.mxu0  ;;  %v9112_v32 = vpop.f32.mrf.mxu1  ;;  %9356 = vmatprep.subr.bf16.mxu0 %v9921_v23 }
 0x1d5   : > { %v2399_v51 = vadd.f32 %v2268_v7, %v10632_v4  ;;  %v10753_v36 = vadd.f32 %v9112_v32, %v2401_v57 }
 0x1d6   : > { %v9061_v53 = vpop.f32.mrf.mxu0  ;;  %v2672_v62 = vpop.f32.mrf.mxu1 }
 0x1d7   : > { %v2402_v60 = vadd.f32 %v9061_v53, %v10637_v19  ;;  %v10758_v46 = vadd.f32 %v2672_v62, %v2399_v51  ;;  %9357 = vmatpush3.bf16.msra.mxu0 %v9921_v23  ;;  %v9923_v53 = vld [vmem:[#allocation9 + $0x58] sm:$0xff]  }
 0x1d8   : > { %v10756_v11 = vpop.f32.mrf.mxu0  ;;  %v9113_v42 = vpop.f32.mrf.mxu1  ;;  %9358 = vmatprep.subr.bf16.mxu0 %v9923_v53 }
 0x1d9   : > { %v10760_v7 = vadd.f32 %v9113_v42, %v2402_v60  ;;  %v9919_v42 = vld [vmem:[#allocation9 + $0x10] sm:$0xff]  }
 0x1da   : > { %v9064_v4 = vpop.f32.mrf.mxu0  ;;  %9295 = vmatmul.mubr.bf16.gmra.mxu0 %v3732_v21  ;;  %v10763_v34 = vpop.f32.mrf.mxu1  ;;  %9308 = vmatprep.subr.bf16.mxu1 %v9919_v42 }
 0x1db   : > { %v2405_v57 = vadd.f32 %v9064_v4, %v10643_v38  ;;  %9359 = vmatpush3.bf16.msra.mxu0 %v9923_v53  ;;  %9309 = vmatpush3.bf16.msra.mxu1 %v9919_v42  ;;  %v9922_v53 = vld [vmem:[#allocation9 + $0x8] sm:$0xff]  }
 0x1dc   : > { %v2284_v8 = vpop.f32.mrf.mxu0  ;;  %v9116_v2 = vpop.f32.mrf.mxu1  ;;  %9310 = vmatprep.subr.bf16.mxu1 %v9922_v53 }
 0x1dd   : > { %v2403_v19 = vadd.f32 %v2284_v8, %v10646_v48  ;;  %v10766_v32 = vadd.f32 %v9116_v2, %v2405_v57  ;;  %v9924_v48 = vld [vmem:[#allocation9 + $0x50] sm:$0xff]  }
 0x1de   : > { %v9065_v51 = vpop.f32.mrf.mxu0  ;;  %v2688_v21 = vpop.f32.mrf.mxu1  ;;  %9360 = vmatprep.subr.bf16.mxu0 %v9924_v48 }
 0x1df   : > { %v2406_v52 = vadd.f32 %v9065_v51, %v10651_v29  ;;  %v10771_v62 = vadd.f32 %v2688_v21, %v2403_v19  ;;  %9361 = vmatpush3.bf16.msra.mxu0 %v9924_v48  ;;  %v9926_v21 = vld [vmem:[#allocation9 + $0x48] sm:$0xff]   ;;  %9311 = vmatpush3.bf16.msra.mxu1 %v9922_v53  ;;  %v9925_v48 = vld [vmem:[#allocation9] sm:$0xff]   ;;  %v9986_v53 = vld [vmem:[#allocation2] sm:$0xff] }
 0x1e0   : > { %v10769_v60 = vpop.f32.mrf.mxu0  ;;  %v9117_v38 = vpop.f32.mrf.mxu1  ;;  %9362 = vmatprep.subr.bf16.mxu0 %v9926_v21  ;;  %9312 = vmatprep.subr.bf16.mxu1 %v9925_v48 }
 0x1e1   : > { %v10773_v28 = vadd.f32 %v9117_v38, %v2406_v52 }
 0x1e2   : > { %v9068_v4 = vpop.f32.mrf.mxu0  ;;  %v10776_v57 = vpop.f32.mrf.mxu1 }
 0x1e3   : > { %v2409_v23 = vadd.f32 %v9068_v4, %v10657_v30  ;;  %9363 = vmatpush3.bf16.msra.mxu0 %v9926_v21  ;;  %9313 = vmatpush3.bf16.msra.mxu1 %v9925_v48  ;;  %v4258_v21 = vpack.c.bf16 %v9986_v53, %v9986_v53 }
 0x1e4   : > { %v2300_v8 = vpop.f32.mrf.mxu0  ;;  %v9120_v19 = vpop.f32.mrf.mxu1 }
 0x1e5   : > { %v2407_v29 = vadd.f32 %v2300_v8, %v10660_v25  ;;  %v10779_v51 = vadd.f32 %v9120_v19, %v2409_v23  ;;  %v9927_v23 = vld [vmem:[#allocation9 + $0x40] sm:$0xff]   ;;  %9314 = vmatprep.mubr.bf16.mxu1 %v4258_v21 }
 0x1e6   : > { %v9069_v2 = vpop.f32.mrf.mxu0  ;;  %v2704_v38 = vpop.f32.mrf.mxu1  ;;  %9364 = vmatprep.subr.bf16.mxu0 %v9927_v23 }
 0x1e7   : > { %v2410_v52 = vadd.f32 %v9069_v2, %v10665_v49  ;;  %v10784_v30 = vadd.f32 %v2704_v38, %v2407_v29  ;;  %v4625_v2 = vld [vmem:[#allocation2 + $0x1] sm:$0xff]  ;;  %v4626_v29 = vld [vmem:[#allocation2 + $0x9] sm:$0xff]  ;;  %9365 = vmatpush3.bf16.msra.mxu0 %v9927_v23 }
 0x1e8   : > { %v10782_v40 = vpop.f32.mrf.mxu0  ;;  %v9121_v42 = vpop.f32.mrf.mxu1 }
 0x1e9   : > { %v10786_v4 = vadd.f32 %v9121_v42, %v2410_v52  ;;  %v4661_v52 = vpack.c.bf16 %v4626_v29, %v4625_v2 }
 0x1ea   : > { %v9072_v25 = vpop.f32.mrf.mxu0  ;;  %v10789_v19 = vpop.f32.mrf.mxu1 }
 0x1eb   : > { %v2413_v8 = vadd.f32 %v9072_v25, %v10671_v9  ;;  %11966 = vst [vmem:[#allocation26_spill] sm:$0xff] %v10789_v19  ;;  %9366 = vmatprep.mubr.bf16.mxu0 %v4661_v52 }
 0x1ec   : > { %v2316_v49 = vpop.f32.mrf.mxu0  ;;  %v9124_v45 = vpop.f32.mrf.mxu1 }
 0x1ed   : > { %v2411_v38 = vadd.f32 %v2316_v49, %v10674_v6  ;;  %v10792_v24 = vadd.f32 %v9124_v45, %v2413_v8  ;;  %v10807_v45 = vld [vmem:[%s11935_s4] ss:$0 sm:$0xff] }
 0x1ee   : > { %v9073_v42 = vpop.f32.mrf.mxu0  ;;  %v2720_v25 = vpop.f32.mrf.mxu1  ;;  %4186 = vst [vmem:[#allocation3] sm:$0xff] %v10807_v45  ;;  %4187 = vst [vmem:[#allocation3 + $0x8] sm:$0xff] %v10807_v45 }
 0x1ef   : > { %v2414_v9 = vadd.f32 %v9073_v42, %v10679_v15  ;;  %v10797_v16 = vadd.f32 %v2720_v25, %v2411_v38  ;;  %4196 = vst [vmem:[#allocation3 + $0x50] sm:$0xff] %v10807_v45  ;;  %4195 = vst [vmem:[#allocation3 + $0x48] sm:$0xff] %v10807_v45 }
 0x1f0   : > { %v10795_v35 = vpop.f32.mrf.mxu0  ;;  %v9125_v3 = vpop.f32.mrf.mxu1  ;;  %4204 = vst [vmem:[#allocation3 + $0x90] sm:$0xff] %v10807_v45  ;;  %4205 = vst [vmem:[#allocation3 + $0x98] sm:$0xff] %v10807_v45 }
 0x1f1   : > { %11967 = vst [vmem:[#allocation27_spill] sm:$0xff] %v10795_v35  ;;  %v10799_v49 = vadd.f32 %v9125_v3, %v2414_v9  ;;  %4213 = vst [vmem:[#allocation3 + $0xd8] sm:$0xff] %v10807_v45 }
 0x1f2   : > { %v9076_v6 = vpop.f32.mrf.mxu0  ;;  %v10802_v23 = vpop.f32.mrf.mxu1  ;;  %4214 = vst [vmem:[#allocation3 + $0xe0] sm:$0xff] %v10807_v45 }
 0x1f3   : > { %v2417_v48 = vadd.f32 %v9076_v6, %v10685_v55  ;;  %11968 = vst [vmem:[#allocation28_spill] sm:$0xff] %v10802_v23 }
 0x1f4   : > { %v2332_v15 = vpop.f32.mrf.mxu0  ;;  %v9128_v3 = vpop.f32.mrf.mxu1 }
 0x1f5   : > { %v2415_v55 = vadd.f32 %v2332_v15, %v10688_v47  ;;  %v10818_v2 = vadd.f32 %v9128_v3, %v2417_v48 }
 0x1f6   : > { %v9077_v8 = vpop.f32.mrf.mxu0  ;;  %v2736_v38 = vpop.f32.mrf.mxu1 }
 0x1f7   : > { %v2418_v29 = vadd.f32 %v9077_v8, %v10693_v22  ;;  %v10823_v21 = vadd.f32 %v2736_v38, %v2415_v55 }
 0x1f8   : > { %v10821_v53 = vpop.f32.mrf.mxu0  ;;  %v9129_v52 = vpop.f32.mrf.mxu1 }
 0x1f9   : > { %11969 = vst [vmem:[#allocation29_spill] sm:$0xff] %v10821_v53  ;;  %v10825_v9 = vadd.f32 %v9129_v52, %v2418_v29 }
 0x1fa   : > { %v9080_v42 = vpop.f32.mrf.mxu0  ;;  %v10828_v6 = vpop.f32.mrf.mxu1 }
 0x1fb   : > { %v2421_v25 = vadd.f32 %v9080_v42, %v10699_v20  ;;  %11970 = vst [vmem:[#allocation30_spill] sm:$0xff] %v10828_v6 }
 0x1fc   : > { %v2348_v47 = vpop.f32.mrf.mxu0  ;;  %v9132_v48 = vpop.f32.mrf.mxu1 }
 0x1fd   : > { %v2419_v15 = vadd.f32 %v2348_v47, %v10702_v59  ;;  %v10831_v39 = vadd.f32 %v9132_v48, %v2421_v25  ;;  %v10843_v59 = vld [vmem:[#allocation9 + $0xb8] sm:$0xff]  }
 0x1fe   : > { %v9081_v3 = vpop.f32.mrf.mxu0  ;;  %v2752_v8 = vpop.f32.mrf.mxu1  ;;  %11973 = vst [vmem:[#allocation33_spill] sm:$0xff] %v10843_v59  ;;  %9402 = vmatprep.subr.bf16.mxu1 %v10843_v59 }
 0x1ff   : > { %v2422_v22 = vadd.f32 %v9081_v3, %v10707_v0  ;;  %v10836_v38 = vadd.f32 %v2752_v8, %v2419_v15 }
 0x200   : > { %v10834_v55 = vpop.f32.mrf.mxu0  ;;  %v9133_v29 = vpop.f32.mrf.mxu1 }
 0x201   : > { %11971 = vst [vmem:[#allocation31_spill] sm:$0xff] %v10834_v55  ;;  %v10838_v53 = vadd.f32 %v9133_v29, %v2422_v22 }
 0x202   : > { %v9084_v52 = vpop.f32.mrf.mxu0  ;;  %v10841_v42 = vpop.f32.mrf.mxu1 }
 0x203   : > { %v2425_v20 = vadd.f32 %v9084_v52, %v10713_v27  ;;  %11972 = vst [vmem:[#allocation32_spill] sm:$0xff] %v10841_v42 }
 0x204   : > { %v2364_v47 = vpop.f32.mrf.mxu0  ;;  %v9136_v48 = vpop.f32.mrf.mxu1 }
 0x205   : > { %v2423_v25 = vadd.f32 %v2364_v47, %v10716_v10  ;;  %v10847_v3 = vadd.f32 %v9136_v48, %v2425_v20 }
 0x206   : > { %v9085_v0 = vpop.f32.mrf.mxu0  ;;  %v2768_v8 = vpop.f32.mrf.mxu1 }
 0x207   : > { %v2426_v15 = vadd.f32 %v9085_v0, %v10721_v50  ;;  %v10852_v29 = vadd.f32 %v2768_v8, %v2423_v25 }
 0x208   : > { %v10850_v22 = vpop.f32.mrf.mxu0  ;;  %v9137_v27 = vpop.f32.mrf.mxu1 }
 0x209   : > { %11974 = vst [vmem:[#allocation34_spill] sm:$0xff] %v10850_v22  ;;  %v10854_v42 = vadd.f32 %v9137_v27, %v2426_v15 }
 0x20a   : > { %v9088_v52 = vpop.f32.mrf.mxu0  ;;  %v10857_v10 = vpop.f32.mrf.mxu1 }
 0x20b   : > { %v2429_v55 = vadd.f32 %v9088_v52, %v10727_v54  ;;  %11975 = vst [vmem:[#allocation35_spill] sm:$0xff] %v10857_v10 }
 0x20c   : > { %v2380_v47 = vpop.f32.mrf.mxu0  ;;  %v9140_v20 = vpop.f32.mrf.mxu1 }
 0x20d   : > { %v2427_v6 = vadd.f32 %v2380_v47, %v10732_v33  ;;  %v10860_v1 = vadd.f32 %v9140_v20, %v2429_v55 }
 0x20e   : > { %v9089_v48 = vpop.f32.mrf.mxu0  ;;  %v2784_v0 = vpop.f32.mrf.mxu1 }
 0x20f   : > { %v2430_v50 = vadd.f32 %v9089_v48, %v10734_v18  ;;  %v10865_v8 = vadd.f32 %v2784_v0, %v2427_v6 }
 0x210   : > { %v10863_v25 = vpop.f32.mrf.mxu0  ;;  %v9141_v15 = vpop.f32.mrf.mxu1 }
 0x211   : > { %11976 = vst [vmem:[#allocation36_spill] sm:$0xff] %v10863_v25  ;;  %v10867_v22 = vadd.f32 %v9141_v15, %v2430_v50  ;;  %v10903_v25 = vld [vmem:[#allocation9 + $0xf8] sm:$0xff]  }
 0x212   : > { %v9160_v27 = vpop.f32.mrf.mxu0  ;;  %v10872_v52 = vpop.f32.mrf.mxu1  ;;  %11978 = vst [vmem:[#allocation38_spill] sm:$0xff] %v10903_v25  ;;  %9454 = vmatprep.subr.bf16.mxu0 %v10903_v25 }
 0x213   : > { %v10870_v54 = vadd.f32 %v9160_v27, %v10740_v5  ;;  %11977 = vst [vmem:[#allocation37_spill] sm:$0xff] %v10872_v52 }
 0x214   : > { %v3060_v33 = vpop.f32.mrf.mxu0  ;;  %v10877_v47 = vpop.f32.mrf.mxu1 }
 0x215   : > { %v10875_v55 = vadd.f32 %v3060_v33, %v10745_v61 }
 0x216   : > { %v9161_v18 = vpop.f32.mrf.mxu0  ;;  %v10882_v6 = vpop.f32.mrf.mxu1 }
 0x217   : > { %v10880_v20 = vadd.f32 %v9161_v18, %v10747_v13 }
 0x218   : > { %v10884_v48 = vpop.f32.mrf.mxu0  ;;  %v10886_v50 = vpop.f32.mrf.mxu1 }
 0x21a   : > { %v9164_v5 = vpop.f32.mrf.mxu0  ;;  %v10891_v27 = vpop.f32.mrf.mxu1 }
 0x21b   : > { %v10889_v0 = vadd.f32 %v9164_v5, %v10753_v36 }
 0x21c   : > { %v3076_v15 = vpop.f32.mrf.mxu0  ;;  %v10901_v52 = vpop.f32.mrf.mxu1 }
 0x21d   : > { %v10894_v61 = vadd.f32 %v3076_v15, %v10758_v46 }
 0x21e   : > { %v9165_v33 = vpop.f32.mrf.mxu0  ;;  %v10909_v23 = vpop.f32.mrf.mxu1 }
 0x21f   : > { %v10897_v13 = vadd.f32 %v9165_v33, %v10760_v7 }
 0x220   : > { %v10899_v18 = vpop.f32.mrf.mxu0  ;;  %v10919_v35 = vpop.f32.mrf.mxu1 }
 0x222   : > { %v9168_v10 = vpop.f32.mrf.mxu0 }
 0x223   : > { %v10907_v36 = vadd.f32 %v9168_v10, %v10766_v32  ;;  %v10924_v32 = vpop.f32.mrf.mxu1 }
 0x224   : > { %v3092_v5 = vpop.f32.mrf.mxu0 }
 0x225   : > { %v10912_v46 = vadd.f32 %v3092_v5, %v10771_v62 }
 0x226   : > { %v9169_v7 = vpop.f32.mrf.mxu0 }
 0x227   : > { %v10915_v15 = vadd.f32 %v9169_v7, %v10773_v28  ;;  %v10932_v28 = vpop.f32.mrf.mxu1 }
 0x228   : > { %v10917_v33 = vpop.f32.mrf.mxu0 }
 0x22a   : > { %v9172_v17 = vpop.f32.mrf.mxu0 }
 0x22b   : > { %v10922_v56 = vadd.f32 %v9172_v17, %v10779_v51  ;;  %v10939_v17 = vpop.f32.mrf.mxu1 }
 0x22c   : > { %v3108_v10 = vpop.f32.mrf.mxu0 }
 0x22d   : > { %11979 = vst [vmem:[#allocation39_spill] sm:$0xff] %v10922_v56  ;;  %v10927_v25 = vadd.f32 %v3108_v10, %v10784_v30 }
 0x22e   : > { %v9173_v62 = vpop.f32.mrf.mxu0 }
 0x22f   : > { %11980 = vst [vmem:[#allocation40_spill] sm:$0xff] %v10927_v25  ;;  %v10930_v5 = vadd.f32 %v9173_v62, %v10786_v4  ;;  %v10947_v4 = vpop.f32.mrf.mxu1 }
 0x230   : > { %v10934_v7 = vpop.f32.mrf.mxu0 }
 0x231   : > { %11981 = vst [vmem:[#allocation41_spill] sm:$0xff] %v10930_v5 }
 0x232   : > { %v9176_v59 = vpop.f32.mrf.mxu0 }
 0x233   : > { %v10937_v19 = vadd.f32 %v9176_v59, %v10792_v24  ;;  %v10954_v24 = vpop.f32.mrf.mxu1 }
 0x234   : > { %v3124_v51 = vpop.f32.mrf.mxu0 }
 0x235   : > { %11982 = vst [vmem:[#allocation42_spill] sm:$0xff] %v10937_v19  ;;  %v10942_v56 = vadd.f32 %v3124_v51, %v10797_v16 }
 0x236   : > { %v9177_v30 = vpop.f32.mrf.mxu0 }
 0x237   : > { %11983 = vst [vmem:[#allocation43_spill] sm:$0xff] %v10942_v56  ;;  %v10945_v10 = vadd.f32 %v9177_v30, %v10799_v49  ;;  %v10962_v49 = vpop.f32.mrf.mxu1 }
 0x238   : > { %v10949_v62 = vpop.f32.mrf.mxu0 }
 0x239   : > { %11984 = vst [vmem:[#allocation44_spill] sm:$0xff] %v10945_v10 }
 0x23a   : > { %v9180_v5 = vpop.f32.mrf.mxu0 }
 0x23b   : > { %v10952_v25 = vadd.f32 %v9180_v5, %v10818_v2  ;;  %v10969_v2 = vpop.f32.mrf.mxu1 }
 0x23c   : > { %v3140_v59 = vpop.f32.mrf.mxu0 }
 0x23d   : > { %11985 = vst [vmem:[#allocation45_spill] sm:$0xff] %v10952_v25  ;;  %v10957_v19 = vadd.f32 %v3140_v59, %v10823_v21 }
 0x23e   : > { %v9181_v16 = vpop.f32.mrf.mxu0 }
 0x23f   : > { %v10960_v51 = vadd.f32 %v9181_v16, %v10825_v9  ;;  %v10977_v9 = vpop.f32.mrf.mxu1 }
 0x240   : > { %v10964_v30 = vpop.f32.mrf.mxu0 }
 0x241   : > { %11986 = vst [vmem:[#allocation46_spill] sm:$0xff] %v10960_v51  ;;  %11987 = vst [vmem:[#allocation47_spill] sm:$0xff] %v10964_v30 }
 0x242   : > { %v9184_v10 = vpop.f32.mrf.mxu0 }
 0x243   : > { %v10967_v56 = vadd.f32 %v9184_v10, %v10831_v39  ;;  %v10984_v39 = vpop.f32.mrf.mxu1 }
 0x244   : > { %v3156_v5 = vpop.f32.mrf.mxu0 }
 0x245   : > { %11988 = vst [vmem:[#allocation48_spill] sm:$0xff] %v10967_v56  ;;  %v10972_v25 = vadd.f32 %v3156_v5, %v10836_v38 }
 0x246   : > { %v9185_v21 = vpop.f32.mrf.mxu0 }
 0x247   : > { %11989 = vst [vmem:[#allocation49_spill] sm:$0xff] %v10972_v25  ;;  %v10975_v59 = vadd.f32 %v9185_v21, %v10838_v53  ;;  %v10992_v53 = vpop.f32.mrf.mxu1  ;;  %v1992_v25 = vadd.f32 %v10626_v31, %v10619_v41  ;;  %v3609_v31 = vadd.f32 %v10877_v47, %v10870_v54 }
 0x248   : > { %v10979_v16 = vpop.f32.mrf.mxu0 }
 0x249   : > { %11990 = vst [vmem:[#allocation50_spill] sm:$0xff] %v10975_v59 }
 0x24a   : > { %v9188_v51 = vpop.f32.mrf.mxu0 }
 0x24b   : > { %v10982_v30 = vadd.f32 %v9188_v51, %v10847_v3  ;;  %v11001_v51 = vpop.f32.mrf.mxu1 }
 0x24c   : > { %v3172_v10 = vpop.f32.mrf.mxu0 }
 0x24d   : > { %11991 = vst [vmem:[#allocation51_spill] sm:$0xff] %v10982_v30  ;;  %v10987_v56 = vadd.f32 %v3172_v10, %v10852_v29  ;;  %v2396_v29 = vadd.f32 %v10743_v14, %v1992_v25  ;;  %v1996_v14 = vadd.f32 %v10640_v37, %v10635_v26 }
 0x24e   : > { %v9189_v38 = vpop.f32.mrf.mxu0 }
 0x24f   : > { %11992 = vst [vmem:[#allocation52_spill] sm:$0xff] %v10987_v56  ;;  %v10990_v5 = vadd.f32 %v9189_v38, %v10854_v42  ;;  %v2800_v41 = vadd.f32 %v10750_v63, %v2396_v29  ;;  %v3610_v63 = vadd.f32 %v10886_v50, %v10880_v20  ;;  %v2000_v20 = vadd.f32 %v10654_v58, %v10649_v44 }
 0x250   : > { %v10994_v21 = vpop.f32.mrf.mxu0 }
 0x251   : > { %11993 = vst [vmem:[#allocation53_spill] sm:$0xff] %v10990_v5  ;;  %v11010_v5 = vpop.f32.mrf.mxu1  ;;  %v3204_v25 = vadd.f32 %v10884_v48, %v2800_v41 }
 0x252   : > { %v9192_v59 = vpop.f32.mrf.mxu0 }
 0x253   : > { %v10999_v3 = vadd.f32 %v9192_v59, %v10860_v1  ;;  %v3608_v29 = vadd.f32 %v10891_v27, %v3204_v25  ;;  %v3611_v27 = vadd.f32 %v10909_v23, %v10894_v61 }
 0x254   : > { %v3188_v30 = vpop.f32.mrf.mxu0 }
 0x255   : > { %v11005_v10 = vadd.f32 %v3188_v30, %v10865_v8  ;;  %v3607_v8 = vadd.f32 %v10882_v6, %v10875_v55  ;;  %v11022_v30 = vpop.f32.mrf.mxu1  ;;  %v3613_v6 = vadd.f32 %v10901_v52, %v10889_v0  ;;  %v3614_v52 = vadd.f32 %v10919_v35, %v10897_v13 }
 0x256   : > { %v9193_v42 = vpop.f32.mrf.mxu0  ;;  %v2004_v13 = vadd.f32 %v10668_v43, %v10663_v12 }
 0x257   : > { %v11008_v38 = vadd.f32 %v9193_v42, %v10867_v22  ;;  %v2400_v42 = vadd.f32 %v10756_v11, %v1996_v14  ;;  %v11028_v48 = vpop.f32.mrf.mxu1 }
 0x258   : > { %v11012_v56 = vpop.f32.mrf.mxu0 }
 0x259   : > { %v2804_v55 = vadd.f32 %v10763_v34, %v2400_v42  ;;  %v11038_v25 = vpop.f32.mrf.mxu1 }
 0x25a   : > { %v9264_v1 = vpop.f32.mrf.mxu0 }
 0x25b   : > { %v4013_v22 = vadd.f32 %v9264_v1, %v3609_v31  ;;  %v3208_v31 = vadd.f32 %v10899_v18, %v2804_v55 }
 0x25c   : > { %v3868_v59 = vpop.f32.mrf.mxu0 }
 0x25d   : > { %4049 = vst [vmem:[#allocation3 + $0x10] sm:$0xff] %v4013_v22  ;;  %v4011_v54 = vadd.f32 %v3868_v59, %v3607_v8  ;;  %v2404_v8 = vadd.f32 %v10769_v60, %v2000_v20  ;;  %v3612_v58 = vadd.f32 %v10924_v32, %v3208_v31  ;;  %v11044_v22 = vpop.f32.mrf.mxu1  ;;  %v3617_v60 = vadd.f32 %v10932_v28, %v10907_v36 }
 0x25e   : > { %v9265_v47 = vpop.f32.mrf.mxu0  ;;  %v2408_v36 = vadd.f32 %v10782_v40, %v2004_v13  ;;  %v3618_v28 = vadd.f32 %v10947_v4, %v10915_v15  ;;  %v11994_v4 = vld [vmem:[#allocation26_spill] sm:$0xff] }
 0x25f   : > { %v4085_v26 = vmax.f32 %v4011_v54, 0.0  ;;  %v4014_v37 = vadd.f32 %v9265_v47, %v3610_v63  ;;  %v2808_v59 = vadd.f32 %v10776_v57, %v2404_v8  ;;  %v3615_v54 = vadd.f32 %v10939_v17, %v10912_v46  ;;  %v9929_v46 = vld [vmem:[#allocation9 + $0xb0] sm:$0xff]   ;;  %v11996_v8 = vld [vmem:[#allocation38_spill] sm:$0xff] }
 0x260   : > { %v3871_v41 = vpop.f32.mrf.mxu0  ;;  %v9934_v17 = vld [vmem:[#allocation9 + $0xf0] sm:$0xff]   ;;  %v2812_v31 = vadd.f32 %v11994_v4, %v2408_v36 }
 0x261   : > { %4087 = vst [vmem:[#allocation2 + $0x13] sm:$0xff] %v4085_v26  ;;  %4050 = vst [vmem:[#allocation3 + $0x18] sm:$0xff] %v4014_v37  ;;  %v4012_v11 = vadd.f32 %v3871_v41, %v3608_v29  ;;  %v3212_v63 = vadd.f32 %v10917_v33, %v2808_v59  ;;  %v11058_v29 = vpop.f32.mrf.mxu1 }
 0x262   : > { %v9268_v50 = vpop.f32.mrf.mxu0 }
 0x263   : > { %v4086_v1 = vmax.f32 %v4012_v11, 0.0  ;;  %v4017_v14 = vadd.f32 %v9268_v50, %v3613_v6  ;;  %v3616_v50 = vadd.f32 %v10954_v24, %v3212_v63  ;;  %v11997_v24 = vld [vmem:[#allocation39_spill] sm:$0xff] }
 0x264   : > { %v3884_v34 = vpop.f32.mrf.mxu0 }
 0x265   : > { %4088 = vst [vmem:[#allocation2 + $0x1b] sm:$0xff] %v4086_v1  ;;  %4053 = vst [vmem:[#allocation3 + $0x30] sm:$0xff] %v4017_v14  ;;  %v4015_v0 = vadd.f32 %v3884_v34, %v3611_v27  ;;  %v11063_v27 = vpop.f32.mrf.mxu1  ;;  %v11995_v34 = vld [vmem:[#allocation33_spill] sm:$0xff] }
 0x266   : > { %v9269_v44 = vpop.f32.mrf.mxu0 }
 0x267   : > { %4051 = vst [vmem:[#allocation3 + $0x20] sm:$0xff] %v4015_v0  ;;  %v4018_v18 = vadd.f32 %v9269_v44, %v3614_v52  ;;  %v3621_v52 = vadd.f32 %v10962_v49, %v11997_v24 }
 0x268   : > { %v4089_v23 = vld [vmem:[#allocation3 + $0x12] sm:$0xff]  ;;  %v3887_v61 = vpop.f32.mrf.mxu0  ;;  %v4224_v47 = vld [vmem:[#allocation2 + $0x10] sm:$0xff] }
 0x269   : > { %v4091_v42 = vmax.f32 %v4089_v23, 0.0  ;;  %4054 = vst [vmem:[#allocation3 + $0x38] sm:$0xff] %v4018_v18  ;;  %v4016_v35 = vadd.f32 %v3887_v61, %v3612_v58  ;;  %4188 = vst [vmem:[#allocation3 + $0x10] sm:$0xff] %v10807_v45  ;;  %v4627_v12 = vld [vmem:[#allocation2 + $0x11] sm:$0xff]  ;;  %v11999_v61 = vld [vmem:[#allocation17_spill] sm:$0xff] }
 0x26a   : > { %v9272_v32 = vpop.f32.mrf.mxu0  ;;  %v9930_v58 = vld [vmem:[#allocation9 + $0xa8] sm:$0xff]   ;;  %v11998_v23 = vld [vmem:[#allocation16_spill] sm:$0xff] }
 0x26b   : > { %4093 = vst [vmem:[#allocation2 + $0x25] sm:$0xff] %v4091_v42  ;;  %4052 = vst [vmem:[#allocation3 + $0x28] sm:$0xff] %v4016_v35  ;;  %v4021_v57 = vadd.f32 %v9272_v32, %v3617_v60  ;;  %v9936_v18 = vld [vmem:[#allocation9 + $0xe8] sm:$0xff]   ;;  %v2008_v59 = vadd.f32 %v11999_v61, %v11998_v23  ;;  %v3216_v60 = vadd.f32 %v10934_v7, %v2812_v31  ;;  %v12000_v42 = vld [vmem:[#allocation40_spill] sm:$0xff] }
 0x26c   : > { %v3900_v26 = vpop.f32.mrf.mxu0  ;;  %v4225_v37 = vld [vmem:[#allocation2 + $0x18] sm:$0xff]  ;;  %v3619_v35 = vadd.f32 %v10969_v2, %v12000_v42  ;;  %v12001_v7 = vld [vmem:[#allocation27_spill] sm:$0xff] }
 0x26d   : > { %v4628_v43 = vld [vmem:[#allocation2 + $0x19] sm:$0xff]  ;;  %v4110_v41 = vmax.f32 %v4021_v57, 0.0  ;;  %v4019_v33 = vadd.f32 %v3900_v26, %v3615_v54  ;;  %v4259_v55 = vpack.c.bf16 %v4225_v37, %v4224_v47  ;;  %v2412_v36 = vadd.f32 %v12001_v7, %v2008_v59  ;;  %v12006_v23 = vld [vmem:[#allocation19_spill] sm:$0xff] }
 0x26e   : > { %v4662_v6 = vpack.c.bf16 %v4628_v43, %v4627_v12  ;;  %v4090_v11 = vld [vmem:[#allocation3 + $0x1a] sm:$0xff]  ;;  %v9273_v20 = vpop.f32.mrf.mxu0  ;;  %v12007_v42 = vld [vmem:[#allocation43_spill] sm:$0xff]  ;;  %v12009_v7 = vld [vmem:[#allocation44_spill] sm:$0xff] }
 0x26f   : > { %v4092_v40 = vmax.f32 %v4090_v11, 0.0  ;;  %4189 = vst [vmem:[#allocation3 + $0x18] sm:$0xff] %v10807_v45  ;;  %4112 = vst [vmem:[#allocation2 + $0x63] sm:$0xff] %v4110_v41  ;;  %v4022_v15 = vadd.f32 %v9273_v20, %v3618_v28  ;;  %9315 = vmatmul.mubr.bf16.vlgmr.msra.gmra.mxu1 %v4259_v55  ;;  %v11083_v28 = vpop.f32.mrf.mxu1  ;;  %v12002_v26 = vld [vmem:[#allocation41_spill] sm:$0xff]  ;;  %v9931_v43 = vld [vmem:[#allocation9 + $0xa0] sm:$0xff]  }
 0x270   : > { %4055 = vst [vmem:[#allocation3 + $0x40] sm:$0xff] %v4019_v33  ;;  %9367 = vmatmul.mubr.bf16.vlgmr.msra.gmra.mxu0 %v4662_v6  ;;  %v11065_v1 = vld [vmem:[#allocation3 + $0x36] sm:$0xff]  ;;  %v3903_v14 = vpop.f32.mrf.mxu0  ;;  %9403 = vmatpush3.bf16.msra.mxu1 %v11995_v34  ;;  %v3622_v37 = vadd.f32 %v10977_v9, %v12002_v26  ;;  %v9937_v41 = vld [vmem:[#allocation9 + $0xe0] sm:$0xff]   ;;  %v3620_v6 = vadd.f32 %v10984_v39, %v3216_v60 }
 0x271   : > { %9455 = vmatpush3.bf16.msra.mxu0 %v11996_v8  ;;  %4094 = vst [vmem:[#allocation2 + $0x2d] sm:$0xff] %v4092_v40  ;;  %v4103_v0 = vmax.f32 %v11065_v1, 0.0  ;;  %4058 = vst [vmem:[#allocation3 + $0x58] sm:$0xff] %v4022_v15  ;;  %v4020_v44 = vadd.f32 %v3903_v14, %v3616_v50  ;;  %9404 = vmatprep.subr.bf16.mxu1 %v9929_v46  ;;  %v12003_v11 = vld [vmem:[#allocation28_spill] sm:$0xff]  ;;  %v12004_v50 = vld [vmem:[#allocation42_spill] sm:$0xff]  ;;  %v11096_v15 = vpop.f32.mrf.mxu1 }
 0x272   : > { %9456 = vmatprep.subr.bf16.mxu0 %v9934_v17  ;;  %v4095_v13 = vld [vmem:[#allocation3 + $0x24] sm:$0xff]  ;;  %v4096_v32 = vld [vmem:[#allocation3 + $0x2c] sm:$0xff]  ;;  %v9276_v49 = vpop.f32.mrf.mxu0  ;;  %v2816_v20 = vadd.f32 %v12003_v11, %v2412_v36  ;;  %v3625_v40 = vadd.f32 %v10992_v53, %v12004_v50  ;;  %v4629_v14 = vld [vmem:[#allocation2 + $0x21] sm:$0xff] }
 0x273   : > { %4105 = vst [vmem:[#allocation2 + $0x49] sm:$0xff] %v4103_v0  ;;  %v4097_v63 = vmax.f32 %v4095_v13, 0.0  ;;  %v4098_v54 = vmax.f32 %v4096_v32, 0.0  ;;  %4191 = vst [vmem:[#allocation3 + $0x28] sm:$0xff] %v10807_v45  ;;  %v4109_v57 = vmax.f32 %v4020_v44, 0.0  ;;  %v4025_v47 = vadd.f32 %v9276_v49, %v3621_v52  ;;  %v9932_v52 = vld [vmem:[#allocation9 + $0x98] sm:$0xff]   ;;  %v11106_v49 = vpop.f32.mrf.mxu1 }
 0x274   : > { %4190 = vst [vmem:[#allocation3 + $0x20] sm:$0xff] %v10807_v45  ;;  %4192 = vst [vmem:[#allocation3 + $0x30] sm:$0xff] %v10807_v45  ;;  %v3916_v2 = vpop.f32.mrf.mxu0  ;;  %9405 = vmatpush3.bf16.msra.mxu1 %v9929_v46  ;;  %v9939_v44 = vld [vmem:[#allocation9 + $0xd8] sm:$0xff]   ;;  %v12005_v53 = vld [vmem:[#allocation18_spill] sm:$0xff]  ;;  %v3220_v60 = vadd.f32 %v10949_v62, %v2816_v20  ;;  %v3626_v62 = vadd.f32 %v11010_v5, %v12009_v7 }
 0x275   : > { %9457 = vmatpush3.bf16.msra.mxu0 %v9934_v17  ;;  %4099 = vst [vmem:[#allocation2 + $0x37] sm:$0xff] %v4097_v63  ;;  %4100 = vst [vmem:[#allocation2 + $0x3f] sm:$0xff] %v4098_v54  ;;  %v4023_v12 = vadd.f32 %v3916_v2, %v3619_v35  ;;  %9406 = vmatprep.subr.bf16.mxu1 %v9930_v58  ;;  %v4226_v17 = vld [vmem:[#allocation2 + $0x20] sm:$0xff]  ;;  %v2012_v61 = vadd.f32 %v12006_v23, %v12005_v53  ;;  %v9940_v50 = vld [vmem:[#allocation9 + $0xd0] sm:$0xff]  }
 0x276   : > { %4111 = vst [vmem:[#allocation2 + $0x5b] sm:$0xff] %v4109_v57  ;;  %4061 = vst [vmem:[#allocation3 + $0x70] sm:$0xff] %v4025_v47  ;;  %9458 = vmatprep.subr.bf16.mxu0 %v9936_v18  ;;  %v9277_v55 = vpop.f32.mrf.mxu0  ;;  %v12008_v13 = vld [vmem:[#allocation29_spill] sm:$0xff]  ;;  %v9938_v53 = vld [vmem:[#allocation9 + $0x88] sm:$0xff]  }
 0x277   : > { %v11087_v33 = vld [vmem:[#allocation3 + $0x3e] sm:$0xff]  ;;  %4059 = vst [vmem:[#allocation3 + $0x60] sm:$0xff] %v4023_v12  ;;  %v4026_v9 = vadd.f32 %v9277_v55, %v3622_v37  ;;  %v2416_v32 = vadd.f32 %v12008_v13, %v2012_v61  ;;  %v12012_v23 = vld [vmem:[#allocation20_spill] sm:$0xff] }
 0x278   : > { %v4104_v46 = vmax.f32 %v11087_v33, 0.0  ;;  %4194 = vst [vmem:[#allocation3 + $0x40] sm:$0xff] %v10807_v45  ;;  %4193 = vst [vmem:[#allocation3 + $0x38] sm:$0xff] %v10807_v45  ;;  %v3919_v4 = vpop.f32.mrf.mxu0  ;;  %v4227_v31 = vld [vmem:[#allocation2 + $0x28] sm:$0xff]  ;;  %9407 = vmatpush3.bf16.msra.mxu1 %v9930_v58  ;;  %v3623_v58 = vadd.f32 %v11001_v51, %v12007_v42  ;;  %v12011_v1 = vld [vmem:[#allocation45_spill] sm:$0xff] }
 0x279   : > { %v4630_v39 = vld [vmem:[#allocation2 + $0x29] sm:$0xff]  ;;  %9459 = vmatpush3.bf16.msra.mxu0 %v9936_v18  ;;  %4062 = vst [vmem:[#allocation3 + $0x78] sm:$0xff] %v4026_v9  ;;  %v4024_v34 = vadd.f32 %v3919_v4, %v3620_v6  ;;  %v4260_v8 = vpack.c.bf16 %v4227_v31, %v4226_v17  ;;  %9408 = vmatprep.subr.bf16.mxu1 %v9931_v43  ;;  %v11115_v31 = vpop.f32.mrf.mxu1  ;;  %v12013_v61 = vld [vmem:[#allocation21_spill] sm:$0xff] }
 0x27a   : > { %4106 = vst [vmem:[#allocation2 + $0x51] sm:$0xff] %v4104_v46  ;;  %v4663_v24 = vpack.c.bf16 %v4630_v39, %v4629_v14  ;;  %9460 = vmatprep.subr.bf16.mxu0 %v9937_v41  ;;  %v9280_v59 = vpop.f32.mrf.mxu0  ;;  %v4231_v35 = vld [vmem:[#allocation2 + $0x48] sm:$0xff] }
 0x27b   : > { %4060 = vst [vmem:[#allocation3 + $0x68] sm:$0xff] %v4024_v34  ;;  %v4029_v18 = vadd.f32 %v9280_v59, %v3625_v40  ;;  %9318 = vmatprep.mubr.bf16.mxu1 %v4260_v8  ;;  %v12010_v40 = vld [vmem:[#allocation30_spill] sm:$0xff]  ;;  %v2016_v59 = vadd.f32 %v12013_v61, %v12012_v23 }
 0x27c   : > { %9370 = vmatprep.mubr.bf16.mxu0 %v4663_v24  ;;  %v3932_v63 = vpop.f32.mrf.mxu0  ;;  %v4228_v54 = vld [vmem:[#allocation2 + $0x30] sm:$0xff]  ;;  %v4229_v57 = vld [vmem:[#allocation2 + $0x38] sm:$0xff]  ;;  %9409 = vmatpush3.bf16.msra.mxu1 %v9931_v43  ;;  %v4230_v37 = vld [vmem:[#allocation2 + $0x40] sm:$0xff]  ;;  %v2820_v4 = vadd.f32 %v12010_v40, %v2416_v32 }
 0x27d   : > { %v4631_v47 = vld [vmem:[#allocation2 + $0x31] sm:$0xff]  ;;  %9461 = vmatpush3.bf16.msra.mxu0 %v9937_v41  ;;  %v4133_v36 = vmax.f32 %v4029_v18, 0.0  ;;  %v4027_v51 = vadd.f32 %v3932_v63, %v3623_v58  ;;  %v4261_v2 = vpack.c.bf16 %v4229_v57, %v4228_v54  ;;  %v4632_v26 = vld [vmem:[#allocation2 + $0x39] sm:$0xff]  ;;  %v4633_v12 = vld [vmem:[#allocation2 + $0x41] sm:$0xff]  ;;  %9410 = vmatprep.subr.bf16.mxu1 %v9932_v52  ;;  %v4262_v17 = vpack.c.bf16 %v4231_v35, %v4230_v37 }
 0x27e   : > { %9462 = vmatprep.subr.bf16.mxu0 %v9939_v44  ;;  %v4113_v55 = vld [vmem:[#allocation3 + $0x5a] sm:$0xff]  ;;  %v9281_v6 = vpop.f32.mrf.mxu0  ;;  %v4664_v9 = vpack.c.bf16 %v4632_v26, %v4631_v47  ;;  %v4665_v11 = vpack.c.bf16 %v4103_v0, %v4633_v12  ;;  %v9935_v43 = vld [vmem:[#allocation9 + $0x90] sm:$0xff]   ;;  %v3624_v41 = vadd.f32 %v11022_v30, %v3220_v60  ;;  %v3629_v0 = vadd.f32 %v11028_v48, %v12011_v1  ;;  %v12014_v48 = vld [vmem:[#allocation47_spill] sm:$0xff] }
 0x27f   : > { %v4115_v20 = vmax.f32 %v4113_v55, 0.0  ;;  %4197 = vst [vmem:[#allocation3 + $0x58] sm:$0xff] %v10807_v45  ;;  %4135 = vst [vmem:[#allocation2 + $0xa3] sm:$0xff] %v4133_v36  ;;  %v4030_v5 = vadd.f32 %v9281_v6, %v3626_v62  ;;  %9319 = vmatmul.mubr.bf16.gmra.mxu1 %v4261_v2  ;;  %v3627_v60 = vadd.f32 %v11038_v25, %v10957_v19  ;;  %v4636_v25 = vld [vmem:[#allocation2 + $0x59] sm:$0xff]  ;;  %v12015_v54 = vld [vmem:[#allocation31_spill] sm:$0xff] }
 0x280   : > { %4063 = vst [vmem:[#allocation3 + $0x80] sm:$0xff] %v4027_v51  ;;  %v4120_v14 = vld [vmem:[#allocation3 + $0x74] sm:$0xff]  ;;  %9371 = vmatmul.mubr.bf16.gmra.mxu0 %v4664_v9  ;;  %v3935_v39 = vpop.f32.mrf.mxu0  ;;  %9322 = vmatprep.mubr.bf16.mxu1 %v4262_v17  ;;  %v3224_v13 = vadd.f32 %v12014_v48, %v2820_v4  ;;  %v2420_v57 = vadd.f32 %v12015_v54, %v2016_v59  ;;  %v12016_v7 = vld [vmem:[#allocation46_spill] sm:$0xff] }
 0x281   : > { %4117 = vst [vmem:[#allocation2 + $0x6d] sm:$0xff] %v4115_v20  ;;  %v4122_v30 = vmax.f32 %v4120_v14, 0.0  ;;  %v4134_v34 = vmax.f32 %v4030_v5, 0.0  ;;  %v4028_v8 = vadd.f32 %v3935_v39, %v3624_v41  ;;  %9374 = vmatprep.mubr.bf16.mxu0 %v4665_v11  ;;  %v4232_v24 = vld [vmem:[#allocation2 + $0x50] sm:$0xff]  ;;  %9411 = vmatpush3.bf16.msra.mxu1 %v9932_v52  ;;  %v4233_v35 = vld [vmem:[#allocation2 + $0x58] sm:$0xff]  ;;  %v3630_v62 = vadd.f32 %v11044_v22, %v12016_v7  ;;  %v12017_v26 = vld [vmem:[#allocation14_spill] sm:$0xff] }
 0x282   : > { %v4114_v42 = vld [vmem:[#allocation3 + $0x62] sm:$0xff]  ;;  %v4119_v58 = vld [vmem:[#allocation3 + $0x6c] sm:$0xff]  ;;  %v9284_v18 = vpop.f32.mrf.mxu0  ;;  %9412 = vmatprep.subr.bf16.mxu1 %v9935_v43  ;;  %9463 = vmatpush3.bf16.msra.mxu0 %v9939_v44  ;;  %v11128_v44 = vpop.f32.mrf.mxu1  ;;  %v4263_v51 = vpack.c.bf16 %v4233_v35, %v4232_v24  ;;  %v9987_v2 = vld [vmem:[%s11933_s2] ss:$0 sm:$0xff]  ;;  %v4666_v6 = vpack.c.bf16 %v4636_v25, %v4104_v46  ;;  %v3628_v9 = vadd.f32 %v11058_v29, %v3224_v13 }
 0x283   : > { %4124 = vst [vmem:[#allocation2 + $0x87] sm:$0xff] %v4122_v30  ;;  %v4116_v32 = vmax.f32 %v4114_v42, 0.0  ;;  %v4121_v63 = vmax.f32 %v4119_v58, 0.0  ;;  %4199 = vst [vmem:[#allocation3 + $0x68] sm:$0xff] %v10807_v45  ;;  %v4033_v19 = vadd.f32 %v9284_v18, %v3629_v0  ;;  %9464 = vmatprep.subr.bf16.mxu0 %v9940_v50  ;;  %v9942_v52 = vld [vmem:[#allocation9 + $0xc8] sm:$0xff]   ;;  %v812_v37 = vadd.f32 %v9987_v2, %v12017_v26  ;;  %v9941_v22 = vld [vmem:[#allocation9 + $0x80] sm:$0xff]  }
 0x284   : > { %4198 = vst [vmem:[#allocation3 + $0x60] sm:$0xff] %v10807_v45  ;;  %4200 = vst [vmem:[#allocation3 + $0x70] sm:$0xff] %v10807_v45  ;;  %v3948_v47 = vpop.f32.mrf.mxu0  ;;  %v9943_v41 = vld [vmem:[#allocation9 + $0xc0] sm:$0xff]   ;;  %v12018_v20 = vld [vmem:[#allocation32_spill] sm:$0xff]  ;;  %v11144_v40 = vpop.f32.mrf.mxu1 }
 0x285   : > { %4136 = vst [vmem:[#allocation2 + $0xab] sm:$0xff] %v4134_v34  ;;  %4064 = vst [vmem:[#allocation3 + $0x88] sm:$0xff] %v4028_v8  ;;  %v4031_v36 = vadd.f32 %v3948_v47, %v3627_v60  ;;  %9413 = vmatpush3.bf16.msra.mxu1 %v9935_v43  ;;  %v4234_v43 = vld [vmem:[#allocation2 + $0x60] sm:$0xff]  ;;  %v2824_v5 = vadd.f32 %v12018_v20, %v2420_v57  ;;  %v12019_v29 = vld [vmem:[#allocation48_spill] sm:$0xff] }
 0x286   : > { %4118 = vst [vmem:[#allocation2 + $0x75] sm:$0xff] %v4116_v32  ;;  %4123 = vst [vmem:[#allocation2 + $0x7f] sm:$0xff] %v4121_v63  ;;  %v9285_v55 = vpop.f32.mrf.mxu0  ;;  %9414 = vmatprep.subr.bf16.mxu1 %v9938_v53  ;;  %9465 = vmatpush3.bf16.msra.mxu0 %v9940_v50  ;;  %v4637_v50 = vld [vmem:[#allocation2 + $0x61] sm:$0xff]  ;;  %v3633_v14 = vadd.f32 %v11063_v27, %v12019_v29  ;;  %v12020_v30 = vld [vmem:[#allocation15_spill] sm:$0xff] }
 0x287   : > { %4069 = vst [vmem:[#allocation3 + $0xb0] sm:$0xff] %v4033_v19  ;;  %v11136_v12 = vld [vmem:[#allocation3 + $0x7e] sm:$0xff]  ;;  %4067 = vst [vmem:[#allocation3 + $0xa0] sm:$0xff] %v4031_v36  ;;  %v4034_v11 = vadd.f32 %v9285_v55, %v3630_v62  ;;  %9323 = vmatmul.mubr.bf16.gmra.mxu1 %v4263_v51  ;;  %9466 = vmatprep.subr.bf16.mxu0 %v9942_v52  ;;  %v1216_v34 = vadd.f32 %v12020_v30, %v812_v37  ;;  %v12022_v24 = vld [vmem:[#allocation23_spill] sm:$0xff] }
 0x288   : > { %v4127_v17 = vmax.f32 %v11136_v12, 0.0  ;;  %4201 = vst [vmem:[#allocation3 + $0x78] sm:$0xff] %v10807_v45  ;;  %9375 = vmatmul.mubr.bf16.gmra.mxu0 %v4666_v6  ;;  %v3951_v33 = vpop.f32.mrf.mxu0  ;;  %v4235_v46 = vld [vmem:[#allocation2 + $0x68] sm:$0xff]  ;;  %v11155_v60 = vld [vmem:[#allocation9 + $0x138] sm:$0xff]   ;;  %v3228_v27 = vadd.f32 %v10979_v16, %v2824_v5  ;;  %v11166_v16 = vpop.f32.mrf.mxu1  ;;  %v12025_v54 = vld [vmem:[#allocation24_spill] sm:$0xff] }
 0x289   : > { %v4638_v4 = vld [vmem:[#allocation2 + $0x69] sm:$0xff]  ;;  %4070 = vst [vmem:[#allocation3 + $0xb8] sm:$0xff] %v4034_v11  ;;  %v4032_v39 = vadd.f32 %v3951_v33, %v3628_v9  ;;  %v4264_v1 = vpack.c.bf16 %v4235_v46, %v4234_v43  ;;  %9415 = vmatpush3.bf16.msra.mxu1 %v9938_v53  ;;  %v12023_v42 = vld [vmem:[#allocation49_spill] sm:$0xff]  ;;  %v1620_v57 = vadd.f32 %v12025_v54, %v1216_v34  ;;  %v12030_v34 = vld [vmem:[#allocation52_spill] sm:$0xff] }
 0x28a   : > { %4129 = vst [vmem:[#allocation2 + $0x91] sm:$0xff] %v4127_v17  ;;  %v4667_v0 = vpack.c.bf16 %v4638_v4, %v4637_v50  ;;  %v12021_v8 = vld [vmem:[#allocation22_spill] sm:$0xff]  ;;  %v9288_v59 = vpop.f32.mrf.mxu0  ;;  %9416 = vmatprep.subr.bf16.mxu1 %v9941_v22  ;;  %9467 = vmatpush3.bf16.msra.mxu0 %v9942_v52  ;;  %v3631_v58 = vadd.f32 %v11083_v28, %v12023_v42  ;;  %v11163_v13 = vld [vmem:[#allocation9 + $0x178] sm:$0xff]   ;;  %v12027_v43 = vld [vmem:[#allocation35_spill] sm:$0xff]  ;;  %v9244_v5 = vpop.f32.mrf.mxu1 }
 0x28b   : > { %v2020_v23 = vadd.f32 %v12022_v24, %v12021_v8  ;;  %4068 = vst [vmem:[#allocation3 + $0xa8] sm:$0xff] %v4032_v39  ;;  %v4037_v53 = vadd.f32 %v9288_v59, %v3633_v14  ;;  %9326 = vmatprep.mubr.bf16.mxu1 %v4264_v1  ;;  %v4239_v35 = vld [vmem:[#allocation2 + $0x88] sm:$0xff]  ;;  %9468 = vmatprep.subr.bf16.mxu0 %v9943_v41  ;;  %v12028_v46 = vld [vmem:[#allocation51_spill] sm:$0xff] }
 0x28c   : > { %v11153_v61 = vld [vmem:[#allocation3 + $0x86] sm:$0xff]  ;;  %9378 = vmatprep.mubr.bf16.mxu0 %v4667_v0  ;;  %v3964_v19 = vpop.f32.mrf.mxu0  ;;  %v3632_v11 = vadd.f32 %v11106_v49, %v3228_v27  ;;  %v3637_v50 = vadd.f32 %v11115_v31, %v12028_v46  ;;  %v12029_v49 = vld [vmem:[#allocation25_spill] sm:$0xff]  ;;  %v3635_v8 = vadd.f32 %v11128_v44, %v12030_v34  ;;  %v12031_v27 = vld [vmem:[#allocation36_spill] sm:$0xff] }
 0x28d   : > { %v4128_v18 = vmax.f32 %v11153_v61, 0.0  ;;  %4203 = vst [vmem:[#allocation3 + $0x88] sm:$0xff] %v10807_v45  ;;  %4202 = vst [vmem:[#allocation3 + $0x80] sm:$0xff] %v10807_v45  ;;  %v4642_v48 = vld [vmem:[#allocation2 + $0x89] sm:$0xff]  ;;  %v4237_v25 = vld [vmem:[#allocation2 + $0x78] sm:$0xff]  ;;  %v4035_v62 = vadd.f32 %v3964_v19, %v3631_v58  ;;  %9417 = vmatpush3.bf16.msra.mxu1 %v9941_v22  ;;  %v2024_v14 = vadd.f32 %v12029_v49, %v1620_v57  ;;  %v3592_v58 = vpop.f32.mrf.mxu1 }
 0x28e   : > { %v12024_v32 = vld [vmem:[#allocation34_spill] sm:$0xff]  ;;  %v4236_v28 = vld [vmem:[#allocation2 + $0x70] sm:$0xff]  ;;  %4073 = vst [vmem:[#allocation3 + $0xd0] sm:$0xff] %v4037_v53  ;;  %v4640_v51 = vld [vmem:[#allocation2 + $0x79] sm:$0xff]  ;;  %v9289_v37 = vpop.f32.mrf.mxu0  ;;  %9469 = vmatpush3.bf16.msra.mxu0 %v9943_v41  ;;  %9506 = vmatprep.subr.bf16.mxu1 %v11155_v60 }
 0x28f   : > { %v2424_v63 = vadd.f32 %v12024_v32, %v2020_v23  ;;  %v4639_v52 = vld [vmem:[#allocation2 + $0x71] sm:$0xff]  ;;  %v12026_v47 = vld [vmem:[#allocation50_spill] sm:$0xff]  ;;  %4130 = vst [vmem:[#allocation2 + $0x99] sm:$0xff] %v4128_v18  ;;  %v4265_v36 = vpack.c.bf16 %v4237_v25, %v4236_v28  ;;  %v4238_v2 = vld [vmem:[#allocation2 + $0x80] sm:$0xff]  ;;  %9558 = vmatprep.subr.bf16.mxu0 %v11163_v13  ;;  %v2428_v42 = vadd.f32 %v12031_v27, %v2024_v14 }
 0x290   : > { %v3634_v7 = vadd.f32 %v11096_v15, %v12026_v47  ;;  %v4641_v26 = vld [vmem:[#allocation2 + $0x81] sm:$0xff]  ;;  %v4668_v55 = vpack.c.bf16 %v4640_v51, %v4639_v52  ;;  %v4266_v6 = vpack.c.bf16 %v4239_v35, %v4238_v2  ;;  %4071 = vst [vmem:[#allocation3 + $0xc0] sm:$0xff] %v4035_v62  ;;  %v3967_v22 = vpop.f32.mrf.mxu0  ;;  %v4670_v47 = vpack.c.bf16 %v4128_v18, %v4127_v17  ;;  %v9245_v2 = vpop.f32.mrf.mxu1 }
 0x291   : > { %v4669_v9 = vpack.c.bf16 %v4642_v48, %v4641_v26  ;;  %9327 = vmatmul.mubr.bf16.gmra.mxu1 %v4265_v36  ;;  %v2828_v20 = vadd.f32 %v12027_v43, %v2424_v63  ;;  %v4143_v33 = vld [vmem:[#allocation3 + $0xb4] sm:$0xff]  ;;  %v4036_v29 = vadd.f32 %v3967_v22, %v3632_v11  ;;  %v4243_v59 = vld [vmem:[#allocation2 + $0xa8] sm:$0xff]  ;;  %v4240_v35 = vld [vmem:[#allocation2 + $0x90] sm:$0xff]  ;;  %v3639_v17 = vadd.f32 %v3592_v58, %v11005_v10 }
 0x292   : > { %v4038_v15 = vadd.f32 %v9289_v37, %v3634_v7  ;;  %9379 = vmatmul.mubr.bf16.gmra.mxu0 %v4668_v55  ;;  %9330 = vmatprep.mubr.bf16.mxu1 %v4266_v6  ;;  %v4145_v41 = vmax.f32 %v4143_v33, 0.0  ;;  %v4137_v1 = vld [vmem:[#allocation3 + $0xa2] sm:$0xff]  ;;  %v4138_v0 = vld [vmem:[#allocation3 + $0xaa] sm:$0xff]  ;;  %v9292_v30 = vpop.f32.mrf.mxu0  ;;  %v12032_v32 = vld [vmem:[#allocation53_spill] sm:$0xff]  ;;  %v3641_v55 = vadd.f32 %v9244_v5, %v10999_v3  ;;  %v3595_v10 = vpop.f32.mrf.mxu1 }
 0x293   : > { %9382 = vmatprep.mubr.bf16.mxu0 %v4669_v9  ;;  %v3232_v39 = vadd.f32 %v10994_v21, %v2828_v20  ;;  %v4139_v24 = vmax.f32 %v4137_v1, 0.0  ;;  %v4140_v23 = vmax.f32 %v4138_v0, 0.0  ;;  %4207 = vst [vmem:[#allocation3 + $0xa8] sm:$0xff] %v10807_v45  ;;  %4206 = vst [vmem:[#allocation3 + $0xa0] sm:$0xff] %v10807_v45  ;;  %v4041_v31 = vadd.f32 %v9292_v30, %v3637_v50  ;;  %v4646_v21 = vld [vmem:[#allocation2 + $0xa9] sm:$0xff]  ;;  %v4645_v7 = vld [vmem:[#allocation2 + $0xa1] sm:$0xff] }
 0x294   : > { %v4157_v4 = vmax.f32 %v4038_v15, 0.0  ;;  %4147 = vst [vmem:[#allocation2 + $0xc7] sm:$0xff] %v4145_v41  ;;  %4208 = vst [vmem:[#allocation3 + $0xb0] sm:$0xff] %v10807_v45  ;;  %v3980_v53 = vpop.f32.mrf.mxu0  ;;  %v3638_v63 = vadd.f32 %v11144_v40, %v12032_v32  ;;  %v4671_v51 = vpack.c.bf16 %v4646_v21, %v4645_v7  ;;  %v11202_v15 = vld [vmem:[#allocation3] sm:$0xff] }
 0x295   : > { %4072 = vst [vmem:[#allocation3 + $0xc8] sm:$0xff] %v4036_v29  ;;  %4141 = vst [vmem:[#allocation2 + $0xb5] sm:$0xff] %v4139_v24  ;;  %v4039_v19 = vadd.f32 %v3980_v53, %v3635_v8  ;;  %v3636_v52 = vadd.f32 %v11166_v16, %v3232_v39  ;;  %v12033_v16 = vld [vmem:[#allocation37_spill] sm:$0xff] }
 0x296   : > { %4159 = vst [vmem:[#allocation2 + $0xeb] sm:$0xff] %v4157_v4  ;;  %v4241_v44 = vld [vmem:[#allocation2 + $0x98] sm:$0xff]  ;;  %v4242_v48 = vld [vmem:[#allocation2 + $0xa0] sm:$0xff]  ;;  %4142 = vst [vmem:[#allocation2 + $0xbd] sm:$0xff] %v4140_v23  ;;  %v9293_v57 = vpop.f32.mrf.mxu0  ;;  %v2832_v37 = vadd.f32 %v12033_v16, %v2428_v42 }
 0x297   : > { %4077 = vst [vmem:[#allocation3 + $0xf0] sm:$0xff] %v4041_v31  ;;  %v4267_v28 = vpack.c.bf16 %v4241_v44, %v4240_v35  ;;  %v4268_v25 = vpack.c.bf16 %v4243_v59, %v4242_v48  ;;  %v4144_v54 = vld [vmem:[#allocation3 + $0xbc] sm:$0xff]  ;;  %v4158_v40 = vmax.f32 %v4039_v19, 0.0  ;;  %v4042_v36 = vadd.f32 %v9293_v57, %v3638_v63 }
 0x298   : > { %v4146_v62 = vmax.f32 %v4144_v54, 0.0  ;;  %4209 = vst [vmem:[#allocation3 + $0xb8] sm:$0xff] %v10807_v45  ;;  %v3983_v26 = vpop.f32.mrf.mxu0  ;;  %v3236_v6 = vadd.f32 %v11012_v56, %v2832_v37  ;;  %v3642_v56 = vadd.f32 %v9245_v2, %v11008_v38 }
 0x299   : > { %9331 = vmatmul.mubr.bf16.gmra.mxu1 %v4267_v28  ;;  %4160 = vst [vmem:[#allocation2 + $0xf3] sm:$0xff] %v4158_v40  ;;  %4078 = vst [vmem:[#allocation3 + $0xf8] sm:$0xff] %v4042_v36  ;;  %v4040_v12 = vadd.f32 %v3983_v26, %v3636_v52 }
 0x29a   : > { %9383 = vmatmul.mubr.bf16.gmra.mxu0 %v4670_v47  ;;  %9334 = vmatprep.mubr.bf16.mxu1 %v4268_v25  ;;  %4148 = vst [vmem:[#allocation2 + $0xcf] sm:$0xff] %v4146_v62  ;;  %v9296_v18 = vpop.f32.mrf.mxu0  ;;  %v3640_v29 = vadd.f32 %v3595_v10, %v3236_v6  ;;  %v5434_v6 = vld [vmem:[#allocation2 + $0x1a] sm:$0xff] }
 0x29b   : > { %9386 = vmatprep.mubr.bf16.mxu0 %v4671_v51  ;;  %4076 = vst [vmem:[#allocation3 + $0xe8] sm:$0xff] %v4040_v12  ;;  %v4045_v3 = vadd.f32 %v9296_v18, %v3641_v55  ;;  %v5030_v18 = vld [vmem:[#allocation2 + $0xa] sm:$0xff] }
 0x29c   : > { %v4149_v45 = vld [vmem:[#allocation3 + $0xc6] sm:$0xff]  ;;  %v11198_v61 = vld [vmem:[#allocation3 + $0xce] sm:$0xff]  ;;  %v3996_v43 = vpop.f32.mrf.mxu0 }
 0x29d   : > { %v4151_v9 = vmax.f32 %v4149_v45, 0.0  ;;  %v4152_v11 = vmax.f32 %v11198_v61, 0.0  ;;  %4211 = vst [vmem:[#allocation3 + $0xc8] sm:$0xff] %v11202_v15  ;;  %4210 = vst [vmem:[#allocation3 + $0xc0] sm:$0xff] %v11202_v15  ;;  %v4244_v20 = vld [vmem:[#allocation2 + $0xb0] sm:$0xff]  ;;  %v4245_v5 = vld [vmem:[#allocation2 + $0xb8] sm:$0xff]  ;;  %v4043_v22 = vadd.f32 %v3996_v43, %v3639_v17 }
 0x29e   : > { %4212 = vst [vmem:[#allocation3 + $0xd0] sm:$0xff] %v11202_v15  ;;  %v4647_v33 = vld [vmem:[#allocation2 + $0xb1] sm:$0xff]  ;;  %4081 = vst [vmem:[#allocation3 + $0x110] sm:$0xff] %v4045_v3  ;;  %v4269_v46 = vpack.c.bf16 %v4245_v5, %v4244_v20  ;;  %v4648_v50 = vld [vmem:[#allocation2 + $0xb9] sm:$0xff]  ;;  %v9297_v41 = vpop.f32.mrf.mxu0 }
 0x29f   : > { %4153 = vst [vmem:[#allocation2 + $0xd9] sm:$0xff] %v4151_v9  ;;  %4154 = vst [vmem:[#allocation2 + $0xe1] sm:$0xff] %v4152_v11  ;;  %v4672_v4 = vpack.c.bf16 %v4648_v50, %v4647_v33  ;;  %v4046_v49 = vadd.f32 %v9297_v41, %v3642_v56  ;;  %v4246_v14 = vld [vmem:[#allocation2 + $0xc0] sm:$0xff]  ;;  %v4654_v63 = vld [vmem:[#allocation2 + $0xe9] sm:$0xff] }
 0x2a0   : > { %4079 = vst [vmem:[#allocation3 + $0x100] sm:$0xff] %v4043_v22  ;;  %v4649_v39 = vld [vmem:[#allocation2 + $0xc1] sm:$0xff]  ;;  %v3999_v0 = vpop.f32.mrf.mxu0  ;;  %v4675_v28 = vpack.c.bf16 %v4654_v63, %v4152_v11  ;;  %v4252_v62 = vld [vmem:[#allocation2 + $0xf0] sm:$0xff] }
 0x2a1   : > { %9335 = vmatmul.mubr.bf16.gmra.mxu1 %v4269_v46  ;;  %v4162_v1 = vld [vmem:[#allocation3 + $0xf2] sm:$0xff]  ;;  %v4247_v30 = vld [vmem:[#allocation2 + $0xc8] sm:$0xff]  ;;  %4082 = vst [vmem:[#allocation3 + $0x118] sm:$0xff] %v4046_v49  ;;  %v4044_v8 = vadd.f32 %v3999_v0, %v3640_v29  ;;  %v4248_v21 = vld [vmem:[#allocation2 + $0xd0] sm:$0xff] }
 0x2a2   : > { %9387 = vmatmul.mubr.bf16.gmra.mxu0 %v4672_v4  ;;  %v4650_v34 = vld [vmem:[#allocation2 + $0xc9] sm:$0xff]  ;;  %v4164_v38 = vmax.f32 %v4162_v1, 0.0  ;;  %v4270_v24 = vpack.c.bf16 %v4247_v30, %v4246_v14  ;;  %v4161_v31 = vld [vmem:[#allocation3 + $0xea] sm:$0xff]  ;;  %v5438_v46 = vld [vmem:[#allocation2 + $0x3a] sm:$0xff] }
 0x2a3   : > { %v4673_v23 = vpack.c.bf16 %v4650_v34, %v4649_v39  ;;  %v4163_v59 = vmax.f32 %v4161_v31, 0.0  ;;  %4215 = vst [vmem:[#allocation3 + $0xe8] sm:$0xff] %v11202_v15  ;;  %4216 = vst [vmem:[#allocation3 + $0xf0] sm:$0xff] %v11202_v15  ;;  %v4651_v27 = vld [vmem:[#allocation2 + $0xd1] sm:$0xff]  ;;  %v5029_v61 = vld [vmem:[#allocation2 + $0x2] sm:$0xff] }
 0x2a4   : > { %4166 = vst [vmem:[#allocation2 + $0x105] sm:$0xff] %v4164_v38  ;;  %4080 = vst [vmem:[#allocation3 + $0x108] sm:$0xff] %v4044_v8  ;;  %9338 = vmatprep.mubr.bf16.mxu1 %v4270_v24  ;;  %v4674_v32 = vpack.c.bf16 %v4151_v9, %v4651_v27  ;;  %v4655_v36 = vld [vmem:[#allocation2 + $0xf1] sm:$0xff]  ;;  %v5065_v3 = vpack.c.bf16 %v5030_v18, %v5029_v61  ;;  %v5435_v50 = vld [vmem:[#allocation2 + $0x22] sm:$0xff] }
 0x2a5   : > { %9390 = vmatprep.mubr.bf16.mxu0 %v4673_v23  ;;  %4165 = vst [vmem:[#allocation2 + $0xfd] sm:$0xff] %v4163_v59  ;;  %v5433_v5 = vld [vmem:[#allocation2 + $0x12] sm:$0xff]  ;;  %v5436_v56 = vld [vmem:[#allocation2 + $0x2a] sm:$0xff]  ;;  %v5439_v30 = vld [vmem:[#allocation2 + $0x42] sm:$0xff] }
 0x2a6   : > { %v4249_v42 = vld [vmem:[#allocation2 + $0xd8] sm:$0xff]  ;;  %v4250_v58 = vld [vmem:[#allocation2 + $0xe0] sm:$0xff]  ;;  %v4251_v53 = vld [vmem:[#allocation2 + $0xe8] sm:$0xff]  ;;  %v5469_v33 = vpack.c.bf16 %v5434_v6, %v5433_v5  ;;  %v5470_v41 = vpack.c.bf16 %v5436_v56, %v5435_v50 }
 0x2a7   : > { %v4271_v35 = vpack.c.bf16 %v4249_v42, %v4248_v21  ;;  %v4272_v44 = vpack.c.bf16 %v4251_v53, %v4250_v58  ;;  %v4167_v48 = vld [vmem:[#allocation3 + $0xfc] sm:$0xff]  ;;  %v5437_v22 = vld [vmem:[#allocation2 + $0x32] sm:$0xff]  ;;  %v5442_v38 = vld [vmem:[#allocation2 + $0x5a] sm:$0xff] }
 0x2a8   : > { %v4169_v19 = vmax.f32 %v4167_v48, 0.0  ;;  %4217 = vst [vmem:[#allocation3 + $0xf8] sm:$0xff] %v11202_v15  ;;  %v4174_v25 = vld [vmem:[#allocation3 + $0x116] sm:$0xff]  ;;  %v5471_v29 = vpack.c.bf16 %v5438_v46, %v5437_v22  ;;  %v9946_v14 = vld [vmem:[#allocation9 + $0x128] sm:$0xff]   ;;  %v9947_v8 = vld [vmem:[#allocation9 + $0x120] sm:$0xff]  }
 0x2a9   : > { %9339 = vmatmul.mubr.bf16.gmra.mxu1 %v4271_v35  ;;  %v4176_v52 = vmax.f32 %v4174_v25, 0.0  ;;  %4221 = vst [vmem:[#allocation3 + $0x118] sm:$0xff] %v11202_v15  ;;  %v9945_v4 = vld [vmem:[#allocation9 + $0x130] sm:$0xff]   ;;  %v5440_v39 = vld [vmem:[#allocation2 + $0x4a] sm:$0xff]  ;;  %v9955_v31 = vld [vmem:[#allocation9 + $0x158] sm:$0xff]  }
 0x2aa   : > { %9391 = vmatmul.mubr.bf16.gmra.mxu0 %v4674_v32  ;;  %9342 = vmatprep.mubr.bf16.mxu1 %v4272_v44  ;;  %4171 = vst [vmem:[#allocation2 + $0x10f] sm:$0xff] %v4169_v19  ;;  %v9950_v49 = vld [vmem:[#allocation9 + $0x170] sm:$0xff]   ;;  %v9952_v1 = vld [vmem:[#allocation9 + $0x168] sm:$0xff]   ;;  %v5472_v34 = vpack.c.bf16 %v5440_v39, %v5439_v30  ;;  %v9953_v23 = vld [vmem:[#allocation9 + $0x160] sm:$0xff]  }
 0x2ab   : > { %9394 = vmatprep.mubr.bf16.mxu0 %v4675_v28  ;;  %v4168_v54 = vld [vmem:[#allocation3 + $0x104] sm:$0xff]  ;;  %v4173_v57 = vld [vmem:[#allocation3 + $0x10e] sm:$0xff]  ;;  %4178 = vst [vmem:[#allocation2 + $0x129] sm:$0xff] %v4176_v52  ;;  %v5443_v27 = vld [vmem:[#allocation2 + $0x62] sm:$0xff] }
 0x2ac   : > { %v4170_v47 = vmax.f32 %v4168_v54, 0.0  ;;  %v4175_v7 = vmax.f32 %v4173_v57, 0.0  ;;  %4219 = vst [vmem:[#allocation3 + $0x108] sm:$0xff] %v11202_v15  ;;  %4218 = vst [vmem:[#allocation3 + $0x100] sm:$0xff] %v11202_v15  ;;  %v4253_v40 = vld [vmem:[#allocation2 + $0xf8] sm:$0xff]  ;;  %v4254_v16 = vld [vmem:[#allocation2 + $0x100] sm:$0xff] }
 0x2ad   : > { %4220 = vst [vmem:[#allocation3 + $0x110] sm:$0xff] %v11202_v15  ;;  %v4656_v51 = vld [vmem:[#allocation2 + $0xf9] sm:$0xff]  ;;  %v4273_v2 = vpack.c.bf16 %v4253_v40, %v4252_v62  ;;  %v4657_v55 = vld [vmem:[#allocation2 + $0x101] sm:$0xff]  ;;  %v9954_v44 = vld [vmem:[#allocation9 + $0x108] sm:$0xff]  }
 0x2ae   : > { %4172 = vst [vmem:[#allocation2 + $0x117] sm:$0xff] %v4170_v47  ;;  %4177 = vst [vmem:[#allocation2 + $0x121] sm:$0xff] %v4175_v7  ;;  %v4676_v26 = vpack.c.bf16 %v4656_v51, %v4655_v36  ;;  %v5441_v0 = vld [vmem:[#allocation2 + $0x52] sm:$0xff]  ;;  %v5446_v21 = vld [vmem:[#allocation2 + $0x7a] sm:$0xff] }
 0x2af   : > { %v5473_v24 = vpack.c.bf16 %v5442_v38, %v5441_v0  ;;  %v5445_v59 = vld [vmem:[#allocation2 + $0x72] sm:$0xff]  ;;  %v5448_v48 = vld [vmem:[#allocation2 + $0x8a] sm:$0xff]  ;;  %v5450_v19 = vld [vmem:[#allocation2 + $0x9a] sm:$0xff] }
 0x2b0   : > { %v9951_v58 = vld [vmem:[#allocation9 + $0x110] sm:$0xff]   ;;  %v5475_v53 = vpack.c.bf16 %v5446_v21, %v5445_v59  ;;  %v9958_v32 = vld [vmem:[#allocation9 + $0x148] sm:$0xff]   ;;  %v5447_v28 = vld [vmem:[#allocation2 + $0x82] sm:$0xff] }
 0x2b1   : > { %9343 = vmatmul.mubr.bf16.gmra.mxu1 %v4273_v2  ;;  %v4255_v37 = vld [vmem:[#allocation2 + $0x108] sm:$0xff]  ;;  %v9956_v35 = vld [vmem:[#allocation9 + $0x150] sm:$0xff]   ;;  %v5476_v25 = vpack.c.bf16 %v5448_v48, %v5447_v28  ;;  %v11217_v47 = vld [vmem:[#allocation9 + $0x1b8] sm:$0xff]  }
 0x2b2   : > { %9395 = vmatmul.mubr.bf16.gmra.mxu0 %v4676_v26  ;;  %v4658_v12 = vld [vmem:[#allocation2 + $0x109] sm:$0xff]  ;;  %v4274_v17 = vpack.c.bf16 %v4255_v37, %v4254_v16  ;;  %v5449_v63 = vld [vmem:[#allocation2 + $0x92] sm:$0xff]  ;;  %v11219_v62 = vld [vmem:[#allocation9 + $0x1f8] sm:$0xff]  }
 0x2b3   : > { %v4677_v45 = vpack.c.bf16 %v4658_v12, %v4657_v55  ;;  %v9957_v52 = vld [vmem:[#allocation9 + $0x100] sm:$0xff]   ;;  %v5477_v54 = vpack.c.bf16 %v5450_v19, %v5449_v63  ;;  %v5453_v40 = vld [vmem:[#allocation2 + $0xb2] sm:$0xff]  ;;  %v5454_v36 = vld [vmem:[#allocation2 + $0xba] sm:$0xff] }
 0x2b4   : > { %9346 = vmatprep.mubr.bf16.mxu1 %v4274_v17  ;;  %v9959_v57 = vld [vmem:[#allocation9 + $0x140] sm:$0xff]   ;;  %v5479_v26 = vpack.c.bf16 %v5454_v36, %v5453_v40  ;;  %v5457_v37 = vld [vmem:[#allocation2 + $0xd2] sm:$0xff]  ;;  %v5458_v55 = vld [vmem:[#allocation2 + $0xda] sm:$0xff] }
 0x2b5   : > { %9398 = vmatprep.mubr.bf16.mxu0 %v4677_v45  ;;  %v4256_v9 = vld [vmem:[#allocation2 + $0x110] sm:$0xff]  ;;  %v4257_v11 = vld [vmem:[#allocation2 + $0x118] sm:$0xff]  ;;  %v5451_v51 = vld [vmem:[#allocation2 + $0xa2] sm:$0xff]  ;;  %v5481_v45 = vpack.c.bf16 %v5458_v55, %v5457_v37 }
 0x2b6   : > { %v4659_v15 = vld [vmem:[#allocation2 + $0x111] sm:$0xff]  ;;  %v4275_v10 = vpack.c.bf16 %v4257_v11, %v4256_v9  ;;  %v4660_v43 = vld [vmem:[#allocation2 + $0x119] sm:$0xff]  ;;  %v5455_v12 = vld [vmem:[#allocation2 + $0xc2] sm:$0xff] }
 0x2b7   : > { %v4678_v20 = vpack.c.bf16 %v4660_v43, %v4659_v15  ;;  %v5452_v7 = vld [vmem:[#allocation2 + $0xaa] sm:$0xff]  ;;  %v5459_v61 = vld [vmem:[#allocation2 + $0xe2] sm:$0xff]  ;;  %v5462_v18 = vld [vmem:[#allocation2 + $0xfa] sm:$0xff] }
 0x2b8   : > { %v5478_v2 = vpack.c.bf16 %v5452_v7, %v5451_v51  ;;  %v5456_v16 = vld [vmem:[#allocation2 + $0xca] sm:$0xff]  ;;  %v5461_v11 = vld [vmem:[#allocation2 + $0xf2] sm:$0xff]  ;;  %v5466_v43 = vld [vmem:[#allocation2 + $0x11a] sm:$0xff] }
 0x2b9   : > { %9347 = vmatmul.mubr.bf16.gmra.mxu1 %v4275_v10  ;;  %v5480_v17 = vpack.c.bf16 %v5456_v16, %v5455_v12  ;;  %v5460_v6 = vld [vmem:[#allocation2 + $0xea] sm:$0xff]  ;;  %v5483_v15 = vpack.c.bf16 %v5462_v18, %v5461_v11  ;;  %v5465_v10 = vld [vmem:[#allocation2 + $0x112] sm:$0xff]  ;;  %v5467_v56 = vld [vmem:[#allocation2 + $0x122] sm:$0xff] }
 0x2ba   : > { %9399 = vmatmul.mubr.bf16.gmra.mxu0 %v4678_v20  ;;  %9418 = vmatprep.mubr.bf16.mxu1 %v5065_v3  ;;  %v5482_v9 = vpack.c.bf16 %v5460_v6, %v5459_v61  ;;  %v5464_v3 = vld [vmem:[#allocation2 + $0x10a] sm:$0xff]  ;;  %v5463_v20 = vld [vmem:[#allocation2 + $0x102] sm:$0xff]  ;;  %v6241_v46 = vld [vmem:[#allocation2 + $0x14] sm:$0xff] }
 0x2bb   : > { %9470 = vmatprep.mubr.bf16.mxu0 %v5469_v33  ;;  %v5484_v5 = vpack.c.bf16 %v5464_v3, %v5463_v20  ;;  %v5838_v22 = vld [vmem:[#allocation2 + $0x1b] sm:$0xff]  ;;  %v5840_v39 = vld [vmem:[#allocation2 + $0x2b] sm:$0xff]  ;;  %v5841_v0 = vld [vmem:[#allocation2 + $0x33] sm:$0xff] }
 0x2bc   : > { %v6242_v50 = vld [vmem:[#allocation2 + $0x1c] sm:$0xff]  ;;  %v6245_v38 = vld [vmem:[#allocation2 + $0x34] sm:$0xff]  ;;  %v6247_v63 = vld [vmem:[#allocation2 + $0x44] sm:$0xff] }
 0x2bd   : > { %v5842_v30 = vld [vmem:[#allocation2 + $0x3b] sm:$0xff]  ;;  %v5848_v7 = vld [vmem:[#allocation2 + $0x6b] sm:$0xff]  ;;  %v5849_v36 = vld [vmem:[#allocation2 + $0x73] sm:$0xff] }
 0x2be   : > { %v9966_v21 = vld [vmem:[#allocation9 + $0x1f0] sm:$0xff]   ;;  %v9964_v40 = vld [vmem:[#allocation9 + $0x198] sm:$0xff]   ;;  %v6256_v11 = vld [vmem:[#allocation2 + $0x8c] sm:$0xff] }
 0x2bf   : > { %v6249_v48 = vld [vmem:[#allocation2 + $0x54] sm:$0xff]  ;;  %v6254_v37 = vld [vmem:[#allocation2 + $0x7c] sm:$0xff]  ;;  %v6251_v12 = vld [vmem:[#allocation2 + $0x64] sm:$0xff] }
 0x2c0   : > { %v5846_v19 = vld [vmem:[#allocation2 + $0x5b] sm:$0xff]  ;;  %v5853_v3 = vld [vmem:[#allocation2 + $0x93] sm:$0xff]  ;;  %v5851_v20 = vld [vmem:[#allocation2 + $0x83] sm:$0xff] }
 0x2c1   : > { %9419 = vmatmul.mubr.bf16.vlgmr.msra.gmra.mxu1 %v5469_v33  ;;  %v5485_v33 = vpack.c.bf16 %v5466_v43, %v5465_v10  ;;  %v5850_v51 = vld [vmem:[#allocation2 + $0x7b] sm:$0xff]  ;;  %v9974_v43 = vld [vmem:[#allocation9 + $0x1c8] sm:$0xff]  }
 0x2c2   : > { %9471 = vmatmul.mubr.bf16.vlgmr.msra.gmra.mxu0 %v5470_v41  ;;  %9422 = vmatprep.mubr.bf16.mxu1 %v5470_v41  ;;  %v5468_v41 = vld [vmem:[#allocation2 + $0x12a] sm:$0xff]  ;;  %v6253_v16 = vld [vmem:[#allocation2 + $0x74] sm:$0xff] }
 0x2c3   : > { %9474 = vmatprep.mubr.bf16.mxu0 %v5471_v29  ;;  %9507 = vmatpush3.bf16.msra.mxu1 %v11155_v60  ;;  %v9948_v60 = vld [vmem:[#allocation9 + $0x118] sm:$0xff]   ;;  %v9967_v61 = vld [vmem:[#allocation9 + $0x190] sm:$0xff]   ;;  %v11239_v18 = vpack.c.bf16 %v6254_v37, %v6253_v16 }
 0x2c4   : > { %9508 = vmatprep.subr.bf16.mxu1 %v9945_v4  ;;  %9559 = vmatpush3.bf16.msra.mxu0 %v11163_v13  ;;  %v5444_v13 = vld [vmem:[#allocation2 + $0x6a] sm:$0xff]  ;;  %v9972_v6 = vld [vmem:[#allocation9 + $0x1d0] sm:$0xff]  }
 0x2c5   : > { %9560 = vmatprep.subr.bf16.mxu0 %v9950_v49  ;;  %v5474_v42 = vpack.c.bf16 %v5444_v13, %v5443_v27  ;;  %v5875_v13 = vpack.c.bf16 %v5842_v30, %v5841_v0  ;;  %v5844_v27 = vld [vmem:[#allocation2 + $0x4b] sm:$0xff]  ;;  %v5854_v10 = vld [vmem:[#allocation2 + $0x9b] sm:$0xff]  ;;  %v5857_v0 = vld [vmem:[#allocation2 + $0xb3] sm:$0xff] }
 0x2c6   : > { %v5858_v30 = vld [vmem:[#allocation2 + $0xbb] sm:$0xff]  ;;  %v6267_v37 = vld [vmem:[#allocation2 + $0xe4] sm:$0xff] }
 0x2c7   : > { %9509 = vmatpush3.bf16.msra.mxu1 %v9945_v4  ;;  %v5837_v4 = vld [vmem:[#allocation2 + $0x13] sm:$0xff] }
 0x2c8   : > { %9510 = vmatprep.subr.bf16.mxu1 %v9946_v14  ;;  %9561 = vmatpush3.bf16.msra.mxu0 %v9950_v49  ;;  %v5873_v49 = vpack.c.bf16 %v5838_v22, %v5837_v4  ;;  %v6255_v22 = vld [vmem:[#allocation2 + $0x84] sm:$0xff] }
 0x2c9   : > { %9423 = vmatmul.mubr.bf16.gmra.mxu1 %v5471_v29  ;;  %9562 = vmatprep.subr.bf16.mxu0 %v9952_v1  ;;  %v5486_v29 = vpack.c.bf16 %v5468_v41, %v5467_v56  ;;  %v9973_v41 = vld [vmem:[#allocation9 + $0x180] sm:$0xff]  }
 0x2ca   : > { %9475 = vmatmul.mubr.bf16.gmra.mxu0 %v5472_v34  ;;  %9426 = vmatprep.mubr.bf16.mxu1 %v5472_v34  ;;  %v5839_v34 = vld [vmem:[#allocation2 + $0x23] sm:$0xff] }
 0x2cb   : > { %9478 = vmatprep.mubr.bf16.mxu0 %v5473_v24  ;;  %9511 = vmatpush3.bf16.msra.mxu1 %v9946_v14  ;;  %v6277_v14 = vpack.c.bf16 %v6242_v50, %v6241_v46  ;;  %v11243_v46 = vpack.c.bf16 %v6256_v11, %v6255_v22  ;;  %v5881_v50 = vpack.c.bf16 %v5854_v10, %v5853_v3  ;;  %v6268_v10 = vld [vmem:[#allocation2 + $0xec] sm:$0xff] }
 0x2cc   : > { %9512 = vmatprep.subr.bf16.mxu1 %v9947_v8  ;;  %9563 = vmatpush3.bf16.msra.mxu0 %v9952_v1  ;;  %v6244_v1 = vld [vmem:[#allocation2 + $0x2c] sm:$0xff] }
 0x2cd   : > { %9564 = vmatprep.subr.bf16.mxu0 %v9953_v23 }
 0x2cf   : > { %9513 = vmatpush3.bf16.msra.mxu1 %v9947_v8  ;;  %v6246_v8 = vld [vmem:[#allocation2 + $0x3c] sm:$0xff] }
 0x2d0   : > { %9514 = vmatprep.subr.bf16.mxu1 %v9948_v60  ;;  %9565 = vmatpush3.bf16.msra.mxu0 %v9953_v23  ;;  %v6243_v23 = vld [vmem:[#allocation2 + $0x24] sm:$0xff]  ;;  %v11225_v59 = vpack.c.bf16 %v6246_v8, %v6245_v38  ;;  %v6261_v38 = vld [vmem:[#allocation2 + $0xb4] sm:$0xff]  ;;  %v6262_v8 = vld [vmem:[#allocation2 + $0xbc] sm:$0xff] }
 0x2d1   : > { %9427 = vmatmul.mubr.bf16.gmra.mxu1 %v5473_v24  ;;  %9566 = vmatprep.subr.bf16.mxu0 %v9955_v31  ;;  %v5874_v24 = vpack.c.bf16 %v5840_v39, %v5839_v34  ;;  %v11249_v39 = vld [vmem:[#allocation9 + $0x238] sm:$0xff]  }
 0x2d2   : > { %9479 = vmatmul.mubr.bf16.gmra.mxu0 %v5474_v42  ;;  %9430 = vmatprep.mubr.bf16.mxu1 %v5474_v42  ;;  %v9962_v42 = vld [vmem:[#allocation9 + $0x1a8] sm:$0xff]   ;;  %v5855_v34 = vld [vmem:[#allocation2 + $0xa3] sm:$0xff] }
 0x2d3   : > { %9482 = vmatprep.mubr.bf16.mxu0 %v5475_v53  ;;  %9515 = vmatpush3.bf16.msra.mxu1 %v9948_v60  ;;  %v11223_v60 = vpack.c.bf16 %v6244_v1, %v6243_v23  ;;  %v6260_v1 = vld [vmem:[#allocation2 + $0xac] sm:$0xff] }
 0x2d4   : > { %9516 = vmatprep.subr.bf16.mxu1 %v9951_v58  ;;  %9567 = vmatpush3.bf16.msra.mxu0 %v9955_v31  ;;  %v9961_v31 = vld [vmem:[#allocation9 + $0x1b0] sm:$0xff]  }
 0x2d5   : > { %9568 = vmatprep.subr.bf16.mxu0 %v9956_v35 }
 0x2d7   : > { %9517 = vmatpush3.bf16.msra.mxu1 %v9951_v58  ;;  %v6248_v58 = vld [vmem:[#allocation2 + $0x4c] sm:$0xff] }
 0x2d8   : > { %9518 = vmatprep.subr.bf16.mxu1 %v9954_v44  ;;  %9569 = vmatpush3.bf16.msra.mxu0 %v9956_v35  ;;  %v9968_v35 = vld [vmem:[#allocation9 + $0x1e8] sm:$0xff]   ;;  %v11231_v28 = vpack.c.bf16 %v6248_v58, %v6247_v63  ;;  %v5862_v58 = vld [vmem:[#allocation2 + $0xdb] sm:$0xff] }
 0x2d9   : > { %9431 = vmatmul.mubr.bf16.gmra.mxu1 %v5475_v53  ;;  %9570 = vmatprep.subr.bf16.mxu0 %v9958_v32  ;;  %v5845_v53 = vld [vmem:[#allocation2 + $0x53] sm:$0xff] }
 0x2da   : > { %9483 = vmatmul.mubr.bf16.gmra.mxu0 %v5476_v25  ;;  %9434 = vmatprep.mubr.bf16.mxu1 %v5476_v25  ;;  %v5877_v25 = vpack.c.bf16 %v5846_v19, %v5845_v53  ;;  %v5859_v53 = vld [vmem:[#allocation2 + $0xc3] sm:$0xff]  ;;  %v4278_v63 = vld [vmem:[#allocation3 + $0x10] sm:$0xff] }
 0x2db   : > { %9486 = vmatprep.mubr.bf16.mxu0 %v5477_v54  ;;  %9519 = vmatpush3.bf16.msra.mxu1 %v9954_v44  ;;  %v5843_v44 = vld [vmem:[#allocation2 + $0x43] sm:$0xff] }
 0x2dc   : > { %9520 = vmatprep.subr.bf16.mxu1 %v9957_v52  ;;  %9571 = vmatpush3.bf16.msra.mxu0 %v9958_v32  ;;  %v5876_v32 = vpack.c.bf16 %v5844_v27, %v5843_v44  ;;  %v6264_v27 = vld [vmem:[#allocation2 + $0xcc] sm:$0xff]  ;;  %v6266_v44 = vld [vmem:[#allocation2 + $0xdc] sm:$0xff] }
 0x2dd   : > { %9572 = vmatprep.subr.bf16.mxu0 %v9959_v57 }
 0x2df   : > { %9521 = vmatpush3.bf16.msra.mxu1 %v9957_v52  ;;  %v6250_v52 = vld [vmem:[#allocation2 + $0x5c] sm:$0xff] }
 0x2e0   : > { %9573 = vmatpush3.bf16.msra.mxu0 %v9959_v57  ;;  %9610 = vmatprep.subr.bf16.mxu1 %v11217_v47  ;;  %v11233_v57 = vpack.c.bf16 %v6250_v52, %v6249_v48 }
 0x2e1   : > { %9435 = vmatmul.mubr.bf16.gmra.mxu1 %v5477_v54  ;;  %9662 = vmatprep.subr.bf16.mxu0 %v11219_v62  ;;  %v9963_v54 = vld [vmem:[#allocation9 + $0x1a0] sm:$0xff]  }
 0x2e2   : > { %9487 = vmatmul.mubr.bf16.gmra.mxu0 %v5478_v2  ;;  %9438 = vmatprep.mubr.bf16.mxu1 %v5478_v2  ;;  %v9971_v2 = vld [vmem:[#allocation9 + $0x1d8] sm:$0xff]  }
 0x2e3   : > { %9490 = vmatprep.mubr.bf16.mxu0 %v5479_v26 }
 0x2e9   : > { %9439 = vmatmul.mubr.bf16.gmra.mxu1 %v5479_v26  ;;  %v5847_v26 = vld [vmem:[#allocation2 + $0x63] sm:$0xff] }
 0x2ea   : > { %9491 = vmatmul.mubr.bf16.gmra.mxu0 %v5480_v17  ;;  %9442 = vmatprep.mubr.bf16.mxu1 %v5480_v17  ;;  %v5878_v55 = vpack.c.bf16 %v5848_v7, %v5847_v26  ;;  %v4276_v7 = vld [vmem:[#allocation3] sm:$0xff] }
 0x2eb   : > { %9494 = vmatprep.mubr.bf16.mxu0 %v5481_v45  ;;  %v5863_v26 = vld [vmem:[#allocation2 + $0xe3] sm:$0xff] }
 0x2f1   : > { %9443 = vmatmul.mubr.bf16.gmra.mxu1 %v5481_v45  ;;  %v5879_v45 = vpack.c.bf16 %v5850_v51, %v5849_v36  ;;  %v4279_v51 = vld [vmem:[#allocation3 + $0x18] sm:$0xff] }
 0x2f2   : > { %9495 = vmatmul.mubr.bf16.gmra.mxu0 %v5482_v9  ;;  %9446 = vmatprep.mubr.bf16.mxu1 %v5482_v9  ;;  %v5852_v9 = vld [vmem:[#allocation2 + $0x8b] sm:$0xff] }
 0x2f3   : > { %9498 = vmatprep.mubr.bf16.mxu0 %v5483_v15  ;;  %v5880_v56 = vpack.c.bf16 %v5852_v9, %v5851_v20  ;;  %v6270_v9 = vld [vmem:[#allocation2 + $0xfc] sm:$0xff] }
 0x2f9   : > { %9447 = vmatmul.mubr.bf16.gmra.mxu1 %v5483_v15  ;;  %v9970_v15 = vld [vmem:[#allocation9 + $0x188] sm:$0xff]  }
 0x2fa   : > { %9499 = vmatmul.mubr.bf16.gmra.mxu0 %v5484_v5  ;;  %9450 = vmatprep.mubr.bf16.mxu1 %v5484_v5  ;;  %v6257_v5 = vld [vmem:[#allocation2 + $0x94] sm:$0xff] }
 0x2fb   : > { %9502 = vmatprep.mubr.bf16.mxu0 %v5485_v33 }
 0x301   : > { %9451 = vmatmul.mubr.bf16.gmra.mxu1 %v5485_v33  ;;  %v6258_v33 = vld [vmem:[#allocation2 + $0x9c] sm:$0xff] }
 0x302   : > { %9503 = vmatmul.mubr.bf16.gmra.mxu0 %v5486_v29  ;;  %9522 = vmatprep.mubr.bf16.mxu1 %v5873_v49  ;;  %v11245_v4 = vpack.c.bf16 %v6258_v33, %v6257_v5  ;;  %v9975_v29 = vld [vmem:[#allocation9 + $0x1c0] sm:$0xff]   ;;  %v11268_v5 = vpack.c.bf16 %v6268_v10, %v6267_v37 }
 0x303   : > { %9574 = vmatprep.mubr.bf16.mxu0 %v6277_v14  ;;  %v5856_v49 = vld [vmem:[#allocation2 + $0xab] sm:$0xff] }
 0x304   : > { %v6259_v14 = vld [vmem:[#allocation2 + $0xa4] sm:$0xff] }
 0x305   : > { %v11251_v23 = vpack.c.bf16 %v6260_v1, %v6259_v14  ;;  %v5868_v14 = vld [vmem:[#allocation2 + $0x10b] sm:$0xff] }
 0x306   : > { %v6272_v1 = vld [vmem:[#allocation2 + $0x10c] sm:$0xff] }
 0x307   : > { %v5872_v37 = vld [vmem:[#allocation2 + $0x12b] sm:$0xff] }
 0x309   : > { %9523 = vmatmul.mubr.bf16.vlgmr.msra.gmra.mxu1 %v5874_v24  ;;  %v5882_v24 = vpack.c.bf16 %v5856_v49, %v5855_v34  ;;  %v5867_v34 = vld [vmem:[#allocation2 + $0x103] sm:$0xff] }
 0x30a   : > { %9575 = vmatmul.mubr.bf16.vlgmr.msra.gmra.mxu0 %v11223_v60  ;;  %9526 = vmatprep.mubr.bf16.mxu1 %v5875_v13  ;;  %v5883_v13 = vpack.c.bf16 %v5858_v30, %v5857_v0  ;;  %v5869_v0 = vld [vmem:[#allocation2 + $0x113] sm:$0xff]  ;;  %v5870_v30 = vld [vmem:[#allocation2 + $0x11b] sm:$0xff] }
 0x30b   : > { %9578 = vmatprep.mubr.bf16.mxu0 %v11225_v59  ;;  %9611 = vmatpush3.bf16.msra.mxu1 %v11217_v47  ;;  %v9969_v47 = vld [vmem:[#allocation9 + $0x1e0] sm:$0xff]  }
 0x30c   : > { %9612 = vmatprep.subr.bf16.mxu1 %v9961_v31  ;;  %9663 = vmatpush3.bf16.msra.mxu0 %v11219_v62  ;;  %v6252_v62 = vld [vmem:[#allocation2 + $0x6c] sm:$0xff] }
 0x30d   : > { %9664 = vmatprep.subr.bf16.mxu0 %v9966_v21  ;;  %v11237_v17 = vpack.c.bf16 %v6252_v62, %v6251_v12 }
 0x30f   : > { %9613 = vmatpush3.bf16.msra.mxu1 %v9961_v31  ;;  %v11254_v31 = vpack.c.bf16 %v6262_v8, %v6261_v38  ;;  %v6273_v38 = vld [vmem:[#allocation2 + $0x114] sm:$0xff]  ;;  %v6274_v8 = vld [vmem:[#allocation2 + $0x11c] sm:$0xff] }
 0x310   : > { %9614 = vmatprep.subr.bf16.mxu1 %v9962_v42  ;;  %9665 = vmatpush3.bf16.msra.mxu0 %v9966_v21  ;;  %v5860_v21 = vld [vmem:[#allocation2 + $0xcb] sm:$0xff] }
 0x311   : > { %9527 = vmatmul.mubr.bf16.gmra.mxu1 %v5876_v32  ;;  %9666 = vmatprep.subr.bf16.mxu0 %v9968_v35  ;;  %v5884_v48 = vpack.c.bf16 %v5860_v21, %v5859_v53  ;;  %v6263_v32 = vld [vmem:[#allocation2 + $0xc4] sm:$0xff]  ;;  %v11280_v53 = vpack.c.bf16 %v6274_v8, %v6273_v38 }
 0x312   : > { %9579 = vmatmul.mubr.bf16.gmra.mxu0 %v11231_v28  ;;  %9530 = vmatprep.mubr.bf16.mxu1 %v5877_v25  ;;  %v11258_v19 = vpack.c.bf16 %v6264_v27, %v6263_v32  ;;  %v6271_v21 = vld [vmem:[#allocation2 + $0x104] sm:$0xff] }
 0x313   : > { %9582 = vmatprep.mubr.bf16.mxu0 %v11233_v57  ;;  %9615 = vmatpush3.bf16.msra.mxu1 %v9962_v42  ;;  %v5861_v42 = vld [vmem:[#allocation2 + $0xd3] sm:$0xff]  ;;  %v11278_v27 = vpack.c.bf16 %v6272_v1, %v6271_v21  ;;  %v7052_v21 = vld [vmem:[#allocation2 + $0x3d] sm:$0xff] }
 0x314   : > { %9616 = vmatprep.subr.bf16.mxu1 %v9963_v54  ;;  %9667 = vmatpush3.bf16.msra.mxu0 %v9968_v35  ;;  %v6265_v35 = vld [vmem:[#allocation2 + $0xd4] sm:$0xff]  ;;  %v5885_v25 = vpack.c.bf16 %v5862_v58, %v5861_v42  ;;  %v5889_v42 = vpack.c.bf16 %v5870_v30, %v5869_v0  ;;  %v4287_v0 = vld [vmem:[#allocation3 + $0x58] sm:$0xff] }
 0x315   : > { %9668 = vmatprep.subr.bf16.mxu0 %v9969_v47  ;;  %v11260_v52 = vpack.c.bf16 %v6266_v44, %v6265_v35  ;;  %v4280_v35 = vld [vmem:[#allocation3 + $0x20] sm:$0xff] }
 0x317   : > { %9617 = vmatpush3.bf16.msra.mxu1 %v9963_v54 }
 0x318   : > { %9618 = vmatprep.subr.bf16.mxu1 %v9964_v40  ;;  %9669 = vmatpush3.bf16.msra.mxu0 %v9969_v47 }
 0x319   : > { %9531 = vmatmul.mubr.bf16.gmra.mxu1 %v5878_v55  ;;  %9670 = vmatprep.subr.bf16.mxu0 %v9971_v2  ;;  %v5866_v55 = vld [vmem:[#allocation2 + $0xfb] sm:$0xff] }
 0x31a   : > { %9583 = vmatmul.mubr.bf16.gmra.mxu0 %v11237_v17  ;;  %9534 = vmatprep.mubr.bf16.mxu1 %v5879_v45 }
 0x31b   : > { %9586 = vmatprep.mubr.bf16.mxu0 %v11239_v18  ;;  %9619 = vmatpush3.bf16.msra.mxu1 %v9964_v40 }
 0x31c   : > { %9620 = vmatprep.subr.bf16.mxu1 %v9967_v61  ;;  %9671 = vmatpush3.bf16.msra.mxu0 %v9971_v2 }
 0x31d   : > { %9672 = vmatprep.subr.bf16.mxu0 %v9972_v6 }
 0x31f   : > { %9621 = vmatpush3.bf16.msra.mxu1 %v9967_v61  ;;  %v4277_v61 = vld [vmem:[#allocation3 + $0x8] sm:$0xff] }
 0x320   : > { %9622 = vmatprep.subr.bf16.mxu1 %v9970_v15  ;;  %9673 = vmatpush3.bf16.msra.mxu0 %v9972_v6  ;;  %v5864_v6 = vld [vmem:[#allocation2 + $0xeb] sm:$0xff] }
 0x321   : > { %9535 = vmatmul.mubr.bf16.gmra.mxu1 %v5880_v56  ;;  %9674 = vmatprep.subr.bf16.mxu0 %v9974_v43  ;;  %v5886_v3 = vpack.c.bf16 %v5864_v6, %v5863_v26  ;;  %v6269_v56 = vld [vmem:[#allocation2 + $0xf4] sm:$0xff]  ;;  %v6276_v6 = vld [vmem:[#allocation2 + $0x12c] sm:$0xff] }
 0x322   : > { %9587 = vmatmul.mubr.bf16.gmra.mxu0 %v11243_v46  ;;  %9538 = vmatprep.mubr.bf16.mxu1 %v5881_v50 }
 0x323   : > { %9590 = vmatprep.mubr.bf16.mxu0 %v11245_v4  ;;  %9623 = vmatpush3.bf16.msra.mxu1 %v9970_v15 }
 0x324   : > { %9624 = vmatprep.subr.bf16.mxu1 %v9973_v41  ;;  %9675 = vmatpush3.bf16.msra.mxu0 %v9974_v43  ;;  %v5865_v43 = vld [vmem:[#allocation2 + $0xf3] sm:$0xff] }
 0x325   : > { %9676 = vmatprep.subr.bf16.mxu0 %v9975_v29  ;;  %v5887_v33 = vpack.c.bf16 %v5866_v55, %v5865_v43  ;;  %v7050_v55 = vld [vmem:[#allocation2 + $0x2d] sm:$0xff]  ;;  %v7049_v43 = vld [vmem:[#allocation2 + $0x25] sm:$0xff] }
 0x327   : > { %9625 = vmatpush3.bf16.msra.mxu1 %v9973_v41  ;;  %v11272_v41 = vpack.c.bf16 %v6270_v9, %v6269_v56  ;;  %v4284_v56 = vld [vmem:[#allocation3 + $0x40] sm:$0xff] }
 0x328   : > { %9677 = vmatpush3.bf16.msra.mxu0 %v9975_v29  ;;  %9714 = vmatprep.subr.bf16.mxu1 %v11249_v39 }
 0x329   : > { %9539 = vmatmul.mubr.bf16.gmra.mxu1 %v5882_v24  ;;  %v4282_v24 = vld [vmem:[#allocation3 + $0x30] sm:$0xff] }
 0x32a   : > { %9591 = vmatmul.mubr.bf16.gmra.mxu0 %v11251_v23  ;;  %9542 = vmatprep.mubr.bf16.mxu1 %v5883_v13  ;;  %v5888_v13 = vpack.c.bf16 %v5868_v14, %v5867_v34 }
 0x32b   : > { %9594 = vmatprep.mubr.bf16.mxu0 %v11254_v31 }
 0x32f   : > { %v9316_v54 = vpop.f32.mrf.mxu1 }
 0x330   : > { %v9368_v47 = vpop.f32.mrf.mxu0  ;;  %v4555_v62 = vadd.f32 %v9316_v54, %v4278_v63  ;;  %v4283_v63 = vld [vmem:[#allocation3 + $0x38] sm:$0xff] }
 0x331   : > { %9543 = vmatmul.mubr.bf16.gmra.mxu1 %v5884_v48  ;;  %v4410_v40 = vpop.f32.mrf.mxu1 }
 0x332   : > { %9595 = vmatmul.mubr.bf16.gmra.mxu0 %v11258_v19  ;;  %9546 = vmatprep.mubr.bf16.mxu1 %v5885_v25  ;;  %v4814_v36 = vpop.f32.mrf.mxu0  ;;  %v11264_v2 = vadd.f32 %v9368_v47, %v4555_v62  ;;  %v4553_v16 = vadd.f32 %v4410_v40, %v4276_v7  ;;  %v5871_v7 = vld [vmem:[#allocation2 + $0x123] sm:$0xff]  ;;  %v4281_v40 = vld [vmem:[#allocation3 + $0x28] sm:$0xff] }
 0x333   : > { %9598 = vmatprep.mubr.bf16.mxu0 %v11260_v52  ;;  %v9317_v12 = vpop.f32.mrf.mxu1 }
 0x334   : > { %v9369_v45 = vpop.f32.mrf.mxu0  ;;  %v11266_v11 = vadd.f32 %v4814_v36, %v4553_v16  ;;  %v4556_v15 = vadd.f32 %v9317_v12, %v4279_v51  ;;  %v6275_v36 = vld [vmem:[#allocation2 + $0x124] sm:$0xff] }
 0x335   : > { %v4413_v20 = vpop.f32.mrf.mxu1  ;;  %v11290_v10 = vpack.c.bf16 %v6276_v6, %v6275_v36 }
 0x336   : > { %v11270_v22 = vadd.f32 %v9369_v45, %v4556_v15  ;;  %v4554_v50 = vadd.f32 %v4413_v20, %v4277_v61  ;;  %v4817_v29 = vpop.f32.mrf.mxu0  ;;  %v4286_v45 = vld [vmem:[#allocation3 + $0x50] sm:$0xff]  ;;  %v5890_v61 = vpack.c.bf16 %v5872_v37, %v5871_v7  ;;  %v7053_v7 = vld [vmem:[#allocation2 + $0x45] sm:$0xff] }
 0x338   : > { %v11275_v49 = vadd.f32 %v4817_v29, %v4554_v50 }
 0x339   : > { %9547 = vmatmul.mubr.bf16.gmra.mxu1 %v5886_v3 }
 0x33a   : > { %9599 = vmatmul.mubr.bf16.gmra.mxu0 %v11268_v5  ;;  %9550 = vmatprep.mubr.bf16.mxu1 %v5887_v33  ;;  %v7085_v33 = vpack.c.bf16 %v7050_v55, %v7049_v43  ;;  %v4289_v43 = vld [vmem:[#allocation3 + $0x68] sm:$0xff] }
 0x33b   : > { %9602 = vmatprep.mubr.bf16.mxu0 %v11272_v41 }
 0x33f   : > { %v9320_v58 = vpop.f32.mrf.mxu1 }
 0x340   : > { %v4559_v44 = vadd.f32 %v9320_v58, %v4282_v24  ;;  %v9372_v48 = vpop.f32.mrf.mxu0  ;;  %v4285_v24 = vld [vmem:[#allocation3 + $0x48] sm:$0xff] }
 0x341   : > { %9551 = vmatmul.mubr.bf16.gmra.mxu1 %v5888_v13  ;;  %v4426_v32 = vpop.f32.mrf.mxu1  ;;  %v7051_v13 = vld [vmem:[#allocation2 + $0x35] sm:$0xff] }
 0x342   : > { %9603 = vmatmul.mubr.bf16.gmra.mxu0 %v11278_v27  ;;  %9554 = vmatprep.mubr.bf16.mxu1 %v5889_v42  ;;  %v11284_v25 = vadd.f32 %v9372_v48, %v4559_v44  ;;  %v4557_v54 = vadd.f32 %v4426_v32, %v4280_v35  ;;  %v4830_v47 = vpop.f32.mrf.mxu0  ;;  %v7054_v44 = vld [vmem:[#allocation2 + $0x4d] sm:$0xff]  ;;  %v4290_v32 = vld [vmem:[#allocation3 + $0x70] sm:$0xff] }
 0x343   : > { %9606 = vmatprep.mubr.bf16.mxu0 %v11280_v53  ;;  %v9321_v62 = vpop.f32.mrf.mxu1  ;;  %v7087_v36 = vpack.c.bf16 %v7054_v44, %v7053_v7 }
 0x344   : > { %v11286_v51 = vadd.f32 %v4830_v47, %v4557_v54  ;;  %v4560_v26 = vadd.f32 %v9321_v62, %v4283_v63  ;;  %v9373_v16 = vpop.f32.mrf.mxu0  ;;  %v7086_v47 = vpack.c.bf16 %v7052_v21, %v7051_v13  ;;  %v9977_v62 = vld [vmem:[#allocation9 + $0x230] sm:$0xff]   ;;  %v9979_v13 = vld [vmem:[#allocation9 + $0x220] sm:$0xff]  }
 0x345   : > { %v4429_v12 = vpop.f32.mrf.mxu1 }
 0x346   : > { %v11288_v9 = vadd.f32 %v9373_v16, %v4560_v26  ;;  %v4558_v15 = vadd.f32 %v4429_v12, %v4281_v40  ;;  %v4833_v3 = vpop.f32.mrf.mxu0  ;;  %v4288_v26 = vld [vmem:[#allocation3 + $0x60] sm:$0xff] }
 0x347   : > { %v9324_v20 = vpop.f32.mrf.mxu1 }
 0x348   : > { %v11292_v50 = vadd.f32 %v4833_v3, %v4558_v15  ;;  %v4563_v29 = vadd.f32 %v9324_v20, %v4286_v45  ;;  %v9376_v14 = vpop.f32.mrf.mxu0  ;;  %v4291_v45 = vld [vmem:[#allocation3 + $0x78] sm:$0xff]  ;;  %v7055_v20 = vld [vmem:[#allocation2 + $0x55] sm:$0xff] }
 0x349   : > { %9555 = vmatmul.mubr.bf16.gmra.mxu1 %v5890_v61  ;;  %v4442_v1 = vpop.f32.mrf.mxu1 }
 0x34a   : > { %9607 = vmatmul.mubr.bf16.gmra.mxu0 %v11290_v10  ;;  %9626 = vmatprep.mubr.bf16.mxu1 %v11223_v60  ;;  %v11296_v30 = vadd.f32 %v9376_v14, %v4563_v29  ;;  %v4561_v34 = vadd.f32 %v4442_v1, %v4284_v56  ;;  %v4846_v38 = vpop.f32.mrf.mxu0  ;;  %v7058_v14 = vld [vmem:[#allocation2 + $0x6d] sm:$0xff]  ;;  %v4294_v1 = vld [vmem:[#allocation3 + $0x90] sm:$0xff] }
 0x34b   : > { %9678 = vmatprep.mubr.bf16.mxu0 %v7085_v33  ;;  %v9325_v8 = vpop.f32.mrf.mxu1 }
 0x34c   : > { %v11298_v42 = vadd.f32 %v4846_v38, %v4561_v34  ;;  %v4564_v58 = vadd.f32 %v9325_v8, %v4287_v0  ;;  %v9377_v35 = vpop.f32.mrf.mxu0  ;;  %v7056_v0 = vld [vmem:[#allocation2 + $0x5d] sm:$0xff] }
 0x34d   : > { %v4445_v48 = vpop.f32.mrf.mxu1  ;;  %v7088_v8 = vpack.c.bf16 %v7056_v0, %v7055_v20 }
 0x34e   : > { %v11300_v63 = vadd.f32 %v9377_v35, %v4564_v58  ;;  %v4562_v60 = vadd.f32 %v4445_v48, %v4285_v24  ;;  %v4849_v54 = vpop.f32.mrf.mxu0  ;;  %v7057_v24 = vld [vmem:[#allocation2 + $0x65] sm:$0xff] }
 0x34f   : > { %v7089_v58 = vpack.c.bf16 %v7058_v14, %v7057_v24  ;;  %v4292_v35 = vld [vmem:[#allocation3 + $0x80] sm:$0xff]  ;;  %v4299_v24 = vld [vmem:[#allocation3 + $0xb8] sm:$0xff] }
 0x350   : > { %v11303_v16 = vadd.f32 %v4849_v54, %v4562_v60  ;;  %v4295_v54 = vld [vmem:[#allocation3 + $0x98] sm:$0xff] }
 0x351   : > { %v9328_v40 = vpop.f32.mrf.mxu1  ;;  %9627 = vmatmul.mubr.bf16.vlgmr.msra.gmra.mxu1 %v11225_v59  ;;  %v9978_v59 = vld [vmem:[#allocation9 + $0x228] sm:$0xff]  }
 0x352   : > { %v4567_v37 = vadd.f32 %v9328_v40, %v4290_v32  ;;  %v9380_v55 = vpop.f32.mrf.mxu0  ;;  %9679 = vmatmul.mubr.bf16.vlgmr.msra.gmra.mxu0 %v7086_v47  ;;  %9630 = vmatprep.mubr.bf16.mxu1 %v11231_v28  ;;  %v9980_v40 = vld [vmem:[#allocation9 + $0x218] sm:$0xff]  }
 0x353   : > { %9682 = vmatprep.mubr.bf16.mxu0 %v7087_v36  ;;  %9715 = vmatpush3.bf16.msra.mxu1 %v11249_v39  ;;  %v4458_v12 = vpop.f32.mrf.mxu1  ;;  %v4293_v36 = vld [vmem:[#allocation3 + $0x88] sm:$0xff] }
 0x354   : > { %v11307_v61 = vadd.f32 %v9380_v55, %v4567_v37  ;;  %v4565_v6 = vadd.f32 %v4458_v12, %v4288_v26  ;;  %v4862_v15 = vpop.f32.mrf.mxu0  ;;  %9716 = vmatprep.subr.bf16.mxu1 %v9977_v62  ;;  %v7059_v26 = vld [vmem:[#allocation2 + $0x75] sm:$0xff]  ;;  %v7060_v37 = vld [vmem:[#allocation2 + $0x7d] sm:$0xff] }
 0x355   : > { %v9329_v3 = vpop.f32.mrf.mxu1  ;;  %v7090_v20 = vpack.c.bf16 %v7060_v37, %v7059_v26  ;;  %v4302_v26 = vld [vmem:[#allocation3 + $0xd0] sm:$0xff] }
 0x356   : > { %v11309_v33 = vadd.f32 %v4862_v15, %v4565_v6  ;;  %v4568_v56 = vadd.f32 %v9329_v3, %v4291_v45  ;;  %v9381_v29 = vpop.f32.mrf.mxu0  ;;  %v7062_v6 = vld [vmem:[#allocation2 + $0x8d] sm:$0xff]  ;;  %v4298_v15 = vld [vmem:[#allocation3 + $0xb0] sm:$0xff] }
 0x357   : > { %v4461_v28 = vpop.f32.mrf.mxu1  ;;  %9717 = vmatpush3.bf16.msra.mxu1 %v9977_v62 }
 0x358   : > { %v11311_v39 = vadd.f32 %v9381_v29, %v4568_v56  ;;  %v4566_v34 = vadd.f32 %v4461_v28, %v4289_v43  ;;  %v4865_v38 = vpop.f32.mrf.mxu0  ;;  %9718 = vmatprep.subr.bf16.mxu1 %v9978_v59  ;;  %v7061_v56 = vld [vmem:[#allocation2 + $0x85] sm:$0xff]  ;;  %v9981_v29 = vld [vmem:[#allocation9 + $0x210] sm:$0xff]  }
 0x359   : > { %v9332_v21 = vpop.f32.mrf.mxu1  ;;  %9631 = vmatmul.mubr.bf16.gmra.mxu1 %v11233_v57  ;;  %v7091_v28 = vpack.c.bf16 %v7062_v6, %v7061_v56  ;;  %v9983_v6 = vld [vmem:[#allocation9 + $0x200] sm:$0xff]  }
 0x35a   : > { %v11314_v44 = vadd.f32 %v4865_v38, %v4566_v34  ;;  %v4571_v48 = vadd.f32 %v9332_v21, %v4294_v1  ;;  %v9384_v32 = vpop.f32.mrf.mxu0  ;;  %9683 = vmatmul.mubr.bf16.gmra.mxu0 %v7088_v8  ;;  %9634 = vmatprep.mubr.bf16.mxu1 %v11237_v17  ;;  %v4296_v1 = vld [vmem:[#allocation3 + $0xa0] sm:$0xff] }
 0x35b   : > { %9686 = vmatprep.mubr.bf16.mxu0 %v7089_v58  ;;  %v4474_v60 = vpop.f32.mrf.mxu1  ;;  %9719 = vmatpush3.bf16.msra.mxu1 %v9978_v59 }
 0x35c   : > { %v11317_v47 = vadd.f32 %v9384_v32, %v4571_v48  ;;  %v4569_v7 = vadd.f32 %v4474_v60, %v4292_v35  ;;  %v4878_v62 = vpop.f32.mrf.mxu0  ;;  %9720 = vmatprep.subr.bf16.mxu1 %v9979_v13  ;;  %v9982_v35 = vld [vmem:[#allocation9 + $0x208] sm:$0xff]   ;;  %v7064_v60 = vld [vmem:[#allocation2 + $0x9d] sm:$0xff] }
 0x35d   : > { %v9333_v57 = vpop.f32.mrf.mxu1  ;;  %v4297_v48 = vld [vmem:[#allocation3 + $0xa8] sm:$0xff] }
 0x35e   : > { %v11319_v55 = vadd.f32 %v4878_v62, %v4569_v7  ;;  %v4572_v12 = vadd.f32 %v9333_v57, %v4295_v54  ;;  %v9385_v45 = vpop.f32.mrf.mxu0  ;;  %v7063_v32 = vld [vmem:[#allocation2 + $0x95] sm:$0xff]  ;;  %v7065_v57 = vld [vmem:[#allocation2 + $0xa5] sm:$0xff] }
 0x35f   : > { %v4477_v17 = vpop.f32.mrf.mxu1  ;;  %9721 = vmatpush3.bf16.msra.mxu1 %v9979_v13 }
 0x360   : > { %v11321_v3 = vadd.f32 %v9385_v45, %v4572_v12  ;;  %v4570_v59 = vadd.f32 %v4477_v17, %v4293_v36  ;;  %v4881_v43 = vpop.f32.mrf.mxu0  ;;  %9722 = vmatprep.subr.bf16.mxu1 %v9980_v40  ;;  %v7092_v45 = vpack.c.bf16 %v7064_v60, %v7063_v32 }
 0x361   : > { %v9336_v14 = vpop.f32.mrf.mxu1  ;;  %9635 = vmatmul.mubr.bf16.gmra.mxu1 %v11239_v18 }
 0x362   : > { %v11324_v0 = vadd.f32 %v4881_v43, %v4570_v59  ;;  %v4575_v34 = vadd.f32 %v9336_v14, %v4298_v15  ;;  %v9388_v38 = vpop.f32.mrf.mxu0  ;;  %9687 = vmatmul.mubr.bf16.gmra.mxu0 %v7090_v20  ;;  %9638 = vmatprep.mubr.bf16.mxu1 %v11243_v46  ;;  %v7066_v46 = vld [vmem:[#allocation2 + $0xad] sm:$0xff]  ;;  %v4303_v14 = vld [vmem:[#allocation3 + $0xd8] sm:$0xff] }
 0x363   : > { %9690 = vmatprep.mubr.bf16.mxu0 %v7091_v28  ;;  %v4490_v8 = vpop.f32.mrf.mxu1  ;;  %9723 = vmatpush3.bf16.msra.mxu1 %v9980_v40  ;;  %v7093_v15 = vpack.c.bf16 %v7066_v46, %v7065_v57  ;;  %v4300_v59 = vld [vmem:[#allocation3 + $0xc0] sm:$0xff] }
 0x364   : > { %v11327_v13 = vadd.f32 %v9388_v38, %v4575_v34  ;;  %v4573_v21 = vadd.f32 %v4490_v8, %v4296_v1  ;;  %v4894_v58 = vpop.f32.mrf.mxu0  ;;  %9724 = vmatprep.subr.bf16.mxu1 %v9981_v29  ;;  %v7067_v8 = vld [vmem:[#allocation2 + $0xb5] sm:$0xff]  ;;  %v7069_v57 = vld [vmem:[#allocation2 + $0xc5] sm:$0xff] }
 0x365   : > { %v9337_v18 = vpop.f32.mrf.mxu1 }
 0x366   : > { %v11329_v54 = vadd.f32 %v4894_v58, %v4573_v21  ;;  %v4576_v7 = vadd.f32 %v9337_v18, %v4299_v24  ;;  %v9389_v62 = vpop.f32.mrf.mxu0  ;;  %v7068_v24 = vld [vmem:[#allocation2 + $0xbd] sm:$0xff] }
 0x367   : > { %v4493_v36 = vpop.f32.mrf.mxu1  ;;  %9725 = vmatpush3.bf16.msra.mxu1 %v9981_v29 }
 0x368   : > { %v11331_v40 = vadd.f32 %v9389_v62, %v4576_v7  ;;  %v4574_v37 = vadd.f32 %v4493_v36, %v4297_v48  ;;  %v4897_v12 = vpop.f32.mrf.mxu0  ;;  %9726 = vmatprep.subr.bf16.mxu1 %v9982_v35  ;;  %v7070_v48 = vld [vmem:[#allocation2 + $0xcd] sm:$0xff]  ;;  %v7094_v62 = vpack.c.bf16 %v7068_v24, %v7067_v8  ;;  %v4310_v24 = vld [vmem:[#allocation3 + $0x110] sm:$0xff] }
 0x369   : > { %v9340_v17 = vpop.f32.mrf.mxu1  ;;  %9639 = vmatmul.mubr.bf16.gmra.mxu1 %v11245_v4  ;;  %v4301_v4 = vld [vmem:[#allocation3 + $0xc8] sm:$0xff]  ;;  %v7095_v36 = vpack.c.bf16 %v7070_v48, %v7069_v57 }
 0x36a   : > { %v11334_v43 = vadd.f32 %v4897_v12, %v4574_v37  ;;  %v4579_v20 = vadd.f32 %v9340_v17, %v4302_v26  ;;  %v9392_v56 = vpop.f32.mrf.mxu0  ;;  %9691 = vmatmul.mubr.bf16.gmra.mxu0 %v7092_v45  ;;  %9642 = vmatprep.mubr.bf16.mxu1 %v11251_v23  ;;  %v4306_v23 = vld [vmem:[#allocation3 + $0xf0] sm:$0xff]  ;;  %v4304_v26 = vld [vmem:[#allocation3 + $0xe0] sm:$0xff]  ;;  %v4307_v17 = vld [vmem:[#allocation3 + $0xf8] sm:$0xff] }
 0x36b   : > { %9694 = vmatprep.mubr.bf16.mxu0 %v7093_v15  ;;  %v4506_v29 = vpop.f32.mrf.mxu1  ;;  %9727 = vmatpush3.bf16.msra.mxu1 %v9982_v35 }
 0x36c   : > { %v11337_v28 = vadd.f32 %v9392_v56, %v4579_v20  ;;  %v4577_v1 = vadd.f32 %v4506_v29, %v4300_v59  ;;  %v4910_v34 = vpop.f32.mrf.mxu0  ;;  %9728 = vmatprep.subr.bf16.mxu1 %v9983_v6  ;;  %v4305_v29 = vld [vmem:[#allocation3 + $0xe8] sm:$0xff] }
 0x36d   : > { %v9341_v38 = vpop.f32.mrf.mxu1 }
 0x36e   : > { %v11339_v21 = vadd.f32 %v4910_v34, %v4577_v1  ;;  %v4580_v58 = vadd.f32 %v9341_v38, %v4303_v14  ;;  %v9393_v18 = vpop.f32.mrf.mxu0  ;;  %v7071_v14 = vld [vmem:[#allocation2 + $0xd5] sm:$0xff] }
 0x36f   : > { %v4509_v32 = vpop.f32.mrf.mxu1  ;;  %9729 = vmatpush3.bf16.msra.mxu1 %v9983_v6 }
 0x370   : > { %v11341_v60 = vadd.f32 %v9393_v18, %v4580_v58  ;;  %v4578_v35 = vadd.f32 %v4509_v32, %v4301_v4  ;;  %v4913_v7 = vpop.f32.mrf.mxu0  ;;  %v7073_v4 = vld [vmem:[#allocation2 + $0xe5] sm:$0xff]  ;;  %v7074_v32 = vld [vmem:[#allocation2 + $0xed] sm:$0xff] }
 0x371   : > { %v9344_v46 = vpop.f32.mrf.mxu1  ;;  %9643 = vmatmul.mubr.bf16.gmra.mxu1 %v11254_v31  ;;  %v7072_v31 = vld [vmem:[#allocation2 + $0xdd] sm:$0xff] }
 0x372   : > { %v11344_v37 = vadd.f32 %v4913_v7, %v4578_v35  ;;  %v4583_v12 = vadd.f32 %v9344_v46, %v4306_v23  ;;  %v9396_v45 = vpop.f32.mrf.mxu0  ;;  %9695 = vmatmul.mubr.bf16.gmra.mxu0 %v7094_v62  ;;  %9646 = vmatprep.mubr.bf16.mxu1 %v11258_v19  ;;  %v7096_v48 = vpack.c.bf16 %v7072_v31, %v7071_v14  ;;  %v4308_v7 = vld [vmem:[#allocation3 + $0x100] sm:$0xff] }
 0x373   : > { %9698 = vmatprep.mubr.bf16.mxu0 %v7095_v36  ;;  %v4522_v6 = vpop.f32.mrf.mxu1  ;;  %v7097_v35 = vpack.c.bf16 %v7074_v32, %v7073_v4  ;;  %v7078_v14 = vld [vmem:[#allocation2 + $0x10d] sm:$0xff] }
 0x374   : > { %v11347_v15 = vadd.f32 %v9396_v45, %v4583_v12  ;;  %v4581_v59 = vadd.f32 %v4522_v6, %v4304_v26  ;;  %v4926_v20 = vpop.f32.mrf.mxu0  ;;  %v4311_v26 = vld [vmem:[#allocation3 + $0x118] sm:$0xff] }
 0x375   : > { %v9345_v56 = vpop.f32.mrf.mxu1 }
 0x376   : > { %v11349_v1 = vadd.f32 %v4926_v20, %v4581_v59  ;;  %v4584_v34 = vadd.f32 %v9345_v56, %v4307_v17  ;;  %v9397_v38 = vpop.f32.mrf.mxu0  ;;  %v4309_v59 = vld [vmem:[#allocation3 + $0x108] sm:$0xff]  ;;  %v7076_v20 = vld [vmem:[#allocation2 + $0xfd] sm:$0xff] }
 0x377   : > { %v4525_v8 = vpop.f32.mrf.mxu1 }
 0x378   : > { %v11351_v58 = vadd.f32 %v9397_v38, %v4584_v34  ;;  %v4582_v19 = vadd.f32 %v4525_v8, %v4305_v29  ;;  %v4929_v18 = vpop.f32.mrf.mxu0  ;;  %v7075_v34 = vld [vmem:[#allocation2 + $0xf5] sm:$0xff] }
 0x379   : > { %v9348_v23 = vpop.f32.mrf.mxu1  ;;  %9647 = vmatmul.mubr.bf16.gmra.mxu1 %v11260_v52  ;;  %v7098_v8 = vpack.c.bf16 %v7076_v20, %v7075_v34 }
 0x37a   : > { %v11354_v62 = vadd.f32 %v4929_v18, %v4582_v19  ;;  %v4587_v57 = vadd.f32 %v9348_v23, %v4310_v24  ;;  %v9400_v46 = vpop.f32.mrf.mxu0  ;;  %9699 = vmatmul.mubr.bf16.gmra.mxu0 %v7096_v48  ;;  %9650 = vmatprep.mubr.bf16.mxu1 %v11268_v5  ;;  %v7077_v24 = vld [vmem:[#allocation2 + $0x105] sm:$0xff] }
 0x37b   : > { %9702 = vmatprep.mubr.bf16.mxu0 %v7097_v35  ;;  %v4538_v36 = vpop.f32.mrf.mxu1  ;;  %v7099_v18 = vpack.c.bf16 %v7078_v14, %v7077_v24  ;;  %v7082_v14 = vld [vmem:[#allocation2 + $0x12d] sm:$0xff] }
 0x37c   : > { %v11357_v12 = vadd.f32 %v9400_v46, %v4587_v57  ;;  %v4585_v45 = vadd.f32 %v4538_v36, %v4308_v7  ;;  %v4942_v6 = vpop.f32.mrf.mxu0 }
 0x37d   : > { %v9349_v17 = vpop.f32.mrf.mxu1 }
 0x37e   : > { %v11359_v52 = vadd.f32 %v4942_v6, %v4585_v45  ;;  %v4588_v56 = vadd.f32 %v9349_v17, %v4311_v26  ;;  %v9401_v29 = vpop.f32.mrf.mxu0  ;;  %v7079_v26 = vld [vmem:[#allocation2 + $0x115] sm:$0xff]  ;;  %v7080_v45 = vld [vmem:[#allocation2 + $0x11d] sm:$0xff] }
 0x37f   : > { %v4541_v31 = vpop.f32.mrf.mxu1 }
 0x380   : > { %v11361_v38 = vadd.f32 %v9401_v29, %v4588_v56  ;;  %v4586_v5 = vadd.f32 %v4541_v31, %v4309_v59  ;;  %v4945_v4 = vpop.f32.mrf.mxu0  ;;  %v7100_v29 = vpack.c.bf16 %v7080_v45, %v7079_v26 }
 0x381   : > { %v9420_v19 = vpop.f32.mrf.mxu1  ;;  %9651 = vmatmul.mubr.bf16.gmra.mxu1 %v11272_v41 }
 0x382   : > { %v11364_v48 = vadd.f32 %v4945_v4, %v4586_v5  ;;  %v5363_v32 = vadd.f32 %v9420_v19, %v11264_v2  ;;  %v9472_v23 = vpop.f32.mrf.mxu0  ;;  %9703 = vmatmul.mubr.bf16.gmra.mxu0 %v7098_v8  ;;  %9654 = vmatprep.mubr.bf16.mxu1 %v11278_v27  ;;  %v7081_v2 = vld [vmem:[#allocation2 + $0x125] sm:$0xff]  ;;  %v6680_v8 = vld [vmem:[#allocation2 + $0x13c] sm:$0xff] }
 0x383   : > { %9706 = vmatprep.mubr.bf16.mxu0 %v7099_v18  ;;  %v5218_v35 = vpop.f32.mrf.mxu1  ;;  %v7084_v19 = vld [vmem:[#allocation2 + $0x13d] sm:$0xff] }
 0x384   : > { %v11368_v7 = vadd.f32 %v9472_v23, %v5363_v32  ;;  %v5361_v57 = vadd.f32 %v5218_v35, %v11266_v11  ;;  %v5622_v46 = vpop.f32.mrf.mxu0  ;;  %v7101_v11 = vpack.c.bf16 %v7082_v14, %v7081_v2 }
 0x385   : > { %v9421_v36 = vpop.f32.mrf.mxu1 }
 0x386   : > { %v11371_v41 = vadd.f32 %v5622_v46, %v5361_v57  ;;  %v5364_v6 = vadd.f32 %v9421_v36, %v11270_v22  ;;  %v9473_v17 = vpop.f32.mrf.mxu0  ;;  %v6679_v22 = vld [vmem:[#allocation2 + $0x134] sm:$0xff]  ;;  %v7453_v57 = vld [vmem:[#allocation2 + $0x26] sm:$0xff] }
 0x387   : > { %v5221_v59 = vpop.f32.mrf.mxu1  ;;  %v6698_v35 = vpack.c.bf16 %v6680_v8, %v6679_v22  ;;  %v7454_v46 = vld [vmem:[#allocation2 + $0x2e] sm:$0xff] }
 0x388   : > { %v11374_v20 = vadd.f32 %v9473_v17, %v5364_v6  ;;  %v5362_v27 = vadd.f32 %v5221_v59, %v11275_v49  ;;  %v5625_v56 = vpop.f32.mrf.mxu0  ;;  %v7083_v49 = vld [vmem:[#allocation2 + $0x135] sm:$0xff]  ;;  %v7489_v59 = vpack.c.bf16 %v7454_v46, %v7453_v57 }
 0x389   : > { %v9424_v31 = vpop.f32.mrf.mxu1  ;;  %9655 = vmatmul.mubr.bf16.gmra.mxu1 %v11280_v53  ;;  %v7102_v26 = vpack.c.bf16 %v7084_v19, %v7083_v49  ;;  %v7458_v22 = vld [vmem:[#allocation2 + $0x4e] sm:$0xff] }
 0x38a   : > { %v11378_v34 = vadd.f32 %v5625_v56, %v5362_v27  ;;  %v5367_v5 = vadd.f32 %v9424_v31, %v11284_v25  ;;  %v9476_v4 = vpop.f32.mrf.mxu0  ;;  %9707 = vmatmul.mubr.bf16.gmra.mxu0 %v7100_v29  ;;  %9658 = vmatprep.mubr.bf16.mxu1 %v11290_v10 }
 0x38b   : > { %9710 = vmatprep.mubr.bf16.mxu0 %v7101_v11  ;;  %v5234_v24 = vpop.f32.mrf.mxu1 }
 0x38c   : > { %v11382_v18 = vadd.f32 %v9476_v4, %v5367_v5  ;;  %v5365_v32 = vadd.f32 %v5234_v24, %v11286_v51  ;;  %v5638_v53 = vpop.f32.mrf.mxu0  ;;  %v7455_v5 = vld [vmem:[#allocation2 + $0x36] sm:$0xff]  ;;  %v7456_v4 = vld [vmem:[#allocation2 + $0x3e] sm:$0xff] }
 0x38d   : > { %v9425_v23 = vpop.f32.mrf.mxu1 }
 0x38e   : > { %v11385_v25 = vadd.f32 %v5638_v53, %v5365_v32  ;;  %v5368_v36 = vadd.f32 %v9425_v23, %v11288_v9  ;;  %v9477_v10 = vpop.f32.mrf.mxu0  ;;  %v7457_v32 = vld [vmem:[#allocation2 + $0x46] sm:$0xff] }
 0x38f   : > { %v5237_v45 = vpop.f32.mrf.mxu1  ;;  %v7491_v57 = vpack.c.bf16 %v7458_v22, %v7457_v32 }
 0x390   : > { %v11388_v6 = vadd.f32 %v9477_v10, %v5368_v36  ;;  %v5366_v17 = vadd.f32 %v5237_v45, %v11292_v50  ;;  %v5641_v2 = vpop.f32.mrf.mxu0 }
 0x391   : > { %v9428_v27 = vpop.f32.mrf.mxu1  ;;  %9659 = vmatmul.mubr.bf16.gmra.mxu1 %v6698_v35 }
 0x392   : > { %v11391_v51 = vadd.f32 %v5641_v2, %v5366_v17  ;;  %v5371_v56 = vadd.f32 %v9428_v27, %v11296_v30  ;;  %v9480_v29 = vpop.f32.mrf.mxu0  ;;  %9730 = vmatprep.mubr.bf16.mxu1 %v7489_v59  ;;  %9711 = vmatmul.mubr.bf16.gmra.mxu0 %v7102_v26  ;;  %v7490_v30 = vpack.c.bf16 %v7456_v4, %v7455_v5  ;;  %v7459_v2 = vld [vmem:[#allocation2 + $0x56] sm:$0xff]  ;;  %v7462_v27 = vld [vmem:[#allocation2 + $0x6e] sm:$0xff] }
 0x393   : > { %v5250_v14 = vpop.f32.mrf.mxu1 }
 0x394   : > { %v11394_v9 = vadd.f32 %v9480_v29, %v5371_v56  ;;  %v5369_v31 = vadd.f32 %v5250_v14, %v11298_v42  ;;  %v5654_v11 = vpop.f32.mrf.mxu0  ;;  %v7460_v14 = vld [vmem:[#allocation2 + $0x5e] sm:$0xff] }
 0x395   : > { %v9429_v50 = vpop.f32.mrf.mxu1 }
 0x396   : > { %v11397_v8 = vadd.f32 %v5654_v11, %v5369_v31  ;;  %v5372_v24 = vadd.f32 %v9429_v50, %v11300_v63  ;;  %v9481_v49 = vpop.f32.mrf.mxu0  ;;  %v7492_v11 = vpack.c.bf16 %v7460_v14, %v7459_v2 }
 0x397   : > { %v5253_v19 = vpop.f32.mrf.mxu1 }
 0x398   : > { %v11400_v53 = vadd.f32 %v9481_v49, %v5372_v24  ;;  %v5370_v23 = vadd.f32 %v5253_v19, %v11303_v16  ;;  %v5657_v35 = vpop.f32.mrf.mxu0 }
 0x399   : > { %v9432_v42 = vpop.f32.mrf.mxu1  ;;  %9731 = vmatmul.mubr.bf16.vlgmr.msra.gmra.mxu1 %v7490_v30 }
 0x39a   : > { %v11403_v46 = vadd.f32 %v5657_v35, %v5370_v23  ;;  %v5375_v36 = vadd.f32 %v9432_v42, %v11307_v61  ;;  %v9484_v10 = vpop.f32.mrf.mxu0  ;;  %9734 = vmatprep.mubr.bf16.mxu1 %v7491_v57  ;;  %v7461_v61 = vld [vmem:[#allocation2 + $0x66] sm:$0xff]  ;;  %v7463_v35 = vld [vmem:[#allocation2 + $0x76] sm:$0xff]  ;;  %v7464_v57 = vld [vmem:[#allocation2 + $0x7e] sm:$0xff] }
 0x39b   : > { %v5266_v26 = vpop.f32.mrf.mxu1  ;;  %v7493_v22 = vpack.c.bf16 %v7462_v27, %v7461_v61 }
 0x39c   : > { %v11406_v63 = vadd.f32 %v9484_v10, %v5375_v36  ;;  %v5373_v45 = vadd.f32 %v5266_v26, %v11309_v33  ;;  %v5670_v17 = vpop.f32.mrf.mxu0 }
 0x39d   : > { %v9433_v59 = vpop.f32.mrf.mxu1 }
 0x39e   : > { %v11409_v16 = vadd.f32 %v5670_v17, %v5373_v45  ;;  %v5376_v56 = vadd.f32 %v9433_v59, %v11311_v39  ;;  %v9485_v29 = vpop.f32.mrf.mxu0  ;;  %v7494_v17 = vpack.c.bf16 %v7464_v57, %v7463_v35 }
 0x39f   : > { %v5269_v31 = vpop.f32.mrf.mxu1 }
 0x3a0   : > { %v11412_v5 = vadd.f32 %v9485_v29, %v5376_v56  ;;  %v5374_v4 = vadd.f32 %v5269_v31, %v11314_v44  ;;  %v5673_v50 = vpop.f32.mrf.mxu0  ;;  %v7466_v44 = vld [vmem:[#allocation2 + $0x8e] sm:$0xff] }
 0x3a1   : > { %v9436_v33 = vpop.f32.mrf.mxu1  ;;  %9735 = vmatmul.mubr.bf16.gmra.mxu1 %v7492_v11 }
 0x3a2   : > { %v11415_v24 = vadd.f32 %v5673_v50, %v5374_v4  ;;  %v5379_v49 = vadd.f32 %v9436_v33, %v11317_v47  ;;  %v9488_v19 = vpop.f32.mrf.mxu0  ;;  %9738 = vmatprep.mubr.bf16.mxu1 %v7493_v22  ;;  %v7465_v47 = vld [vmem:[#allocation2 + $0x86] sm:$0xff]  ;;  %v7467_v50 = vld [vmem:[#allocation2 + $0x96] sm:$0xff]  ;;  %v7468_v22 = vld [vmem:[#allocation2 + $0x9e] sm:$0xff] }
 0x3a3   : > { %v5282_v39 = vpop.f32.mrf.mxu1  ;;  %v7495_v56 = vpack.c.bf16 %v7466_v44, %v7465_v47 }
 0x3a4   : > { %v11418_v30 = vadd.f32 %v9488_v19, %v5379_v49  ;;  %v5377_v32 = vadd.f32 %v5282_v39, %v11319_v55  ;;  %v5686_v23 = vpop.f32.mrf.mxu0 }
 0x3a5   : > { %v9437_v42 = vpop.f32.mrf.mxu1 }
 0x3a6   : > { %v11421_v36 = vadd.f32 %v5686_v23, %v5377_v32  ;;  %v5380_v10 = vadd.f32 %v9437_v42, %v11321_v3  ;;  %v9489_v26 = vpop.f32.mrf.mxu0  ;;  %v7496_v23 = vpack.c.bf16 %v7468_v22, %v7467_v50 }
 0x3a7   : > { %v5285_v45 = vpop.f32.mrf.mxu1 }
 0x3a8   : > { %v11424_v2 = vadd.f32 %v9489_v26, %v5380_v10  ;;  %v5378_v59 = vadd.f32 %v5285_v45, %v11324_v0  ;;  %v5689_v27 = vpop.f32.mrf.mxu0  ;;  %v7470_v0 = vld [vmem:[#allocation2 + $0xae] sm:$0xff] }
 0x3a9   : > { %v9440_v55 = vpop.f32.mrf.mxu1  ;;  %9739 = vmatmul.mubr.bf16.gmra.mxu1 %v7494_v17 }
 0x3aa   : > { %v11427_v29 = vadd.f32 %v5689_v27, %v5378_v59  ;;  %v5383_v14 = vadd.f32 %v9440_v55, %v11327_v13  ;;  %v9492_v31 = vpop.f32.mrf.mxu0  ;;  %9742 = vmatprep.mubr.bf16.mxu1 %v7495_v56  ;;  %v7469_v13 = vld [vmem:[#allocation2 + $0xa6] sm:$0xff]  ;;  %v7471_v27 = vld [vmem:[#allocation2 + $0xb6] sm:$0xff]  ;;  %v7472_v56 = vld [vmem:[#allocation2 + $0xbe] sm:$0xff] }
 0x3ab   : > { %v5298_v11 = vpop.f32.mrf.mxu1  ;;  %v7497_v44 = vpack.c.bf16 %v7470_v0, %v7469_v13 }
 0x3ac   : > { %v11430_v3 = vadd.f32 %v9492_v31, %v5383_v14  ;;  %v5381_v61 = vadd.f32 %v5298_v11, %v11329_v54  ;;  %v5702_v4 = vpop.f32.mrf.mxu0 }
 0x3ad   : > { %v9441_v33 = vpop.f32.mrf.mxu1 }
 0x3ae   : > { %v11433_v49 = vadd.f32 %v5702_v4, %v5381_v61  ;;  %v5384_v19 = vadd.f32 %v9441_v33, %v11331_v40  ;;  %v9493_v39 = vpop.f32.mrf.mxu0  ;;  %v7498_v4 = vpack.c.bf16 %v7472_v56, %v7471_v27 }
 0x3af   : > { %v5301_v32 = vpop.f32.mrf.mxu1 }
 0x3b0   : > { %v11436_v35 = vadd.f32 %v9493_v39, %v5384_v19  ;;  %v5382_v57 = vadd.f32 %v5301_v32, %v11334_v43  ;;  %v5705_v42 = vpop.f32.mrf.mxu0  ;;  %v7474_v43 = vld [vmem:[#allocation2 + $0xce] sm:$0xff] }
 0x3b1   : > { %v9444_v54 = vpop.f32.mrf.mxu1  ;;  %9743 = vmatmul.mubr.bf16.gmra.mxu1 %v7496_v23 }
 0x3b2   : > { %v11439_v10 = vadd.f32 %v5705_v42, %v5382_v57  ;;  %v5387_v26 = vadd.f32 %v9444_v54, %v11337_v28  ;;  %v9496_v45 = vpop.f32.mrf.mxu0  ;;  %9746 = vmatprep.mubr.bf16.mxu1 %v7497_v44  ;;  %v7473_v28 = vld [vmem:[#allocation2 + $0xc6] sm:$0xff]  ;;  %v7475_v42 = vld [vmem:[#allocation2 + $0xd6] sm:$0xff]  ;;  %v7476_v44 = vld [vmem:[#allocation2 + $0xde] sm:$0xff] }
 0x3b3   : > { %v5314_v17 = vpop.f32.mrf.mxu1  ;;  %v7499_v0 = vpack.c.bf16 %v7474_v43, %v7473_v28 }
 0x3b4   : > { %v11442_v40 = vadd.f32 %v9496_v45, %v5387_v26  ;;  %v5385_v47 = vadd.f32 %v5314_v17, %v11339_v21  ;;  %v5718_v59 = vpop.f32.mrf.mxu0 }
 0x3b5   : > { %v9445_v55 = vpop.f32.mrf.mxu1 }
 0x3b6   : > { %v11445_v14 = vadd.f32 %v5718_v59, %v5385_v47  ;;  %v5388_v31 = vadd.f32 %v9445_v55, %v11341_v60  ;;  %v9497_v11 = vpop.f32.mrf.mxu0  ;;  %v7500_v59 = vpack.c.bf16 %v7476_v44, %v7475_v42 }
 0x3b7   : > { %v5317_v61 = vpop.f32.mrf.mxu1 }
 0x3b8   : > { %v11448_v50 = vadd.f32 %v9497_v11, %v5388_v31  ;;  %v5386_v22 = vadd.f32 %v5317_v61, %v11344_v37  ;;  %v5721_v33 = vpop.f32.mrf.mxu0  ;;  %v7477_v37 = vld [vmem:[#allocation2 + $0xe6] sm:$0xff] }
 0x3b9   : > { %v9448_v21 = vpop.f32.mrf.mxu1  ;;  %9747 = vmatmul.mubr.bf16.gmra.mxu1 %v7498_v4 }
 0x3ba   : > { %v11451_v19 = vadd.f32 %v5721_v33, %v5386_v22  ;;  %v5391_v39 = vadd.f32 %v9448_v21, %v11347_v15  ;;  %v9500_v32 = vpop.f32.mrf.mxu0  ;;  %9750 = vmatprep.mubr.bf16.mxu1 %v7499_v0  ;;  %v7478_v15 = vld [vmem:[#allocation2 + $0xee] sm:$0xff]  ;;  %v7479_v33 = vld [vmem:[#allocation2 + $0xf6] sm:$0xff]  ;;  %v7480_v0 = vld [vmem:[#allocation2 + $0xfe] sm:$0xff] }
 0x3bb   : > { %v5330_v23 = vpop.f32.mrf.mxu1  ;;  %v7501_v43 = vpack.c.bf16 %v7478_v15, %v7477_v37 }
 0x3bc   : > { %v11454_v60 = vadd.f32 %v9500_v32, %v5391_v39  ;;  %v5389_v13 = vadd.f32 %v5330_v23, %v11349_v1  ;;  %v5734_v57 = vpop.f32.mrf.mxu0 }
 0x3bd   : > { %v9449_v54 = vpop.f32.mrf.mxu1 }
 0x3be   : > { %v11457_v26 = vadd.f32 %v5734_v57, %v5389_v13  ;;  %v5392_v45 = vadd.f32 %v9449_v54, %v11351_v58  ;;  %v9501_v17 = vpop.f32.mrf.mxu0  ;;  %v7502_v57 = vpack.c.bf16 %v7480_v0, %v7479_v33 }
 0x3bf   : > { %v5333_v47 = vpop.f32.mrf.mxu1 }
 0x3c0   : > { %v11460_v27 = vadd.f32 %v9501_v17, %v5392_v45  ;;  %v5390_v56 = vadd.f32 %v5333_v47, %v11354_v62  ;;  %v5737_v55 = vpop.f32.mrf.mxu0  ;;  %v7482_v62 = vld [vmem:[#allocation2 + $0x10e] sm:$0xff] }
 0x3c1   : > { %v9452_v1 = vpop.f32.mrf.mxu1  ;;  %9751 = vmatmul.mubr.bf16.gmra.mxu1 %v7500_v59 }
 0x3c2   : > { %v11463_v31 = vadd.f32 %v5737_v55, %v5390_v56  ;;  %v5395_v11 = vadd.f32 %v9452_v1, %v11357_v12  ;;  %v9504_v61 = vpop.f32.mrf.mxu0  ;;  %9754 = vmatprep.mubr.bf16.mxu1 %v7501_v43  ;;  %v7481_v12 = vld [vmem:[#allocation2 + $0x106] sm:$0xff]  ;;  %v7483_v55 = vld [vmem:[#allocation2 + $0x116] sm:$0xff]  ;;  %v7484_v43 = vld [vmem:[#allocation2 + $0x11e] sm:$0xff] }
 0x3c3   : > { %v5346_v4 = vpop.f32.mrf.mxu1  ;;  %v7503_v37 = vpack.c.bf16 %v7482_v62, %v7481_v12 }
 0x3c4   : > { %v11466_v58 = vadd.f32 %v9504_v61, %v5395_v11  ;;  %v5393_v28 = vadd.f32 %v5346_v4, %v11359_v52  ;;  %v5750_v22 = vpop.f32.mrf.mxu0 }
 0x3c5   : > { %v9453_v21 = vpop.f32.mrf.mxu1 }
 0x3c6   : > { %v11469_v39 = vadd.f32 %v5750_v22, %v5393_v28  ;;  %v5396_v32 = vadd.f32 %v9453_v21, %v11361_v38  ;;  %v9505_v23 = vpop.f32.mrf.mxu0  ;;  %v7504_v22 = vpack.c.bf16 %v7484_v43, %v7483_v55 }
 0x3c7   : > { %v5349_v13 = vpop.f32.mrf.mxu1 }
 0x3c8   : > { %v11472_v42 = vadd.f32 %v9505_v23, %v5396_v32  ;;  %v5394_v44 = vadd.f32 %v5349_v13, %v11364_v48  ;;  %v5753_v54 = vpop.f32.mrf.mxu0  ;;  %v7485_v48 = vld [vmem:[#allocation2 + $0x126] sm:$0xff] }
 0x3c9   : > { %v9524_v52 = vpop.f32.mrf.mxu1  ;;  %9755 = vmatmul.mubr.bf16.gmra.mxu1 %v7502_v57  ;;  %v7487_v57 = vld [vmem:[#allocation2 + $0x136] sm:$0xff] }
 0x3ca   : > { %v11475_v45 = vadd.f32 %v5753_v54, %v5394_v44  ;;  %v6171_v17 = vadd.f32 %v9524_v52, %v11368_v7  ;;  %v9576_v47 = vpop.f32.mrf.mxu0  ;;  %9758 = vmatprep.mubr.bf16.mxu1 %v7503_v37  ;;  %v7486_v7 = vld [vmem:[#allocation2 + $0x12e] sm:$0xff] }
 0x3cb   : > { %v6026_v59 = vpop.f32.mrf.mxu1  ;;  %v7505_v62 = vpack.c.bf16 %v7486_v7, %v7485_v48 }
 0x3cc   : > { %v11478_v38 = vadd.f32 %v9576_v47, %v6171_v17  ;;  %v6169_v15 = vadd.f32 %v6026_v59, %v11371_v41  ;;  %v6430_v56 = vpop.f32.mrf.mxu0 }
 0x3cd   : > { %v9525_v1 = vpop.f32.mrf.mxu1 }
 0x3ce   : > { %v11481_v11 = vadd.f32 %v6430_v56, %v6169_v15  ;;  %v6172_v61 = vadd.f32 %v9525_v1, %v11374_v20  ;;  %v9577_v4 = vpop.f32.mrf.mxu0  ;;  %v7488_v20 = vld [vmem:[#allocation2 + $0x13e] sm:$0xff] }
 0x3cf   : > { %v6029_v28 = vpop.f32.mrf.mxu1 }
 0x3d0   : > { %v11484_v33 = vadd.f32 %v9577_v4, %v6172_v61  ;;  %v6170_v0 = vadd.f32 %v6029_v28, %v11378_v34  ;;  %v6433_v21 = vpop.f32.mrf.mxu0  ;;  %v7506_v34 = vpack.c.bf16 %v7488_v20, %v7487_v57 }
 0x3d1   : > { %v9528_v41 = vpop.f32.mrf.mxu1  ;;  %9759 = vmatmul.mubr.bf16.gmra.mxu1 %v7504_v22 }
 0x3d2   : > { %v11487_v32 = vadd.f32 %v6433_v21, %v6170_v0  ;;  %v6175_v23 = vadd.f32 %v9528_v41, %v11382_v18  ;;  %v9580_v13 = vpop.f32.mrf.mxu0  ;;  %9762 = vmatprep.mubr.bf16.mxu1 %v7505_v62 }
 0x3d3   : > { %v6042_v12 = vpop.f32.mrf.mxu1 }
 0x3d4   : > { %v11490_v44 = vadd.f32 %v9580_v13, %v6175_v23  ;;  %v6173_v54 = vadd.f32 %v6042_v12, %v11385_v25  ;;  %v6446_v37 = vpop.f32.mrf.mxu0 }
 0x3d5   : > { %v9529_v52 = vpop.f32.mrf.mxu1 }
 0x3d6   : > { %v11493_v17 = vadd.f32 %v6446_v37, %v6173_v54  ;;  %v6176_v47 = vadd.f32 %v9529_v52, %v11388_v6  ;;  %v9581_v59 = vpop.f32.mrf.mxu0 }
 0x3d7   : > { %v6045_v15 = vpop.f32.mrf.mxu1 }
 0x3d8   : > { %v11496_v56 = vadd.f32 %v9581_v59, %v6176_v47  ;;  %v6174_v18 = vadd.f32 %v6045_v15, %v11391_v51  ;;  %v6449_v55 = vpop.f32.mrf.mxu0 }
 0x3d9   : > { %v9532_v43 = vpop.f32.mrf.mxu1  ;;  %9763 = vmatmul.mubr.bf16.gmra.mxu1 %v7506_v34 }
 0x3da   : > { %v11499_v1 = vadd.f32 %v6449_v55, %v6174_v18  ;;  %v6179_v25 = vadd.f32 %v9532_v43, %v11394_v9  ;;  %v9584_v48 = vpop.f32.mrf.mxu0 }
 0x3db   : > { %v6058_v61 = vpop.f32.mrf.mxu1 }
 0x3dc   : > { %v11502_v4 = vadd.f32 %v9584_v48, %v6179_v25  ;;  %v6177_v28 = vadd.f32 %v6058_v61, %v11397_v8  ;;  %v6462_v6 = vpop.f32.mrf.mxu0 }
 0x3dd   : > { %v9533_v22 = vpop.f32.mrf.mxu1 }
 0x3de   : > { %v11505_v7 = vadd.f32 %v6462_v6, %v6177_v28  ;;  %v6180_v0 = vadd.f32 %v9533_v22, %v11400_v53  ;;  %v9585_v51 = vpop.f32.mrf.mxu0 }
 0x3df   : > { %v6061_v21 = vpop.f32.mrf.mxu1 }
 0x3e0   : > { %v11508_v62 = vadd.f32 %v9585_v51, %v6180_v0  ;;  %v6178_v41 = vadd.f32 %v6061_v21, %v11403_v46  ;;  %v6465_v23 = vpop.f32.mrf.mxu0 }
 0x3e1   : > { %v9536_v9 = vpop.f32.mrf.mxu1 }
 0x3e2   : > { %v11511_v13 = vadd.f32 %v6465_v23, %v6178_v41  ;;  %v6183_v57 = vadd.f32 %v9536_v9, %v11406_v63  ;;  %v9588_v20 = vpop.f32.mrf.mxu0 }
 0x3e3   : > { %v6074_v8 = vpop.f32.mrf.mxu1 }
 0x3e4   : > { %v11514_v12 = vadd.f32 %v9588_v20, %v6183_v57  ;;  %v6181_v54 = vadd.f32 %v6074_v8, %v11409_v16  ;;  %v6478_v37 = vpop.f32.mrf.mxu0 }
 0x3e5   : > { %v9537_v53 = vpop.f32.mrf.mxu1 }
 0x3e6   : > { %v11517_v52 = vadd.f32 %v6478_v37, %v6181_v54  ;;  %v6184_v34 = vadd.f32 %v9537_v53, %v11412_v5  ;;  %v9589_v47 = vpop.f32.mrf.mxu0 }
 0x3e7   : > { %v6077_v46 = vpop.f32.mrf.mxu1 }
 0x3e8   : > { %v11520_v59 = vadd.f32 %v9589_v47, %v6184_v34  ;;  %v6182_v15 = vadd.f32 %v6077_v46, %v11415_v24  ;;  %v6481_v18 = vpop.f32.mrf.mxu0 }
 0x3e9   : > { %v9540_v63 = vpop.f32.mrf.mxu1 }
 0x3ea   : > { %v11523_v55 = vadd.f32 %v6481_v18, %v6182_v15  ;;  %v6187_v43 = vadd.f32 %v9540_v63, %v11418_v30  ;;  %v9592_v25 = vpop.f32.mrf.mxu0 }
 0x3eb   : > { %v6090_v16 = vpop.f32.mrf.mxu1 }
 0x3ec   : > { %v11526_v48 = vadd.f32 %v9592_v25, %v6187_v43  ;;  %v6185_v61 = vadd.f32 %v6090_v16, %v11421_v36  ;;  %v6494_v28 = vpop.f32.mrf.mxu0 }
 0x3ed   : > { %v9541_v5 = vpop.f32.mrf.mxu1 }
 0x3ee   : > { %v11529_v6 = vadd.f32 %v6494_v28, %v6185_v61  ;;  %v6188_v22 = vadd.f32 %v9541_v5, %v11424_v2  ;;  %v9593_v0 = vpop.f32.mrf.mxu0 }
 0x3ef   : > { %v6093_v24 = vpop.f32.mrf.mxu1 }
 0x3f0   : > { %v11532_v51 = vadd.f32 %v9593_v0, %v6188_v22  ;;  %v6186_v21 = vadd.f32 %v6093_v24, %v11427_v29  ;;  %v6497_v41 = vpop.f32.mrf.mxu0 }
 0x3f1   : > { %v9544_v30 = vpop.f32.mrf.mxu1 }
 0x3f2   : > { %v11535_v23 = vadd.f32 %v6497_v41, %v6186_v21  ;;  %v6191_v9 = vadd.f32 %v9544_v30, %v11430_v3  ;;  %v9596_v57 = vpop.f32.mrf.mxu0 }
 0x3f3   : > { %v6106_v36 = vpop.f32.mrf.mxu1 }
 0x3f4   : > { %v11538_v20 = vadd.f32 %v9596_v57, %v6191_v9  ;;  %v6189_v8 = vadd.f32 %v6106_v36, %v11433_v49  ;;  %v6510_v54 = vpop.f32.mrf.mxu0 }
 0x3f5   : > { %v9545_v2 = vpop.f32.mrf.mxu1 }
 0x3f6   : > { %v11541_v37 = vadd.f32 %v6510_v54, %v6189_v8  ;;  %v6192_v53 = vadd.f32 %v9545_v2, %v11436_v35  ;;  %v9597_v34 = vpop.f32.mrf.mxu0 }
 0x3f7   : > { %v6109_v29 = vpop.f32.mrf.mxu1 }
 0x3f8   : > { %v11544_v47 = vadd.f32 %v9597_v34, %v6192_v53  ;;  %v6190_v46 = vadd.f32 %v6109_v29, %v11439_v10  ;;  %v6513_v15 = vpop.f32.mrf.mxu0 }
 0x3f9   : > { %v9548_v3 = vpop.f32.mrf.mxu1 }
 0x3fa   : > { %v11547_v18 = vadd.f32 %v6513_v15, %v6190_v46  ;;  %v6195_v63 = vadd.f32 %v9548_v3, %v11442_v40  ;;  %v9600_v43 = vpop.f32.mrf.mxu0 }
 0x3fb   : > { %v6122_v49 = vpop.f32.mrf.mxu1 }
 0x3fc   : > { %v11550_v25 = vadd.f32 %v9600_v43, %v6195_v63  ;;  %v6193_v16 = vadd.f32 %v6122_v49, %v11445_v14  ;;  %v6526_v61 = vpop.f32.mrf.mxu0 }
 0x3fd   : > { %v9549_v35 = vpop.f32.mrf.mxu1 }
 0x3fe   : > { %v11553_v28 = vadd.f32 %v6526_v61, %v6193_v16  ;;  %v6196_v5 = vadd.f32 %v9549_v35, %v11448_v50  ;;  %v9601_v22 = vpop.f32.mrf.mxu0 }
 0x3ff   : > { %v6125_v10 = vpop.f32.mrf.mxu1 }
 0x400   : > { %v11556_v0 = vadd.f32 %v9601_v22, %v6196_v5  ;;  %v6194_v24 = vadd.f32 %v6125_v10, %v11451_v19  ;;  %v6529_v21 = vpop.f32.mrf.mxu0 }
 0x401   : > { %v9552_v40 = vpop.f32.mrf.mxu1 }
 0x402   : > { %v11559_v41 = vadd.f32 %v6529_v21, %v6194_v24  ;;  %v6199_v30 = vadd.f32 %v9552_v40, %v11454_v60  ;;  %v9604_v9 = vpop.f32.mrf.mxu0 }
 0x403   : > { %v6138_v14 = vpop.f32.mrf.mxu1 }
 0x404   : > { %v11562_v57 = vadd.f32 %v9604_v9, %v6199_v30  ;;  %v6197_v36 = vadd.f32 %v6138_v14, %v11457_v26  ;;  %v6542_v8 = vpop.f32.mrf.mxu0 }
 0x405   : > { %v9553_v50 = vpop.f32.mrf.mxu1 }
 0x406   : > { %v11565_v54 = vadd.f32 %v6542_v8, %v6197_v36  ;;  %v6200_v2 = vadd.f32 %v9553_v50, %v11460_v27  ;;  %v9605_v53 = vpop.f32.mrf.mxu0 }
 0x407   : > { %v6141_v19 = vpop.f32.mrf.mxu1 }
 0x408   : > { %v11568_v34 = vadd.f32 %v9605_v53, %v6200_v2  ;;  %v6198_v29 = vadd.f32 %v6141_v19, %v11463_v31  ;;  %v6545_v46 = vpop.f32.mrf.mxu0 }
 0x409   : > { %v9556_v60 = vpop.f32.mrf.mxu1 }
 0x40a   : > { %v11571_v15 = vadd.f32 %v6545_v46, %v6198_v29  ;;  %v6203_v3 = vadd.f32 %v9556_v60, %v11466_v58  ;;  %v9608_v63 = vpop.f32.mrf.mxu0 }
 0x40b   : > { %v6154_v26 = vpop.f32.mrf.mxu1 }
 0x40c   : > { %v11574_v43 = vadd.f32 %v9608_v63, %v6203_v3  ;;  %v6201_v49 = vadd.f32 %v6154_v26, %v11469_v39  ;;  %v6558_v16 = vpop.f32.mrf.mxu0 }
 0x40d   : > { %v9557_v27 = vpop.f32.mrf.mxu1 }
 0x40e   : > { %v11577_v61 = vadd.f32 %v6558_v16, %v6201_v49  ;;  %v6204_v35 = vadd.f32 %v9557_v27, %v11472_v42  ;;  %v9609_v5 = vpop.f32.mrf.mxu0 }
 0x40f   : > { %v6157_v31 = vpop.f32.mrf.mxu1 }
 0x410   : > { %v11580_v22 = vadd.f32 %v9609_v5, %v6204_v35  ;;  %v6202_v10 = vadd.f32 %v6157_v31, %v11475_v45  ;;  %v6561_v24 = vpop.f32.mrf.mxu0 }
 0x411   : > { %v9628_v58 = vpop.f32.mrf.mxu1 }
 0x412   : > { %v11583_v21 = vadd.f32 %v6561_v24, %v6202_v10  ;;  %v11586_v40 = vadd.f32 %v9628_v58, %v11478_v38  ;;  %v11588_v39 = vpop.f32.mrf.mxu0 }
 0x413   : > { %v6834_v30 = vpop.f32.mrf.mxu1 }
 0x414   : > { %v11591_v9 = vadd.f32 %v6834_v30, %v11481_v11  ;;  %v11593_v42 = vpop.f32.mrf.mxu0 }
 0x415   : > { %v9629_v14 = vpop.f32.mrf.mxu1 }
 0x416   : > { %v11596_v36 = vadd.f32 %v9629_v14, %v11484_v33  ;;  %v11601_v50 = vpop.f32.mrf.mxu0 }
 0x417   : > { %v6837_v45 = vpop.f32.mrf.mxu1 }
 0x418   : > { %v11599_v8 = vadd.f32 %v6837_v45, %v11487_v32  ;;  %v11609_v19 = vpop.f32.mrf.mxu0 }
 0x419   : > { %v9632_v38 = vpop.f32.mrf.mxu1 }
 0x41a   : > { %v11604_v2 = vadd.f32 %v9632_v38, %v11490_v44  ;;  %v11617_v60 = vpop.f32.mrf.mxu0 }
 0x41b   : > { %v6850_v53 = vpop.f32.mrf.mxu1 }
 0x41c   : > { %v11607_v11 = vadd.f32 %v6850_v53, %v11493_v17  ;;  %v11625_v26 = vpop.f32.mrf.mxu0 }
 0x41d   : > { %v9633_v29 = vpop.f32.mrf.mxu1 }
 0x41e   : > { %v11612_v33 = vadd.f32 %v9633_v29, %v11496_v56  ;;  %v11633_v27 = vpop.f32.mrf.mxu0 }
 0x41f   : > { %v6853_v46 = vpop.f32.mrf.mxu1 }
 0x420   : > { %v11615_v32 = vadd.f32 %v6853_v46, %v11499_v1  ;;  %v11641_v31 = vpop.f32.mrf.mxu0 }
 0x421   : > { %v9636_v3 = vpop.f32.mrf.mxu1 }
 0x422   : > { %v11620_v44 = vadd.f32 %v9636_v3, %v11502_v4  ;;  %v11649_v58 = vpop.f32.mrf.mxu0 }
 0x423   : > { %v6866_v63 = vpop.f32.mrf.mxu1 }
 0x424   : > { %v11623_v17 = vadd.f32 %v6866_v63, %v11505_v7  ;;  %v11657_v45 = vpop.f32.mrf.mxu0 }
 0x425   : > { %v9637_v49 = vpop.f32.mrf.mxu1 }
 0x426   : > { %v11628_v56 = vadd.f32 %v9637_v49, %v11508_v62  ;;  %v11665_v29 = vpop.f32.mrf.mxu0 }
 0x427   : > { %v6869_v16 = vpop.f32.mrf.mxu1 }
 0x428   : > { %v11631_v1 = vadd.f32 %v6869_v16, %v11511_v13  ;;  %v11673_v63 = vpop.f32.mrf.mxu0 }
 0x429   : > { %v9640_v35 = vpop.f32.mrf.mxu1 }
 0x42a   : > { %v11636_v4 = vadd.f32 %v9640_v35, %v11514_v12  ;;  %v11681_v35 = vpop.f32.mrf.mxu0 }
 0x42b   : > { %v6882_v5 = vpop.f32.mrf.mxu1 }
 0x42c   : > { %v11639_v7 = vadd.f32 %v6882_v5, %v11517_v52 }
 0x42d   : > { %v9641_v10 = vpop.f32.mrf.mxu1 }
 0x42e   : > { %v11644_v62 = vadd.f32 %v9641_v10, %v11520_v59 }
 0x42f   : > { %v6885_v24 = vpop.f32.mrf.mxu1 }
 0x430   : > { %v11647_v13 = vadd.f32 %v6885_v24, %v11523_v55  ;;  %v11689_v24 = vpop.f32.mrf.mxu0 }
 0x431   : > { %v9644_v30 = vpop.f32.mrf.mxu1 }
 0x432   : > { %v11652_v12 = vadd.f32 %v9644_v30, %v11526_v48 }
 0x433   : > { %v6898_v14 = vpop.f32.mrf.mxu1 }
 0x434   : > { %v11655_v52 = vadd.f32 %v6898_v14, %v11529_v6 }
 0x435   : > { %v9645_v38 = vpop.f32.mrf.mxu1 }
 0x436   : > { %v11660_v59 = vadd.f32 %v9645_v38, %v11532_v51  ;;  %v11697_v38 = vpop.f32.mrf.mxu0 }
 0x437   : > { %v6901_v53 = vpop.f32.mrf.mxu1 }
 0x438   : > { %v11663_v55 = vadd.f32 %v6901_v53, %v11535_v23 }
 0x439   : > { %v9648_v46 = vpop.f32.mrf.mxu1 }
 0x43a   : > { %v11668_v48 = vadd.f32 %v9648_v46, %v11538_v20 }
 0x43b   : > { %v6914_v3 = vpop.f32.mrf.mxu1 }
 0x43c   : > { %v11671_v6 = vadd.f32 %v6914_v3, %v11541_v37  ;;  %v11705_v3 = vpop.f32.mrf.mxu0 }
 0x43d   : > { %v9649_v49 = vpop.f32.mrf.mxu1 }
 0x43e   : > { %v11676_v51 = vadd.f32 %v9649_v49, %v11544_v47 }
 0x43f   : > { %v6917_v16 = vpop.f32.mrf.mxu1 }
 0x440   : > { %v11679_v23 = vadd.f32 %v6917_v16, %v11547_v18 }
 0x441   : > { %v9652_v5 = vpop.f32.mrf.mxu1 }
 0x442   : > { %v11684_v20 = vadd.f32 %v9652_v5, %v11550_v25  ;;  %v11713_v5 = vpop.f32.mrf.mxu0 }
 0x443   : > { %v6930_v10 = vpop.f32.mrf.mxu1 }
 0x444   : > { %v11687_v37 = vadd.f32 %v6930_v10, %v11553_v28 }
 0x445   : > { %v9653_v30 = vpop.f32.mrf.mxu1 }
 0x446   : > { %v11692_v47 = vadd.f32 %v9653_v30, %v11556_v0 }
 0x447   : > { %v6933_v14 = vpop.f32.mrf.mxu1 }
 0x448   : > { %v11695_v18 = vadd.f32 %v6933_v14, %v11559_v41  ;;  %v11721_v14 = vpop.f32.mrf.mxu0 }
 0x449   : > { %v9656_v53 = vpop.f32.mrf.mxu1 }
 0x44a   : > { %v11700_v25 = vadd.f32 %v9656_v53, %v11562_v57 }
 0x44b   : > { %v6946_v46 = vpop.f32.mrf.mxu1 }
 0x44c   : > { %v11703_v28 = vadd.f32 %v6946_v46, %v11565_v54 }
 0x44d   : > { %v9657_v49 = vpop.f32.mrf.mxu1 }
 0x44e   : > { %v11708_v0 = vadd.f32 %v9657_v49, %v11568_v34 }
 0x44f   : > { %v6949_v16 = vpop.f32.mrf.mxu1 }
 0x450   : > { %v11711_v41 = vadd.f32 %v6949_v16, %v11571_v15  ;;  %v7383_v15 = vadd.f32 %v11588_v39, %v11586_v40  ;;  %v11731_v16 = vpop.f32.mrf.mxu0  ;;  %v7382_v39 = vadd.f32 %v11609_v19, %v11599_v8  ;;  %v7385_v19 = vadd.f32 %v11625_v26, %v11607_v11 }
 0x451   : > { %v9660_v10 = vpop.f32.mrf.mxu1 }
 0x452   : > { %v11716_v57 = vadd.f32 %v9660_v10, %v11574_v43  ;;  %v11738_v40 = vpop.f32.mrf.mxu0 }
 0x453   : > { %v6962_v30 = vpop.f32.mrf.mxu1 }
 0x454   : > { %v11719_v54 = vadd.f32 %v6962_v30, %v11577_v61  ;;  %v7381_v61 = vadd.f32 %v11593_v42, %v11591_v9  ;;  %v7860_v9 = vld [vmem:[%s10314_s30 + $0x8] sm:$0xff]  ;;  %v7387_v42 = vadd.f32 %v11617_v60, %v11604_v2  ;;  %v7388_v2 = vadd.f32 %v11633_v27, %v11612_v33 }
 0x455   : > { %v9661_v53 = vpop.f32.mrf.mxu1  ;;  %v7391_v33 = vadd.f32 %v11649_v58, %v11620_v44  ;;  %v7392_v44 = vadd.f32 %v11665_v29, %v11628_v56  ;;  %v8300_v29 = vld [vmem:[%s10314_s30 + $0x28] sm:$0xff] }
 0x456   : > { %12034 = vst [vmem:[#allocation26_spill] sm:$0xff] %v11719_v54  ;;  %v11724_v34 = vadd.f32 %v9661_v53, %v11580_v22  ;;  %v7859_v54 = vld [vmem:[%s10314_s30] sm:$0xff]  ;;  %v7384_v22 = vadd.f32 %v11601_v50, %v11596_v36  ;;  %v11750_v50 = vpop.f32.mrf.mxu0 }
 0x457   : > { %v6965_v46 = vpop.f32.mrf.mxu1 }
 0x458   : > { %12035 = vst [vmem:[#allocation33_spill] sm:$0xff] %v11724_v34  ;;  %v11729_v49 = vadd.f32 %v6965_v46, %v11583_v21 }
 0x459   : > { %v9732_v43 = vpop.f32.mrf.mxu1 }
 0x45a   : > { %12036 = vst [vmem:[#allocation38_spill] sm:$0xff] %v11729_v49  ;;  %v7787_v10 = vadd.f32 %v9732_v43, %v7383_v15 }
 0x45b   : > { %v7642_v30 = vpop.f32.mrf.mxu1 }
 0x45c   : > { %7823 = vst [vmem:[#allocation3 + $0x10] sm:$0xff] %v7787_v10  ;;  %v7785_v53 = vadd.f32 %v7642_v30, %v7381_v61  ;;  %v11757_v61 = vpop.f32.mrf.mxu0  ;;  %v7386_v10 = vadd.f32 %v11641_v31, %v11615_v32  ;;  %v8296_v31 = vld [vmem:[%s10314_s30 + $0x18] sm:$0xff] }
 0x45d   : > { %v9733_v21 = vpop.f32.mrf.mxu1 }
 0x45e   : > { %7821 = vst [vmem:[#allocation3] sm:$0xff] %v7785_v53  ;;  %v7861_v46 = vadd.f32 %v7859_v54, %v7785_v53  ;;  %v7788_v49 = vadd.f32 %v9733_v21, %v7384_v22  ;;  %v11764_v53 = vpop.f32.mrf.mxu0 }
 0x45f   : > { %v7645_v34 = vpop.f32.mrf.mxu1 }
 0x460   : > { %7863 = vst [vmem:[%s11747_s28] sm:$0xff] %v7861_v46  ;;  %7824 = vst [vmem:[#allocation3 + $0x18] sm:$0xff] %v7788_v49  ;;  %v7786_v36 = vadd.f32 %v7645_v34, %v7382_v39  ;;  %v8295_v34 = vld [vmem:[%s10314_s30 + $0x10] sm:$0xff]  ;;  %v8308_v39 = vld [vmem:[%s10314_s30 + $0x48] sm:$0xff]  ;;  %v7389_v46 = vadd.f32 %v11657_v45, %v11623_v17 }
 0x461   : > { %v9736_v8 = vpop.f32.mrf.mxu1  ;;  %v8303_v17 = vld [vmem:[%s10314_s30 + $0x30] sm:$0xff] }
 0x462   : > { %7822 = vst [vmem:[#allocation3 + $0x8] sm:$0xff] %v7786_v36  ;;  %v7862_v54 = vadd.f32 %v7860_v9, %v7786_v36  ;;  %v7791_v15 = vadd.f32 %v9736_v8, %v7387_v42  ;;  %v11773_v36 = vpop.f32.mrf.mxu0 }
 0x463   : > { %v7658_v43 = vpop.f32.mrf.mxu1 }
 0x464   : > { %7864 = vst [vmem:[%s11747_s28 + $0x8] sm:$0xff] %v7862_v54  ;;  %7827 = vst [vmem:[#allocation3 + $0x30] sm:$0xff] %v7791_v15  ;;  %v7789_v60 = vadd.f32 %v7658_v43, %v7385_v19  ;;  %v7390_v19 = vadd.f32 %v11673_v63, %v11631_v1  ;;  %v8299_v15 = vld [vmem:[%s10314_s30 + $0x20] sm:$0xff]  ;;  %v7393_v1 = vadd.f32 %v11689_v24, %v11639_v7  ;;  %v11787_v63 = vpop.f32.mrf.mxu0 }
 0x465   : > { %v9737_v49 = vpop.f32.mrf.mxu1 }
 0x466   : > { %7825 = vst [vmem:[#allocation3 + $0x20] sm:$0xff] %v7789_v60  ;;  %v7792_v11 = vadd.f32 %v9737_v49, %v7388_v2  ;;  %v8307_v60 = vld [vmem:[%s10314_s30 + $0x40] sm:$0xff]  ;;  %v11796_v24 = vpop.f32.mrf.mxu0 }
 0x467   : > { %v7865_v26 = vld [vmem:[#allocation3 + $0x12] sm:$0xff]  ;;  %v7661_v30 = vpop.f32.mrf.mxu1 }
 0x468   : > { %v7869_v27 = vadd.f32 %v8295_v34, %v7865_v26  ;;  %7828 = vst [vmem:[#allocation3 + $0x38] sm:$0xff] %v7792_v11  ;;  %v7790_v22 = vadd.f32 %v7661_v30, %v7386_v10  ;;  %v7395_v34 = vadd.f32 %v11681_v35, %v11636_v4 }
 0x469   : > { %v9740_v21 = vpop.f32.mrf.mxu1 }
 0x46a   : > { %8297 = vst [vmem:[%s11747_s28 + $0x10] sm:$0xff] %v7869_v27  ;;  %7826 = vst [vmem:[#allocation3 + $0x28] sm:$0xff] %v7790_v22  ;;  %v7795_v32 = vadd.f32 %v9740_v21, %v7391_v33  ;;  %v8304_v22 = vld [vmem:[%s10314_s30 + $0x38] sm:$0xff] }
 0x46b   : > { %v7674_v9 = vpop.f32.mrf.mxu1 }
 0x46c   : > { %7831 = vst [vmem:[#allocation3 + $0x50] sm:$0xff] %v7795_v32  ;;  %v7897_v58 = vadd.f32 %v8308_v39, %v7795_v32  ;;  %v7793_v42 = vadd.f32 %v7674_v9, %v7389_v46  ;;  %v7396_v39 = vadd.f32 %v11697_v38, %v11644_v62  ;;  %v7399_v62 = vadd.f32 %v11713_v5, %v11652_v12 }
 0x46d   : > { %v7866_v8 = vld [vmem:[#allocation3 + $0x1a] sm:$0xff]  ;;  %v9741_v45 = vpop.f32.mrf.mxu1  ;;  %v7400_v12 = vadd.f32 %v11731_v16, %v11660_v59 }
 0x46e   : > { %v7870_v54 = vadd.f32 %v8296_v31, %v7866_v8  ;;  %8310 = vst [vmem:[%s11747_s28 + $0x48] sm:$0xff] %v7897_v58  ;;  %7829 = vst [vmem:[#allocation3 + $0x40] sm:$0xff] %v7793_v42  ;;  %v7796_v43 = vadd.f32 %v9741_v45, %v7392_v44  ;;  %v7394_v31 = vadd.f32 %v11705_v3, %v11647_v13  ;;  %v11803_v42 = vpop.f32.mrf.mxu0  ;;  %v8311_v3 = vld [vmem:[%s10314_s30 + $0x50] sm:$0xff]  ;;  %v8312_v16 = vld [vmem:[%s10314_s30 + $0x58] sm:$0xff] }
 0x46f   : > { %v7883_v56 = vld [vmem:[#allocation3 + $0x36] sm:$0xff]  ;;  %v7677_v2 = vpop.f32.mrf.mxu1  ;;  %v7397_v45 = vadd.f32 %v11721_v14, %v11655_v52  ;;  %v8324_v52 = vld [vmem:[%s10314_s30 + $0x88] sm:$0xff]  ;;  %v7398_v14 = vadd.f32 %v11738_v40, %v11663_v55 }
 0x470   : > { %8298 = vst [vmem:[%s11747_s28 + $0x18] sm:$0xff] %v7870_v54  ;;  %v7887_v49 = vadd.f32 %v8303_v17, %v7883_v56  ;;  %7832 = vst [vmem:[#allocation3 + $0x58] sm:$0xff] %v7796_v43  ;;  %v7794_v10 = vadd.f32 %v7677_v2, %v7390_v19  ;;  %v8323_v17 = vld [vmem:[%s10314_s30 + $0x80] sm:$0xff]  ;;  %v8316_v56 = vld [vmem:[%s10314_s30 + $0x68] sm:$0xff] }
 0x471   : > { %v7874_v11 = vld [vmem:[#allocation3 + $0x24] sm:$0xff]  ;;  %v7875_v26 = vld [vmem:[#allocation3 + $0x2c] sm:$0xff]  ;;  %v9744_v30 = vpop.f32.mrf.mxu1 }
 0x472   : > { %8305 = vst [vmem:[%s11747_s28 + $0x30] sm:$0xff] %v7887_v49  ;;  %v7878_v33 = vadd.f32 %v8299_v15, %v7874_v11  ;;  %v7879_v27 = vadd.f32 %v8300_v29, %v7875_v26  ;;  %7830 = vst [vmem:[#allocation3 + $0x48] sm:$0xff] %v7794_v10  ;;  %v7896_v4 = vadd.f32 %v8307_v60, %v7794_v10  ;;  %v11811_v15 = vpop.f32.mrf.mxu0 }
 0x473   : > { %v7799_v35 = vadd.f32 %v9744_v30, %v7395_v34  ;;  %v7690_v21 = vpop.f32.mrf.mxu1  ;;  %v8315_v34 = vld [vmem:[%s10314_s30 + $0x60] sm:$0xff]  ;;  %v7403_v10 = vadd.f32 %v11750_v50, %v11668_v48  ;;  %v8319_v50 = vld [vmem:[%s10314_s30 + $0x70] sm:$0xff] }
 0x474   : > { %8301 = vst [vmem:[%s11747_s28 + $0x20] sm:$0xff] %v7878_v33  ;;  %8302 = vst [vmem:[%s11747_s28 + $0x28] sm:$0xff] %v7879_v27  ;;  %v7797_v7 = vadd.f32 %v7690_v21, %v7393_v1  ;;  %v9708_v40 = vpop.f32.mrf.mxu0  ;;  %v7401_v27 = vadd.f32 %v11757_v61, %v11671_v6  ;;  %v7404_v21 = vadd.f32 %v11764_v53, %v11676_v51 }
 0x475   : > { %8309 = vst [vmem:[%s11747_s28 + $0x40] sm:$0xff] %v7896_v4  ;;  %7835 = vst [vmem:[#allocation3 + $0x70] sm:$0xff] %v7799_v35  ;;  %v7884_v46 = vld [vmem:[#allocation3 + $0x3e] sm:$0xff]  ;;  %v9745_v32 = vpop.f32.mrf.mxu1  ;;  %v7402_v61 = vadd.f32 %v11773_v36, %v11679_v23  ;;  %v7405_v23 = vadd.f32 %v11796_v24, %v11687_v37 }
 0x476   : > { %v7888_v9 = vadd.f32 %v8304_v22, %v7884_v46  ;;  %7833 = vst [vmem:[#allocation3 + $0x60] sm:$0xff] %v7797_v7  ;;  %v7800_v44 = vadd.f32 %v9745_v32, %v7396_v39  ;;  %v7350_v7 = vpop.f32.mrf.mxu0 }
 0x477   : > { %v7693_v58 = vpop.f32.mrf.mxu1 }
 0x478   : > { %8306 = vst [vmem:[%s11747_s28 + $0x38] sm:$0xff] %v7888_v9  ;;  %7836 = vst [vmem:[#allocation3 + $0x78] sm:$0xff] %v7800_v44  ;;  %v7798_v38 = vadd.f32 %v7693_v58, %v7394_v31  ;;  %v8320_v9 = vld [vmem:[%s10314_s30 + $0x78] sm:$0xff]  ;;  %v7407_v58 = vadd.f32 %v11787_v63, %v11684_v20  ;;  %v9709_v53 = vpop.f32.mrf.mxu0  ;;  %v7408_v20 = vadd.f32 %v11803_v42, %v11692_v47 }
 0x479   : > { %v9748_v8 = vpop.f32.mrf.mxu1  ;;  %v7411_v47 = vadd.f32 %v9708_v40, %v11700_v25 }
 0x47a   : > { %7834 = vst [vmem:[#allocation3 + $0x68] sm:$0xff] %v7798_v38  ;;  %v7803_v13 = vadd.f32 %v9748_v8, %v7399_v62 }
 0x47b   : > { %v7706_v19 = vpop.f32.mrf.mxu1 }
 0x47c   : > { %7839 = vst [vmem:[#allocation3 + $0x90] sm:$0xff] %v7803_v13  ;;  %v7932_v5 = vadd.f32 %v8323_v17, %v7803_v13  ;;  %v7801_v54 = vadd.f32 %v7706_v19, %v7397_v45  ;;  %v7353_v45 = vpop.f32.mrf.mxu0  ;;  %v8331_v13 = vld [vmem:[%s10314_s30 + $0xa0] sm:$0xff] }
 0x47d   : > { %v7901_v43 = vld [vmem:[#allocation3 + $0x5a] sm:$0xff]  ;;  %v9749_v29 = vpop.f32.mrf.mxu1  ;;  %v7410_v40 = vadd.f32 %v7353_v45, %v11711_v41 }
 0x47e   : > { %v7905_v2 = vadd.f32 %v8311_v3, %v7901_v43  ;;  %8325 = vst [vmem:[%s11747_s28 + $0x80] sm:$0xff] %v7932_v5  ;;  %7837 = vst [vmem:[#allocation3 + $0x80] sm:$0xff] %v7801_v54  ;;  %v7804_v60 = vadd.f32 %v9749_v29, %v7400_v12  ;;  %v8339_v19 = vld [vmem:[%s10314_s30 + $0xc0] sm:$0xff]  ;;  %v7406_v12 = vadd.f32 %v11811_v15, %v11695_v18  ;;  %v9712_v24 = vpop.f32.mrf.mxu0  ;;  %v8327_v54 = vld [vmem:[%s10314_s30 + $0x90] sm:$0xff] }
 0x47f   : > { %v7911_v59 = vld [vmem:[#allocation3 + $0x74] sm:$0xff]  ;;  %v7709_v49 = vpop.f32.mrf.mxu1 }
 0x480   : > { %8313 = vst [vmem:[%s11747_s28 + $0x50] sm:$0xff] %v7905_v2  ;;  %v7915_v1 = vadd.f32 %v8316_v56, %v7911_v59  ;;  %7840 = vst [vmem:[#allocation3 + $0x98] sm:$0xff] %v7804_v60  ;;  %v7933_v11 = vadd.f32 %v8324_v52, %v7804_v60  ;;  %v7802_v55 = vadd.f32 %v7709_v49, %v7398_v14  ;;  %v8328_v43 = vld [vmem:[%s10314_s30 + $0x98] sm:$0xff]  ;;  %v7366_v25 = vpop.f32.mrf.mxu0 }
 0x481   : > { %v7902_v26 = vld [vmem:[#allocation3 + $0x62] sm:$0xff]  ;;  %v7910_v30 = vld [vmem:[#allocation3 + $0x6c] sm:$0xff]  ;;  %v9752_v33 = vpop.f32.mrf.mxu1  ;;  %v7409_v2 = vadd.f32 %v7350_v7, %v11703_v28 }
 0x482   : > { %8318 = vst [vmem:[%s11747_s28 + $0x68] sm:$0xff] %v7915_v1  ;;  %v7906_v4 = vadd.f32 %v8312_v16, %v7902_v26  ;;  %v7914_v35 = vadd.f32 %v8315_v34, %v7910_v30  ;;  %8326 = vst [vmem:[%s11747_s28 + $0x88] sm:$0xff] %v7933_v11  ;;  %v7807_v48 = vadd.f32 %v9752_v33, %v7403_v10  ;;  %v8332_v34 = vld [vmem:[%s10314_s30 + $0xa8] sm:$0xff] }
 0x483   : > { %7838 = vst [vmem:[#allocation3 + $0x88] sm:$0xff] %v7802_v55  ;;  %v7722_v22 = vpop.f32.mrf.mxu1  ;;  %v8340_v10 = vld [vmem:[%s10314_s30 + $0xc8] sm:$0xff]  ;;  %v7412_v1 = vadd.f32 %v9709_v53, %v11708_v0  ;;  %v7415_v0 = vadd.f32 %v9712_v24, %v11716_v57  ;;  %v12038_v57 = vld [vmem:[#allocation33_spill] sm:$0xff]  ;;  %v12039_v53 = vld [vmem:[#allocation38_spill] sm:$0xff] }
 0x484   : > { %8314 = vst [vmem:[%s11747_s28 + $0x58] sm:$0xff] %v7906_v4  ;;  %8317 = vst [vmem:[%s11747_s28 + $0x60] sm:$0xff] %v7914_v35  ;;  %v7805_v39 = vadd.f32 %v7722_v22, %v7401_v27  ;;  %v9713_v27 = vpop.f32.mrf.mxu0  ;;  %v8335_v4 = vld [vmem:[%s10314_s30 + $0xb0] sm:$0xff]  ;;  %v8336_v35 = vld [vmem:[%s10314_s30 + $0xb8] sm:$0xff] }
 0x485   : > { %7843 = vst [vmem:[#allocation3 + $0xb0] sm:$0xff] %v7807_v48  ;;  %v7919_v46 = vld [vmem:[#allocation3 + $0x7e] sm:$0xff]  ;;  %v9753_v6 = vpop.f32.mrf.mxu1  ;;  %v8348_v24 = vld [vmem:[%s10314_s30 + $0xe8] sm:$0xff] }
 0x486   : > { %v7923_v32 = vadd.f32 %v8319_v50, %v7919_v46  ;;  %7841 = vst [vmem:[#allocation3 + $0xa0] sm:$0xff] %v7805_v39  ;;  %v7808_v31 = vadd.f32 %v9753_v6, %v7404_v21  ;;  %v12037_v39 = vld [vmem:[#allocation26_spill] sm:$0xff] }
 0x487   : > { %v7725_v44 = vpop.f32.mrf.mxu1  ;;  %v7413_v7 = vadd.f32 %v7366_v25, %v12037_v39 }
 0x488   : > { %8321 = vst [vmem:[%s11747_s28 + $0x70] sm:$0xff] %v7923_v32  ;;  %7844 = vst [vmem:[#allocation3 + $0xb8] sm:$0xff] %v7808_v31  ;;  %v7806_v51 = vadd.f32 %v7725_v44, %v7402_v61  ;;  %v7369_v32 = vpop.f32.mrf.mxu0 }
 0x489   : > { %v9756_v38 = vpop.f32.mrf.mxu1 }
 0x48a   : > { %v7920_v62 = vld [vmem:[#allocation3 + $0x86] sm:$0xff]  ;;  %7842 = vst [vmem:[#allocation3 + $0xa8] sm:$0xff] %v7806_v51  ;;  %v7811_v8 = vadd.f32 %v9756_v38, %v7407_v58  ;;  %v8344_v58 = vld [vmem:[%s10314_s30 + $0xd8] sm:$0xff] }
 0x48b   : > { %v7924_v36 = vadd.f32 %v8320_v9, %v7920_v62  ;;  %v7738_v17 = vpop.f32.mrf.mxu1  ;;  %v7416_v9 = vadd.f32 %v9713_v27, %v12038_v57  ;;  %v7414_v62 = vadd.f32 %v7369_v32, %v12039_v53 }
 0x48c   : > { %7847 = vst [vmem:[#allocation3 + $0xd0] sm:$0xff] %v7811_v8  ;;  %v7809_v63 = vadd.f32 %v7738_v17, %v7405_v23 }
 0x48d   : > { %8322 = vst [vmem:[%s11747_s28 + $0x78] sm:$0xff] %v7924_v36  ;;  %v9757_v3 = vpop.f32.mrf.mxu1  ;;  %v8343_v36 = vld [vmem:[%s10314_s30 + $0xd0] sm:$0xff] }
 0x48e   : > { %7845 = vst [vmem:[#allocation3 + $0xc0] sm:$0xff] %v7809_v63  ;;  %v7812_v37 = vadd.f32 %v9757_v3, %v7408_v20 }
 0x48f   : > { %v7946_v5 = vld [vmem:[#allocation3 + $0xb4] sm:$0xff]  ;;  %v7741_v56 = vpop.f32.mrf.mxu1 }
 0x490   : > { %v7950_v42 = vadd.f32 %v8331_v13, %v7946_v5  ;;  %7848 = vst [vmem:[#allocation3 + $0xd8] sm:$0xff] %v7812_v37  ;;  %v7968_v29 = vadd.f32 %v8339_v19, %v7812_v37  ;;  %v7810_v52 = vadd.f32 %v7741_v56, %v7406_v12  ;;  %v8347_v13 = vld [vmem:[%s10314_s30 + $0xe0] sm:$0xff]  ;;  %v8352_v19 = vld [vmem:[%s10314_s30 + $0xf8] sm:$0xff]  ;;  %v8351_v5 = vld [vmem:[%s10314_s30 + $0xf0] sm:$0xff]  ;;  %s10073_s30 = sshll.u32 %s10148_s29, 4  ;;  %s10074_s30 = int_to_ptr.vmem [resolvable:$false] %s10073_s30 }
 0x491   : > { %v7937_v14 = vld [vmem:[#allocation3 + $0xa2] sm:$0xff]  ;;  %v7938_v18 = vld [vmem:[#allocation3 + $0xaa] sm:$0xff]  ;;  %v9760_v15 = vpop.f32.mrf.mxu1  ;;  %s10075_s24 = scalar_lea.vmem %s10074_s30, 8192  ;;  %p10076_p6 = scmp.lt.s32.totalorder %s11885_s7, %s10074_s30 }
 0x492   : > { %8333 = vst [vmem:[%s11747_s28 + $0xa0] sm:$0xff] %v7950_v42  ;;  %v7941_v60 = vadd.f32 %v8327_v54, %v7937_v14  ;;  %v7942_v59 = vadd.f32 %v8328_v43, %v7938_v18  ;;  %8341 = vst [vmem:[%s11747_s28 + $0xc0] sm:$0xff] %v7968_v29  ;;  %v7815_v16 = vadd.f32 %v9760_v15, %v7411_v47  ;;  %p10077_p12 = scmp.lt.s32.totalorder %s10075_s24, %s10069_s17 }
 0x493   : > { %7846 = vst [vmem:[#allocation3 + $0xc8] sm:$0xff] %v7810_v52  ;;  %v7754_v49 = vpop.f32.mrf.mxu1 }
 0x494   : > { %8329 = vst [vmem:[%s11747_s28 + $0x90] sm:$0xff] %v7941_v60  ;;  %8330 = vst [vmem:[%s11747_s28 + $0x98] sm:$0xff] %v7942_v59  ;;  %v7813_v28 = vadd.f32 %v7754_v49, %v7409_v2  ;;  %p10078_p7 = por %p10077_p12, %p10076_p6 }
 0x495   : > { %7851 = vst [vmem:[#allocation3 + $0xf0] sm:$0xff] %v7815_v16  ;;  %v7947_v11 = vld [vmem:[#allocation3 + $0xbc] sm:$0xff]  ;;  %v9761_v55 = vpop.f32.mrf.mxu1 }
 0x496   : > { %v7951_v26 = vadd.f32 %v8332_v34, %v7947_v11  ;;  %7849 = vst [vmem:[#allocation3 + $0xe0] sm:$0xff] %v7813_v28  ;;  %v7969_v30 = vadd.f32 %v8340_v10, %v7813_v28  ;;  %v7816_v33 = vadd.f32 %v9761_v55, %v7412_v1  ;;  %p10079_p9 = pnand %p10078_p7, %p10072_p2 }
 0x497   : > { %v7757_v48 = vpop.f32.mrf.mxu1 }
 0x498   : > { %8334 = vst [vmem:[%s11747_s28 + $0xa8] sm:$0xff] %v7951_v26  ;;  %8342 = vst [vmem:[%s11747_s28 + $0xc8] sm:$0xff] %v7969_v30  ;;  %v7814_v50 = vadd.f32 %v7757_v48, %v7410_v40 }
 0x499   : > { %7852 = vst [vmem:[#allocation3 + $0xf8] sm:$0xff] %v7816_v33  ;;  %v9764_v41 = vpop.f32.mrf.mxu1 }
 0x49a   : > { %v7955_v22 = vld [vmem:[#allocation3 + $0xc6] sm:$0xff]  ;;  %v7956_v21 = vld [vmem:[#allocation3 + $0xce] sm:$0xff]  ;;  %7850 = vst [vmem:[#allocation3 + $0xe8] sm:$0xff] %v7814_v50  ;;  %v7819_v61 = vadd.f32 %v9764_v41, %v7415_v0 }
 0x49b   : > { %v7959_v46 = vadd.f32 %v8335_v4, %v7955_v22  ;;  %v7960_v6 = vadd.f32 %v8336_v35, %v7956_v21  ;;  %v7770_v31 = vpop.f32.mrf.mxu1 }
 0x49c   : > { %7855 = vst [vmem:[#allocation3 + $0x110] sm:$0xff] %v7819_v61  ;;  %v7817_v44 = vadd.f32 %v7770_v31, %v7413_v7 }
 0x49d   : > { %8337 = vst [vmem:[%s11747_s28 + $0xb0] sm:$0xff] %v7959_v46  ;;  %8338 = vst [vmem:[%s11747_s28 + $0xb8] sm:$0xff] %v7960_v6  ;;  %v9765_v51 = vpop.f32.mrf.mxu1 }
 0x49e   : > { %7853 = vst [vmem:[#allocation3 + $0x100] sm:$0xff] %v7817_v44  ;;  %v7820_v38 = vadd.f32 %v9765_v51, %v7416_v9 }
 0x49f   : > { %v7773_v8 = vpop.f32.mrf.mxu1 }
 0x4a0   : > { %v7974_v23 = vld [vmem:[#allocation3 + $0xf2] sm:$0xff]  ;;  %7856 = vst [vmem:[#allocation3 + $0x118] sm:$0xff] %v7820_v38  ;;  %v7818_v20 = vadd.f32 %v7773_v8, %v7414_v62 }
 0x4a1   : > { %v7978_v17 = vadd.f32 %v8344_v58, %v7974_v23  ;;  %v7973_v63 = vld [vmem:[#allocation3 + $0xea] sm:$0xff] }
 0x4a2   : > { %v7977_v45 = vadd.f32 %v8343_v36, %v7973_v63  ;;  %7854 = vst [vmem:[#allocation3 + $0x108] sm:$0xff] %v7818_v20 }
 0x4a3   : > { %8346 = vst [vmem:[%s11747_s28 + $0xd8] sm:$0xff] %v7978_v17 }
 0x4a4   : > { %8345 = vst [vmem:[%s11747_s28 + $0xd0] sm:$0xff] %v7977_v45 }
 0x4a5   : > { %v7982_v3 = vld [vmem:[#allocation3 + $0xfc] sm:$0xff] }
 0x4a6   : > { %v7986_v12 = vadd.f32 %v8347_v13, %v7982_v3 }
 0x4a7   : > { %v7992_v37 = vld [vmem:[#allocation3 + $0x116] sm:$0xff] }
 0x4a8   : > { %8349 = vst [vmem:[%s11747_s28 + $0xe0] sm:$0xff] %v7986_v12  ;;  %v7996_v54 = vadd.f32 %v8352_v19, %v7992_v37 }
 0x4a9   : > { %v7983_v43 = vld [vmem:[#allocation3 + $0x104] sm:$0xff]  ;;  %v7991_v56 = vld [vmem:[#allocation3 + $0x10e] sm:$0xff] }
 0x4aa   : > { %8354 = vst [vmem:[%s11747_s28 + $0xf8] sm:$0xff] %v7996_v54  ;;  %v7987_v47 = vadd.f32 %v8348_v24, %v7983_v43  ;;  %v7995_v42 = vadd.f32 %v8351_v5, %v7991_v56 }
 0x4ac   : > { %8350 = vst [vmem:[%s11747_s28 + $0xe8] sm:$0xff] %v7987_v47  ;;  %8353 = vst [vmem:[%s11747_s28 + $0xf0] sm:$0xff] %v7995_v42 }
 0x4ad   : > { %10082 = shalt.err (!%p10079_p9)
}
 0x4ae   : > { %s10083_s26 = scalar_lea.hbm %s11883_s14, 4096  ;;  %s10087_s11 = scalar_lea.hbm %s11936_s5, 8192 }
 0x4af   : > { %p10084_p13 = scmp.ne.s32.totalorder %s11883_s14, %s10083_s26  ;;  %p10088_p4 = scmp.lt.s32.totalorder %s11883_s14, %s11936_s5 }
 0x4b0   : > { %p10089_p8 = scmp.lt.s32.totalorder %s10087_s11, %s10083_s26 }
 0x4b1   : > { %p10085_p5 = pnand %p10084_p13, %p12040_p10 }
 0x4b2   : > { %p10090_p3 = por %p10089_p8, %p10088_p4 }
 0x4b3   : > { %p10086_p0 = pneg %p10085_p5 }
 0x4b5   : > { %p10091_p11 = pnand %p10090_p3, %p10086_p0 }
 0x4b7   : > { %10094 = shalt.err (!%p10091_p11)
}
 0x4b8   : > { %s10149_s6 = smov 128   ;;  %s10150_s9 = smov 8  }
 0x4b9   : > { %9776 = dma.vmem_to_hbm [thread:$0]  (%p12040_p10), %s11885_s7, 4096, %s11883_s14, %s8001_s22, %s10149_s6, %s10149_s6, %s10150_s9  }
 0x4ba PF: > { %s8029_s13 = sand.u32 1, %s10125_s18   ;;  %p12041_p1 = scmp.ne.s32.totalorder %s11944_s25, 0 }
 0x4bb   : > { %p12042_p2 = scmp.ge.s32.totalorder %s10137_s21, 2  ;;  %s8030_s17 = scalar_lea.sflag [#allocation6], %s8029_s13 }
 0x4bd   : > { %p9790_p6 = pnand %p12042_p2, %p12041_p1 }
 0x4bf   : > { %p9791_p12 = pneg %p9790_p6 }
 0x4c1   : > { %10120 = dma.done.wait (%p9791_p12), %s8030_s17, 4096  }
 0x4c2   : > { %10122 = vsyncadd (%p9791_p12), %s8030_s17, 4294963200  ;;  %p19_p7 = scmp.ge.s32.totalorder %s10253_s15, 4   ;;  %s12043_s18 = smov %s10129_s19 }
 0x4c3   : > { %s12044_s19 = smov %s10133_s20  ;;  %s12045_s20 = smov %s10269_s27 }
 0x4c4   : > { %s12046_s21 = smov %s10253_s15  ;;  %21 = sbr.rel (!%p19_p7) target bundleno = 6 (0x6), region = 139 }
 0x4c9   :  { %8035 = vsyncpa [#allocation5], 1 }
 0x4ca   :  { %8037 = vsyncpa [#allocation5 + $0x1], 1 }
 0x4cb   :  { %8038 = vsyncpa [#allocation8], 1 }
 0x4cc   :  { %8039 = vsyncpa [#allocation6], 1 }
 0x4cd   :  { %8041 = vsyncpa [#allocation6 + $0x1], 1 }

</bundles_post_ra>
